<compile_context>
chip_gen: v7x
topology: tpu7x:2x2x1
jax: 0.10.0
libtpu: 0.0.40
codegen_flags: <defaults>
</compile_context>

<pallas_src>
import functools

import jax
import jax.numpy as jnp
from jax.experimental import pallas as pl
from jax.experimental.pallas import tpu as pltpu


def _round_up(x, m):
    return ((x + m - 1) // m) * m


def _apply_act(x, act):
    if act == "leaky":
        return jnp.where(x >= 0.0, x, 0.2 * x)
    if act == "sigmoid":
        # exp + approximate reciprocal stay on the EUP slot (no f32 VPU divide);
        # the clip only removes the tiny approximation error (true sigmoid is
        # already in [0, 1]).
        return jnp.clip(pl.reciprocal(1.0 + jnp.exp(-x), approx=True), 0.0, 1.0)
    return x


# ----------------------------------------------------------------------------
# Kernel 1: tiled fused matmul   out = act(A @ W + b)
# ----------------------------------------------------------------------------
def _matmul_bias_act_kernel(a_ref, w_ref, b_ref, o_ref, acc_ref, *, act):
    @pl.when(pl.program_id(2) == 0)
    def _init():
        acc_ref[...] = jnp.zeros_like(acc_ref)

    acc_ref[...] += jnp.dot(a_ref[...], w_ref[...],
                            preferred_element_type=jnp.float32)

    @pl.when(pl.program_id(2) == pl.num_programs(2) - 1)
    def _finalize():
        acc = acc_ref[...] + b_ref[...]            # (1, tn) broadcast over rows
        o_ref[...] = _apply_act(acc, act).astype(o_ref.dtype)


def matmul_bias_act(a, w, b, act="none"):
    """act(a @ w + b).  a: (M, K), w: (K, N), b: (N,) -> (M, N) float32."""
    M, K = a.shape
    K2, N = w.shape
    assert K == K2

    # Tile sizes: 128-lane tiles (also matches the v5e 128x128 MXU); pad M to a
    # multiple of 8 sublanes when it is small, N (lanes) to a multiple of 128.
    tm = 128 if M >= 128 else _round_up(M, 8)
    tn = 128
    tk = _round_up(K, 128)
    if tk > 512:
        tk = 512
    Mp, Np, Kp = _round_up(M, tm), _round_up(N, tn), _round_up(K, tk)

    a_p = jnp.pad(a.astype(jnp.bfloat16), ((0, Mp - M), (0, Kp - K)))
    w_p = jnp.pad(w.astype(jnp.bfloat16), ((0, Kp - K), (0, Np - N)))
    b_p = jnp.pad(b.astype(jnp.float32), (0, Np - N)).reshape(1, Np)

    grid = (Mp // tm, Np // tn, Kp // tk)
    out = pl.pallas_call(
        functools.partial(_matmul_bias_act_kernel, act=act),
        out_shape=jax.ShapeDtypeStruct((Mp, Np), jnp.float32),
        grid_spec=pltpu.PrefetchScalarGridSpec(
            num_scalar_prefetch=0,
            grid=grid,
            in_specs=[
                pl.BlockSpec((tm, tk), lambda i, j, k: (i, k)),
                pl.BlockSpec((tk, tn), lambda i, j, k: (k, j)),
                pl.BlockSpec((1, tn), lambda i, j, k: (0, j)),
            ],
            out_specs=pl.BlockSpec((tm, tn), lambda i, j, k: (i, j)),
            scratch_shapes=[pltpu.VMEM((tm, tn), jnp.float32)],
        ),
        compiler_params=pltpu.CompilerParams(
            dimension_semantics=("parallel", "parallel", "arbitrary")),
    )(a_p, w_p, b_p)
    return out[:M, :N]


# ----------------------------------------------------------------------------
# Kernel 2: fused separable bilinear upsample (+ optional sigmoid), NHWC.
#   out2d[n] = act( Uh @ x2d[n] @ kron(Uw^T, I_C) ),  x2d[n] = x[n] as (H, W*C)
# ----------------------------------------------------------------------------
def _upsample_kernel(x_ref, uh_ref, uwc_ref, o_ref, *, act):
    x = x_ref[0]                                                     # (H, W*C)
    t = jnp.dot(uh_ref[...], x, preferred_element_type=jnp.float32)  # (Ho, W*C)
    y = jnp.dot(t.astype(jnp.bfloat16), uwc_ref[...],
                preferred_element_type=jnp.float32)                  # (Ho, Wo*C)
    o_ref[0] = _apply_act(y, act).astype(o_ref.dtype)


def _upsample_matrix(in_size, out_size):
    """PyTorch bilinear (align_corners=False) interpolation matrix (out, in)."""
    scale = in_size / out_size
    dst = jnp.arange(out_size, dtype=jnp.float32)
    src = jnp.clip((dst + 0.5) * scale - 0.5, 0.0)   # clamp negatives to 0
    x0 = jnp.minimum(jnp.floor(src).astype(jnp.int32), in_size - 1)
    x1 = jnp.minimum(x0 + 1, in_size - 1)
    lam = src - x0.astype(jnp.float32)
    U = jnp.zeros((out_size, in_size), jnp.float32)
    idx = jnp.arange(out_size)
    U = U.at[idx, x0].add(1.0 - lam)
    U = U.at[idx, x1].add(lam)
    return U


def bilinear_upsample(x, scale, act="none"):
    """x: (N, H, W, C) NHWC -> (N, H*scale, W*scale, C); one Pallas call."""
    N, H, W, C = x.shape
    Ho, Wo = H * scale, W * scale
    Uh = _upsample_matrix(H, Ho).astype(jnp.bfloat16)                 # (Ho, H)
    Uw = _upsample_matrix(W, Wo)                                       # (Wo, W)
    UwC = jnp.kron(Uw.T, jnp.eye(C, dtype=jnp.float32)).astype(jnp.bfloat16)
    x2d = x.reshape(N, H, W * C).astype(jnp.bfloat16)

    out = pl.pallas_call(
        functools.partial(_upsample_kernel, act=act),
        out_shape=jax.ShapeDtypeStruct((N, Ho, Wo * C), jnp.float32),
        grid=(N,),
        in_specs=[
            pl.BlockSpec((1, H, W * C), lambda n: (n, 0, 0)),
            pl.BlockSpec((Ho, H), lambda n: (0, 0)),
            pl.BlockSpec((W * C, Wo * C), lambda n: (0, 0)),
        ],
        out_specs=pl.BlockSpec((1, Ho, Wo * C), lambda n: (n, 0, 0)),
        compiler_params=pltpu.CompilerParams(
            dimension_semantics=("parallel",)),
    )(x2d, Uh, UwC)
    return out.reshape(N, Ho, Wo, C)


# ----------------------------------------------------------------------------
# Conv layer: NHWC im2col (channel-last patch order, no transposes) + kernel 1.
# ----------------------------------------------------------------------------
def conv2d(x, w, b, stride, pad, act):
    """x: (N, H, W, Cin) NHWC; w: (Cout, Cin, kh, kw) (PyTorch layout)."""
    N, H, W, Cin = x.shape
    Cout, Cin2, kh, kw = w.shape
    assert Cin == Cin2
    Ho = (H + 2 * pad - kh) // stride + 1
    Wo = (W + 2 * pad - kw) // stride + 1
    xp = jnp.pad(x, ((0, 0), (pad, pad), (pad, pad), (0, 0)))
    # TODO(synk): fuse this kh*kw patch gather into the matmul kernel as
    # kh*kw accumulating (tm, Cin)@(Cin, Cout) matmuls over shifted windows to
    # avoid materializing the kh*kw-expanded patch tensor in HBM.
    patches = [
        xp[:, dy:dy + stride * Ho:stride, dx:dx + stride * Wo:stride, :]
        for dy in range(kh) for dx in range(kw)
    ]
    cols = jnp.stack(patches, axis=3)                 # (N, Ho, Wo, kh*kw, Cin)
    cols = cols.reshape(N * Ho * Wo, kh * kw * Cin)
    wmat = w.transpose(2, 3, 1, 0).reshape(kh * kw * Cin, Cout)  # (ky,kx,cin)->cout
    out = matmul_bias_act(cols, wmat, b, act)         # (N*Ho*Wo, Cout)
    return out.reshape(N, Ho, Wo, Cout)


# ----------------------------------------------------------------------------
# Parameters (deterministic, PyTorch-default-style uniform init).
# ----------------------------------------------------------------------------
def _init_conv(key, cout, cin, k):
    kw, kb = jax.random.split(key)
    bound = (cin * k * k) ** -0.5
    w = jax.random.uniform(kw, (cout, cin, k, k), jnp.float32, -bound, bound)
    b = jax.random.uniform(kb, (cout,), jnp.float32, -bound, bound)
    return w, b


def init_dis_params(key, num_classes=1, ndf=32):
    ks = jax.random.split(key, 8)
    p = {}
    p["conv1"] = _init_conv(ks[0], ndf, num_classes, 3)
    p["conv2"] = _init_conv(ks[1], ndf * 2, ndf, 3)
    p["conv3"] = _init_conv(ks[2], ndf * 4, ndf * 2, 3)
    p["conv4"] = _init_conv(ks[3], ndf * 8, ndf * 4, 3)
    p["deconv4"] = _init_conv(ks[4], ndf * 4, ndf * 8, 3)
    p["deconv3"] = _init_conv(ks[5], ndf * 2, ndf * 4, 3)
    p["deconv2"] = _init_conv(ks[6], ndf, ndf * 2, 3)
    p["classifier"] = _init_conv(ks[7], 1, ndf, 4)
    return p


# ----------------------------------------------------------------------------
# Full forward pass (mirrors Dis.forward).  External layout: NCHW.
# ----------------------------------------------------------------------------
@jax.jit
def dis_forward(x_nchw, p):
    x = x_nchw.transpose(0, 2, 3, 1)                  # NCHW -> NHWC (once)
    x = conv2d(x, *p["conv1"], stride=2, pad=1, act="leaky")
    x = conv2d(x, *p["conv2"], stride=2, pad=1, act="leaky")
    x = conv2d(x, *p["conv3"], stride=2, pad=1, act="leaky")
    x = conv2d(x, *p["conv4"], stride=2, pad=1, act="leaky")
    x = bilinear_upsample(x, 2)
    x = conv2d(x, *p["deconv4"], stride=1, pad=1, act="leaky")
    x = bilinear_upsample(x, 2)
    x = conv2d(x, *p["deconv3"], stride=1, pad=1, act="leaky")
    x = bilinear_upsample(x, 2)
    x = conv2d(x, *p["deconv2"], stride=1, pad=1, act="leaky")
    x = conv2d(x, *p["classifier"], stride=2, pad=1, act="none")
    x = bilinear_upsample(x, 4, act="sigmoid")        # upsample x4 + sigmoid
    return x.transpose(0, 3, 1, 2)                    # NHWC -> NCHW (once)


if __name__ == "__main__":
    key = jax.random.PRNGKey(0)
    kp, kx = jax.random.split(key)
    params = init_dis_params(kp, num_classes=1, ndf=32)
    # NCHW input, small but deep enough to survive 4 stride-2 convs (32 -> 2).
    x = jax.random.normal(kx, (2, 1, 32, 32), jnp.float32)

    out = dis_forward(x, params)
    out = jax.block_until_ready(out)

    assert out.shape == (2, 1, 32, 32), out.shape
    assert bool(jnp.all(jnp.isfinite(out)))
    assert bool(jnp.all((out >= 0.0) & (out <= 1.0)))  # sigmoid output range
    print("KERNEL_OK")
</pallas_src>

<mosaic_0001>
module attributes {stable_mosaic.version = 11 : i64} {
  func.func private @main(%arg0: i32) attributes {dimension_semantics = [#tpu.dimension_semantics<core_parallel>], iteration_bounds = array<i64: 2>, tpu.core_type = #tpu.core_type<sc_scalar_subcore>, window_params = []} {
    return
  }
}

module attributes {stable_mosaic.version = 11 : i64} {
  func.func private @main(%arg0: i32) attributes {dimension_semantics = [#tpu.dimension_semantics<core_parallel>], iteration_bounds = array<i64: 2>, tpu.core_type = #tpu.core_type<sc_scalar_subcore>, window_params = []} {
    return
  }
}

module attributes {stable_mosaic.version = 11 : i64} {
  func.func @_matmul_bias_act_kernel(%arg0: i32, %arg1: i32, %arg2: i32, %arg3: memref<128x128xbf16, #tpu.memory_space<vmem>>, %arg4: memref<128x128xbf16, #tpu.memory_space<vmem>>, %arg5: memref<1x128xf32, #tpu.memory_space<vmem>>, %arg6: memref<128x128xf32, #tpu.memory_space<vmem>>, %arg7: memref<128x128xf32, #tpu.memory_space<vmem>>) attributes {dimension_semantics = [#tpu.dimension_semantics<parallel>, #tpu.dimension_semantics<parallel>, #tpu.dimension_semantics<arbitrary>], iteration_bounds = array<i64: 4, 1, 1>, scalar_prefetch = 0 : i64, scratch_operands = 1 : i64, tpu.core_type = #tpu.core_type<tc>, window_params = [{transform_indices = @transform_0, window_bounds = array<i64: 128, 128>}, {transform_indices = @transform_1, window_bounds = array<i64: 128, 128>}, {transform_indices = @transform_2, window_bounds = array<i64: 1, 128>}, {transform_indices = @transform_3, window_bounds = array<i64: 128, 128>}]} {
    %c0_i32 = arith.constant 0 : i32
    %0 = arith.cmpi eq, %arg2, %c0_i32 : i32
    %1 = arith.extui %0 : i1 to i32
    %c0_i32_0 = arith.constant 0 : i32
    %2 = arith.cmpi ne, %1, %c0_i32_0 : i32
    scf.if %2 {
      %cst_10 = arith.constant 0.000000e+00 : f32
      %12 = vector.broadcast %cst_10 : f32 to vector<128x128xf32>
      %c0_11 = arith.constant 0 : index
      %c0_12 = arith.constant 0 : index
      %13 = vector.load %arg7[%c0_11, %c0_12] : memref<128x128xf32, #tpu.memory_space<vmem>>, vector<128x128xf32>
      tpu.vector_store %arg7[%c0_11, %c0_12], %12 {strides = array<i32>} : memref<128x128xf32, #tpu.memory_space<vmem>>, vector<128x128xf32>,
    } else {
    }
    %c0 = arith.constant 0 : index
    %c0_1 = arith.constant 0 : index
    %3 = vector.load %arg7[%c0, %c0_1] : memref<128x128xf32, #tpu.memory_space<vmem>>, vector<128x128xf32>
    %c0_2 = arith.constant 0 : index
    %c0_3 = arith.constant 0 : index
    %4 = vector.load %arg3[%c0_2, %c0_3] : memref<128x128xbf16, #tpu.memory_space<vmem>>, vector<128x128xbf16>
    %c0_4 = arith.constant 0 : index
    %c0_5 = arith.constant 0 : index
    %5 = vector.load %arg4[%c0_4, %c0_5] : memref<128x128xbf16, #tpu.memory_space<vmem>>, vector<128x128xbf16>
    %cst = arith.constant dense<0.000000e+00> : vector<128x128xf32>
    %6 = tpu.matmul %4, %5, %cst {dimension_numbers = #tpu.dot_dimension_numbers<[1], [0], [0], [1], [0, 0, 1, 1], [], []>} : vector<128x128xbf16>, vector<128x128xbf16>, vector<128x128xf32> -> vector<128x128xf32>
    %7 = arith.addf %3, %6 : vector<128x128xf32>
    %c0_6 = arith.constant 0 : index
    %c0_7 = arith.constant 0 : index
    %8 = vector.load %arg7[%c0_6, %c0_7] : memref<128x128xf32, #tpu.memory_space<vmem>>, vector<128x128xf32>
    tpu.vector_store %arg7[%c0_6, %c0_7], %7 {strides = array<i32>} : memref<128x128xf32, #tpu.memory_space<vmem>>, vector<128x128xf32>,
    %c0_i32_8 = arith.constant 0 : i32
    %9 = arith.cmpi eq, %arg2, %c0_i32_8 : i32
    %10 = arith.extui %9 : i1 to i32
    %c0_i32_9 = arith.constant 0 : i32
    %11 = arith.cmpi ne, %10, %c0_i32_9 : i32
    scf.if %11 {
      %c0_10 = arith.constant 0 : index
      %c0_11 = arith.constant 0 : index
      %12 = vector.load %arg7[%c0_10, %c0_11] : memref<128x128xf32, #tpu.memory_space<vmem>>, vector<128x128xf32>
      %c0_12 = arith.constant 0 : index
      %c0_13 = arith.constant 0 : index
      %13 = vector.load %arg5[%c0_12, %c0_13] : memref<1x128xf32, #tpu.memory_space<vmem>>, vector<1x128xf32>
      %14 = vector.broadcast %13 : vector<1x128xf32> to vector<128x128xf32>
      %15 = arith.addf %12, %14 : vector<128x128xf32>
      %cst_14 = arith.constant 0.000000e+00 : f32
      %16 = vector.broadcast %cst_14 : f32 to vector<128x128xf32>
      %17 = arith.cmpf oge, %15, %16 : vector<128x128xf32>
      %cst_15 = arith.constant 2.000000e-01 : f32
      %18 = vector.broadcast %cst_15 : f32 to vector<128x128xf32>
      %19 = arith.mulf %18, %15 : vector<128x128xf32>
      %20 = arith.select %17, %15, %19 : vector<128x128xi1>, vector<128x128xf32>
      %c0_16 = arith.constant 0 : index
      %c0_17 = arith.constant 0 : index
      %21 = vector.load %arg6[%c0_16, %c0_17] : memref<128x128xf32, #tpu.memory_space<vmem>>, vector<128x128xf32>
      tpu.vector_store %arg6[%c0_16, %c0_17], %20 {strides = array<i32>} : memref<128x128xf32, #tpu.memory_space<vmem>>, vector<128x128xf32>,
    } else {
    }
    return
  }
  func.func @transform_0(%arg0: i32, %arg1: i32, %arg2: i32) -> (i32, i32) {
    %c0_i32 = arith.constant 0 : i32
    return %arg0, %arg2 : i32, i32
  }
  func.func @transform_1(%arg0: i32, %arg1: i32, %arg2: i32) -> (i32, i32) {
    %c0_i32 = arith.constant 0 : i32
    return %arg2, %arg1 : i32, i32
  }
  func.func @transform_2(%arg0: i32, %arg1: i32, %arg2: i32) -> (i32, i32) {
    %c0_i32 = arith.constant 0 : i32
    %c0_i32_0 = arith.constant 0 : i32
    return %c0_i32, %arg1 : i32, i32
  }
  func.func @transform_3(%arg0: i32, %arg1: i32, %arg2: i32) -> (i32, i32) {
    %c0_i32 = arith.constant 0 : i32
    return %arg0, %arg1 : i32, i32
  }
}

module attributes {stable_mosaic.version = 11 : i64} {
  func.func @_matmul_bias_act_kernel(%arg0: i32, %arg1: i32, %arg2: i32, %arg3: memref<128x384xbf16, #tpu.memory_space<vmem>>, %arg4: memref<384x128xbf16, #tpu.memory_space<vmem>>, %arg5: memref<1x128xf32, #tpu.memory_space<vmem>>, %arg6: memref<128x128xf32, #tpu.memory_space<vmem>>, %arg7: memref<128x128xf32, #tpu.memory_space<vmem>>) attributes {dimension_semantics = [#tpu.dimension_semantics<parallel>, #tpu.dimension_semantics<parallel>, #tpu.dimension_semantics<arbitrary>], iteration_bounds = array<i64: 1, 1, 1>, scalar_prefetch = 0 : i64, scratch_operands = 1 : i64, tpu.core_type = #tpu.core_type<tc>, window_params = [{transform_indices = @transform_0, window_bounds = array<i64: 128, 384>}, {transform_indices = @transform_1, window_bounds = array<i64: 384, 128>}, {transform_indices = @transform_2, window_bounds = array<i64: 1, 128>}, {transform_indices = @transform_3, window_bounds = array<i64: 128, 128>}]} {
    %c0_i32 = arith.constant 0 : i32
    %0 = arith.cmpi eq, %arg2, %c0_i32 : i32
    %1 = arith.extui %0 : i1 to i32
    %c0_i32_0 = arith.constant 0 : i32
    %2 = arith.cmpi ne, %1, %c0_i32_0 : i32
    scf.if %2 {
      %cst_10 = arith.constant 0.000000e+00 : f32
      %12 = vector.broadcast %cst_10 : f32 to vector<128x128xf32>
      %c0_11 = arith.constant 0 : index
      %c0_12 = arith.constant 0 : index
      %13 = vector.load %arg7[%c0_11, %c0_12] : memref<128x128xf32, #tpu.memory_space<vmem>>, vector<128x128xf32>
      tpu.vector_store %arg7[%c0_11, %c0_12], %12 {strides = array<i32>} : memref<128x128xf32, #tpu.memory_space<vmem>>, vector<128x128xf32>,
    } else {
    }
    %c0 = arith.constant 0 : index
    %c0_1 = arith.constant 0 : index
    %3 = vector.load %arg7[%c0, %c0_1] : memref<128x128xf32, #tpu.memory_space<vmem>>, vector<128x128xf32>
    %c0_2 = arith.constant 0 : index
    %c0_3 = arith.constant 0 : index
    %4 = vector.load %arg3[%c0_2, %c0_3] : memref<128x384xbf16, #tpu.memory_space<vmem>>, vector<128x384xbf16>
    %c0_4 = arith.constant 0 : index
    %c0_5 = arith.constant 0 : index
    %5 = vector.load %arg4[%c0_4, %c0_5] : memref<384x128xbf16, #tpu.memory_space<vmem>>, vector<384x128xbf16>
    %cst = arith.constant dense<0.000000e+00> : vector<128x128xf32>
    %6 = tpu.matmul %4, %5, %cst {dimension_numbers = #tpu.dot_dimension_numbers<[1], [0], [0], [1], [0, 0, 1, 1], [], []>} : vector<128x384xbf16>, vector<384x128xbf16>, vector<128x128xf32> -> vector<128x128xf32>
    %7 = arith.addf %3, %6 : vector<128x128xf32>
    %c0_6 = arith.constant 0 : index
    %c0_7 = arith.constant 0 : index
    %8 = vector.load %arg7[%c0_6, %c0_7] : memref<128x128xf32, #tpu.memory_space<vmem>>, vector<128x128xf32>
    tpu.vector_store %arg7[%c0_6, %c0_7], %7 {strides = array<i32>} : memref<128x128xf32, #tpu.memory_space<vmem>>, vector<128x128xf32>,
    %c0_i32_8 = arith.constant 0 : i32
    %9 = arith.cmpi eq, %arg2, %c0_i32_8 : i32
    %10 = arith.extui %9 : i1 to i32
    %c0_i32_9 = arith.constant 0 : i32
    %11 = arith.cmpi ne, %10, %c0_i32_9 : i32
    scf.if %11 {
      %c0_10 = arith.constant 0 : index
      %c0_11 = arith.constant 0 : index
      %12 = vector.load %arg7[%c0_10, %c0_11] : memref<128x128xf32, #tpu.memory_space<vmem>>, vector<128x128xf32>
      %c0_12 = arith.constant 0 : index
      %c0_13 = arith.constant 0 : index
      %13 = vector.load %arg5[%c0_12, %c0_13] : memref<1x128xf32, #tpu.memory_space<vmem>>, vector<1x128xf32>
      %14 = vector.broadcast %13 : vector<1x128xf32> to vector<128x128xf32>
      %15 = arith.addf %12, %14 : vector<128x128xf32>
      %cst_14 = arith.constant 0.000000e+00 : f32
      %16 = vector.broadcast %cst_14 : f32 to vector<128x128xf32>
      %17 = arith.cmpf oge, %15, %16 : vector<128x128xf32>
      %cst_15 = arith.constant 2.000000e-01 : f32
      %18 = vector.broadcast %cst_15 : f32 to vector<128x128xf32>
      %19 = arith.mulf %18, %15 : vector<128x128xf32>
      %20 = arith.select %17, %15, %19 : vector<128x128xi1>, vector<128x128xf32>
      %c0_16 = arith.constant 0 : index
      %c0_17 = arith.constant 0 : index
      %21 = vector.load %arg6[%c0_16, %c0_17] : memref<128x128xf32, #tpu.memory_space<vmem>>, vector<128x128xf32>
      tpu.vector_store %arg6[%c0_16, %c0_17], %20 {strides = array<i32>} : memref<128x128xf32, #tpu.memory_space<vmem>>, vector<128x128xf32>,
    } else {
    }
    return
  }
  func.func @transform_0(%arg0: i32, %arg1: i32, %arg2: i32) -> (i32, i32) {
    %c0_i32 = arith.constant 0 : i32
    return %arg0, %arg2 : i32, i32
  }
  func.func @transform_1(%arg0: i32, %arg1: i32, %arg2: i32) -> (i32, i32) {
    %c0_i32 = arith.constant 0 : i32
    return %arg2, %arg1 : i32, i32
  }
  func.func @transform_2(%arg0: i32, %arg1: i32, %arg2: i32) -> (i32, i32) {
    %c0_i32 = arith.constant 0 : i32
    %c0_i32_0 = arith.constant 0 : i32
    return %c0_i32, %arg1 : i32, i32
  }
  func.func @transform_3(%arg0: i32, %arg1: i32, %arg2: i32) -> (i32, i32) {
    %c0_i32 = arith.constant 0 : i32
    return %arg0, %arg1 : i32, i32
  }
}

module attributes {stable_mosaic.version = 11 : i64} {
  func.func @_matmul_bias_act_kernel(%arg0: i32, %arg1: i32, %arg2: i32, %arg3: memref<32x512xbf16, #tpu.memory_space<vmem>>, %arg4: memref<512x128xbf16, #tpu.memory_space<vmem>>, %arg5: memref<1x128xf32, #tpu.memory_space<vmem>>, %arg6: memref<32x128xf32, #tpu.memory_space<vmem>>, %arg7: memref<32x128xf32, #tpu.memory_space<vmem>>) attributes {dimension_semantics = [#tpu.dimension_semantics<parallel>, #tpu.dimension_semantics<parallel>, #tpu.dimension_semantics<arbitrary>], iteration_bounds = array<i64: 1, 1, 2>, scalar_prefetch = 0 : i64, scratch_operands = 1 : i64, tpu.core_type = #tpu.core_type<tc>, window_params = [{transform_indices = @transform_0, window_bounds = array<i64: 32, 512>}, {transform_indices = @transform_1, window_bounds = array<i64: 512, 128>}, {transform_indices = @transform_2, window_bounds = array<i64: 1, 128>}, {transform_indices = @transform_3, window_bounds = array<i64: 32, 128>}]} {
    %c0_i32 = arith.constant 0 : i32
    %0 = arith.cmpi eq, %arg2, %c0_i32 : i32
    %1 = arith.extui %0 : i1 to i32
    %c0_i32_0 = arith.constant 0 : i32
    %2 = arith.cmpi ne, %1, %c0_i32_0 : i32
    scf.if %2 {
      %cst_9 = arith.constant 0.000000e+00 : f32
      %12 = vector.broadcast %cst_9 : f32 to vector<32x128xf32>
      %c0_10 = arith.constant 0 : index
      %c0_11 = arith.constant 0 : index
      %13 = vector.load %arg7[%c0_10, %c0_11] : memref<32x128xf32, #tpu.memory_space<vmem>>, vector<32x128xf32>
      tpu.vector_store %arg7[%c0_10, %c0_11], %12 {strides = array<i32>} : memref<32x128xf32, #tpu.memory_space<vmem>>, vector<32x128xf32>,
    } else {
    }
    %c0 = arith.constant 0 : index
    %c0_1 = arith.constant 0 : index
    %3 = vector.load %arg7[%c0, %c0_1] : memref<32x128xf32, #tpu.memory_space<vmem>>, vector<32x128xf32>
    %c0_2 = arith.constant 0 : index
    %c0_3 = arith.constant 0 : index
    %4 = vector.load %arg3[%c0_2, %c0_3] : memref<32x512xbf16, #tpu.memory_space<vmem>>, vector<32x512xbf16>
    %c0_4 = arith.constant 0 : index
    %c0_5 = arith.constant 0 : index
    %5 = vector.load %arg4[%c0_4, %c0_5] : memref<512x128xbf16, #tpu.memory_space<vmem>>, vector<512x128xbf16>
    %cst = arith.constant dense<0.000000e+00> : vector<32x128xf32>
    %6 = tpu.matmul %4, %5, %cst {dimension_numbers = #tpu.dot_dimension_numbers<[1], [0], [0], [1], [0, 0, 1, 1], [], []>} : vector<32x512xbf16>, vector<512x128xbf16>, vector<32x128xf32> -> vector<32x128xf32>
    %7 = arith.addf %3, %6 : vector<32x128xf32>
    %c0_6 = arith.constant 0 : index
    %c0_7 = arith.constant 0 : index
    %8 = vector.load %arg7[%c0_6, %c0_7] : memref<32x128xf32, #tpu.memory_space<vmem>>, vector<32x128xf32>
    tpu.vector_store %arg7[%c0_6, %c0_7], %7 {strides = array<i32>} : memref<32x128xf32, #tpu.memory_space<vmem>>, vector<32x128xf32>,
    %c1_i32 = arith.constant 1 : i32
    %9 = arith.cmpi eq, %arg2, %c1_i32 : i32
    %10 = arith.extui %9 : i1 to i32
    %c0_i32_8 = arith.constant 0 : i32
    %11 = arith.cmpi ne, %10, %c0_i32_8 : i32
    scf.if %11 {
      %c0_9 = arith.constant 0 : index
      %c0_10 = arith.constant 0 : index
      %12 = vector.load %arg7[%c0_9, %c0_10] : memref<32x128xf32, #tpu.memory_space<vmem>>, vector<32x128xf32>
      %c0_11 = arith.constant 0 : index
      %c0_12 = arith.constant 0 : index
      %13 = vector.load %arg5[%c0_11, %c0_12] : memref<1x128xf32, #tpu.memory_space<vmem>>, vector<1x128xf32>
      %14 = vector.broadcast %13 : vector<1x128xf32> to vector<32x128xf32>
      %15 = arith.addf %12, %14 : vector<32x128xf32>
      %cst_13 = arith.constant 0.000000e+00 : f32
      %16 = vector.broadcast %cst_13 : f32 to vector<32x128xf32>
      %17 = arith.cmpf oge, %15, %16 : vector<32x128xf32>
      %cst_14 = arith.constant 2.000000e-01 : f32
      %18 = vector.broadcast %cst_14 : f32 to vector<32x128xf32>
      %19 = arith.mulf %18, %15 : vector<32x128xf32>
      %20 = arith.select %17, %15, %19 : vector<32x128xi1>, vector<32x128xf32>
      %c0_15 = arith.constant 0 : index
      %c0_16 = arith.constant 0 : index
      %21 = vector.load %arg6[%c0_15, %c0_16] : memref<32x128xf32, #tpu.memory_space<vmem>>, vector<32x128xf32>
      tpu.vector_store %arg6[%c0_15, %c0_16], %20 {strides = array<i32>} : memref<32x128xf32, #tpu.memory_space<vmem>>, vector<32x128xf32>,
    } else {
    }
    return
  }
  func.func @transform_0(%arg0: i32, %arg1: i32, %arg2: i32) -> (i32, i32) {
    %c0_i32 = arith.constant 0 : i32
    return %arg0, %arg2 : i32, i32
  }
  func.func @transform_1(%arg0: i32, %arg1: i32, %arg2: i32) -> (i32, i32) {
    %c0_i32 = arith.constant 0 : i32
    return %arg2, %arg1 : i32, i32
  }
  func.func @transform_2(%arg0: i32, %arg1: i32, %arg2: i32) -> (i32, i32) {
    %c0_i32 = arith.constant 0 : i32
    %c0_i32_0 = arith.constant 0 : i32
    return %c0_i32, %arg1 : i32, i32
  }
  func.func @transform_3(%arg0: i32, %arg1: i32, %arg2: i32) -> (i32, i32) {
    %c0_i32 = arith.constant 0 : i32
    return %arg0, %arg1 : i32, i32
  }
}

module attributes {stable_mosaic.version = 11 : i64} {
  func.func @_matmul_bias_act_kernel(%arg0: i32, %arg1: i32, %arg2: i32, %arg3: memref<8x512xbf16, #tpu.memory_space<vmem>>, %arg4: memref<512x128xbf16, #tpu.memory_space<vmem>>, %arg5: memref<1x128xf32, #tpu.memory_space<vmem>>, %arg6: memref<8x128xf32, #tpu.memory_space<vmem>>, %arg7: memref<8x128xf32, #tpu.memory_space<vmem>>) attributes {dimension_semantics = [#tpu.dimension_semantics<parallel>, #tpu.dimension_semantics<parallel>, #tpu.dimension_semantics<arbitrary>], iteration_bounds = array<i64: 1, 2, 3>, scalar_prefetch = 0 : i64, scratch_operands = 1 : i64, tpu.core_type = #tpu.core_type<tc>, window_params = [{transform_indices = @transform_0, window_bounds = array<i64: 8, 512>}, {transform_indices = @transform_1, window_bounds = array<i64: 512, 128>}, {transform_indices = @transform_2, window_bounds = array<i64: 1, 128>}, {transform_indices = @transform_3, window_bounds = array<i64: 8, 128>}]} {
    %c0_i32 = arith.constant 0 : i32
    %0 = arith.cmpi eq, %arg2, %c0_i32 : i32
    %1 = arith.extui %0 : i1 to i32
    %c0_i32_0 = arith.constant 0 : i32
    %2 = arith.cmpi ne, %1, %c0_i32_0 : i32
    scf.if %2 {
      %cst_9 = arith.constant 0.000000e+00 : f32
      %12 = vector.broadcast %cst_9 : f32 to vector<8x128xf32>
      %c0_10 = arith.constant 0 : index
      %c0_11 = arith.constant 0 : index
      %13 = vector.load %arg7[%c0_10, %c0_11] : memref<8x128xf32, #tpu.memory_space<vmem>>, vector<8x128xf32>
      tpu.vector_store %arg7[%c0_10, %c0_11], %12 {strides = array<i32>} : memref<8x128xf32, #tpu.memory_space<vmem>>, vector<8x128xf32>,
    } else {
    }
    %c0 = arith.constant 0 : index
    %c0_1 = arith.constant 0 : index
    %3 = vector.load %arg7[%c0, %c0_1] : memref<8x128xf32, #tpu.memory_space<vmem>>, vector<8x128xf32>
    %c0_2 = arith.constant 0 : index
    %c0_3 = arith.constant 0 : index
    %4 = vector.load %arg3[%c0_2, %c0_3] : memref<8x512xbf16, #tpu.memory_space<vmem>>, vector<8x512xbf16>
    %c0_4 = arith.constant 0 : index
    %c0_5 = arith.constant 0 : index
    %5 = vector.load %arg4[%c0_4, %c0_5] : memref<512x128xbf16, #tpu.memory_space<vmem>>, vector<512x128xbf16>
    %cst = arith.constant dense<0.000000e+00> : vector<8x128xf32>
    %6 = tpu.matmul %4, %5, %cst {dimension_numbers = #tpu.dot_dimension_numbers<[1], [0], [0], [1], [0, 0, 1, 1], [], []>} : vector<8x512xbf16>, vector<512x128xbf16>, vector<8x128xf32> -> vector<8x128xf32>
    %7 = arith.addf %3, %6 : vector<8x128xf32>
    %c0_6 = arith.constant 0 : index
    %c0_7 = arith.constant 0 : index
    %8 = vector.load %arg7[%c0_6, %c0_7] : memref<8x128xf32, #tpu.memory_space<vmem>>, vector<8x128xf32>
    tpu.vector_store %arg7[%c0_6, %c0_7], %7 {strides = array<i32>} : memref<8x128xf32, #tpu.memory_space<vmem>>, vector<8x128xf32>,
    %c2_i32 = arith.constant 2 : i32
    %9 = arith.cmpi eq, %arg2, %c2_i32 : i32
    %10 = arith.extui %9 : i1 to i32
    %c0_i32_8 = arith.constant 0 : i32
    %11 = arith.cmpi ne, %10, %c0_i32_8 : i32
    scf.if %11 {
      %c0_9 = arith.constant 0 : index
      %c0_10 = arith.constant 0 : index
      %12 = vector.load %arg7[%c0_9, %c0_10] : memref<8x128xf32, #tpu.memory_space<vmem>>, vector<8x128xf32>
      %c0_11 = arith.constant 0 : index
      %c0_12 = arith.constant 0 : index
      %13 = vector.load %arg5[%c0_11, %c0_12] : memref<1x128xf32, #tpu.memory_space<vmem>>, vector<1x128xf32>
      %14 = vector.broadcast %13 : vector<1x128xf32> to vector<8x128xf32>
      %15 = arith.addf %12, %14 : vector<8x128xf32>
      %cst_13 = arith.constant 0.000000e+00 : f32
      %16 = vector.broadcast %cst_13 : f32 to vector<8x128xf32>
      %17 = arith.cmpf oge, %15, %16 : vector<8x128xf32>
      %cst_14 = arith.constant 2.000000e-01 : f32
      %18 = vector.broadcast %cst_14 : f32 to vector<8x128xf32>
      %19 = arith.mulf %18, %15 : vector<8x128xf32>
      %20 = arith.select %17, %15, %19 : vector<8x128xi1>, vector<8x128xf32>
      %c0_15 = arith.constant 0 : index
      %c0_16 = arith.constant 0 : index
      %21 = vector.load %arg6[%c0_15, %c0_16] : memref<8x128xf32, #tpu.memory_space<vmem>>, vector<8x128xf32>
      tpu.vector_store %arg6[%c0_15, %c0_16], %20 {strides = array<i32>} : memref<8x128xf32, #tpu.memory_space<vmem>>, vector<8x128xf32>,
    } else {
    }
    return
  }
  func.func @transform_0(%arg0: i32, %arg1: i32, %arg2: i32) -> (i32, i32) {
    %c0_i32 = arith.constant 0 : i32
    return %arg0, %arg2 : i32, i32
  }
  func.func @transform_1(%arg0: i32, %arg1: i32, %arg2: i32) -> (i32, i32) {
    %c0_i32 = arith.constant 0 : i32
    return %arg2, %arg1 : i32, i32
  }
  func.func @transform_2(%arg0: i32, %arg1: i32, %arg2: i32) -> (i32, i32) {
    %c0_i32 = arith.constant 0 : i32
    %c0_i32_0 = arith.constant 0 : i32
    return %c0_i32, %arg1 : i32, i32
  }
  func.func @transform_3(%arg0: i32, %arg1: i32, %arg2: i32) -> (i32, i32) {
    %c0_i32 = arith.constant 0 : i32
    return %arg0, %arg1 : i32, i32
  }
}

module attributes {stable_mosaic.version = 11 : i64} {
  func.func @_upsample_kernel(%arg0: i32, %arg1: memref<1x2x512xbf16, #tpu.memory_space<vmem>>, %arg2: memref<4x2xbf16, #tpu.memory_space<vmem>>, %arg3: memref<512x1024xbf16, #tpu.memory_space<vmem>>, %arg4: memref<1x4x1024xf32, #tpu.memory_space<vmem>>) attributes {dimension_semantics = [#tpu.dimension_semantics<parallel>], iteration_bounds = array<i64: 2>, scalar_prefetch = 0 : i64, scratch_operands = 0 : i64, tpu.core_type = #tpu.core_type<tc>, window_params = [{transform_indices = @transform_0, window_bounds = array<i64: 1, 2, 512>}, {pipeline_mode = #tpu.pipeline_mode<synchronous>, transform_indices = @transform_1, window_bounds = array<i64: 4, 2>}, {pipeline_mode = #tpu.pipeline_mode<synchronous>, transform_indices = @transform_2, window_bounds = array<i64: 512, 1024>}, {transform_indices = @transform_3, window_bounds = array<i64: 1, 4, 1024>}]} {
    %c0 = arith.constant 0 : index
    %c0_0 = arith.constant 0 : index
    %c0_1 = arith.constant 0 : index
    %0 = vector.load %arg1[%c0, %c0_0, %c0_1] : memref<1x2x512xbf16, #tpu.memory_space<vmem>>, vector<1x2x512xbf16>
    %1 = vector.shape_cast %0 : vector<1x2x512xbf16> to vector<2x512xbf16>
    %c0_2 = arith.constant 0 : index
    %c0_3 = arith.constant 0 : index
    %2 = vector.load %arg2[%c0_2, %c0_3] : memref<4x2xbf16, #tpu.memory_space<vmem>>, vector<4x2xbf16>
    %cst = arith.constant dense<0.000000e+00> : vector<4x512xf32>
    %3 = tpu.matmul %2, %1, %cst {dimension_numbers = #tpu.dot_dimension_numbers<[1], [0], [0], [1], [0, 0, 1, 1], [], []>} : vector<4x2xbf16>, vector<2x512xbf16>, vector<4x512xf32> -> vector<4x512xf32>
    %4 = arith.truncf %3 : vector<4x512xf32> to vector<4x512xbf16>
    %c0_4 = arith.constant 0 : index
    %c0_5 = arith.constant 0 : index
    %5 = vector.load %arg3[%c0_4, %c0_5] : memref<512x1024xbf16, #tpu.memory_space<vmem>>, vector<512x1024xbf16>
    %cst_6 = arith.constant dense<0.000000e+00> : vector<4x1024xf32>
    %6 = tpu.matmul %4, %5, %cst_6 {dimension_numbers = #tpu.dot_dimension_numbers<[1], [0], [0], [1], [0, 0, 1, 1], [], []>} : vector<4x512xbf16>, vector<512x1024xbf16>, vector<4x1024xf32> -> vector<4x1024xf32>
    %c0_7 = arith.constant 0 : index
    %c0_8 = arith.constant 0 : index
    %c0_9 = arith.constant 0 : index
    %7 = vector.load %arg4[%c0_7, %c0_8, %c0_9] : memref<1x4x1024xf32, #tpu.memory_space<vmem>>, vector<1x4x1024xf32>
    %8 = vector.shape_cast %7 : vector<1x4x1024xf32> to vector<4x1024xf32>
    %9 = vector.shape_cast %6 : vector<4x1024xf32> to vector<1x4x1024xf32>
    tpu.vector_store %arg4[%c0_7, %c0_8, %c0_9], %9 {strides = array<i32>} : memref<1x4x1024xf32, #tpu.memory_space<vmem>>, vector<1x4x1024xf32>,
    return
  }
  func.func @transform_0(%arg0: i32) -> (i32, i32, i32) {
    %c0_i32 = arith.constant 0 : i32
    %c0_i32_0 = arith.constant 0 : i32
    %c0_i32_1 = arith.constant 0 : i32
    return %arg0, %c0_i32, %c0_i32_0 : i32, i32, i32
  }
  func.func @transform_1(%arg0: i32) -> (i32, i32) {
    %c0_i32 = arith.constant 0 : i32
    %c0_i32_0 = arith.constant 0 : i32
    %c0_i32_1 = arith.constant 0 : i32
    return %c0_i32, %c0_i32_0 : i32, i32
  }
  func.func @transform_2(%arg0: i32) -> (i32, i32) {
    %c0_i32 = arith.constant 0 : i32
    %c0_i32_0 = arith.constant 0 : i32
    %c0_i32_1 = arith.constant 0 : i32
    return %c0_i32, %c0_i32_0 : i32, i32
  }
  func.func @transform_3(%arg0: i32) -> (i32, i32, i32) {
    %c0_i32 = arith.constant 0 : i32
    %c0_i32_0 = arith.constant 0 : i32
    %c0_i32_1 = arith.constant 0 : i32
    return %arg0, %c0_i32, %c0_i32_0 : i32, i32, i32
  }
}

module attributes {stable_mosaic.version = 11 : i64} {
  func.func @_matmul_bias_act_kernel(%arg0: i32, %arg1: i32, %arg2: i32, %arg3: memref<32x512xbf16, #tpu.memory_space<vmem>>, %arg4: memref<512x128xbf16, #tpu.memory_space<vmem>>, %arg5: memref<1x128xf32, #tpu.memory_space<vmem>>, %arg6: memref<32x128xf32, #tpu.memory_space<vmem>>, %arg7: memref<32x128xf32, #tpu.memory_space<vmem>>) attributes {dimension_semantics = [#tpu.dimension_semantics<parallel>, #tpu.dimension_semantics<parallel>, #tpu.dimension_semantics<arbitrary>], iteration_bounds = array<i64: 1, 1, 5>, scalar_prefetch = 0 : i64, scratch_operands = 1 : i64, tpu.core_type = #tpu.core_type<tc>, window_params = [{transform_indices = @transform_0, window_bounds = array<i64: 32, 512>}, {transform_indices = @transform_1, window_bounds = array<i64: 512, 128>}, {transform_indices = @transform_2, window_bounds = array<i64: 1, 128>}, {transform_indices = @transform_3, window_bounds = array<i64: 32, 128>}]} {
    %c0_i32 = arith.constant 0 : i32
    %0 = arith.cmpi eq, %arg2, %c0_i32 : i32
    %1 = arith.extui %0 : i1 to i32
    %c0_i32_0 = arith.constant 0 : i32
    %2 = arith.cmpi ne, %1, %c0_i32_0 : i32
    scf.if %2 {
      %cst_9 = arith.constant 0.000000e+00 : f32
      %12 = vector.broadcast %cst_9 : f32 to vector<32x128xf32>
      %c0_10 = arith.constant 0 : index
      %c0_11 = arith.constant 0 : index
      %13 = vector.load %arg7[%c0_10, %c0_11] : memref<32x128xf32, #tpu.memory_space<vmem>>, vector<32x128xf32>
      tpu.vector_store %arg7[%c0_10, %c0_11], %12 {strides = array<i32>} : memref<32x128xf32, #tpu.memory_space<vmem>>, vector<32x128xf32>,
    } else {
    }
    %c0 = arith.constant 0 : index
    %c0_1 = arith.constant 0 : index
    %3 = vector.load %arg7[%c0, %c0_1] : memref<32x128xf32, #tpu.memory_space<vmem>>, vector<32x128xf32>
    %c0_2 = arith.constant 0 : index
    %c0_3 = arith.constant 0 : index
    %4 = vector.load %arg3[%c0_2, %c0_3] : memref<32x512xbf16, #tpu.memory_space<vmem>>, vector<32x512xbf16>
    %c0_4 = arith.constant 0 : index
    %c0_5 = arith.constant 0 : index
    %5 = vector.load %arg4[%c0_4, %c0_5] : memref<512x128xbf16, #tpu.memory_space<vmem>>, vector<512x128xbf16>
    %cst = arith.constant dense<0.000000e+00> : vector<32x128xf32>
    %6 = tpu.matmul %4, %5, %cst {dimension_numbers = #tpu.dot_dimension_numbers<[1], [0], [0], [1], [0, 0, 1, 1], [], []>} : vector<32x512xbf16>, vector<512x128xbf16>, vector<32x128xf32> -> vector<32x128xf32>
    %7 = arith.addf %3, %6 : vector<32x128xf32>
    %c0_6 = arith.constant 0 : index
    %c0_7 = arith.constant 0 : index
    %8 = vector.load %arg7[%c0_6, %c0_7] : memref<32x128xf32, #tpu.memory_space<vmem>>, vector<32x128xf32>
    tpu.vector_store %arg7[%c0_6, %c0_7], %7 {strides = array<i32>} : memref<32x128xf32, #tpu.memory_space<vmem>>, vector<32x128xf32>,
    %c4_i32 = arith.constant 4 : i32
    %9 = arith.cmpi eq, %arg2, %c4_i32 : i32
    %10 = arith.extui %9 : i1 to i32
    %c0_i32_8 = arith.constant 0 : i32
    %11 = arith.cmpi ne, %10, %c0_i32_8 : i32
    scf.if %11 {
      %c0_9 = arith.constant 0 : index
      %c0_10 = arith.constant 0 : index
      %12 = vector.load %arg7[%c0_9, %c0_10] : memref<32x128xf32, #tpu.memory_space<vmem>>, vector<32x128xf32>
      %c0_11 = arith.constant 0 : index
      %c0_12 = arith.constant 0 : index
      %13 = vector.load %arg5[%c0_11, %c0_12] : memref<1x128xf32, #tpu.memory_space<vmem>>, vector<1x128xf32>
      %14 = vector.broadcast %13 : vector<1x128xf32> to vector<32x128xf32>
      %15 = arith.addf %12, %14 : vector<32x128xf32>
      %cst_13 = arith.constant 0.000000e+00 : f32
      %16 = vector.broadcast %cst_13 : f32 to vector<32x128xf32>
      %17 = arith.cmpf oge, %15, %16 : vector<32x128xf32>
      %cst_14 = arith.constant 2.000000e-01 : f32
      %18 = vector.broadcast %cst_14 : f32 to vector<32x128xf32>
      %19 = arith.mulf %18, %15 : vector<32x128xf32>
      %20 = arith.select %17, %15, %19 : vector<32x128xi1>, vector<32x128xf32>
      %c0_15 = arith.constant 0 : index
      %c0_16 = arith.constant 0 : index
      %21 = vector.load %arg6[%c0_15, %c0_16] : memref<32x128xf32, #tpu.memory_space<vmem>>, vector<32x128xf32>
      tpu.vector_store %arg6[%c0_15, %c0_16], %20 {strides = array<i32>} : memref<32x128xf32, #tpu.memory_space<vmem>>, vector<32x128xf32>,
    } else {
    }
    return
  }
  func.func @transform_0(%arg0: i32, %arg1: i32, %arg2: i32) -> (i32, i32) {
    %c0_i32 = arith.constant 0 : i32
    return %arg0, %arg2 : i32, i32
  }
  func.func @transform_1(%arg0: i32, %arg1: i32, %arg2: i32) -> (i32, i32) {
    %c0_i32 = arith.constant 0 : i32
    return %arg2, %arg1 : i32, i32
  }
  func.func @transform_2(%arg0: i32, %arg1: i32, %arg2: i32) -> (i32, i32) {
    %c0_i32 = arith.constant 0 : i32
    %c0_i32_0 = arith.constant 0 : i32
    return %c0_i32, %arg1 : i32, i32
  }
  func.func @transform_3(%arg0: i32, %arg1: i32, %arg2: i32) -> (i32, i32) {
    %c0_i32 = arith.constant 0 : i32
    return %arg0, %arg1 : i32, i32
  }
}

module attributes {stable_mosaic.version = 11 : i64} {
  func.func @_upsample_kernel(%arg0: i32, %arg1: memref<1x4x512xbf16, #tpu.memory_space<vmem>>, %arg2: memref<8x4xbf16, #tpu.memory_space<vmem>>, %arg3: memref<512x1024xbf16, #tpu.memory_space<vmem>>, %arg4: memref<1x8x1024xf32, #tpu.memory_space<vmem>>) attributes {dimension_semantics = [#tpu.dimension_semantics<parallel>], iteration_bounds = array<i64: 2>, scalar_prefetch = 0 : i64, scratch_operands = 0 : i64, tpu.core_type = #tpu.core_type<tc>, window_params = [{transform_indices = @transform_0, window_bounds = array<i64: 1, 4, 512>}, {pipeline_mode = #tpu.pipeline_mode<synchronous>, transform_indices = @transform_1, window_bounds = array<i64: 8, 4>}, {pipeline_mode = #tpu.pipeline_mode<synchronous>, transform_indices = @transform_2, window_bounds = array<i64: 512, 1024>}, {transform_indices = @transform_3, window_bounds = array<i64: 1, 8, 1024>}]} {
    %c0 = arith.constant 0 : index
    %c0_0 = arith.constant 0 : index
    %c0_1 = arith.constant 0 : index
    %0 = vector.load %arg1[%c0, %c0_0, %c0_1] : memref<1x4x512xbf16, #tpu.memory_space<vmem>>, vector<1x4x512xbf16>
    %1 = vector.shape_cast %0 : vector<1x4x512xbf16> to vector<4x512xbf16>
    %c0_2 = arith.constant 0 : index
    %c0_3 = arith.constant 0 : index
    %2 = vector.load %arg2[%c0_2, %c0_3] : memref<8x4xbf16, #tpu.memory_space<vmem>>, vector<8x4xbf16>
    %cst = arith.constant dense<0.000000e+00> : vector<8x512xf32>
    %3 = tpu.matmul %2, %1, %cst {dimension_numbers = #tpu.dot_dimension_numbers<[1], [0], [0], [1], [0, 0, 1, 1], [], []>} : vector<8x4xbf16>, vector<4x512xbf16>, vector<8x512xf32> -> vector<8x512xf32>
    %4 = arith.truncf %3 : vector<8x512xf32> to vector<8x512xbf16>
    %c0_4 = arith.constant 0 : index
    %c0_5 = arith.constant 0 : index
    %5 = vector.load %arg3[%c0_4, %c0_5] : memref<512x1024xbf16, #tpu.memory_space<vmem>>, vector<512x1024xbf16>
    %cst_6 = arith.constant dense<0.000000e+00> : vector<8x1024xf32>
    %6 = tpu.matmul %4, %5, %cst_6 {dimension_numbers = #tpu.dot_dimension_numbers<[1], [0], [0], [1], [0, 0, 1, 1], [], []>} : vector<8x512xbf16>, vector<512x1024xbf16>, vector<8x1024xf32> -> vector<8x1024xf32>
    %c0_7 = arith.constant 0 : index
    %c0_8 = arith.constant 0 : index
    %c0_9 = arith.constant 0 : index
    %7 = vector.load %arg4[%c0_7, %c0_8, %c0_9] : memref<1x8x1024xf32, #tpu.memory_space<vmem>>, vector<1x8x1024xf32>
    %8 = vector.shape_cast %7 : vector<1x8x1024xf32> to vector<8x1024xf32>
    %9 = vector.shape_cast %6 : vector<8x1024xf32> to vector<1x8x1024xf32>
    tpu.vector_store %arg4[%c0_7, %c0_8, %c0_9], %9 {strides = array<i32>} : memref<1x8x1024xf32, #tpu.memory_space<vmem>>, vector<1x8x1024xf32>,
    return
  }
  func.func @transform_0(%arg0: i32) -> (i32, i32, i32) {
    %c0_i32 = arith.constant 0 : i32
    %c0_i32_0 = arith.constant 0 : i32
    %c0_i32_1 = arith.constant 0 : i32
    return %arg0, %c0_i32, %c0_i32_0 : i32, i32, i32
  }
  func.func @transform_1(%arg0: i32) -> (i32, i32) {
    %c0_i32 = arith.constant 0 : i32
    %c0_i32_0 = arith.constant 0 : i32
    %c0_i32_1 = arith.constant 0 : i32
    return %c0_i32, %c0_i32_0 : i32, i32
  }
  func.func @transform_2(%arg0: i32) -> (i32, i32) {
    %c0_i32 = arith.constant 0 : i32
    %c0_i32_0 = arith.constant 0 : i32
    %c0_i32_1 = arith.constant 0 : i32
    return %c0_i32, %c0_i32_0 : i32, i32
  }
  func.func @transform_3(%arg0: i32) -> (i32, i32, i32) {
    %c0_i32 = arith.constant 0 : i32
    %c0_i32_0 = arith.constant 0 : i32
    %c0_i32_1 = arith.constant 0 : i32
    return %arg0, %c0_i32, %c0_i32_0 : i32, i32, i32
  }
}

module attributes {stable_mosaic.version = 11 : i64} {
  func.func @_matmul_bias_act_kernel(%arg0: i32, %arg1: i32, %arg2: i32, %arg3: memref<128x512xbf16, #tpu.memory_space<vmem>>, %arg4: memref<512x128xbf16, #tpu.memory_space<vmem>>, %arg5: memref<1x128xf32, #tpu.memory_space<vmem>>, %arg6: memref<128x128xf32, #tpu.memory_space<vmem>>, %arg7: memref<128x128xf32, #tpu.memory_space<vmem>>) attributes {dimension_semantics = [#tpu.dimension_semantics<parallel>, #tpu.dimension_semantics<parallel>, #tpu.dimension_semantics<arbitrary>], iteration_bounds = array<i64: 1, 1, 3>, scalar_prefetch = 0 : i64, scratch_operands = 1 : i64, tpu.core_type = #tpu.core_type<tc>, window_params = [{transform_indices = @transform_0, window_bounds = array<i64: 128, 512>}, {transform_indices = @transform_1, window_bounds = array<i64: 512, 128>}, {transform_indices = @transform_2, window_bounds = array<i64: 1, 128>}, {transform_indices = @transform_3, window_bounds = array<i64: 128, 128>}]} {
    %c0_i32 = arith.constant 0 : i32
    %0 = arith.cmpi eq, %arg2, %c0_i32 : i32
    %1 = arith.extui %0 : i1 to i32
    %c0_i32_0 = arith.constant 0 : i32
    %2 = arith.cmpi ne, %1, %c0_i32_0 : i32
    scf.if %2 {
      %cst_9 = arith.constant 0.000000e+00 : f32
      %12 = vector.broadcast %cst_9 : f32 to vector<128x128xf32>
      %c0_10 = arith.constant 0 : index
      %c0_11 = arith.constant 0 : index
      %13 = vector.load %arg7[%c0_10, %c0_11] : memref<128x128xf32, #tpu.memory_space<vmem>>, vector<128x128xf32>
      tpu.vector_store %arg7[%c0_10, %c0_11], %12 {strides = array<i32>} : memref<128x128xf32, #tpu.memory_space<vmem>>, vector<128x128xf32>,
    } else {
    }
    %c0 = arith.constant 0 : index
    %c0_1 = arith.constant 0 : index
    %3 = vector.load %arg7[%c0, %c0_1] : memref<128x128xf32, #tpu.memory_space<vmem>>, vector<128x128xf32>
    %c0_2 = arith.constant 0 : index
    %c0_3 = arith.constant 0 : index
    %4 = vector.load %arg3[%c0_2, %c0_3] : memref<128x512xbf16, #tpu.memory_space<vmem>>, vector<128x512xbf16>
    %c0_4 = arith.constant 0 : index
    %c0_5 = arith.constant 0 : index
    %5 = vector.load %arg4[%c0_4, %c0_5] : memref<512x128xbf16, #tpu.memory_space<vmem>>, vector<512x128xbf16>
    %cst = arith.constant dense<0.000000e+00> : vector<128x128xf32>
    %6 = tpu.matmul %4, %5, %cst {dimension_numbers = #tpu.dot_dimension_numbers<[1], [0], [0], [1], [0, 0, 1, 1], [], []>} : vector<128x512xbf16>, vector<512x128xbf16>, vector<128x128xf32> -> vector<128x128xf32>
    %7 = arith.addf %3, %6 : vector<128x128xf32>
    %c0_6 = arith.constant 0 : index
    %c0_7 = arith.constant 0 : index
    %8 = vector.load %arg7[%c0_6, %c0_7] : memref<128x128xf32, #tpu.memory_space<vmem>>, vector<128x128xf32>
    tpu.vector_store %arg7[%c0_6, %c0_7], %7 {strides = array<i32>} : memref<128x128xf32, #tpu.memory_space<vmem>>, vector<128x128xf32>,
    %c2_i32 = arith.constant 2 : i32
    %9 = arith.cmpi eq, %arg2, %c2_i32 : i32
    %10 = arith.extui %9 : i1 to i32
    %c0_i32_8 = arith.constant 0 : i32
    %11 = arith.cmpi ne, %10, %c0_i32_8 : i32
    scf.if %11 {
      %c0_9 = arith.constant 0 : index
      %c0_10 = arith.constant 0 : index
      %12 = vector.load %arg7[%c0_9, %c0_10] : memref<128x128xf32, #tpu.memory_space<vmem>>, vector<128x128xf32>
      %c0_11 = arith.constant 0 : index
      %c0_12 = arith.constant 0 : index
      %13 = vector.load %arg5[%c0_11, %c0_12] : memref<1x128xf32, #tpu.memory_space<vmem>>, vector<1x128xf32>
      %14 = vector.broadcast %13 : vector<1x128xf32> to vector<128x128xf32>
      %15 = arith.addf %12, %14 : vector<128x128xf32>
      %cst_13 = arith.constant 0.000000e+00 : f32
      %16 = vector.broadcast %cst_13 : f32 to vector<128x128xf32>
      %17 = arith.cmpf oge, %15, %16 : vector<128x128xf32>
      %cst_14 = arith.constant 2.000000e-01 : f32
      %18 = vector.broadcast %cst_14 : f32 to vector<128x128xf32>
      %19 = arith.mulf %18, %15 : vector<128x128xf32>
      %20 = arith.select %17, %15, %19 : vector<128x128xi1>, vector<128x128xf32>
      %c0_15 = arith.constant 0 : index
      %c0_16 = arith.constant 0 : index
      %21 = vector.load %arg6[%c0_15, %c0_16] : memref<128x128xf32, #tpu.memory_space<vmem>>, vector<128x128xf32>
      tpu.vector_store %arg6[%c0_15, %c0_16], %20 {strides = array<i32>} : memref<128x128xf32, #tpu.memory_space<vmem>>, vector<128x128xf32>,
    } else {
    }
    return
  }
  func.func @transform_0(%arg0: i32, %arg1: i32, %arg2: i32) -> (i32, i32) {
    %c0_i32 = arith.constant 0 : i32
    return %arg0, %arg2 : i32, i32
  }
  func.func @transform_1(%arg0: i32, %arg1: i32, %arg2: i32) -> (i32, i32) {
    %c0_i32 = arith.constant 0 : i32
    return %arg2, %arg1 : i32, i32
  }
  func.func @transform_2(%arg0: i32, %arg1: i32, %arg2: i32) -> (i32, i32) {
    %c0_i32 = arith.constant 0 : i32
    %c0_i32_0 = arith.constant 0 : i32
    return %c0_i32, %arg1 : i32, i32
  }
  func.func @transform_3(%arg0: i32, %arg1: i32, %arg2: i32) -> (i32, i32) {
    %c0_i32 = arith.constant 0 : i32
    return %arg0, %arg1 : i32, i32
  }
}

module attributes {stable_mosaic.version = 11 : i64} {
  func.func @_upsample_kernel(%arg0: i32, %arg1: memref<1x8x512xbf16, #tpu.memory_space<vmem>>, %arg2: memref<16x8xbf16, #tpu.memory_space<vmem>>, %arg3: memref<512x1024xbf16, #tpu.memory_space<vmem>>, %arg4: memref<1x16x1024xf32, #tpu.memory_space<vmem>>) attributes {dimension_semantics = [#tpu.dimension_semantics<parallel>], iteration_bounds = array<i64: 2>, scalar_prefetch = 0 : i64, scratch_operands = 0 : i64, tpu.core_type = #tpu.core_type<tc>, window_params = [{transform_indices = @transform_0, window_bounds = array<i64: 1, 8, 512>}, {pipeline_mode = #tpu.pipeline_mode<synchronous>, transform_indices = @transform_1, window_bounds = array<i64: 16, 8>}, {pipeline_mode = #tpu.pipeline_mode<synchronous>, transform_indices = @transform_2, window_bounds = array<i64: 512, 1024>}, {transform_indices = @transform_3, window_bounds = array<i64: 1, 16, 1024>}]} {
    %c0 = arith.constant 0 : index
    %c0_0 = arith.constant 0 : index
    %c0_1 = arith.constant 0 : index
    %0 = vector.load %arg1[%c0, %c0_0, %c0_1] : memref<1x8x512xbf16, #tpu.memory_space<vmem>>, vector<1x8x512xbf16>
    %1 = vector.shape_cast %0 : vector<1x8x512xbf16> to vector<8x512xbf16>
    %c0_2 = arith.constant 0 : index
    %c0_3 = arith.constant 0 : index
    %2 = vector.load %arg2[%c0_2, %c0_3] : memref<16x8xbf16, #tpu.memory_space<vmem>>, vector<16x8xbf16>
    %cst = arith.constant dense<0.000000e+00> : vector<16x512xf32>
    %3 = tpu.matmul %2, %1, %cst {dimension_numbers = #tpu.dot_dimension_numbers<[1], [0], [0], [1], [0, 0, 1, 1], [], []>} : vector<16x8xbf16>, vector<8x512xbf16>, vector<16x512xf32> -> vector<16x512xf32>
    %4 = arith.truncf %3 : vector<16x512xf32> to vector<16x512xbf16>
    %c0_4 = arith.constant 0 : index
    %c0_5 = arith.constant 0 : index
    %5 = vector.load %arg3[%c0_4, %c0_5] : memref<512x1024xbf16, #tpu.memory_space<vmem>>, vector<512x1024xbf16>
    %cst_6 = arith.constant dense<0.000000e+00> : vector<16x1024xf32>
    %6 = tpu.matmul %4, %5, %cst_6 {dimension_numbers = #tpu.dot_dimension_numbers<[1], [0], [0], [1], [0, 0, 1, 1], [], []>} : vector<16x512xbf16>, vector<512x1024xbf16>, vector<16x1024xf32> -> vector<16x1024xf32>
    %c0_7 = arith.constant 0 : index
    %c0_8 = arith.constant 0 : index
    %c0_9 = arith.constant 0 : index
    %7 = vector.load %arg4[%c0_7, %c0_8, %c0_9] : memref<1x16x1024xf32, #tpu.memory_space<vmem>>, vector<1x16x1024xf32>
    %8 = vector.shape_cast %7 : vector<1x16x1024xf32> to vector<16x1024xf32>
    %9 = vector.shape_cast %6 : vector<16x1024xf32> to vector<1x16x1024xf32>
    tpu.vector_store %arg4[%c0_7, %c0_8, %c0_9], %9 {strides = array<i32>} : memref<1x16x1024xf32, #tpu.memory_space<vmem>>, vector<1x16x1024xf32>,
    return
  }
  func.func @transform_0(%arg0: i32) -> (i32, i32, i32) {
    %c0_i32 = arith.constant 0 : i32
    %c0_i32_0 = arith.constant 0 : i32
    %c0_i32_1 = arith.constant 0 : i32
    return %arg0, %c0_i32, %c0_i32_0 : i32, i32, i32
  }
  func.func @transform_1(%arg0: i32) -> (i32, i32) {
    %c0_i32 = arith.constant 0 : i32
    %c0_i32_0 = arith.constant 0 : i32
    %c0_i32_1 = arith.constant 0 : i32
    return %c0_i32, %c0_i32_0 : i32, i32
  }
  func.func @transform_2(%arg0: i32) -> (i32, i32) {
    %c0_i32 = arith.constant 0 : i32
    %c0_i32_0 = arith.constant 0 : i32
    %c0_i32_1 = arith.constant 0 : i32
    return %c0_i32, %c0_i32_0 : i32, i32
  }
  func.func @transform_3(%arg0: i32) -> (i32, i32, i32) {
    %c0_i32 = arith.constant 0 : i32
    %c0_i32_0 = arith.constant 0 : i32
    %c0_i32_1 = arith.constant 0 : i32
    return %arg0, %c0_i32, %c0_i32_0 : i32, i32, i32
  }
}

module attributes {stable_mosaic.version = 11 : i64} {
  func.func @_matmul_bias_act_kernel(%arg0: i32, %arg1: i32, %arg2: i32, %arg3: memref<128x512xbf16, #tpu.memory_space<vmem>>, %arg4: memref<512x128xbf16, #tpu.memory_space<vmem>>, %arg5: memref<1x128xf32, #tpu.memory_space<vmem>>, %arg6: memref<128x128xf32, #tpu.memory_space<vmem>>, %arg7: memref<128x128xf32, #tpu.memory_space<vmem>>) attributes {dimension_semantics = [#tpu.dimension_semantics<parallel>, #tpu.dimension_semantics<parallel>, #tpu.dimension_semantics<arbitrary>], iteration_bounds = array<i64: 4, 1, 2>, scalar_prefetch = 0 : i64, scratch_operands = 1 : i64, tpu.core_type = #tpu.core_type<tc>, window_params = [{transform_indices = @transform_0, window_bounds = array<i64: 128, 512>}, {transform_indices = @transform_1, window_bounds = array<i64: 512, 128>}, {transform_indices = @transform_2, window_bounds = array<i64: 1, 128>}, {transform_indices = @transform_3, window_bounds = array<i64: 128, 128>}]} {
    %c0_i32 = arith.constant 0 : i32
    %0 = arith.cmpi eq, %arg2, %c0_i32 : i32
    %1 = arith.extui %0 : i1 to i32
    %c0_i32_0 = arith.constant 0 : i32
    %2 = arith.cmpi ne, %1, %c0_i32_0 : i32
    scf.if %2 {
      %cst_9 = arith.constant 0.000000e+00 : f32
      %12 = vector.broadcast %cst_9 : f32 to vector<128x128xf32>
      %c0_10 = arith.constant 0 : index
      %c0_11 = arith.constant 0 : index
      %13 = vector.load %arg7[%c0_10, %c0_11] : memref<128x128xf32, #tpu.memory_space<vmem>>, vector<128x128xf32>
      tpu.vector_store %arg7[%c0_10, %c0_11], %12 {strides = array<i32>} : memref<128x128xf32, #tpu.memory_space<vmem>>, vector<128x128xf32>,
    } else {
    }
    %c0 = arith.constant 0 : index
    %c0_1 = arith.constant 0 : index
    %3 = vector.load %arg7[%c0, %c0_1] : memref<128x128xf32, #tpu.memory_space<vmem>>, vector<128x128xf32>
    %c0_2 = arith.constant 0 : index
    %c0_3 = arith.constant 0 : index
    %4 = vector.load %arg3[%c0_2, %c0_3] : memref<128x512xbf16, #tpu.memory_space<vmem>>, vector<128x512xbf16>
    %c0_4 = arith.constant 0 : index
    %c0_5 = arith.constant 0 : index
    %5 = vector.load %arg4[%c0_4, %c0_5] : memref<512x128xbf16, #tpu.memory_space<vmem>>, vector<512x128xbf16>
    %cst = arith.constant dense<0.000000e+00> : vector<128x128xf32>
    %6 = tpu.matmul %4, %5, %cst {dimension_numbers = #tpu.dot_dimension_numbers<[1], [0], [0], [1], [0, 0, 1, 1], [], []>} : vector<128x512xbf16>, vector<512x128xbf16>, vector<128x128xf32> -> vector<128x128xf32>
    %7 = arith.addf %3, %6 : vector<128x128xf32>
    %c0_6 = arith.constant 0 : index
    %c0_7 = arith.constant 0 : index
    %8 = vector.load %arg7[%c0_6, %c0_7] : memref<128x128xf32, #tpu.memory_space<vmem>>, vector<128x128xf32>
    tpu.vector_store %arg7[%c0_6, %c0_7], %7 {strides = array<i32>} : memref<128x128xf32, #tpu.memory_space<vmem>>, vector<128x128xf32>,
    %c1_i32 = arith.constant 1 : i32
    %9 = arith.cmpi eq, %arg2, %c1_i32 : i32
    %10 = arith.extui %9 : i1 to i32
    %c0_i32_8 = arith.constant 0 : i32
    %11 = arith.cmpi ne, %10, %c0_i32_8 : i32
    scf.if %11 {
      %c0_9 = arith.constant 0 : index
      %c0_10 = arith.constant 0 : index
      %12 = vector.load %arg7[%c0_9, %c0_10] : memref<128x128xf32, #tpu.memory_space<vmem>>, vector<128x128xf32>
      %c0_11 = arith.constant 0 : index
      %c0_12 = arith.constant 0 : index
      %13 = vector.load %arg5[%c0_11, %c0_12] : memref<1x128xf32, #tpu.memory_space<vmem>>, vector<1x128xf32>
      %14 = vector.broadcast %13 : vector<1x128xf32> to vector<128x128xf32>
      %15 = arith.addf %12, %14 : vector<128x128xf32>
      %cst_13 = arith.constant 0.000000e+00 : f32
      %16 = vector.broadcast %cst_13 : f32 to vector<128x128xf32>
      %17 = arith.cmpf oge, %15, %16 : vector<128x128xf32>
      %cst_14 = arith.constant 2.000000e-01 : f32
      %18 = vector.broadcast %cst_14 : f32 to vector<128x128xf32>
      %19 = arith.mulf %18, %15 : vector<128x128xf32>
      %20 = arith.select %17, %15, %19 : vector<128x128xi1>, vector<128x128xf32>
      %c0_15 = arith.constant 0 : index
      %c0_16 = arith.constant 0 : index
      %21 = vector.load %arg6[%c0_15, %c0_16] : memref<128x128xf32, #tpu.memory_space<vmem>>, vector<128x128xf32>
      tpu.vector_store %arg6[%c0_15, %c0_16], %20 {strides = array<i32>} : memref<128x128xf32, #tpu.memory_space<vmem>>, vector<128x128xf32>,
    } else {
    }
    return
  }
  func.func @transform_0(%arg0: i32, %arg1: i32, %arg2: i32) -> (i32, i32) {
    %c0_i32 = arith.constant 0 : i32
    return %arg0, %arg2 : i32, i32
  }
  func.func @transform_1(%arg0: i32, %arg1: i32, %arg2: i32) -> (i32, i32) {
    %c0_i32 = arith.constant 0 : i32
    return %arg2, %arg1 : i32, i32
  }
  func.func @transform_2(%arg0: i32, %arg1: i32, %arg2: i32) -> (i32, i32) {
    %c0_i32 = arith.constant 0 : i32
    %c0_i32_0 = arith.constant 0 : i32
    return %c0_i32, %arg1 : i32, i32
  }
  func.func @transform_3(%arg0: i32, %arg1: i32, %arg2: i32) -> (i32, i32) {
    %c0_i32 = arith.constant 0 : i32
    return %arg0, %arg1 : i32, i32
  }
}

module attributes {stable_mosaic.version = 11 : i64} {
  func.func @_matmul_bias_act_kernel(%arg0: i32, %arg1: i32, %arg2: i32, %arg3: memref<128x512xbf16, #tpu.memory_space<vmem>>, %arg4: memref<512x128xbf16, #tpu.memory_space<vmem>>, %arg5: memref<1x128xf32, #tpu.memory_space<vmem>>, %arg6: memref<128x128xf32, #tpu.memory_space<vmem>>, %arg7: memref<128x128xf32, #tpu.memory_space<vmem>>) attributes {dimension_semantics = [#tpu.dimension_semantics<parallel>, #tpu.dimension_semantics<parallel>, #tpu.dimension_semantics<arbitrary>], iteration_bounds = array<i64: 1, 1, 1>, scalar_prefetch = 0 : i64, scratch_operands = 1 : i64, tpu.core_type = #tpu.core_type<tc>, window_params = [{transform_indices = @transform_0, window_bounds = array<i64: 128, 512>}, {transform_indices = @transform_1, window_bounds = array<i64: 512, 128>}, {transform_indices = @transform_2, window_bounds = array<i64: 1, 128>}, {transform_indices = @transform_3, window_bounds = array<i64: 128, 128>}]} {
    %c0_i32 = arith.constant 0 : i32
    %0 = arith.cmpi eq, %arg2, %c0_i32 : i32
    %1 = arith.extui %0 : i1 to i32
    %c0_i32_0 = arith.constant 0 : i32
    %2 = arith.cmpi ne, %1, %c0_i32_0 : i32
    scf.if %2 {
      %cst_10 = arith.constant 0.000000e+00 : f32
      %12 = vector.broadcast %cst_10 : f32 to vector<128x128xf32>
      %c0_11 = arith.constant 0 : index
      %c0_12 = arith.constant 0 : index
      %13 = vector.load %arg7[%c0_11, %c0_12] : memref<128x128xf32, #tpu.memory_space<vmem>>, vector<128x128xf32>
      tpu.vector_store %arg7[%c0_11, %c0_12], %12 {strides = array<i32>} : memref<128x128xf32, #tpu.memory_space<vmem>>, vector<128x128xf32>,
    } else {
    }
    %c0 = arith.constant 0 : index
    %c0_1 = arith.constant 0 : index
    %3 = vector.load %arg7[%c0, %c0_1] : memref<128x128xf32, #tpu.memory_space<vmem>>, vector<128x128xf32>
    %c0_2 = arith.constant 0 : index
    %c0_3 = arith.constant 0 : index
    %4 = vector.load %arg3[%c0_2, %c0_3] : memref<128x512xbf16, #tpu.memory_space<vmem>>, vector<128x512xbf16>
    %c0_4 = arith.constant 0 : index
    %c0_5 = arith.constant 0 : index
    %5 = vector.load %arg4[%c0_4, %c0_5] : memref<512x128xbf16, #tpu.memory_space<vmem>>, vector<512x128xbf16>
    %cst = arith.constant dense<0.000000e+00> : vector<128x128xf32>
    %6 = tpu.matmul %4, %5, %cst {dimension_numbers = #tpu.dot_dimension_numbers<[1], [0], [0], [1], [0, 0, 1, 1], [], []>} : vector<128x512xbf16>, vector<512x128xbf16>, vector<128x128xf32> -> vector<128x128xf32>
    %7 = arith.addf %3, %6 : vector<128x128xf32>
    %c0_6 = arith.constant 0 : index
    %c0_7 = arith.constant 0 : index
    %8 = vector.load %arg7[%c0_6, %c0_7] : memref<128x128xf32, #tpu.memory_space<vmem>>, vector<128x128xf32>
    tpu.vector_store %arg7[%c0_6, %c0_7], %7 {strides = array<i32>} : memref<128x128xf32, #tpu.memory_space<vmem>>, vector<128x128xf32>,
    %c0_i32_8 = arith.constant 0 : i32
    %9 = arith.cmpi eq, %arg2, %c0_i32_8 : i32
    %10 = arith.extui %9 : i1 to i32
    %c0_i32_9 = arith.constant 0 : i32
    %11 = arith.cmpi ne, %10, %c0_i32_9 : i32
    scf.if %11 {
      %c0_10 = arith.constant 0 : index
      %c0_11 = arith.constant 0 : index
      %12 = vector.load %arg7[%c0_10, %c0_11] : memref<128x128xf32, #tpu.memory_space<vmem>>, vector<128x128xf32>
      %c0_12 = arith.constant 0 : index
      %c0_13 = arith.constant 0 : index
      %13 = vector.load %arg5[%c0_12, %c0_13] : memref<1x128xf32, #tpu.memory_space<vmem>>, vector<1x128xf32>
      %14 = vector.broadcast %13 : vector<1x128xf32> to vector<128x128xf32>
      %15 = arith.addf %12, %14 : vector<128x128xf32>
      %c0_14 = arith.constant 0 : index
      %c0_15 = arith.constant 0 : index
      %16 = vector.load %arg6[%c0_14, %c0_15] : memref<128x128xf32, #tpu.memory_space<vmem>>, vector<128x128xf32>
      tpu.vector_store %arg6[%c0_14, %c0_15], %15 {strides = array<i32>} : memref<128x128xf32, #tpu.memory_space<vmem>>, vector<128x128xf32>,
    } else {
    }
    return
  }
  func.func @transform_0(%arg0: i32, %arg1: i32, %arg2: i32) -> (i32, i32) {
    %c0_i32 = arith.constant 0 : i32
    return %arg0, %arg2 : i32, i32
  }
  func.func @transform_1(%arg0: i32, %arg1: i32, %arg2: i32) -> (i32, i32) {
    %c0_i32 = arith.constant 0 : i32
    return %arg2, %arg1 : i32, i32
  }
  func.func @transform_2(%arg0: i32, %arg1: i32, %arg2: i32) -> (i32, i32) {
    %c0_i32 = arith.constant 0 : i32
    %c0_i32_0 = arith.constant 0 : i32
    return %c0_i32, %arg1 : i32, i32
  }
  func.func @transform_3(%arg0: i32, %arg1: i32, %arg2: i32) -> (i32, i32) {
    %c0_i32 = arith.constant 0 : i32
    return %arg0, %arg1 : i32, i32
  }
}

module attributes {stable_mosaic.version = 11 : i64} {
  func.func @_upsample_kernel(%arg0: i32, %arg1: memref<1x8x8xbf16, #tpu.memory_space<vmem>>, %arg2: memref<32x8xbf16, #tpu.memory_space<vmem>>, %arg3: memref<8x32xbf16, #tpu.memory_space<vmem>>, %arg4: memref<1x32x32xf32, #tpu.memory_space<vmem>>) attributes {dimension_semantics = [#tpu.dimension_semantics<parallel>], iteration_bounds = array<i64: 2>, scalar_prefetch = 0 : i64, scratch_operands = 0 : i64, tpu.core_type = #tpu.core_type<tc>, window_params = [{transform_indices = @transform_0, window_bounds = array<i64: 1, 8, 8>}, {pipeline_mode = #tpu.pipeline_mode<synchronous>, transform_indices = @transform_1, window_bounds = array<i64: 32, 8>}, {pipeline_mode = #tpu.pipeline_mode<synchronous>, transform_indices = @transform_2, window_bounds = array<i64: 8, 32>}, {transform_indices = @transform_3, window_bounds = array<i64: 1, 32, 32>}]} {
    %c0 = arith.constant 0 : index
    %c0_0 = arith.constant 0 : index
    %c0_1 = arith.constant 0 : index
    %0 = vector.load %arg1[%c0, %c0_0, %c0_1] : memref<1x8x8xbf16, #tpu.memory_space<vmem>>, vector<1x8x8xbf16>
    %1 = vector.shape_cast %0 : vector<1x8x8xbf16> to vector<8x8xbf16>
    %c0_2 = arith.constant 0 : index
    %c0_3 = arith.constant 0 : index
    %2 = vector.load %arg2[%c0_2, %c0_3] : memref<32x8xbf16, #tpu.memory_space<vmem>>, vector<32x8xbf16>
    %cst = arith.constant dense<0.000000e+00> : vector<32x8xf32>
    %3 = tpu.matmul %2, %1, %cst {dimension_numbers = #tpu.dot_dimension_numbers<[1], [0], [0], [1], [0, 0, 1, 1], [], []>} : vector<32x8xbf16>, vector<8x8xbf16>, vector<32x8xf32> -> vector<32x8xf32>
    %4 = arith.truncf %3 : vector<32x8xf32> to vector<32x8xbf16>
    %c0_4 = arith.constant 0 : index
    %c0_5 = arith.constant 0 : index
    %5 = vector.load %arg3[%c0_4, %c0_5] : memref<8x32xbf16, #tpu.memory_space<vmem>>, vector<8x32xbf16>
    %cst_6 = arith.constant dense<0.000000e+00> : vector<32x32xf32>
    %6 = tpu.matmul %4, %5, %cst_6 {dimension_numbers = #tpu.dot_dimension_numbers<[1], [0], [0], [1], [0, 0, 1, 1], [], []>} : vector<32x8xbf16>, vector<8x32xbf16>, vector<32x32xf32> -> vector<32x32xf32>
    %cst_7 = arith.constant 0.000000e+00 : f32
    %7 = vector.broadcast %cst_7 : f32 to vector<32x32xf32>
    %8 = arith.subf %7, %6 : vector<32x32xf32>
    %9 = math.exp %8 : vector<32x32xf32>
    %cst_8 = arith.constant 1.000000e+00 : f32
    %10 = vector.broadcast %cst_8 : f32 to vector<32x32xf32>
    %11 = arith.addf %10, %9 : vector<32x32xf32>
    %12 = tpu.reciprocal %11 {approx = true} : vector<32x32xf32> -> vector<32x32xf32>
    %cst_9 = arith.constant 0.000000e+00 : f32
    %cst_10 = arith.constant 1.000000e+00 : f32
    %13 = vector.broadcast %cst_9 : f32 to vector<32x32xf32>
    %14 = arith.maximumf %13, %12 : vector<32x32xf32>
    %15 = vector.broadcast %cst_10 : f32 to vector<32x32xf32>
    %16 = arith.minimumf %15, %14 : vector<32x32xf32>
    %c0_11 = arith.constant 0 : index
    %c0_12 = arith.constant 0 : index
    %c0_13 = arith.constant 0 : index
    %17 = vector.load %arg4[%c0_11, %c0_12, %c0_13] : memref<1x32x32xf32, #tpu.memory_space<vmem>>, vector<1x32x32xf32>
    %18 = vector.shape_cast %17 : vector<1x32x32xf32> to vector<32x32xf32>
    %19 = vector.shape_cast %16 : vector<32x32xf32> to vector<1x32x32xf32>
    tpu.vector_store %arg4[%c0_11, %c0_12, %c0_13], %19 {strides = array<i32>} : memref<1x32x32xf32, #tpu.memory_space<vmem>>, vector<1x32x32xf32>,
    return
  }
  func.func @transform_0(%arg0: i32) -> (i32, i32, i32) {
    %c0_i32 = arith.constant 0 : i32
    %c0_i32_0 = arith.constant 0 : i32
    %c0_i32_1 = arith.constant 0 : i32
    return %arg0, %c0_i32, %c0_i32_0 : i32, i32, i32
  }
  func.func @transform_1(%arg0: i32) -> (i32, i32) {
    %c0_i32 = arith.constant 0 : i32
    %c0_i32_0 = arith.constant 0 : i32
    %c0_i32_1 = arith.constant 0 : i32
    return %c0_i32, %c0_i32_0 : i32, i32
  }
  func.func @transform_2(%arg0: i32) -> (i32, i32) {
    %c0_i32 = arith.constant 0 : i32
    %c0_i32_0 = arith.constant 0 : i32
    %c0_i32_1 = arith.constant 0 : i32
    return %c0_i32, %c0_i32_0 : i32, i32
  }
  func.func @transform_3(%arg0: i32) -> (i32, i32, i32) {
    %c0_i32 = arith.constant 0 : i32
    %c0_i32_0 = arith.constant 0 : i32
    %c0_i32_1 = arith.constant 0 : i32
    return %arg0, %c0_i32, %c0_i32_0 : i32, i32, i32
  }
}

</mosaic_0001>

<bundles_post_ra>
// kernel: dis_forward.12
= control target key start
LH: loop header
LB: loop body
LE: loop exit
PB: predicated region body
PF: predicated region fallthrough
CT: control target
= control target key end

     0   :  { %s948_s12 = smov 0   ;;  %s950_s13 = smov 0   ;;  %s1058_s0 = inlined_call_operand.vmem [shape: bf16[512,128], index: 0, kind: input, shape index: {}]   ;;  %s1059_s1 = inlined_call_operand.vmem [shape: bf16[128,128], index: 1, kind: input, shape index: {}]   ;;  %s1060_s2 = inlined_call_operand.vmem [shape: f32[1,128], index: 2, kind: input, shape index: {}]   ;;  %s1061_s3 = inlined_call_operand.vmem [shape: f32[512,128], index: 3, kind: output, shape index: {}]  }
   0x1   :  { %s952_s14 = smov 0  }
   0x2 LB: > { %s32_s15 = sadd.s32 1, %s922_s13  ;;  %p776_p0 = scmp.ge.s32.totalorder %s926_s14, 1  ;;  %s926_s14 = sphi %s952_s14, %s13_s14   ;;  %s922_s13 = sphi %s950_s13, %s1063_s13   ;;  %s918_s12 = sphi %s948_s12, %s1062_s12  }
   0x3   : > { %p34_p1 = scmp.ge.s32.totalorder %s32_s15, 4  ;;  %p188_p2 = scmp.lt.s32.totalorder %s926_s14, 5 }
   0x5   : > { %s1065_s15 = smov (%p34_p1, %s32_s15), 0  ;;  %p189_p3 = pnand %p776_p0, %p188_p2 }
   0x6   : > { %v888_v0 = vld [vmem:[%s1059_s1] sm:$0xff] (!%p189_p3)   ;;  %s777_s18 = sshll.u32 (!%p189_p3), %s918_s12, 4  ;;  %v889_v1 = vld [vmem:[%s1059_s1 + $0x8] sm:$0xff] (!%p189_p3)   ;;  %v890_v2 = vld [vmem:[%s1059_s1 + $0x10] sm:$0xff] (!%p189_p3)  }
   0x7   : > { %192 = sbr.rel (%p189_p3) target bundleno = 271 (0x10f), region = 32  ;;  %p230_p4 = scmp.lt.s32.totalorder (!%p189_p3), %s777_s18, 63  ;;  %816 = vmatprep.subr.bf16.mxu0 (!%p189_p3), %v888_v0  ;;  %848 = vmatprep.subr.bf16.mxu1 (!%p189_p3), %v888_v0  ;;  %v891_v3 = vld [vmem:[%s1059_s1 + $0x18] sm:$0xff] (!%p189_p3)   ;;  %v892_v6 = vld [vmem:[%s1059_s1 + $0x20] sm:$0xff] (!%p189_p3)   ;;  %v893_v7 = vld [vmem:[%s1059_s1 + $0x28] sm:$0xff] (!%p189_p3)  }
   0x8   : > { %817 = vmatpush3.bf16.msra.mxu0 (!%p189_p3), %v888_v0  ;;  %856 = vmatpush3.bf16.msra.mxu1 (!%p189_p3), %v888_v0  ;;  %v894_v8 = vld [vmem:[%s1059_s1 + $0x30] sm:$0xff] (!%p189_p3)   ;;  %v895_v9 = vld [vmem:[%s1059_s1 + $0x38] sm:$0xff] (!%p189_p3)   ;;  %v1009_v16 = vld [vmem:[%s1060_s2] ss:$0 sm:$0xff] (!%p189_p3) }
   0x9   : > { %818 = vmatprep.subr.bf16.mxu0 (!%p189_p3), %v889_v1  ;;  %849 = vmatprep.subr.bf16.mxu1 (!%p189_p3), %v889_v1 }
   0xc   : > { %819 = vmatpush3.bf16.msra.mxu0 (!%p189_p3), %v889_v1  ;;  %857 = vmatpush3.bf16.msra.mxu1 (!%p189_p3), %v889_v1 }
   0xd   : > { %820 = vmatprep.subr.bf16.mxu0 (!%p189_p3), %v890_v2  ;;  %850 = vmatprep.subr.bf16.mxu1 (!%p189_p3), %v890_v2 }
   0xe   : > { %s1067_s18 = smov (!%p230_p4, %s777_s18), 63 }
   0xf   : > { %s778_s23 = sshll.u32 %s1067_s18, 2  ;;  %s780_s12 = sshll.u32 %s1067_s18, 3 }
  0x10   : > { %s981_s26 = scalar_lea.vmem %s1058_s0, %s778_s23  ;;  %821 = vmatpush3.bf16.msra.mxu0 %v890_v2  ;;  %858 = vmatpush3.bf16.msra.mxu1 %v890_v2  ;;  %s1019_s19 = scalar_lea.vmem %s1061_s3, %s780_s12 }
  0x11   : > { %v896_v4 = vld [vmem:[%s981_s26] sm:$0xff]   ;;  %822 = vmatprep.subr.bf16.mxu0 %v891_v3  ;;  %851 = vmatprep.subr.bf16.mxu1 %v891_v3  ;;  %v898_v10 = vld [vmem:[%s981_s26 + $0x8] sm:$0xff]   ;;  %v900_v12 = vld [vmem:[%s981_s26 + $0x10] sm:$0xff]  }
  0x12   : > { %v897_v5 = vld [vmem:[%s981_s26 + $0x20] sm:$0xff]   ;;  %832 = vmatprep.mubr.bf16.mxu0 %v896_v4  ;;  %v899_v11 = vld [vmem:[%s981_s26 + $0x28] sm:$0xff]   ;;  %v901_v13 = vld [vmem:[%s981_s26 + $0x30] sm:$0xff]  }
  0x13   : > { %840 = vmatprep.mubr.bf16.mxu1 %v897_v5  ;;  %v902_v14 = vld [vmem:[%s981_s26 + $0x18] sm:$0xff]  }
  0x14   : > { %823 = vmatpush3.bf16.msra.mxu0 %v891_v3  ;;  %859 = vmatpush3.bf16.msra.mxu1 %v891_v3  ;;  %v903_v15 = vld [vmem:[%s981_s26 + $0x38] sm:$0xff]  }
  0x15   : > { %824 = vmatprep.subr.bf16.mxu0 %v892_v6  ;;  %852 = vmatprep.subr.bf16.mxu1 %v892_v6 }
  0x18   : > { %825 = vmatpush3.bf16.msra.mxu0 %v892_v6  ;;  %860 = vmatpush3.bf16.msra.mxu1 %v892_v6 }
  0x19   : > { %826 = vmatprep.subr.bf16.mxu0 %v893_v7  ;;  %853 = vmatprep.subr.bf16.mxu1 %v893_v7 }
  0x1c   : > { %827 = vmatpush3.bf16.msra.mxu0 %v893_v7  ;;  %861 = vmatpush3.bf16.msra.mxu1 %v893_v7 }
  0x1d   : > { %828 = vmatprep.subr.bf16.mxu0 %v894_v8  ;;  %854 = vmatprep.subr.bf16.mxu1 %v894_v8 }
  0x20   : > { %829 = vmatpush3.bf16.msra.mxu0 %v894_v8  ;;  %862 = vmatpush3.bf16.msra.mxu1 %v894_v8 }
  0x21   : > { %830 = vmatprep.subr.bf16.mxu0 %v895_v9  ;;  %855 = vmatprep.subr.bf16.mxu1 %v895_v9 }
  0x24   : > { %831 = vmatpush3.bf16.msra.mxu0 %v895_v9  ;;  %863 = vmatpush3.bf16.msra.mxu1 %v895_v9 }
  0x27   : > { %833 = vmatmul.mubr.bf16.vlgmr.msra.gmra.mrb[0].mxu0 %v898_v10  ;;  %841 = vmatmul.mubr.bf16.vlgmr.msra.gmra.mrb[0].mxu1 %v899_v11 }
  0x28   : > { %836 = vmatprep.mubr.bf16.mxu0 %v900_v12  ;;  %844 = vmatprep.mubr.bf16.mxu1 %v901_v13 }
  0x2f   : > { %837 = vmatmul.mubr.bf16.gmra.mrb[4].mxu0 %v902_v14  ;;  %845 = vmatmul.mubr.bf16.gmra.mrb[4].mxu1 %v903_v15 }
  0xfa   : > { %v834_v17 = vpop.f32.mrb[0].mxu0  ;;  %v842_v18 = vpop.f32.mrb[0].mxu1 }
  0xfb   : > { %v581_v19 = vadd.f32 %v834_v17, %v1009_v16  ;;  %v589_v20 = vadd.f32 %v842_v18, %v1009_v16  ;;  %v458_v21 = vpop.f32.mrb[1].mxu0  ;;  %v490_v22 = vpop.f32.mrb[1].mxu1 }
  0xfc   : > { %v579_v23 = vadd.f32 %v1009_v16, %v458_v21  ;;  %v587_v24 = vadd.f32 %v1009_v16, %v490_v22  ;;  %v835_v25 = vpop.f32.mrb[2].mxu0  ;;  %v843_v26 = vpop.f32.mrb[2].mxu1 }
  0xfd   : > { %vm597_vm0 = vcmp.ge.f32.partialorder %v581_v19, 0.0  ;;  %v613_v27 = vmul.f32 0.2, %v581_v19  ;;  %vm605_vm1 = vcmp.ge.f32.partialorder %v589_v20, 0.0  ;;  %v621_v28 = vmul.f32 0.2, %v589_v20 }
  0xfe   : > { %vm595_vm2 = vcmp.ge.f32.partialorder %v579_v23, 0.0  ;;  %v611_v29 = vmul.f32 0.2, %v579_v23  ;;  %vm603_vm3 = vcmp.ge.f32.partialorder %v587_v24, 0.0  ;;  %v619_v30 = vmul.f32 0.2, %v587_v24 }
  0xff   : > { %v629_v31 = vsel %vm597_vm0, %v581_v19, %v613_v27  ;;  %v637_v32 = vsel %vm605_vm1, %v589_v20, %v621_v28  ;;  %v582_v33 = vadd.f32 %v835_v25, %v1009_v16  ;;  %v590_v34 = vadd.f32 %v843_v26, %v1009_v16  ;;  %v461_v35 = vpop.f32.mrb[3].mxu0  ;;  %v493_v36 = vpop.f32.mrb[3].mxu1 }
 0x100   : > { %645 = vst [vmem:[%s1019_s19 + $0x10] sm:$0xff] %v629_v31  ;;  %653 = vst [vmem:[%s1019_s19 + $0x50] sm:$0xff] %v637_v32  ;;  %v627_v37 = vsel %vm595_vm2, %v579_v23, %v611_v29  ;;  %v635_v38 = vsel %vm603_vm3, %v587_v24, %v619_v30  ;;  %v580_v39 = vadd.f32 %v1009_v16, %v461_v35 }
 0x101   : > { %v588_v40 = vadd.f32 %v1009_v16, %v493_v36  ;;  %643 = vst [vmem:[%s1019_s19] sm:$0xff] %v627_v37  ;;  %651 = vst [vmem:[%s1019_s19 + $0x40] sm:$0xff] %v635_v38  ;;  %vm598_vm4 = vcmp.ge.f32.partialorder %v582_v33, 0.0  ;;  %v614_v41 = vmul.f32 0.2, %v582_v33  ;;  %vm606_vm5 = vcmp.ge.f32.partialorder %v590_v34, 0.0 }
 0x102   : > { %v622_v42 = vmul.f32 0.2, %v590_v34  ;;  %vm596_vm6 = vcmp.ge.f32.partialorder %v580_v39, 0.0  ;;  %v612_v43 = vmul.f32 0.2, %v580_v39  ;;  %v838_v47 = vpop.f32.mrb[4].mxu0 }
 0x103   : > { %vm604_vm7 = vcmp.ge.f32.partialorder %v588_v40, 0.0  ;;  %v620_v44 = vmul.f32 0.2, %v588_v40  ;;  %v630_v45 = vsel %vm598_vm4, %v582_v33, %v614_v41  ;;  %v846_v48 = vpop.f32.mrb[4].mxu1  ;;  %v585_v51 = vadd.f32 %v838_v47, %v1009_v16  ;;  %v474_v53 = vpop.f32.mrb[5].mxu0 }
 0x104   : > { %v638_v46 = vsel %vm606_vm5, %v590_v34, %v622_v42  ;;  %646 = vst [vmem:[%s1019_s19 + $0x18] sm:$0xff] %v630_v45  ;;  %v628_v49 = vsel %vm596_vm6, %v580_v39, %v612_v43  ;;  %v593_v52 = vadd.f32 %v846_v48, %v1009_v16  ;;  %v506_v54 = vpop.f32.mrb[5].mxu1  ;;  %v583_v55 = vadd.f32 %v1009_v16, %v474_v53  ;;  %v839_v57 = vpop.f32.mrb[6].mxu0 }
 0x105   : > { %654 = vst [vmem:[%s1019_s19 + $0x58] sm:$0xff] %v638_v46  ;;  %v636_v50 = vsel %vm604_vm7, %v588_v40, %v620_v44  ;;  %644 = vst [vmem:[%s1019_s19 + $0x8] sm:$0xff] %v628_v49  ;;  %v591_v56 = vadd.f32 %v1009_v16, %v506_v54  ;;  %v847_v58 = vpop.f32.mrb[6].mxu1  ;;  %vm601_vm8 = vcmp.ge.f32.partialorder %v585_v51, 0.0  ;;  %v617_v59 = vmul.f32 0.2, %v585_v51 }
 0x106   : > { %652 = vst [vmem:[%s1019_s19 + $0x48] sm:$0xff] %v636_v50  ;;  %vm609_vm9 = vcmp.ge.f32.partialorder %v593_v52, 0.0  ;;  %v625_v60 = vmul.f32 0.2, %v593_v52  ;;  %vm599_vm10 = vcmp.ge.f32.partialorder %v583_v55, 0.0  ;;  %v586_v1 = vadd.f32 %v839_v57, %v1009_v16  ;;  %v477_v3 = vpop.f32.mrb[7].mxu0 }
 0x107   : > { %v615_v61 = vmul.f32 0.2, %v583_v55  ;;  %vm607_vm11 = vcmp.ge.f32.partialorder %v591_v56, 0.0  ;;  %v623_v62 = vmul.f32 0.2, %v591_v56  ;;  %v633_v63 = vsel %vm601_vm8, %v585_v51, %v617_v59  ;;  %v509_v4 = vpop.f32.mrb[7].mxu1 }
 0x108   : > { %v641_v0 = vsel %vm609_vm9, %v593_v52, %v625_v60  ;;  %v594_v2 = vadd.f32 %v847_v58, %v1009_v16  ;;  %649 = vst [vmem:[%s1019_s19 + $0x30] sm:$0xff] %v633_v63  ;;  %v584_v7 = vadd.f32 %v1009_v16, %v477_v3  ;;  %v592_v8 = vadd.f32 %v1009_v16, %v509_v4 }
 0x109   : > { %657 = vst [vmem:[%s1019_s19 + $0x70] sm:$0xff] %v641_v0  ;;  %v631_v5 = vsel %vm599_vm10, %v583_v55, %v615_v61  ;;  %v639_v6 = vsel %vm607_vm11, %v591_v56, %v623_v62  ;;  %vm602_vm12 = vcmp.ge.f32.partialorder %v586_v1, 0.0  ;;  %v618_v9 = vmul.f32 0.2, %v586_v1 }
 0x10a   : > { %647 = vst [vmem:[%s1019_s19 + $0x20] sm:$0xff] %v631_v5  ;;  %655 = vst [vmem:[%s1019_s19 + $0x60] sm:$0xff] %v639_v6  ;;  %vm610_vm13 = vcmp.ge.f32.partialorder %v594_v2, 0.0  ;;  %v626_v10 = vmul.f32 0.2, %v594_v2  ;;  %vm600_vm14 = vcmp.ge.f32.partialorder %v584_v7, 0.0 }
 0x10b   : > { %v616_v11 = vmul.f32 0.2, %v584_v7  ;;  %vm608_vm15 = vcmp.ge.f32.partialorder %v592_v8, 0.0  ;;  %v624_v12 = vmul.f32 0.2, %v592_v8  ;;  %v634_v13 = vsel %vm602_vm12, %v586_v1, %v618_v9 }
 0x10c   : > { %v642_v14 = vsel %vm610_vm13, %v594_v2, %v626_v10  ;;  %650 = vst [vmem:[%s1019_s19 + $0x38] sm:$0xff] %v634_v13 }
 0x10d   : > { %658 = vst [vmem:[%s1019_s19 + $0x78] sm:$0xff] %v642_v14  ;;  %v632_v15 = vsel %vm600_vm14, %v584_v7, %v616_v11  ;;  %v640_v17 = vsel %vm608_vm15, %v592_v8, %v624_v12 }
 0x10e   : > { %648 = vst [vmem:[%s1019_s19 + $0x28] sm:$0xff] %v632_v15  ;;  %656 = vst [vmem:[%s1019_s19 + $0x68] sm:$0xff] %v640_v17 }
 0x10f PF: > { %s13_s14 = sadd.s32 1, %s926_s14   ;;  %s1062_s12 = smov %s922_s13 }
 0x110   : > { %p10_p5 = scmp.ge.s32.totalorder %s13_s14, 6   ;;  %s1063_s13 = smov %s1065_s15 }
 0x112   :  { %12 = sbr.rel (!%p10_p5) target bundleno = 2 (0x2), region = 76 }

// kernel: dis_forward.13
= control target key start
LH: loop header
LB: loop body
LE: loop exit
PB: predicated region body
PF: predicated region fallthrough
CT: control target
= control target key end

     0   :  { %s1198_s1 = inlined_call_operand.vmem [shape: bf16[384,128], index: 1, kind: input, shape index: {}]   ;;  %s1199_s0 = inlined_call_operand.vmem [shape: bf16[128,384], index: 0, kind: input, shape index: {}]   ;;  %s1200_s2 = inlined_call_operand.vmem [shape: f32[1,128], index: 2, kind: input, shape index: {}]   ;;  %s1201_s3 = inlined_call_operand.vmem [shape: f32[128,128], index: 3, kind: output, shape index: {}]  }
   0x1   :  { %v900_v0 = vld [vmem:[%s1198_s1 + $0x40] sm:$0xff]   ;;  %v903_v3 = vld [vmem:[%s1198_s1 + $0x48] sm:$0xff]   ;;  %v906_v6 = vld [vmem:[%s1198_s1 + $0x50] sm:$0xff]  }
   0x2   :  { %v901_v1 = vld [vmem:[%s1198_s1] sm:$0xff]   ;;  %788 = vmatprep.subr.bf16.mxu0 %v900_v0  ;;  %v904_v4 = vld [vmem:[%s1198_s1 + $0x8] sm:$0xff]   ;;  %v907_v7 = vld [vmem:[%s1198_s1 + $0x10] sm:$0xff]  }
   0x3   :  { %v902_v2 = vld [vmem:[%s1198_s1 + $0x80] sm:$0xff]   ;;  %789 = vmatpush3.bf16.msra.mxu0 %v901_v1  ;;  %v905_v5 = vld [vmem:[%s1198_s1 + $0x88] sm:$0xff]   ;;  %v908_v8 = vld [vmem:[%s1198_s1 + $0x90] sm:$0xff]  }
   0x4   :  { %868 = vmatprep.subr.bf16.mxu1 %v902_v2  ;;  %790 = vmatprep.subr.bf16.mxu0 %v903_v3  ;;  %v909_v9 = vld [vmem:[%s1198_s1 + $0x58] sm:$0xff]   ;;  %v912_v12 = vld [vmem:[%s1198_s1 + $0x60] sm:$0xff]   ;;  %v915_v15 = vld [vmem:[%s1198_s1 + $0x68] sm:$0xff]  }
   0x5   :  { %869 = vmatpush3.bf16.msra.mxu1 %v902_v2  ;;  %v910_v10 = vld [vmem:[%s1198_s1 + $0x18] sm:$0xff]   ;;  %v914_v13 = vld [vmem:[%s1198_s1 + $0xa0] sm:$0xff]   ;;  %v917_v16 = vld [vmem:[%s1198_s1 + $0xa8] sm:$0xff]  }
   0x6   :  { %870 = vmatprep.subr.bf16.mxu1 %v905_v5  ;;  %v911_v11 = vld [vmem:[%s1198_s1 + $0x98] sm:$0xff]   ;;  %v913_v14 = vld [vmem:[%s1198_s1 + $0x20] sm:$0xff]   ;;  %v916_v17 = vld [vmem:[%s1198_s1 + $0x28] sm:$0xff]  }
   0x7   :  { %791 = vmatpush3.bf16.msra.mxu0 %v904_v4  ;;  %v918_v18 = vld [vmem:[%s1198_s1 + $0x70] sm:$0xff]   ;;  %v921_v21 = vld [vmem:[%s1198_s1 + $0x78] sm:$0xff]   ;;  %v924_v26 = vld [vmem:[%s1199_s0] ss:$12 sps:$4 sm:$0xff]  }
   0x8   :  { %792 = vmatprep.subr.bf16.mxu0 %v906_v6  ;;  %v919_v19 = vld [vmem:[%s1198_s1 + $0x30] sm:$0xff]   ;;  %v923_v22 = vld [vmem:[%s1198_s1 + $0xb8] sm:$0xff]   ;;  %v928_v28 = vld [vmem:[%s1199_s0 + $0x20] ss:$12 sps:$4 sm:$0xff]  }
   0x9   :  { %871 = vmatpush3.bf16.msra.mxu1 %v905_v5  ;;  %v920_v20 = vld [vmem:[%s1198_s1 + $0xb0] sm:$0xff]   ;;  %v922_v25 = vld [vmem:[%s1198_s1 + $0x38] sm:$0xff]   ;;  %v944_v36 = vld [vmem:[%s1199_s0 + $0x80] ss:$12 sps:$4 sm:$0xff]  }
   0xa   :  { %872 = vmatprep.subr.bf16.mxu1 %v908_v8  ;;  %v926_v23 = vld [vmem:[%s1199_s0 + $0x4] ss:$12 sps:$4 sm:$0xff]   ;;  %v927_v24 = vld [vmem:[%s1199_s0 + $0x8] ss:$12 sps:$4 sm:$0xff]   ;;  %v937_v35 = vld [vmem:[%s1199_s0 + $0x4c] ss:$12 sps:$4 sm:$0xff]  }
   0xb   :  { %793 = vmatpush3.bf16.msra.mxu0 %v907_v7  ;;  %435 = vmatprep.mubr.bf16.mxu0 %v926_v23  ;;  %v929_v27 = vld [vmem:[%s1199_s0 + $0x1c] ss:$12 sps:$4 sm:$0xff]   ;;  %v935_v29 = vld [vmem:[%s1199_s0 + $0x38] ss:$12 sps:$4 sm:$0xff]   ;;  %v932_v31 = vld [vmem:[%s1199_s0 + $0x34] ss:$12 sps:$4 sm:$0xff]  }
   0xc   :  { %794 = vmatprep.subr.bf16.mxu0 %v909_v9  ;;  %884 = vmatprep.mubr.bf16.mxu1 %v927_v24  ;;  %v931_v30 = vld [vmem:[%s1199_s0 + $0x18] ss:$12 sps:$4 sm:$0xff]   ;;  %v936_v32 = vld [vmem:[%s1199_s0 + $0x50] ss:$12 sps:$4 sm:$0xff]   ;;  %v943_v33 = vld [vmem:[%s1199_s0 + $0x68] ss:$12 sps:$4 sm:$0xff]  }
   0xd   :  { %873 = vmatpush3.bf16.msra.mxu1 %v908_v8  ;;  %v934_v34 = vld [vmem:[%s1199_s0 + $0x30] ss:$12 sps:$4 sm:$0xff]   ;;  %v951_v37 = vld [vmem:[%s1199_s0 + $0x98] ss:$12 sps:$4 sm:$0xff]   ;;  %v939_v38 = vld [vmem:[%s1199_s0 + $0x48] ss:$12 sps:$4 sm:$0xff]  }
   0xe   :  { %874 = vmatprep.subr.bf16.mxu1 %v911_v11  ;;  %v940_v39 = vld [vmem:[%s1199_s0 + $0x64] ss:$12 sps:$4 sm:$0xff]   ;;  %v942_v41 = vld [vmem:[%s1199_s0 + $0x60] ss:$12 sps:$4 sm:$0xff]   ;;  %v945_v42 = vld [vmem:[%s1199_s0 + $0x7c] ss:$12 sps:$4 sm:$0xff]  }
   0xf   :  { %795 = vmatpush3.bf16.msra.mxu0 %v910_v10  ;;  %v952_v40 = vld [vmem:[%s1199_s0 + $0xb0] ss:$12 sps:$4 sm:$0xff]   ;;  %v947_v43 = vld [vmem:[%s1199_s0 + $0x78] ss:$12 sps:$4 sm:$0xff]   ;;  %v948_v44 = vld [vmem:[%s1199_s0 + $0x94] ss:$12 sps:$4 sm:$0xff]  }
  0x10   :  { %796 = vmatprep.subr.bf16.mxu0 %v912_v12  ;;  %v950_v45 = vld [vmem:[%s1199_s0 + $0x90] ss:$12 sps:$4 sm:$0xff]   ;;  %v953_v46 = vld [vmem:[%s1199_s0 + $0xac] ss:$12 sps:$4 sm:$0xff]   ;;  %v955_v47 = vld [vmem:[%s1199_s0 + $0xa8] ss:$12 sps:$4 sm:$0xff]  }
  0x11   :  { %875 = vmatpush3.bf16.msra.mxu1 %v911_v11  ;;  %v1123_v55 = vld [vmem:[%s1200_s2] ss:$0 sm:$0xff] }
  0x12   :  { %876 = vmatprep.subr.bf16.mxu1 %v914_v13 }
  0x13   :  { %797 = vmatpush3.bf16.msra.mxu0 %v913_v14 }
  0x14   :  { %798 = vmatprep.subr.bf16.mxu0 %v915_v15 }
  0x15   :  { %877 = vmatpush3.bf16.msra.mxu1 %v914_v13 }
  0x16   :  { %878 = vmatprep.subr.bf16.mxu1 %v917_v16 }
  0x17   :  { %799 = vmatpush3.bf16.msra.mxu0 %v916_v17 }
  0x18   :  { %800 = vmatprep.subr.bf16.mxu0 %v918_v18 }
  0x19   :  { %879 = vmatpush3.bf16.msra.mxu1 %v917_v16 }
  0x1a   :  { %880 = vmatprep.subr.bf16.mxu1 %v920_v20 }
  0x1b   :  { %801 = vmatpush3.bf16.msra.mxu0 %v919_v19 }
  0x1c   :  { %802 = vmatprep.subr.bf16.mxu0 %v921_v21 }
  0x1d   :  { %881 = vmatpush3.bf16.msra.mxu1 %v920_v20 }
  0x1e   :  { %882 = vmatprep.subr.bf16.mxu1 %v923_v22 }
  0x1f   :  { %803 = vmatpush3.bf16.msra.mxu0 %v922_v25 }
  0x21   :  { %883 = vmatpush3.bf16.msra.mxu1 %v923_v22 }
  0x22   :  { %436 = vmatmul.mubr.bf16.vlgmr.msra.gmra.mrb[0].mxu0 %v924_v26 }
  0x23   :  { %443 = vmatprep.mubr.bf16.mxu0 %v929_v27 }
  0x24   :  { %885 = vmatmul.mubr.bf16.vlgmr.msra.gmra.mrb[0].mxu1 %v928_v28 }
  0x25   :  { %888 = vmatprep.mubr.bf16.mxu1 %v935_v29 }
  0x2a   :  { %444 = vmatmul.mubr.bf16.gmra.mrb[4].mxu0 %v931_v30 }
  0x2b   :  { %451 = vmatprep.mubr.bf16.mxu0 %v932_v31 }
  0x2c   :  { %889 = vmatmul.mubr.bf16.gmra.mrb[4].mxu1 %v936_v32 }
  0x2d   :  { %892 = vmatprep.mubr.bf16.mxu1 %v943_v33 }
  0x32   :  { %452 = vmatmul.mubr.bf16.gmra.mrb[8].mxu0 %v934_v34 }
  0x33   :  { %459 = vmatprep.mubr.bf16.mxu0 %v937_v35 }
  0x34   :  { %893 = vmatmul.mubr.bf16.gmra.mrb[8].mxu1 %v944_v36 }
  0x35   :  { %896 = vmatprep.mubr.bf16.mxu1 %v951_v37 }
  0x3a   :  { %460 = vmatmul.mubr.bf16.gmra.mrb[12].mxu0 %v939_v38 }
  0x3b   :  { %467 = vmatprep.mubr.bf16.mxu0 %v940_v39 }
  0x3c   :  { %897 = vmatmul.mubr.bf16.gmra.mrb[12].mxu1 %v952_v40 }
  0x42   :  { %468 = vmatmul.mubr.bf16.gmra.mrb[16].mxu0 %v942_v41 }
  0x43   :  { %475 = vmatprep.mubr.bf16.mxu0 %v945_v42 }
  0x4a   :  { %476 = vmatmul.mubr.bf16.gmra.mrb[20].mxu0 %v947_v43 }
  0x4b   :  { %483 = vmatprep.mubr.bf16.mxu0 %v948_v44 }
  0x52   :  { %484 = vmatmul.mubr.bf16.gmra.mrb[24].mxu0 %v950_v45 }
  0x53   :  { %491 = vmatprep.mubr.bf16.mxu0 %v953_v46 }
  0x5a   :  { %492 = vmatmul.mubr.bf16.gmra.mrb[28].mxu0 %v955_v47 }
  0xf5   :  { %v804_v48 = vpop.f32.mrb[0].mxu0 }
  0xf6   :  { %v805_v49 = vpop.f32.mrb[1].mxu0 }
  0xf7   :  { %v806_v50 = vadd.f32 %v805_v49, %v804_v48  ;;  %v807_v51 = vpop.f32.mrb[2].mxu0  ;;  %v886_v52 = vpop.f32.mrb[0].mxu1 }
  0xf8   :  { %v808_v53 = vpop.f32.mrb[3].mxu0  ;;  %v534_v54 = vpop.f32.mrb[1].mxu1 }
  0xf9   :  { %v809_v56 = vadd.f32 %v808_v53, %v807_v51  ;;  %v535_v57 = vadd.f32 %v806_v50, %v534_v54  ;;  %v887_v58 = vpop.f32.mrb[2].mxu1 }
  0xfa   :  { %v537_v59 = vpop.f32.mrb[3].mxu1 }
  0xfb   :  { %v655_v60 = vadd.f32 %v1123_v55, %v535_v57  ;;  %v538_v61 = vadd.f32 %v809_v56, %v537_v59 }
  0xfd   :  { %vm671_vm0 = vcmp.ge.f32.partialorder %v655_v60, 0.0  ;;  %v687_v62 = vmul.f32 0.2, %v655_v60  ;;  %v656_v63 = vadd.f32 %v1123_v55, %v538_v61  ;;  %v810_v0 = vpop.f32.mrb[4].mxu0 }
  0xfe   :  { %v811_v1 = vpop.f32.mrb[5].mxu0 }
  0xff   :  { %v703_v2 = vsel %vm671_vm0, %v655_v60, %v687_v62  ;;  %vm672_vm1 = vcmp.ge.f32.partialorder %v656_v63, 0.0  ;;  %v688_v3 = vmul.f32 0.2, %v656_v63  ;;  %v812_v4 = vadd.f32 %v811_v1, %v810_v0  ;;  %v813_v5 = vpop.f32.mrb[6].mxu0  ;;  %v890_v6 = vpop.f32.mrb[4].mxu1 }
 0x100   :  { %719 = vst [vmem:[%s1201_s3] sm:$0xff] %v703_v2  ;;  %v814_v7 = vpop.f32.mrb[7].mxu0  ;;  %v550_v8 = vpop.f32.mrb[5].mxu1 }
 0x101   :  { %v704_v9 = vsel %vm672_vm1, %v656_v63, %v688_v3  ;;  %v543_v10 = vadd.f32 %v886_v52, %v812_v4  ;;  %v815_v11 = vadd.f32 %v814_v7, %v813_v5  ;;  %v891_v12 = vpop.f32.mrb[6].mxu1 }
 0x102   :  { %720 = vst [vmem:[%s1201_s3 + $0x8] sm:$0xff] %v704_v9  ;;  %v553_v13 = vpop.f32.mrb[7].mxu1 }
 0x103   :  { %v657_v14 = vadd.f32 %v1123_v55, %v543_v10  ;;  %v546_v15 = vadd.f32 %v887_v58, %v815_v11 }
 0x105   :  { %vm673_vm2 = vcmp.ge.f32.partialorder %v657_v14, 0.0  ;;  %v689_v16 = vmul.f32 0.2, %v657_v14  ;;  %v658_v17 = vadd.f32 %v1123_v55, %v546_v15  ;;  %v816_v18 = vpop.f32.mrb[8].mxu0 }
 0x106   :  { %v817_v19 = vpop.f32.mrb[9].mxu0 }
 0x107   :  { %v705_v20 = vsel %vm673_vm2, %v657_v14, %v689_v16  ;;  %vm674_vm3 = vcmp.ge.f32.partialorder %v658_v17, 0.0  ;;  %v690_v21 = vmul.f32 0.2, %v658_v17  ;;  %v818_v22 = vadd.f32 %v817_v19, %v816_v18  ;;  %v819_v23 = vpop.f32.mrb[10].mxu0  ;;  %v1135_v24 = vpop.f32.mrb[8].mxu1 }
 0x108   :  { %721 = vst [vmem:[%s1201_s3 + $0x10] sm:$0xff] %v705_v20  ;;  %v820_v25 = vpop.f32.mrb[11].mxu0  ;;  %v566_v26 = vpop.f32.mrb[9].mxu1 }
 0x109   :  { %v706_v27 = vsel %vm674_vm3, %v658_v17, %v690_v21  ;;  %v821_v28 = vadd.f32 %v820_v25, %v819_v23  ;;  %v551_v29 = vadd.f32 %v818_v22, %v550_v8  ;;  %v895_v30 = vpop.f32.mrb[10].mxu1 }
 0x10a   :  { %722 = vst [vmem:[%s1201_s3 + $0x18] sm:$0xff] %v706_v27  ;;  %v569_v31 = vpop.f32.mrb[11].mxu1 }
 0x10b   :  { %v659_v32 = vadd.f32 %v1123_v55, %v551_v29  ;;  %v554_v33 = vadd.f32 %v821_v28, %v553_v13 }
 0x10d   :  { %vm675_vm4 = vcmp.ge.f32.partialorder %v659_v32, 0.0  ;;  %v691_v34 = vmul.f32 0.2, %v659_v32  ;;  %v660_v35 = vadd.f32 %v1123_v55, %v554_v33  ;;  %v822_v36 = vpop.f32.mrb[12].mxu0 }
 0x10e   :  { %v823_v37 = vpop.f32.mrb[13].mxu0 }
 0x10f   :  { %v707_v38 = vsel %vm675_vm4, %v659_v32, %v691_v34  ;;  %vm676_vm5 = vcmp.ge.f32.partialorder %v660_v35, 0.0  ;;  %v692_v39 = vmul.f32 0.2, %v660_v35  ;;  %v824_v40 = vadd.f32 %v823_v37, %v822_v36  ;;  %v825_v41 = vpop.f32.mrb[14].mxu0  ;;  %v1145_v42 = vpop.f32.mrb[12].mxu1 }
 0x110   :  { %723 = vst [vmem:[%s1201_s3 + $0x20] sm:$0xff] %v707_v38  ;;  %v826_v43 = vpop.f32.mrb[15].mxu0  ;;  %v582_v44 = vpop.f32.mrb[13].mxu1 }
 0x111   :  { %v708_v45 = vsel %vm676_vm5, %v660_v35, %v692_v39  ;;  %v559_v46 = vadd.f32 %v890_v6, %v824_v40  ;;  %v827_v47 = vadd.f32 %v826_v43, %v825_v41  ;;  %v1150_v48 = vpop.f32.mrb[14].mxu1 }
 0x112   :  { %724 = vst [vmem:[%s1201_s3 + $0x28] sm:$0xff] %v708_v45  ;;  %v585_v49 = vpop.f32.mrb[15].mxu1 }
 0x113   :  { %v661_v50 = vadd.f32 %v1123_v55, %v559_v46  ;;  %v562_v51 = vadd.f32 %v891_v12, %v827_v47 }
 0x115   :  { %vm677_vm6 = vcmp.ge.f32.partialorder %v661_v50, 0.0  ;;  %v693_v52 = vmul.f32 0.2, %v661_v50  ;;  %v662_v53 = vadd.f32 %v1123_v55, %v562_v51  ;;  %v828_v54 = vpop.f32.mrb[16].mxu0 }
 0x116   :  { %v829_v56 = vpop.f32.mrb[17].mxu0 }
 0x117   :  { %v709_v57 = vsel %vm677_vm6, %v661_v50, %v693_v52  ;;  %vm678_vm7 = vcmp.ge.f32.partialorder %v662_v53, 0.0  ;;  %v694_v58 = vmul.f32 0.2, %v662_v53  ;;  %v830_v59 = vadd.f32 %v829_v56, %v828_v54  ;;  %v831_v60 = vpop.f32.mrb[18].mxu0 }
 0x118   :  { %725 = vst [vmem:[%s1201_s3 + $0x30] sm:$0xff] %v709_v57  ;;  %v832_v61 = vpop.f32.mrb[19].mxu0 }
 0x119   :  { %v710_v62 = vsel %vm678_vm7, %v662_v53, %v694_v58  ;;  %v833_v63 = vadd.f32 %v832_v61, %v831_v60  ;;  %v567_v0 = vadd.f32 %v830_v59, %v566_v26 }
 0x11a   :  { %726 = vst [vmem:[%s1201_s3 + $0x38] sm:$0xff] %v710_v62 }
 0x11b   :  { %v663_v1 = vadd.f32 %v1123_v55, %v567_v0  ;;  %v570_v2 = vadd.f32 %v833_v63, %v569_v31 }
 0x11d   :  { %vm679_vm8 = vcmp.ge.f32.partialorder %v663_v1, 0.0  ;;  %v695_v3 = vmul.f32 0.2, %v663_v1  ;;  %v664_v4 = vadd.f32 %v1123_v55, %v570_v2  ;;  %v834_v5 = vpop.f32.mrb[20].mxu0 }
 0x11e   :  { %v835_v6 = vpop.f32.mrb[21].mxu0 }
 0x11f   :  { %v711_v7 = vsel %vm679_vm8, %v663_v1, %v695_v3  ;;  %vm680_vm9 = vcmp.ge.f32.partialorder %v664_v4, 0.0  ;;  %v696_v8 = vmul.f32 0.2, %v664_v4  ;;  %v836_v9 = vadd.f32 %v835_v6, %v834_v5  ;;  %v837_v10 = vpop.f32.mrb[22].mxu0 }
 0x120   :  { %727 = vst [vmem:[%s1201_s3 + $0x40] sm:$0xff] %v711_v7  ;;  %v838_v11 = vpop.f32.mrb[23].mxu0 }
 0x121   :  { %v712_v12 = vsel %vm680_vm9, %v664_v4, %v696_v8  ;;  %v575_v13 = vadd.f32 %v1135_v24, %v836_v9  ;;  %v839_v14 = vadd.f32 %v838_v11, %v837_v10 }
 0x122   :  { %728 = vst [vmem:[%s1201_s3 + $0x48] sm:$0xff] %v712_v12 }
 0x123   :  { %v665_v15 = vadd.f32 %v1123_v55, %v575_v13  ;;  %v578_v16 = vadd.f32 %v895_v30, %v839_v14 }
 0x125   :  { %vm681_vm10 = vcmp.ge.f32.partialorder %v665_v15, 0.0  ;;  %v697_v17 = vmul.f32 0.2, %v665_v15  ;;  %v666_v18 = vadd.f32 %v1123_v55, %v578_v16  ;;  %v840_v19 = vpop.f32.mrb[24].mxu0 }
 0x126   :  { %v841_v20 = vpop.f32.mrb[25].mxu0 }
 0x127   :  { %v713_v21 = vsel %vm681_vm10, %v665_v15, %v697_v17  ;;  %vm682_vm11 = vcmp.ge.f32.partialorder %v666_v18, 0.0  ;;  %v698_v22 = vmul.f32 0.2, %v666_v18  ;;  %v842_v23 = vadd.f32 %v841_v20, %v840_v19  ;;  %v843_v25 = vpop.f32.mrb[26].mxu0 }
 0x128   :  { %729 = vst [vmem:[%s1201_s3 + $0x50] sm:$0xff] %v713_v21  ;;  %v844_v24 = vpop.f32.mrb[27].mxu0 }
 0x129   :  { %v714_v26 = vsel %vm682_vm11, %v666_v18, %v698_v22  ;;  %v845_v27 = vadd.f32 %v844_v24, %v843_v25  ;;  %v583_v28 = vadd.f32 %v842_v23, %v582_v44 }
 0x12a   :  { %730 = vst [vmem:[%s1201_s3 + $0x58] sm:$0xff] %v714_v26 }
 0x12b   :  { %v667_v29 = vadd.f32 %v1123_v55, %v583_v28  ;;  %v586_v30 = vadd.f32 %v845_v27, %v585_v49 }
 0x12d   :  { %vm683_vm12 = vcmp.ge.f32.partialorder %v667_v29, 0.0  ;;  %v699_v31 = vmul.f32 0.2, %v667_v29  ;;  %v668_v32 = vadd.f32 %v1123_v55, %v586_v30  ;;  %v846_v33 = vpop.f32.mrb[28].mxu0 }
 0x12e   :  { %v847_v34 = vpop.f32.mrb[29].mxu0 }
 0x12f   :  { %v715_v35 = vsel %vm683_vm12, %v667_v29, %v699_v31  ;;  %vm684_vm13 = vcmp.ge.f32.partialorder %v668_v32, 0.0  ;;  %v700_v36 = vmul.f32 0.2, %v668_v32  ;;  %v848_v37 = vadd.f32 %v847_v34, %v846_v33  ;;  %v849_v38 = vpop.f32.mrb[30].mxu0 }
 0x130   :  { %731 = vst [vmem:[%s1201_s3 + $0x60] sm:$0xff] %v715_v35  ;;  %v850_v39 = vpop.f32.mrb[31].mxu0 }
 0x131   :  { %v716_v40 = vsel %vm684_vm13, %v668_v32, %v700_v36  ;;  %v591_v41 = vadd.f32 %v1145_v42, %v848_v37  ;;  %v851_v43 = vadd.f32 %v850_v39, %v849_v38 }
 0x132   :  { %732 = vst [vmem:[%s1201_s3 + $0x68] sm:$0xff] %v716_v40 }
 0x133   :  { %v669_v44 = vadd.f32 %v1123_v55, %v591_v41  ;;  %v594_v45 = vadd.f32 %v1150_v48, %v851_v43 }
 0x135   :  { %vm685_vm14 = vcmp.ge.f32.partialorder %v669_v44, 0.0  ;;  %v701_v46 = vmul.f32 0.2, %v669_v44  ;;  %v670_v47 = vadd.f32 %v1123_v55, %v594_v45 }
 0x137   :  { %v717_v49 = vsel %vm685_vm14, %v669_v44, %v701_v46  ;;  %vm686_vm15 = vcmp.ge.f32.partialorder %v670_v47, 0.0  ;;  %v702_v50 = vmul.f32 0.2, %v670_v47 }
 0x138   :  { %733 = vst [vmem:[%s1201_s3 + $0x70] sm:$0xff] %v717_v49 }
 0x139   :  { %v718_v42 = vsel %vm686_vm15, %v670_v47, %v702_v50 }
 0x13a   :  { %734 = vst [vmem:[%s1201_s3 + $0x78] sm:$0xff] %v718_v42 }

// kernel: dis_forward.14
= control target key start
LH: loop header
LB: loop body
LE: loop exit
PB: predicated region body
PF: predicated region fallthrough
CT: control target
= control target key end

     0   :  { %s1117_s12 = smov 0   ;;  %s1119_s13 = smov 0   ;;  %s1243_s0 = inlined_call_operand.vmem [shape: bf16[32,1024], index: 0, kind: input, shape index: {}]   ;;  %s1244_s1 = inlined_call_operand.vmem [shape: bf16[1024,128], index: 1, kind: input, shape index: {}]   ;;  %s1245_s2 = inlined_call_operand.vmem [shape: f32[1,128], index: 2, kind: input, shape index: {}]   ;;  %s1246_s3 = inlined_call_operand.vmem [shape: f32[32,128], index: 3, kind: output, shape index: {}]  }
   0x1   :  { %s1121_s14 = smov 0   ;;  %s1123_s15 = smov 0  }
   0x2   :  { %s1125_s16 = smov 0  }
   0x3 LB: > { %s25_s17 = sadd.s32 1, %s1090_s15  ;;  %p48_p1 = scmp.ne.s32.totalorder %s1082_s13, %s1078_s12  ;;  %s1094_s16 = sphi %s1125_s16, %s13_s16   ;;  %s1090_s15 = sphi %s1123_s15, %s1250_s15   ;;  %s1086_s14 = sphi %s1121_s14, %s1249_s14   ;;  %s1082_s13 = sphi %s1119_s13, %s1248_s13   ;;  %s1078_s12 = sphi %s1117_s12, %s1247_s12  }
   0x4   : > { %p26_p0 = scmp.ge.s32.totalorder %s25_s17, 2  ;;  %p49_p2 = scmp.eq.s32.totalorder %s1094_s16, 0 }
   0x5   : > { %s41_s19 = sadd.s32 1, %s1082_s13  ;;  %p859_p5 = scmp.ge.s32.totalorder %s1094_s16, 2 }
   0x6   : > { %s1252_s17 = smov (%p26_p0, %s25_s17), 0  ;;  %p50_p3 = por %p49_p2, %p48_p1 }
   0x7   : > { %s37_s18 = ssub.s32 %s1090_s15, %s1252_s17  ;;  %162 = sbr.rel (%p859_p5) target bundleno = 22 (0x16), region = 20 }
   0x8   : > { %p39_p4 = scmp.eq.s32.totalorder %s37_s18, 0 }
   0xa   : > { %s1152_s20 = scalar_select %p39_p4, %s1082_s13, %s41_s19  }
   0xe   : > { %165 = sbr.rel (!%p50_p3) target bundleno = 22 (0x16), region = 24  ;;  %s167_s21 = sand.u32 (%p50_p3), 1, %s1082_s13  }
   0xf   : > { %s914_s22 = sshll.u32 (%p50_p3), %s1090_s15, 4  ;;  %s860_s23 = sshll.u32 (%p50_p3), %s167_s21, 6 }
  0x10   : > { %s175_s26 = scalar_lea.vmem (%p50_p3), %s1243_s0, %s914_s22  ;;  %s169_s27 = scalar_lea.vmem (%p50_p3), [#allocation3], %s860_s23 }
  0x11   : > { %v188_v0 = vld [vmem:[%s175_s26] sm:$0xff] (%p50_p3)  ;;  %v190_v1 = vld [vmem:[%s175_s26 + $0x8] sm:$0xff] (%p50_p3) }
  0x12   : > { %v192_v2 = vld [vmem:[%s175_s26 + $0x20] sm:$0xff] (%p50_p3)  ;;  %189 = vst [vmem:[%s169_s27] sm:$0xff] (%p50_p3), %v188_v0  ;;  %191 = vst [vmem:[%s169_s27 + $0x8] sm:$0xff] (%p50_p3), %v190_v1  ;;  %v194_v3 = vld [vmem:[%s175_s26 + $0x28] sm:$0xff] (%p50_p3) }
  0x13   : > { %193 = vst [vmem:[%s169_s27 + $0x10] sm:$0xff] (%p50_p3), %v192_v2  ;;  %v196_v4 = vld [vmem:[%s175_s26 + $0x40] sm:$0xff] (%p50_p3)  ;;  %v198_v5 = vld [vmem:[%s175_s26 + $0x48] sm:$0xff] (%p50_p3)  ;;  %195 = vst [vmem:[%s169_s27 + $0x18] sm:$0xff] (%p50_p3), %v194_v3 }
  0x14   : > { %197 = vst [vmem:[%s169_s27 + $0x20] sm:$0xff] (%p50_p3), %v196_v4  ;;  %199 = vst [vmem:[%s169_s27 + $0x28] sm:$0xff] (%p50_p3), %v198_v5  ;;  %v200_v6 = vld [vmem:[%s175_s26 + $0x60] sm:$0xff] (%p50_p3)  ;;  %v202_v7 = vld [vmem:[%s175_s26 + $0x68] sm:$0xff] (%p50_p3) }
  0x15   : > { %201 = vst [vmem:[%s169_s27 + $0x30] sm:$0xff] %v200_v6  ;;  %203 = vst [vmem:[%s169_s27 + $0x38] sm:$0xff] %v202_v7 }
  0x16 PF: > { %p863_p6 = scmp.ge.s32.totalorder %s1094_s16, 1  ;;  %p220_p7 = scmp.lt.s32.totalorder %s1094_s16, 3 }
  0x18   : > { %p221_p8 = pnand %p863_p6, %p220_p7 }
  0x19   : > { %s227_s28 = sand.u32 (!%p221_p8), 1, %s1078_s12   ;;  %s865_s29 = sshll.u32 (!%p221_p8), %s1086_s14, 6 }
  0x1a   : > { %224 = sbr.rel (%p221_p8) target bundleno = 318 (0x13e), region = 51  ;;  %s864_s30 = sshll.u32 (!%p221_p8), %s227_s28, 6 }
  0x1b   : > { %p267_p9 = scmp.lt.s32.totalorder (!%p221_p8), %s865_s29, 127  ;;  %s1169_s8 = scalar_lea.vmem (!%p221_p8), [#allocation3], %s864_s30 }
  0x1c   : > { %p867_p10 = scmp.ne.s32.totalorder (!%p221_p8), %s1086_s14, 0 }
  0x21   : > { %s1254_s29 = smov (!%p267_p9, %s865_s29), 127  ;;  %291 = sbr.rel (%p867_p10) target bundleno = 40 (0x28), region = 59 }
  0x22   : > { %s866_s4 = sshll.u32 %s1254_s29, 2  ;;  %v1096_v8 = vmov (!%p867_p10), 0.0  }
  0x23   : > { %s1167_s7 = scalar_lea.vmem %s1244_s1, %s866_s4  ;;  %292 = vst [vmem:[#allocation2] sm:$0xff] (!%p867_p10), %v1096_v8  ;;  %293 = vst [vmem:[#allocation2 + $0x8] sm:$0xff] (!%p867_p10), %v1096_v8 }
  0x24   : > { %294 = vst [vmem:[#allocation2 + $0x10] sm:$0xff] (!%p867_p10), %v1096_v8  ;;  %295 = vst [vmem:[#allocation2 + $0x18] sm:$0xff] (!%p867_p10), %v1096_v8 }
  0x28 PF: > { %v1012_v9 = vld [vmem:[%s1167_s7 + $0x40] sm:$0xff]   ;;  %v1016_v13 = vld [vmem:[%s1167_s7 + $0x48] sm:$0xff]   ;;  %v1020_v17 = vld [vmem:[%s1167_s7 + $0x50] sm:$0xff]   ;;  %p908_p11 = scmp.ne.s32.totalorder %s1086_s14, 1 }
  0x29   : > { %v1013_v10 = vld [vmem:[%s1167_s7 + $0xc0] sm:$0xff]   ;;  %915 = vmatprep.subr.bf16.mxu0 %v1012_v9  ;;  %v1017_v14 = vld [vmem:[%s1167_s7 + $0xc8] sm:$0xff]   ;;  %v1021_v18 = vld [vmem:[%s1167_s7 + $0xd0] sm:$0xff]  }
  0x2a   : > { %v1014_v11 = vld [vmem:[%s1167_s7] sm:$0xff]   ;;  %943 = vmatprep.subr.bf16.mxu1 %v1013_v10  ;;  %v1018_v15 = vld [vmem:[%s1167_s7 + $0x8] sm:$0xff]   ;;  %v1022_v19 = vld [vmem:[%s1167_s7 + $0x10] sm:$0xff]  }
  0x2b   : > { %v1015_v12 = vld [vmem:[%s1167_s7 + $0x80] sm:$0xff]   ;;  %916 = vmatpush3.bf16.msra.mxu0 %v1014_v11  ;;  %v1019_v16 = vld [vmem:[%s1167_s7 + $0x88] sm:$0xff]   ;;  %v1023_v20 = vld [vmem:[%s1167_s7 + $0x90] sm:$0xff]  }
  0x2c   : > { %944 = vmatpush3.bf16.msra.mxu1 %v1015_v12  ;;  %917 = vmatprep.subr.bf16.mxu0 %v1016_v13  ;;  %v1024_v21 = vld [vmem:[%s1167_s7 + $0x58] sm:$0xff]   ;;  %v1028_v25 = vld [vmem:[%s1167_s7 + $0x60] sm:$0xff]   ;;  %v1032_v29 = vld [vmem:[%s1167_s7 + $0x68] sm:$0xff]  }
  0x2d   : > { %945 = vmatprep.subr.bf16.mxu1 %v1017_v14  ;;  %v1025_v22 = vld [vmem:[%s1167_s7 + $0xd8] sm:$0xff]   ;;  %v1029_v26 = vld [vmem:[%s1167_s7 + $0xe0] sm:$0xff]   ;;  %v1033_v30 = vld [vmem:[%s1167_s7 + $0xe8] sm:$0xff]  }
  0x2e   : > { %v1026_v23 = vld [vmem:[%s1167_s7 + $0x18] sm:$0xff]   ;;  %v1030_v27 = vld [vmem:[%s1167_s7 + $0x20] sm:$0xff]   ;;  %v1034_v31 = vld [vmem:[%s1167_s7 + $0x28] sm:$0xff]  }
  0x2f   : > { %918 = vmatpush3.bf16.msra.mxu0 %v1018_v15  ;;  %v1027_v24 = vld [vmem:[%s1167_s7 + $0x98] sm:$0xff]   ;;  %v1031_v28 = vld [vmem:[%s1167_s7 + $0xa0] sm:$0xff]   ;;  %v1035_v32 = vld [vmem:[%s1167_s7 + $0xa8] sm:$0xff]  }
  0x30   : > { %946 = vmatpush3.bf16.msra.mxu1 %v1019_v16  ;;  %919 = vmatprep.subr.bf16.mxu0 %v1020_v17  ;;  %v1036_v33 = vld [vmem:[%s1167_s7 + $0x70] sm:$0xff]   ;;  %v1040_v37 = vld [vmem:[%s1167_s7 + $0x78] sm:$0xff]   ;;  %v296_v58 = vld [vmem:[#allocation2] sm:$0xff] }
  0x31   : > { %947 = vmatprep.subr.bf16.mxu1 %v1021_v18  ;;  %v1037_v34 = vld [vmem:[%s1167_s7 + $0xf0] sm:$0xff]   ;;  %v1041_v38 = vld [vmem:[%s1167_s7 + $0xf8] sm:$0xff]   ;;  %v297_v63 = vld [vmem:[#allocation2 + $0x8] sm:$0xff] }
  0x32   : > { %v1038_v35 = vld [vmem:[%s1167_s7 + $0x30] sm:$0xff]   ;;  %v1042_v39 = vld [vmem:[%s1167_s7 + $0x38] sm:$0xff]  }
  0x33   : > { %920 = vmatpush3.bf16.msra.mxu0 %v1022_v19  ;;  %v1039_v36 = vld [vmem:[%s1167_s7 + $0xb0] sm:$0xff]   ;;  %v1043_v40 = vld [vmem:[%s1167_s7 + $0xb8] sm:$0xff]  }
  0x34   : > { %948 = vmatpush3.bf16.msra.mxu1 %v1023_v20  ;;  %921 = vmatprep.subr.bf16.mxu0 %v1024_v21  ;;  %v1044_v41 = vld [vmem:[%s1169_s8] ss:$16 sps:$4 sm:$0xff]   ;;  %v1046_v42 = vld [vmem:[%s1169_s8 + $0x4] ss:$16 sps:$4 sm:$0xff]   ;;  %v1047_v43 = vld [vmem:[%s1169_s8 + $0x8] ss:$16 sps:$4 sm:$0xff]  }
  0x35   : > { %949 = vmatprep.subr.bf16.mxu1 %v1025_v22  ;;  %v1049_v44 = vld [vmem:[%s1169_s8 + $0xc] ss:$16 sps:$4 sm:$0xff]   ;;  %636 = vmatprep.mubr.bf16.mxu0 %v1046_v42  ;;  %v1050_v45 = vld [vmem:[%s1169_s8 + $0x24] ss:$16 sps:$4 sm:$0xff]   ;;  %v1054_v47 = vld [vmem:[%s1169_s8 + $0x20] ss:$16 sps:$4 sm:$0xff]  }
  0x36   : > { %685 = vmatprep.mubr.bf16.mxu1 %v1049_v44  ;;  %v1052_v46 = vld [vmem:[%s1169_s8 + $0x2c] ss:$16 sps:$4 sm:$0xff]   ;;  %v1055_v48 = vld [vmem:[%s1169_s8 + $0x28] ss:$16 sps:$4 sm:$0xff]   ;;  %v298_v12 = vld [vmem:[#allocation2 + $0x10] sm:$0xff] }
  0x37   : > { %922 = vmatpush3.bf16.msra.mxu0 %v1026_v23  ;;  %v299_v17 = vld [vmem:[#allocation2 + $0x18] sm:$0xff]  ;;  %v909_v22 = vld [vmem:[%s1245_s2] ss:$0 sm:$0xff] (!%p908_p11) }
  0x38   : > { %950 = vmatpush3.bf16.msra.mxu1 %v1027_v24  ;;  %923 = vmatprep.subr.bf16.mxu0 %v1028_v25 }
  0x39   : > { %951 = vmatprep.subr.bf16.mxu1 %v1029_v26 }
  0x3b   : > { %924 = vmatpush3.bf16.msra.mxu0 %v1030_v27 }
  0x3c   : > { %952 = vmatpush3.bf16.msra.mxu1 %v1031_v28  ;;  %925 = vmatprep.subr.bf16.mxu0 %v1032_v29 }
  0x3d   : > { %953 = vmatprep.subr.bf16.mxu1 %v1033_v30 }
  0x3f   : > { %926 = vmatpush3.bf16.msra.mxu0 %v1034_v31 }
  0x40   : > { %954 = vmatpush3.bf16.msra.mxu1 %v1035_v32  ;;  %927 = vmatprep.subr.bf16.mxu0 %v1036_v33 }
  0x41   : > { %955 = vmatprep.subr.bf16.mxu1 %v1037_v34 }
  0x43   : > { %928 = vmatpush3.bf16.msra.mxu0 %v1038_v35 }
  0x44   : > { %956 = vmatpush3.bf16.msra.mxu1 %v1039_v36  ;;  %929 = vmatprep.subr.bf16.mxu0 %v1040_v37 }
  0x45   : > { %957 = vmatprep.subr.bf16.mxu1 %v1041_v38 }
  0x47   : > { %930 = vmatpush3.bf16.msra.mxu0 %v1042_v39 }
  0x48   : > { %958 = vmatpush3.bf16.msra.mxu1 %v1043_v40 }
  0x4a   : > { %637 = vmatmul.mubr.bf16.vlgmr.msra.gmra.mrb[0].mxu0 %v1044_v41 }
  0x4b   : > { %686 = vmatmul.mubr.bf16.vlgmr.msra.gmra.mrb[0].mxu1 %v1047_v43  ;;  %644 = vmatprep.mubr.bf16.mxu0 %v1050_v45 }
  0x4c   : > { %693 = vmatprep.mubr.bf16.mxu1 %v1052_v46 }
  0x52   : > { %645 = vmatmul.mubr.bf16.gmra.mrb[4].mxu0 %v1054_v47 }
  0x53   : > { %694 = vmatmul.mubr.bf16.gmra.mrb[4].mxu1 %v1055_v48 }
 0x11d   : > { %v931_v49 = vpop.f32.mrb[0].mxu0 }
 0x11e   : > { %v959_v50 = vpop.f32.mrb[0].mxu1  ;;  %v932_v51 = vpop.f32.mrb[1].mxu0 }
 0x11f   : > { %v933_v52 = vadd.f32 %v932_v51, %v931_v49  ;;  %v960_v53 = vpop.f32.mrb[1].mxu1  ;;  %v934_v54 = vpop.f32.mrb[2].mxu0 }
 0x120   : > { %v961_v55 = vadd.f32 %v960_v53, %v959_v50  ;;  %v962_v56 = vpop.f32.mrb[2].mxu1  ;;  %v935_v57 = vpop.f32.mrb[3].mxu0 }
 0x121   : > { %v936_v59 = vadd.f32 %v935_v57, %v934_v54  ;;  %v963_v60 = vpop.f32.mrb[3].mxu1 }
 0x122   : > { %v688_v61 = vadd.f32 %v961_v55, %v933_v52  ;;  %v964_v62 = vadd.f32 %v963_v60, %v962_v56 }
 0x124   : > { %v702_v0 = vadd.f32 %v688_v61, %v296_v58  ;;  %v691_v1 = vadd.f32 %v964_v62, %v936_v59 }
 0x125   : > { %v937_v2 = vpop.f32.mrb[4].mxu0 }
 0x126   : > { %706 = vst [vmem:[#allocation2] sm:$0xff] %v702_v0  ;;  %v703_v3 = vadd.f32 %v691_v1, %v297_v63  ;;  %v965_v4 = vpop.f32.mrb[4].mxu1  ;;  %v938_v5 = vpop.f32.mrb[5].mxu0 }
 0x127   : > { %v939_v6 = vadd.f32 %v938_v5, %v937_v2  ;;  %v966_v7 = vpop.f32.mrb[5].mxu1  ;;  %v940_v8 = vpop.f32.mrb[6].mxu0 }
 0x128   : > { %707 = vst [vmem:[#allocation2 + $0x8] sm:$0xff] %v703_v3  ;;  %v967_v9 = vadd.f32 %v966_v7, %v965_v4  ;;  %v968_v10 = vpop.f32.mrb[6].mxu1  ;;  %v941_v11 = vpop.f32.mrb[7].mxu0 }
 0x129   : > { %v942_v13 = vadd.f32 %v941_v11, %v940_v8  ;;  %v969_v14 = vpop.f32.mrb[7].mxu1 }
 0x12a   : > { %v696_v15 = vadd.f32 %v967_v9, %v939_v6  ;;  %v970_v16 = vadd.f32 %v969_v14, %v968_v10  ;;  %713 = sbr.rel (%p908_p11) target bundleno = 318 (0x13e), region = 63 }
 0x12c   : > { %v704_v18 = vadd.f32 %v696_v15, %v298_v12  ;;  %v699_v19 = vadd.f32 %v970_v16, %v942_v13 }
 0x12d   : > { %v714_v21 = vld [vmem:[#allocation2] sm:$0xff] (!%p908_p11) }
 0x12e   : > { %708 = vst [vmem:[#allocation2 + $0x10] sm:$0xff] %v704_v18  ;;  %v705_v20 = vadd.f32 %v699_v19, %v299_v17  ;;  %v725_v24 = vadd.f32 (!%p908_p11), %v909_v22, %v714_v21 }
 0x12f   : > { %v715_v23 = vld [vmem:[#allocation2 + $0x8] sm:$0xff] (!%p908_p11) }
 0x130   : > { %709 = vst [vmem:[#allocation2 + $0x18] sm:$0xff] %v705_v20  ;;  %v726_v25 = vadd.f32 (!%p908_p11), %v909_v22, %v715_v23  ;;  %vm729_vm0 = vcmp.ge.f32.partialorder (!%p908_p11), %v725_v24, 0.0  ;;  %v733_v30 = vmul.f32 (!%p908_p11), 0.2, %v725_v24 }
 0x132   : > { %vm730_vm1 = vcmp.ge.f32.partialorder %v726_v25, 0.0  ;;  %v734_v31 = vmul.f32 0.2, %v726_v25  ;;  %v737_v34 = vsel %vm729_vm0, %v725_v24, %v733_v30 }
 0x133   : > { %741 = vst [vmem:[%s1246_s3] sm:$0xff] %v737_v34 }
 0x134   : > { %v738_v35 = vsel %vm730_vm1, %v726_v25, %v734_v31 }
 0x135   : > { %v716_v26 = vld [vmem:[#allocation2 + $0x10] sm:$0xff]  ;;  %742 = vst [vmem:[%s1246_s3 + $0x8] sm:$0xff] %v738_v35 }
 0x136   : > { %v727_v28 = vadd.f32 %v909_v22, %v716_v26 }
 0x137   : > { %v717_v27 = vld [vmem:[#allocation2 + $0x18] sm:$0xff] }
 0x138   : > { %v728_v29 = vadd.f32 %v909_v22, %v717_v27  ;;  %vm731_vm2 = vcmp.ge.f32.partialorder %v727_v28, 0.0  ;;  %v735_v32 = vmul.f32 0.2, %v727_v28 }
 0x13a   : > { %vm732_vm3 = vcmp.ge.f32.partialorder %v728_v29, 0.0  ;;  %v736_v33 = vmul.f32 0.2, %v728_v29  ;;  %v739_v36 = vsel %vm731_vm2, %v727_v28, %v735_v32 }
 0x13b   : > { %743 = vst [vmem:[%s1246_s3 + $0x10] sm:$0xff] %v739_v36 }
 0x13c   : > { %v740_v37 = vsel %vm732_vm3, %v728_v29, %v736_v33 }
 0x13d   : > { %744 = vst [vmem:[%s1246_s3 + $0x18] sm:$0xff] %v740_v37 }
 0x13e PF: > { %s13_s16 = sadd.s32 1, %s1094_s16   ;;  %s1247_s12 = smov %s1082_s13 }
 0x13f   : > { %p10_p12 = scmp.ge.s32.totalorder %s13_s16, 4   ;;  %s1248_s13 = smov %s1152_s20 }
 0x140   : > { %s1249_s14 = smov %s1090_s15  ;;  %s1250_s15 = smov %s1252_s17 }
 0x141   :  { %12 = sbr.rel (!%p10_p12) target bundleno = 3 (0x3), region = 104 }

// kernel: dis_forward.15
= control target key start
LH: loop header
LB: loop body
LE: loop exit
PB: predicated region body
PF: predicated region fallthrough
CT: control target
= control target key end

     0   :  { %s1312_s12 = smov 0   ;;  %s1314_s13 = smov 0   ;;  %s1592_s0 = inlined_call_operand.vmem [shape: bf16[8,1536], index: 0, kind: input, shape index: {}]   ;;  %s1593_s1 = inlined_call_operand.vmem [shape: bf16[1536,256], index: 1, kind: input, shape index: {}]   ;;  %s1594_s2 = inlined_call_operand.vmem [shape: f32[1,256], index: 2, kind: input, shape index: {}]   ;;  %s1595_s3 = inlined_call_operand.vmem [shape: f32[8,256], index: 3, kind: output, shape index: {}]  }
   0x1   :  { %s1316_s14 = smov 0   ;;  %s1318_s15 = smov 0  }
   0x2   :  { %s1320_s16 = smov 0   ;;  %s1322_s17 = smov 0  }
   0x3   :  { %s1324_s18 = smov 0  }
   0x4 LB: > { %s25_s19 = sadd.s32 1, %s1281_s16  ;;  %s28_s20 = sadd.s32 1, %s1285_s17  ;;  %s1289_s18 = sphi %s1324_s18, %s13_s18   ;;  %s1285_s17 = sphi %s1322_s17, %s1601_s17   ;;  %s1281_s16 = sphi %s1320_s16, %s1600_s16   ;;  %s1277_s15 = sphi %s1318_s15, %s1599_s15   ;;  %s1273_s14 = sphi %s1316_s14, %s1598_s14   ;;  %s1269_s13 = sphi %s1314_s13, %s1597_s13   ;;  %s1265_s12 = sphi %s1312_s12, %s1596_s12  }
   0x5   : > { %p26_p0 = scmp.ge.s32.totalorder %s25_s19, 3  ;;  %p76_p1 = scmp.ne.s32.totalorder %s1269_s13, %s1265_s12 }
   0x6   : > { %p77_p2 = scmp.eq.s32.totalorder %s1289_s18, 0  ;;  %s69_s24 = sadd.s32 1, %s1269_s13 }
   0x7   : > { %s1603_s19 = smov (%p26_p0, %s25_s19), 0  ;;  %s1605_s20 = smov (!%p26_p0, %s28_s20), %s1285_s17 }
   0x8   : > { %p78_p3 = por %p77_p2, %p76_p1  ;;  %p30_p4 = scmp.ge.s32.totalorder %s1605_s20, 2 }
   0x9   : > { %s64_s21 = ssub.s32 %s1281_s16, %s1603_s19  ;;  %p1046_p6 = scmp.ge.s32.totalorder %s1289_s18, 6 }
   0xa   : > { %s1607_s20 = smov (%p30_p4, %s1605_s20), 0 }
   0xb   : > { %s65_s22 = ssub.s32 %s1285_s17, %s1607_s20  ;;  %156 = sbr.rel (%p1046_p6) target bundleno = 66 (0x42), region = 16 }
   0xc   : > { %s66_s23 = sor.u32 %s65_s22, %s64_s21 }
   0xd   : > { %p67_p5 = scmp.eq.s32.totalorder %s66_s23, 0 }
   0xf   : > { %s1363_s25 = scalar_select %p67_p5, %s1269_s13, %s69_s24  }
  0x12   : > { %172 = sbr.rel (!%p78_p3) target bundleno = 66 (0x42), region = 24  ;;  %s174_s26 = sand.u32 (%p78_p3), 1, %s1269_s13  }
  0x13   : > { %s1097_s27 = sshll.u32 (%p78_p3), %s1281_s16, 7  ;;  %s1047_s28 = sshll.u32 (%p78_p3), %s174_s26, 8 }
  0x14   : > { %s179_s29 = sadd.s32 (%p78_p3), %s1285_s17, %s1097_s27  ;;  %s1377_s7 = scalar_lea.vmem (%p78_p3), [#allocation3], %s1047_s28 }
  0x15   : > { %s1050_s30 = sshll.u32 (%p78_p3), %s179_s29, 2 }
  0x16   : > { %s1372_s6 = scalar_lea.vmem (%p78_p3), %s1593_s1, %s1050_s30 }
  0x17   : > { %v197_v0 = vld [vmem:[%s1372_s6] sm:$0xf] (%p78_p3)  ;;  %v199_v1 = vld [vmem:[%s1372_s6 + $0x8] sm:$0xf] (%p78_p3)  ;;  %v201_v2 = vld [vmem:[%s1372_s6 + $0x10] sm:$0xf] (%p78_p3) }
  0x18   : > { %198 = vst [vmem:[%s1377_s7] sm:$0xf] (%p78_p3), %v197_v0  ;;  %200 = vst [vmem:[%s1377_s7 + $0x4] sm:$0xf] (%p78_p3), %v199_v1  ;;  %v203_v3 = vld [vmem:[%s1372_s6 + $0x18] sm:$0xf] (%p78_p3) }
  0x19   : > { %202 = vst [vmem:[%s1377_s7 + $0x8] sm:$0xf] %v201_v2  ;;  %v205_v4 = vld [vmem:[%s1372_s6 + $0x20] sm:$0xf]  ;;  %v207_v5 = vld [vmem:[%s1372_s6 + $0x28] sm:$0xf] }
  0x1a   : > { %204 = vst [vmem:[%s1377_s7 + $0xc] sm:$0xf] %v203_v3  ;;  %206 = vst [vmem:[%s1377_s7 + $0x10] sm:$0xf] %v205_v4  ;;  %v209_v6 = vld [vmem:[%s1372_s6 + $0x30] sm:$0xf] }
  0x1b   : > { %208 = vst [vmem:[%s1377_s7 + $0x14] sm:$0xf] %v207_v5  ;;  %v211_v7 = vld [vmem:[%s1372_s6 + $0x38] sm:$0xf]  ;;  %v213_v8 = vld [vmem:[%s1372_s6 + $0x40] sm:$0xf] }
  0x1c   : > { %210 = vst [vmem:[%s1377_s7 + $0x18] sm:$0xf] %v209_v6  ;;  %212 = vst [vmem:[%s1377_s7 + $0x1c] sm:$0xf] %v211_v7  ;;  %v215_v9 = vld [vmem:[%s1372_s6 + $0x48] sm:$0xf] }
  0x1d   : > { %214 = vst [vmem:[%s1377_s7 + $0x20] sm:$0xf] %v213_v8  ;;  %v217_v10 = vld [vmem:[%s1372_s6 + $0x50] sm:$0xf]  ;;  %v219_v11 = vld [vmem:[%s1372_s6 + $0x58] sm:$0xf] }
  0x1e   : > { %216 = vst [vmem:[%s1377_s7 + $0x24] sm:$0xf] %v215_v9  ;;  %218 = vst [vmem:[%s1377_s7 + $0x28] sm:$0xf] %v217_v10  ;;  %v221_v12 = vld [vmem:[%s1372_s6 + $0x60] sm:$0xf] }
  0x1f   : > { %220 = vst [vmem:[%s1377_s7 + $0x2c] sm:$0xf] %v219_v11  ;;  %v223_v13 = vld [vmem:[%s1372_s6 + $0x68] sm:$0xf]  ;;  %v225_v14 = vld [vmem:[%s1372_s6 + $0x70] sm:$0xf] }
  0x20   : > { %222 = vst [vmem:[%s1377_s7 + $0x30] sm:$0xf] %v221_v12  ;;  %224 = vst [vmem:[%s1377_s7 + $0x34] sm:$0xf] %v223_v13  ;;  %v227_v15 = vld [vmem:[%s1372_s6 + $0x78] sm:$0xf] }
  0x21   : > { %226 = vst [vmem:[%s1377_s7 + $0x38] sm:$0xf] %v225_v14  ;;  %v229_v16 = vld [vmem:[%s1372_s6 + $0x80] sm:$0xf]  ;;  %v231_v17 = vld [vmem:[%s1372_s6 + $0x88] sm:$0xf] }
  0x22   : > { %228 = vst [vmem:[%s1377_s7 + $0x3c] sm:$0xf] %v227_v15  ;;  %230 = vst [vmem:[%s1377_s7 + $0x40] sm:$0xf] %v229_v16  ;;  %v233_v18 = vld [vmem:[%s1372_s6 + $0x90] sm:$0xf] }
  0x23   : > { %232 = vst [vmem:[%s1377_s7 + $0x44] sm:$0xf] %v231_v17  ;;  %v235_v19 = vld [vmem:[%s1372_s6 + $0x98] sm:$0xf]  ;;  %v237_v20 = vld [vmem:[%s1372_s6 + $0xa0] sm:$0xf] }
  0x24   : > { %234 = vst [vmem:[%s1377_s7 + $0x48] sm:$0xf] %v233_v18  ;;  %236 = vst [vmem:[%s1377_s7 + $0x4c] sm:$0xf] %v235_v19  ;;  %v239_v21 = vld [vmem:[%s1372_s6 + $0xa8] sm:$0xf] }
  0x25   : > { %238 = vst [vmem:[%s1377_s7 + $0x50] sm:$0xf] %v237_v20  ;;  %v241_v22 = vld [vmem:[%s1372_s6 + $0xb0] sm:$0xf]  ;;  %v243_v23 = vld [vmem:[%s1372_s6 + $0xb8] sm:$0xf] }
  0x26   : > { %240 = vst [vmem:[%s1377_s7 + $0x54] sm:$0xf] %v239_v21  ;;  %242 = vst [vmem:[%s1377_s7 + $0x58] sm:$0xf] %v241_v22  ;;  %v245_v24 = vld [vmem:[%s1372_s6 + $0xc0] sm:$0xf] }
  0x27   : > { %244 = vst [vmem:[%s1377_s7 + $0x5c] sm:$0xf] %v243_v23  ;;  %v247_v25 = vld [vmem:[%s1372_s6 + $0xc8] sm:$0xf]  ;;  %v249_v26 = vld [vmem:[%s1372_s6 + $0xd0] sm:$0xf] }
  0x28   : > { %246 = vst [vmem:[%s1377_s7 + $0x60] sm:$0xf] %v245_v24  ;;  %248 = vst [vmem:[%s1377_s7 + $0x64] sm:$0xf] %v247_v25  ;;  %v251_v27 = vld [vmem:[%s1372_s6 + $0xd8] sm:$0xf] }
  0x29   : > { %250 = vst [vmem:[%s1377_s7 + $0x68] sm:$0xf] %v249_v26  ;;  %v253_v28 = vld [vmem:[%s1372_s6 + $0xe0] sm:$0xf]  ;;  %v255_v29 = vld [vmem:[%s1372_s6 + $0xe8] sm:$0xf] }
  0x2a   : > { %252 = vst [vmem:[%s1377_s7 + $0x6c] sm:$0xf] %v251_v27  ;;  %254 = vst [vmem:[%s1377_s7 + $0x70] sm:$0xf] %v253_v28  ;;  %v257_v30 = vld [vmem:[%s1372_s6 + $0xf0] sm:$0xf] }
  0x2b   : > { %256 = vst [vmem:[%s1377_s7 + $0x74] sm:$0xf] %v255_v29  ;;  %v259_v31 = vld [vmem:[%s1372_s6 + $0xf8] sm:$0xf]  ;;  %v261_v32 = vld [vmem:[%s1372_s6 + $0x100] sm:$0xf] }
  0x2c   : > { %258 = vst [vmem:[%s1377_s7 + $0x78] sm:$0xf] %v257_v30  ;;  %260 = vst [vmem:[%s1377_s7 + $0x7c] sm:$0xf] %v259_v31  ;;  %v263_v33 = vld [vmem:[%s1372_s6 + $0x108] sm:$0xf] }
  0x2d   : > { %262 = vst [vmem:[%s1377_s7 + $0x80] sm:$0xf] %v261_v32  ;;  %v265_v34 = vld [vmem:[%s1372_s6 + $0x110] sm:$0xf]  ;;  %v267_v35 = vld [vmem:[%s1372_s6 + $0x118] sm:$0xf] }
  0x2e   : > { %264 = vst [vmem:[%s1377_s7 + $0x84] sm:$0xf] %v263_v33  ;;  %266 = vst [vmem:[%s1377_s7 + $0x88] sm:$0xf] %v265_v34  ;;  %v269_v36 = vld [vmem:[%s1372_s6 + $0x120] sm:$0xf] }
  0x2f   : > { %268 = vst [vmem:[%s1377_s7 + $0x8c] sm:$0xf] %v267_v35  ;;  %v271_v37 = vld [vmem:[%s1372_s6 + $0x128] sm:$0xf]  ;;  %v273_v38 = vld [vmem:[%s1372_s6 + $0x130] sm:$0xf] }
  0x30   : > { %270 = vst [vmem:[%s1377_s7 + $0x90] sm:$0xf] %v269_v36  ;;  %272 = vst [vmem:[%s1377_s7 + $0x94] sm:$0xf] %v271_v37  ;;  %v275_v39 = vld [vmem:[%s1372_s6 + $0x138] sm:$0xf] }
  0x31   : > { %274 = vst [vmem:[%s1377_s7 + $0x98] sm:$0xf] %v273_v38  ;;  %v277_v40 = vld [vmem:[%s1372_s6 + $0x140] sm:$0xf]  ;;  %v279_v41 = vld [vmem:[%s1372_s6 + $0x148] sm:$0xf] }
  0x32   : > { %276 = vst [vmem:[%s1377_s7 + $0x9c] sm:$0xf] %v275_v39  ;;  %278 = vst [vmem:[%s1377_s7 + $0xa0] sm:$0xf] %v277_v40  ;;  %v281_v42 = vld [vmem:[%s1372_s6 + $0x150] sm:$0xf] }
  0x33   : > { %280 = vst [vmem:[%s1377_s7 + $0xa4] sm:$0xf] %v279_v41  ;;  %v283_v43 = vld [vmem:[%s1372_s6 + $0x158] sm:$0xf]  ;;  %v285_v44 = vld [vmem:[%s1372_s6 + $0x160] sm:$0xf] }
  0x34   : > { %282 = vst [vmem:[%s1377_s7 + $0xa8] sm:$0xf] %v281_v42  ;;  %284 = vst [vmem:[%s1377_s7 + $0xac] sm:$0xf] %v283_v43  ;;  %v287_v45 = vld [vmem:[%s1372_s6 + $0x168] sm:$0xf] }
  0x35   : > { %286 = vst [vmem:[%s1377_s7 + $0xb0] sm:$0xf] %v285_v44  ;;  %v289_v46 = vld [vmem:[%s1372_s6 + $0x170] sm:$0xf]  ;;  %v291_v47 = vld [vmem:[%s1372_s6 + $0x178] sm:$0xf] }
  0x36   : > { %288 = vst [vmem:[%s1377_s7 + $0xb4] sm:$0xf] %v287_v45  ;;  %290 = vst [vmem:[%s1377_s7 + $0xb8] sm:$0xf] %v289_v46  ;;  %v293_v48 = vld [vmem:[%s1372_s6 + $0x180] sm:$0xf] }
  0x37   : > { %292 = vst [vmem:[%s1377_s7 + $0xbc] sm:$0xf] %v291_v47  ;;  %v295_v49 = vld [vmem:[%s1372_s6 + $0x188] sm:$0xf]  ;;  %v297_v50 = vld [vmem:[%s1372_s6 + $0x190] sm:$0xf] }
  0x38   : > { %294 = vst [vmem:[%s1377_s7 + $0xc0] sm:$0xf] %v293_v48  ;;  %296 = vst [vmem:[%s1377_s7 + $0xc4] sm:$0xf] %v295_v49  ;;  %v299_v51 = vld [vmem:[%s1372_s6 + $0x198] sm:$0xf] }
  0x39   : > { %298 = vst [vmem:[%s1377_s7 + $0xc8] sm:$0xf] %v297_v50  ;;  %v301_v52 = vld [vmem:[%s1372_s6 + $0x1a0] sm:$0xf]  ;;  %v303_v53 = vld [vmem:[%s1372_s6 + $0x1a8] sm:$0xf] }
  0x3a   : > { %300 = vst [vmem:[%s1377_s7 + $0xcc] sm:$0xf] %v299_v51  ;;  %302 = vst [vmem:[%s1377_s7 + $0xd0] sm:$0xf] %v301_v52  ;;  %v305_v54 = vld [vmem:[%s1372_s6 + $0x1b0] sm:$0xf] }
  0x3b   : > { %304 = vst [vmem:[%s1377_s7 + $0xd4] sm:$0xf] %v303_v53  ;;  %v307_v55 = vld [vmem:[%s1372_s6 + $0x1b8] sm:$0xf]  ;;  %v309_v56 = vld [vmem:[%s1372_s6 + $0x1c0] sm:$0xf] }
  0x3c   : > { %306 = vst [vmem:[%s1377_s7 + $0xd8] sm:$0xf] %v305_v54  ;;  %308 = vst [vmem:[%s1377_s7 + $0xdc] sm:$0xf] %v307_v55  ;;  %v311_v57 = vld [vmem:[%s1372_s6 + $0x1c8] sm:$0xf] }
  0x3d   : > { %310 = vst [vmem:[%s1377_s7 + $0xe0] sm:$0xf] %v309_v56  ;;  %v313_v58 = vld [vmem:[%s1372_s6 + $0x1d0] sm:$0xf]  ;;  %v315_v59 = vld [vmem:[%s1372_s6 + $0x1d8] sm:$0xf] }
  0x3e   : > { %312 = vst [vmem:[%s1377_s7 + $0xe4] sm:$0xf] %v311_v57  ;;  %314 = vst [vmem:[%s1377_s7 + $0xe8] sm:$0xf] %v313_v58  ;;  %v317_v60 = vld [vmem:[%s1372_s6 + $0x1e0] sm:$0xf] }
  0x3f   : > { %316 = vst [vmem:[%s1377_s7 + $0xec] sm:$0xf] %v315_v59  ;;  %v319_v61 = vld [vmem:[%s1372_s6 + $0x1e8] sm:$0xf]  ;;  %v321_v62 = vld [vmem:[%s1372_s6 + $0x1f0] sm:$0xf] }
  0x40   : > { %318 = vst [vmem:[%s1377_s7 + $0xf0] sm:$0xf] %v317_v60  ;;  %320 = vst [vmem:[%s1377_s7 + $0xf4] sm:$0xf] %v319_v61  ;;  %v323_v63 = vld [vmem:[%s1372_s6 + $0x1f8] sm:$0xf] }
  0x41   : > { %322 = vst [vmem:[%s1377_s7 + $0xf8] sm:$0xf] %v321_v62  ;;  %324 = vst [vmem:[%s1377_s7 + $0xfc] sm:$0xf] %v323_v63 }
  0x42 PF: > { %p1051_p7 = scmp.ge.s32.totalorder %s1289_s18, 1  ;;  %p480_p8 = scmp.lt.s32.totalorder %s1289_s18, 7 }
  0x44   : > { %p481_p9 = pnand %p1051_p7, %p480_p8 }
  0x45   : > { %s487_s8 = sand.u32 (!%p481_p9), 1, %s1265_s12   ;;  %s1053_s9 = sshll.u32 (!%p481_p9), %s1273_s14, 2 }
  0x46   : > { %484 = sbr.rel (%p481_p9) target bundleno = 355 (0x163), region = 69  ;;  %s1052_s10 = sshll.u32 (!%p481_p9), %s487_s8, 8 }
  0x47   : > { %p528_p10 = scmp.lt.s32.totalorder (!%p481_p9), %s1053_s9, 11  ;;  %p536_p11 = scmp.lt.s32.totalorder (!%p481_p9), %s1277_s15, 1 }
  0x48   : > { %s1527_s4 = scalar_lea.vmem (!%p481_p9), [#allocation3], %s1052_s10  ;;  %p1056_p12 = scmp.ne.s32.totalorder (!%p481_p9), %s1273_s14, 0 }
  0x4d   : > { %s1609_s9 = smov (!%p528_p10, %s1053_s9), 11  ;;  %s1611_s15 = smov (!%p536_p11, %s1277_s15), 1 }
  0x4e   : > { %s1054_s11 = sshll.u32 %s1609_s9, 2  ;;  %s538_s27 = scalar_lea.vmem %s1594_s2, %s1611_s15  ;;  %v1291_v0 = vmov (!%p1056_p12), 0.0  }
  0x4f   : > { %s1515_s23 = scalar_lea.vmem %s1592_s0, %s1054_s11  ;;  %s1055_s12 = sshll.u32 %s1611_s15, 3  ;;  %552 = vst [vmem:[#allocation2] sm:$0xff] (!%p1056_p12), %v1291_v0 }
  0x50   : > { %s1525_s30 = scalar_lea.vmem %s1595_s3, %s1055_s12  ;;  %551 = sbr.rel (%p1056_p12) target bundleno = 87 (0x57), region = 77 }
  0x57 PF: > { %v1199_v1 = vld [vmem:[%s1527_s4 + $0x40] sm:$0xff]   ;;  %v1203_v5 = vld [vmem:[%s1527_s4 + $0x48] sm:$0xff]   ;;  %v1207_v9 = vld [vmem:[%s1527_s4 + $0x50] sm:$0xff]   ;;  %p1093_p13 = scmp.ne.s32.totalorder %s1273_s14, 2 }
  0x58   : > { %v1200_v2 = vld [vmem:[%s1527_s4 + $0xc0] sm:$0xff]   ;;  %1098 = vmatprep.subr.bf16.mxu0 %v1199_v1  ;;  %v1204_v6 = vld [vmem:[%s1527_s4 + $0xc8] sm:$0xff]   ;;  %v1208_v10 = vld [vmem:[%s1527_s4 + $0xd0] sm:$0xff]  }
  0x59   : > { %v1201_v3 = vld [vmem:[%s1527_s4] sm:$0xff]   ;;  %1120 = vmatprep.subr.bf16.mxu1 %v1200_v2  ;;  %v1205_v7 = vld [vmem:[%s1527_s4 + $0x8] sm:$0xff]   ;;  %v1209_v11 = vld [vmem:[%s1527_s4 + $0x10] sm:$0xff]  }
  0x5a   : > { %v1202_v4 = vld [vmem:[%s1527_s4 + $0x80] sm:$0xff]   ;;  %1099 = vmatpush3.bf16.msra.mxu0 %v1201_v3  ;;  %v1206_v8 = vld [vmem:[%s1527_s4 + $0x88] sm:$0xff]   ;;  %v1210_v12 = vld [vmem:[%s1527_s4 + $0x90] sm:$0xff]  }
  0x5b   : > { %1121 = vmatpush3.bf16.msra.mxu1 %v1202_v4  ;;  %1100 = vmatprep.subr.bf16.mxu0 %v1203_v5  ;;  %v1211_v13 = vld [vmem:[%s1527_s4 + $0x58] sm:$0xff]   ;;  %v1215_v17 = vld [vmem:[%s1527_s4 + $0x60] sm:$0xff]   ;;  %v1219_v21 = vld [vmem:[%s1527_s4 + $0x68] sm:$0xff]  }
  0x5c   : > { %1122 = vmatprep.subr.bf16.mxu1 %v1204_v6  ;;  %v1212_v14 = vld [vmem:[%s1527_s4 + $0xd8] sm:$0xff]   ;;  %v1216_v18 = vld [vmem:[%s1527_s4 + $0xe0] sm:$0xff]   ;;  %v1220_v22 = vld [vmem:[%s1527_s4 + $0xe8] sm:$0xff]  }
  0x5d   : > { %v1213_v15 = vld [vmem:[%s1527_s4 + $0x18] sm:$0xff]   ;;  %v1217_v19 = vld [vmem:[%s1527_s4 + $0x20] sm:$0xff]   ;;  %v1221_v23 = vld [vmem:[%s1527_s4 + $0x28] sm:$0xff]  }
  0x5e   : > { %1101 = vmatpush3.bf16.msra.mxu0 %v1205_v7  ;;  %v1214_v16 = vld [vmem:[%s1527_s4 + $0x98] sm:$0xff]   ;;  %v1218_v20 = vld [vmem:[%s1527_s4 + $0xa0] sm:$0xff]   ;;  %v1222_v24 = vld [vmem:[%s1527_s4 + $0xa8] sm:$0xff]  }
  0x5f   : > { %1123 = vmatpush3.bf16.msra.mxu1 %v1206_v8  ;;  %1102 = vmatprep.subr.bf16.mxu0 %v1207_v9  ;;  %v1223_v25 = vld [vmem:[%s1527_s4 + $0x70] sm:$0xff]   ;;  %v1227_v29 = vld [vmem:[%s1527_s4 + $0x78] sm:$0xff]   ;;  %v555_v34 = vld [vmem:[%s1515_s23 + $0x8] sm:$0xff] }
  0x60   : > { %1124 = vmatprep.subr.bf16.mxu1 %v1208_v10  ;;  %v1224_v26 = vld [vmem:[%s1527_s4 + $0xf0] sm:$0xff]   ;;  %v1228_v30 = vld [vmem:[%s1527_s4 + $0xf8] sm:$0xff]   ;;  %v1059_v37 = vcombine.low %v555_v34, %v555_v34  ;;  %v1060_v38 = vcombine.high %v555_v34, %v555_v34 }
  0x61   : > { %v1225_v27 = vld [vmem:[%s1527_s4 + $0x30] sm:$0xff]   ;;  %v1229_v31 = vld [vmem:[%s1527_s4 + $0x38] sm:$0xff]  }
  0x62   : > { %1103 = vmatpush3.bf16.msra.mxu0 %v1209_v11  ;;  %v1226_v28 = vld [vmem:[%s1527_s4 + $0xb0] sm:$0xff]   ;;  %v1230_v32 = vld [vmem:[%s1527_s4 + $0xb8] sm:$0xff]   ;;  %898 = vmatprep.mubr.bf16.mxu1 %v1060_v38 }
  0x63   : > { %1125 = vmatpush3.bf16.msra.mxu1 %v1210_v12  ;;  %1104 = vmatprep.subr.bf16.mxu0 %v1211_v13  ;;  %v554_v33 = vld [vmem:[%s1515_s23] sm:$0xff] }
  0x64   : > { %1126 = vmatprep.subr.bf16.mxu1 %v1212_v14  ;;  %v1057_v35 = vcombine.low %v554_v33, %v554_v33  ;;  %v1058_v36 = vcombine.high %v554_v33, %v554_v33  ;;  %v553_v47 = vld [vmem:[#allocation2] sm:$0xff] }
  0x65   : > { %v1094_v53 = vld [vmem:[%s538_s27] ss:$0 sm:$0xff] (!%p1093_p13) }
  0x66   : > { %1105 = vmatpush3.bf16.msra.mxu0 %v1213_v15  ;;  %858 = vmatprep.mubr.bf16.mxu0 %v1058_v36 }
  0x67   : > { %1127 = vmatpush3.bf16.msra.mxu1 %v1214_v16  ;;  %1106 = vmatprep.subr.bf16.mxu0 %v1215_v17 }
  0x68   : > { %1128 = vmatprep.subr.bf16.mxu1 %v1216_v18 }
  0x6a   : > { %1107 = vmatpush3.bf16.msra.mxu0 %v1217_v19 }
  0x6b   : > { %1129 = vmatpush3.bf16.msra.mxu1 %v1218_v20  ;;  %1108 = vmatprep.subr.bf16.mxu0 %v1219_v21 }
  0x6c   : > { %1130 = vmatprep.subr.bf16.mxu1 %v1220_v22 }
  0x6e   : > { %1109 = vmatpush3.bf16.msra.mxu0 %v1221_v23 }
  0x6f   : > { %1131 = vmatpush3.bf16.msra.mxu1 %v1222_v24  ;;  %1110 = vmatprep.subr.bf16.mxu0 %v1223_v25 }
  0x70   : > { %1132 = vmatprep.subr.bf16.mxu1 %v1224_v26 }
  0x72   : > { %1111 = vmatpush3.bf16.msra.mxu0 %v1225_v27 }
  0x73   : > { %1133 = vmatpush3.bf16.msra.mxu1 %v1226_v28  ;;  %1112 = vmatprep.subr.bf16.mxu0 %v1227_v29 }
  0x74   : > { %1134 = vmatprep.subr.bf16.mxu1 %v1228_v30 }
  0x76   : > { %1113 = vmatpush3.bf16.msra.mxu0 %v1229_v31 }
  0x77   : > { %1135 = vmatpush3.bf16.msra.mxu1 %v1230_v32 }
  0x79   : > { %859 = vmatmul.mubr.bf16.vlgmr.msra.gmra.mrb[0].mxu0 %v1057_v35 }
  0x7a   : > { %899 = vmatmul.mubr.bf16.vlgmr.msra.gmra.mrb[0].mxu1 %v1059_v37 }
 0x14c   : > { %v1114_v39 = vpop.f32.mrb[0].mxu0 }
 0x14d   : > { %v1136_v40 = vpop.f32.mrb[0].mxu1  ;;  %v1115_v41 = vpop.f32.mrb[1].mxu0 }
 0x14e   : > { %v1137_v42 = vpop.f32.mrb[1].mxu1  ;;  %v1116_v43 = vadd.f32 %v1115_v41, %v1114_v39  ;;  %v1117_v45 = vpop.f32.mrb[2].mxu0 }
 0x14f   : > { %v1138_v44 = vadd.f32 %v1137_v42, %v1136_v40  ;;  %v1139_v46 = vpop.f32.mrb[2].mxu1  ;;  %v1118_v48 = vpop.f32.mrb[3].mxu0  ;;  %911 = sbr.rel (%p1093_p13) target bundleno = 355 (0x163), region = 81 }
 0x150   : > { %v1140_v49 = vpop.f32.mrb[3].mxu1 }
 0x151   : > { %v901_v50 = vadd.f32 %v1138_v44, %v1116_v43 }
 0x153   : > { %v906_v51 = vadd.f32 %v901_v50, %v553_v47 }
 0x155   : > { %907 = vst [vmem:[#allocation2] sm:$0xff] %v906_v51 }
 0x15c   : > { %v912_v52 = vld [vmem:[#allocation2] sm:$0xff] }
 0x15d   : > { %v920_v54 = vadd.f32 %v1094_v53, %v912_v52 }
 0x15f   : > { %vm921_vm0 = vcmp.ge.f32.partialorder %v920_v54, 0.0  ;;  %v922_v55 = vmul.f32 0.2, %v920_v54 }
 0x161   : > { %v923_v56 = vsel %vm921_vm0, %v920_v54, %v922_v55 }
 0x162   : > { %924 = vst [vmem:[%s1525_s30] sm:$0xff] %v923_v56 }
 0x163 PF: > { %s13_s18 = sadd.s32 1, %s1289_s18   ;;  %s1596_s12 = smov %s1269_s13 }
 0x164   : > { %p10_p0 = scmp.ge.s32.totalorder %s13_s18, 8   ;;  %s1597_s13 = smov %s1363_s25 }
 0x165   : > { %s1598_s14 = smov %s1281_s16  ;;  %s1599_s15 = smov %s1285_s17 }
 0x166   : > { %s1600_s16 = smov %s1603_s19  ;;  %s1601_s17 = smov %s1607_s20 }
 0x167   :  { %12 = sbr.rel (!%p10_p0) target bundleno = 4 (0x4), region = 122 }

// kernel: dis_forward.16
= control target key start
LH: loop header
LB: loop body
LE: loop exit
PB: predicated region body
PF: predicated region fallthrough
CT: control target
= control target key end

     0   :  { %s2566_s12 = smov 0   ;;  %s3392_s0 = inlined_call_operand.vmem [shape: bf16[2,2,512], index: 0, kind: input, shape index: {}]   ;;  %s3393_s1 = inlined_call_operand.vmem [shape: bf16[4,2], index: 1, kind: input, shape index: {}]   ;;  %s3394_s2 = inlined_call_operand.vmem [shape: bf16[512,1024], index: 2, kind: input, shape index: {}]   ;;  %s3395_s3 = inlined_call_operand.vmem [shape: f32[2,4,1024], index: 3, kind: output, shape index: {}]  }
   0x1 LB: > { %s2238_s13 = sadd.s32 4294967295, %s2542_s12   ;;  %p2242_p0 = scmp.ge.s32.totalorder %s2542_s12, 1  ;;  %s2542_s12 = sphi %s2566_s12, %s13_s12  }
   0x2   : > { %p136_p1 = scmp.lt.s32.totalorder %s2542_s12, 3 }
   0x4   : > { %p137_p2 = pnand %p2242_p0, %p136_p1 }
   0x5   : > { %p159_p3 = scmp.lt.s32.totalorder (!%p137_p2), %s2238_s13, 1  ;;  %v183_v0 = vlaneseq (!%p137_p2)  ;;  %v2544_v1 = vmov (!%p137_p2), 1966171168   ;;  %v2545_v3 = vmov (!%p137_p2), 0   ;;  %vm200_vm0 = vcmask (!%p137_p2), 1040384   ;;  %v299_v8 = vld [vmem:[%s3394_s2] sm:$0xff] (!%p137_p2) }
   0x6   : > { %140 = sbr.rel (%p137_p2) target bundleno = 650 (0x28a), region = 32  ;;  %v181_v2 = vunpack.c.l.s4 (!%p137_p2), %v2544_v1  ;;  %245 = vmatprep.mubr.bf16.mxu0 (!%p137_p2), %v2545_v3  ;;  %286 = vmatprep.mubr.bf16.mxu1 (!%p137_p2), %v2545_v3  ;;  %v303_v9 = vld [vmem:[%s3394_s2 + $0x20] sm:$0xff] (!%p137_p2)  ;;  %v300_v12 = vld [vmem:[%s3394_s2 + $0x8] sm:$0xff] (!%p137_p2)  ;;  %vm196_vm1 = vcmask (!%p137_p2), 15360  }
   0x7   : > { %v184_v4 = vshrl.u32 (!%p137_p2), %v183_v0, 7  ;;  %v304_v13 = vld [vmem:[%s3394_s2 + $0x28] sm:$0xff] (!%p137_p2)  ;;  %v2252_v17 = vcombine.high (!%p137_p2), %v299_v8, %v303_v9  ;;  %v307_v18 = vld [vmem:[%s3394_s2 + $0x40] sm:$0xff] (!%p137_p2)  ;;  %v2251_v24 = vcombine.low (!%p137_p2), %v299_v8, %v303_v9 }
   0x8   : > { %v182_v5 = vunpack.c.0.s8 (!%p137_p2), %v181_v2  ;;  %v311_v19 = vld [vmem:[%s3394_s2 + $0x60] sm:$0xff] (!%p137_p2)  ;;  %v2254_v22 = vcombine.high (!%p137_p2), %v300_v12, %v304_v13  ;;  %v308_v25 = vld [vmem:[%s3394_s2 + $0x48] sm:$0xff] (!%p137_p2)  ;;  %v2253_v28 = vcombine.low (!%p137_p2), %v300_v12, %v304_v13 }
   0x9   : > { %v170_v23 = vld [vmem:[%s3393_s1] sm:$0x3] (!%p137_p2)  ;;  %v312_v26 = vld [vmem:[%s3394_s2 + $0x68] sm:$0xff] (!%p137_p2)  ;;  %v2260_v27 = vcombine.high (!%p137_p2), %v307_v18, %v311_v19  ;;  %v2259_v32 = vcombine.low (!%p137_p2), %v307_v18, %v311_v19 }
   0xa   : > { %v185_v6 = vsub.s32 (!%p137_p2), %v182_v5, %v184_v4  ;;  %v315_v29 = vld [vmem:[%s3394_s2 + $0x80] sm:$0xff] (!%p137_p2)  ;;  %v2262_v31 = vcombine.high (!%p137_p2), %v308_v25, %v312_v26  ;;  %v316_v33 = vld [vmem:[%s3394_s2 + $0x88] sm:$0xff] (!%p137_p2)  ;;  %v2261_v36 = vcombine.low (!%p137_p2), %v308_v25, %v312_v26 }
   0xb   : > { %v319_v30 = vld [vmem:[%s3394_s2 + $0xa0] sm:$0xff] (!%p137_p2)  ;;  %v320_v34 = vld [vmem:[%s3394_s2 + $0xa8] sm:$0xff] (!%p137_p2) }
   0xc   : > { %v2268_v35 = vcombine.high (!%p137_p2), %v315_v29, %v319_v30  ;;  %v323_v37 = vld [vmem:[%s3394_s2 + $0xc0] sm:$0xff] (!%p137_p2)  ;;  %v2270_v39 = vcombine.high (!%p137_p2), %v316_v33, %v320_v34  ;;  %v2267_v40 = vcombine.low (!%p137_p2), %v315_v29, %v319_v30  ;;  %v324_v41 = vld [vmem:[%s3394_s2 + $0xc8] sm:$0xff] (!%p137_p2)  ;;  %v2269_v44 = vcombine.low (!%p137_p2), %v316_v33, %v320_v34 }
   0xd   : > { %s3397_s13 = smov (!%p159_p3, %s2238_s13), 1  ;;  %v327_v38 = vld [vmem:[%s3394_s2 + $0xe0] sm:$0xff]  ;;  %v328_v42 = vld [vmem:[%s3394_s2 + $0xe8] sm:$0xff] }
   0xe   : > { %s2243_s14 = sshll.u32 %s3397_s13, 2  ;;  %v2276_v43 = vcombine.high %v323_v37, %v327_v38  ;;  %v331_v45 = vld [vmem:[%s3394_s2 + $0x100] sm:$0xff]  ;;  %v2278_v47 = vcombine.high %v324_v41, %v328_v42  ;;  %v2275_v48 = vcombine.low %v323_v37, %v327_v38  ;;  %v332_v49 = vld [vmem:[%s3394_s2 + $0x108] sm:$0xff]  ;;  %v2277_v52 = vcombine.low %v324_v41, %v328_v42  ;;  %s2509_s5 = sshll.u32 %s3397_s13, 5 }
   0xf   : > { %s162_s17 = scalar_lea.vmem %s3392_s0, %s2243_s14  ;;  %v335_v46 = vld [vmem:[%s3394_s2 + $0x120] sm:$0xff]  ;;  %v336_v50 = vld [vmem:[%s3394_s2 + $0x128] sm:$0xff]  ;;  %s167_s8 = scalar_lea.vmem %s3395_s3, %s2509_s5 }
  0x10   : > { %v2246_v7 = vld.sshfl [vmem:[%s162_s17] sm:$0x33 pattern:$0x75316420]  ;;  %v2284_v51 = vcombine.high %v331_v45, %v335_v46  ;;  %v2286_v55 = vcombine.high %v332_v49, %v336_v50  ;;  %v2283_v56 = vcombine.low %v331_v45, %v335_v46  ;;  %v340_v57 = vld [vmem:[%s3394_s2 + $0x148] sm:$0xff]  ;;  %v2285_v60 = vcombine.low %v332_v49, %v336_v50 }
  0x11   : > { %v179_v10 = vcombine.high %v2246_v7, %v2246_v7  ;;  %v186_v11 = vrot.slane %v2246_v7, %v185_v6  ;;  %v339_v53 = vld [vmem:[%s3394_s2 + $0x140] sm:$0xff]  ;;  %v344_v58 = vld [vmem:[%s3394_s2 + $0x168] sm:$0xff] }
  0x12   : > { %v343_v54 = vld [vmem:[%s3394_s2 + $0x160] sm:$0xff]  ;;  %v2294_v63 = vcombine.high %v340_v57, %v344_v58  ;;  %v348_v1 = vld [vmem:[%s3394_s2 + $0x188] sm:$0xff]  ;;  %v2293_v4 = vcombine.low %v340_v57, %v344_v58 }
  0x13   : > { %v193_v14 = vrot.slane %v179_v10, %v185_v6  ;;  %v202_v15 = vsel %vm200_vm0, %v186_v11, 0  ;;  %v194_v16 = vcombine.high %v186_v11, %v186_v11  ;;  %v2292_v59 = vcombine.high %v339_v53, %v343_v54  ;;  %v347_v61 = vld [vmem:[%s3394_s2 + $0x180] sm:$0xff]  ;;  %v352_v2 = vld [vmem:[%s3394_s2 + $0x1a8] sm:$0xff] }
  0x14   : > { %v351_v62 = vld [vmem:[%s3394_s2 + $0x1a0] sm:$0xff]  ;;  %v2291_v0 = vcombine.low %v339_v53, %v343_v54  ;;  %v2302_v7 = vcombine.high %v348_v1, %v352_v2  ;;  %v356_v9 = vld [vmem:[%s3394_s2 + $0x1c8] sm:$0xff]  ;;  %v2301_v12 = vcombine.low %v348_v1, %v352_v2 }
  0x15   : > { %2247 = vmatprep.subr.msk.bf16.mxu0 %vm200_vm0, %v193_v14  ;;  %v195_v20 = vcombine.high %v193_v14, %v193_v14  ;;  %v208_v21 = vsel %vm200_vm0, %v194_v16, 0  ;;  %v2300_v3 = vcombine.high %v347_v61, %v351_v62  ;;  %v355_v5 = vld [vmem:[%s3394_s2 + $0x1c0] sm:$0xff]  ;;  %v2299_v8 = vcombine.low %v347_v61, %v351_v62  ;;  %v360_v10 = vld [vmem:[%s3394_s2 + $0x1e8] sm:$0xff] }
  0x16   : > { %214 = vmatpush1.bf16.msra.mxu0 %v202_v15  ;;  %v359_v6 = vld [vmem:[%s3394_s2 + $0x1e0] sm:$0xff]  ;;  %v2310_v15 = vcombine.high %v356_v9, %v360_v10  ;;  %v368_v18 = vld [vmem:[%s3394_s2 + $0x228] sm:$0xff] }
  0x17   : > { %2249 = vmatprep.subr.msk.bf16.mxu1 %vm200_vm0, %v195_v20  ;;  %1835 = vmatprep.subr.bf16.mxu0 %v2252_v17  ;;  %v2308_v11 = vcombine.high %v355_v5, %v359_v6  ;;  %v363_v13 = vld [vmem:[%s3394_s2 + $0x200] sm:$0xff]  ;;  %v2307_v16 = vcombine.low %v355_v5, %v359_v6  ;;  %v364_v17 = vld [vmem:[%s3394_s2 + $0x208] sm:$0xff]  ;;  %v2309_v20 = vcombine.low %v356_v9, %v360_v10 }
  0x18   : > { %255 = vmatpush1.bf16.msra.mxu1 %v208_v21  ;;  %v367_v14 = vld [vmem:[%s3394_s2 + $0x220] sm:$0xff]  ;;  %v372_v25 = vld [vmem:[%s3394_s2 + $0x248] sm:$0xff] }
  0x19   : > { %2248 = vmatmul.mubr.msk.bf16.vlgmr.msra.gmra.mrb[0].mxu0 %vm196_vm1, %v170_v23  ;;  %1917 = vmatprep.subr.bf16.mxu1 %v2254_v22  ;;  %v2316_v19 = vcombine.high %v363_v13, %v367_v14  ;;  %v371_v21 = vld [vmem:[%s3394_s2 + $0x240] sm:$0xff]  ;;  %v376_v26 = vld [vmem:[%s3394_s2 + $0x268] sm:$0xff] }
  0x1a   : > { %1836 = vmatpush1.bf16.msra.mxu0 %v2251_v24  ;;  %v375_v22 = vld [vmem:[%s3394_s2 + $0x260] sm:$0xff]  ;;  %v2315_v24 = vcombine.low %v363_v13, %v367_v14  ;;  %v380_v33 = vld [vmem:[%s3394_s2 + $0x288] sm:$0xff] }
  0x1b   : > { %2250 = vmatmul.mubr.msk.bf16.vlgmr.msra.gmra.mrb[0].mxu1 %vm196_vm1, %v170_v23  ;;  %1837 = vmatprep.subr.bf16.mxu0 %v2260_v27  ;;  %v2318_v23 = vcombine.high %v364_v17, %v368_v18  ;;  %v2324_v27 = vcombine.high %v371_v21, %v375_v22  ;;  %v379_v29 = vld [vmem:[%s3394_s2 + $0x280] sm:$0xff]  ;;  %v384_v34 = vld [vmem:[%s3394_s2 + $0x2a8] sm:$0xff] }
  0x1c   : > { %1918 = vmatpush1.bf16.msra.mxu1 %v2253_v28  ;;  %v2317_v28 = vcombine.low %v364_v17, %v368_v18  ;;  %v383_v30 = vld [vmem:[%s3394_s2 + $0x2a0] sm:$0xff]  ;;  %v388_v41 = vld [vmem:[%s3394_s2 + $0x2c8] sm:$0xff] }
  0x1d   : > { %1919 = vmatprep.subr.bf16.mxu1 %v2262_v31  ;;  %v2326_v31 = vcombine.high %v372_v25, %v376_v26  ;;  %v387_v37 = vld [vmem:[%s3394_s2 + $0x2c0] sm:$0xff]  ;;  %v392_v42 = vld [vmem:[%s3394_s2 + $0x2e8] sm:$0xff] }
  0x1e   : > { %1838 = vmatpush1.bf16.msra.mxu0 %v2259_v32  ;;  %v2323_v32 = vcombine.low %v371_v21, %v375_v22  ;;  %v391_v38 = vld [vmem:[%s3394_s2 + $0x2e0] sm:$0xff]  ;;  %v396_v49 = vld [vmem:[%s3394_s2 + $0x308] sm:$0xff] }
  0x1f   : > { %1839 = vmatprep.subr.bf16.mxu0 %v2268_v35  ;;  %v2332_v35 = vcombine.high %v379_v29, %v383_v30  ;;  %v395_v45 = vld [vmem:[%s3394_s2 + $0x300] sm:$0xff]  ;;  %v400_v50 = vld [vmem:[%s3394_s2 + $0x328] sm:$0xff] }
  0x20   : > { %1920 = vmatpush1.bf16.msra.mxu1 %v2261_v36  ;;  %v2325_v36 = vcombine.low %v372_v25, %v376_v26  ;;  %v399_v46 = vld [vmem:[%s3394_s2 + $0x320] sm:$0xff]  ;;  %v404_v57 = vld [vmem:[%s3394_s2 + $0x348] sm:$0xff] }
  0x21   : > { %1921 = vmatprep.subr.bf16.mxu1 %v2270_v39  ;;  %v2334_v39 = vcombine.high %v380_v33, %v384_v34  ;;  %v403_v53 = vld [vmem:[%s3394_s2 + $0x340] sm:$0xff]  ;;  %v408_v58 = vld [vmem:[%s3394_s2 + $0x368] sm:$0xff] }
  0x22   : > { %1840 = vmatpush1.bf16.msra.mxu0 %v2267_v40  ;;  %v2331_v40 = vcombine.low %v379_v29, %v383_v30  ;;  %v407_v54 = vld [vmem:[%s3394_s2 + $0x360] sm:$0xff]  ;;  %v412_v1 = vld [vmem:[%s3394_s2 + $0x388] sm:$0xff] }
  0x23   : > { %1841 = vmatprep.subr.bf16.mxu0 %v2276_v43  ;;  %v2340_v43 = vcombine.high %v387_v37, %v391_v38  ;;  %v411_v61 = vld [vmem:[%s3394_s2 + $0x380] sm:$0xff]  ;;  %v416_v2 = vld [vmem:[%s3394_s2 + $0x3a8] sm:$0xff] }
  0x24   : > { %1922 = vmatpush1.bf16.msra.mxu1 %v2269_v44  ;;  %v2333_v44 = vcombine.low %v380_v33, %v384_v34  ;;  %v415_v62 = vld [vmem:[%s3394_s2 + $0x3a0] sm:$0xff]  ;;  %v2366_v5 = vcombine.high %v412_v1, %v416_v2  ;;  %v420_v10 = vld [vmem:[%s3394_s2 + $0x3c8] sm:$0xff] }
  0x25   : > { %1923 = vmatprep.subr.bf16.mxu1 %v2278_v47  ;;  %v2342_v47 = vcombine.high %v388_v41, %v392_v42  ;;  %v2363_v6 = vcombine.low %v411_v61, %v415_v62  ;;  %v423_v9 = vld [vmem:[%s3394_s2 + $0x3e0] sm:$0xff]  ;;  %v428_v18 = vld [vmem:[%s3394_s2 + $0x408] sm:$0xff] }
  0x26   : > { %1842 = vmatpush1.bf16.msra.mxu0 %v2275_v48  ;;  %v2339_v48 = vcombine.low %v387_v37, %v391_v38  ;;  %v431_v17 = vld [vmem:[%s3394_s2 + $0x420] sm:$0xff] }
  0x27   : > { %1843 = vmatprep.subr.bf16.mxu0 %v2284_v51  ;;  %v2348_v51 = vcombine.high %v395_v45, %v399_v46  ;;  %v439_v26 = vld [vmem:[%s3394_s2 + $0x460] sm:$0xff] }
  0x28   : > { %1924 = vmatpush1.bf16.msra.mxu1 %v2277_v52  ;;  %v2341_v52 = vcombine.low %v388_v41, %v392_v42  ;;  %v443_v37 = vld [vmem:[%s3394_s2 + $0x480] sm:$0xff]  ;;  %v448_v41 = vld [vmem:[%s3394_s2 + $0x4a8] sm:$0xff] }
  0x29   : > { %1925 = vmatprep.subr.bf16.mxu1 %v2286_v55  ;;  %v2350_v55 = vcombine.high %v396_v49, %v400_v50 }
  0x2a   : > { %1844 = vmatpush1.bf16.msra.mxu0 %v2283_v56  ;;  %v2347_v56 = vcombine.low %v395_v45, %v399_v46 }
  0x2b   : > { %1845 = vmatprep.subr.bf16.mxu0 %v2292_v59  ;;  %v2356_v59 = vcombine.high %v403_v53, %v407_v54 }
  0x2c   : > { %1926 = vmatpush1.bf16.msra.mxu1 %v2285_v60  ;;  %v2349_v60 = vcombine.low %v396_v49, %v400_v50  ;;  %v451_v49 = vld [vmem:[%s3394_s2 + $0x4c0] sm:$0xff] }
  0x2d   : > { %1927 = vmatprep.subr.bf16.mxu1 %v2294_v63  ;;  %v2358_v63 = vcombine.high %v404_v57, %v408_v58  ;;  %v455_v50 = vld [vmem:[%s3394_s2 + $0x4e0] sm:$0xff] }
  0x2e   : > { %1846 = vmatpush1.bf16.msra.mxu0 %v2291_v0  ;;  %v2355_v0 = vcombine.low %v403_v53, %v407_v54 }
  0x2f   : > { %1847 = vmatprep.subr.bf16.mxu0 %v2300_v3  ;;  %v2364_v3 = vcombine.high %v411_v61, %v415_v62  ;;  %v2403_v61 = vcombine.low %v451_v49, %v455_v50 }
  0x30   : > { %1928 = vmatpush1.bf16.msra.mxu1 %v2293_v4  ;;  %v2357_v4 = vcombine.low %v404_v57, %v408_v58  ;;  %v459_v57 = vld [vmem:[%s3394_s2 + $0x500] sm:$0xff] }
  0x31   : > { %1929 = vmatprep.subr.bf16.mxu1 %v2302_v7  ;;  %v2365_v7 = vcombine.low %v412_v1, %v416_v2  ;;  %v463_v58 = vld [vmem:[%s3394_s2 + $0x520] sm:$0xff] }
  0x32   : > { %1848 = vmatpush1.bf16.msra.mxu0 %v2299_v8  ;;  %v419_v8 = vld [vmem:[%s3394_s2 + $0x3c0] sm:$0xff] }
  0x33   : > { %1849 = vmatprep.subr.bf16.mxu0 %v2308_v11  ;;  %v2372_v11 = vcombine.high %v419_v8, %v423_v9  ;;  %v2371_v13 = vcombine.low %v419_v8, %v423_v9  ;;  %v467_v1 = vld [vmem:[%s3394_s2 + $0x540] sm:$0xff] }
  0x34   : > { %1930 = vmatpush1.bf16.msra.mxu1 %v2301_v12  ;;  %v424_v12 = vld [vmem:[%s3394_s2 + $0x3e8] sm:$0xff]  ;;  %v471_v2 = vld [vmem:[%s3394_s2 + $0x560] sm:$0xff] }
  0x35   : > { %1931 = vmatprep.subr.bf16.mxu1 %v2310_v15  ;;  %v2373_v14 = vcombine.low %v420_v10, %v424_v12  ;;  %v2374_v15 = vcombine.high %v420_v10, %v424_v12  ;;  %v475_v9 = vld [vmem:[%s3394_s2 + $0x580] sm:$0xff]  ;;  %v480_v12 = vld [vmem:[%s3394_s2 + $0x5a8] sm:$0xff] }
  0x36   : > { %1850 = vmatpush1.bf16.msra.mxu0 %v2307_v16  ;;  %v427_v16 = vld [vmem:[%s3394_s2 + $0x400] sm:$0xff] }
  0x37   : > { %1851 = vmatprep.subr.bf16.mxu0 %v2316_v19  ;;  %v2380_v19 = vcombine.high %v427_v16, %v431_v17  ;;  %v2379_v21 = vcombine.low %v427_v16, %v431_v17  ;;  %v479_v10 = vld [vmem:[%s3394_s2 + $0x5a0] sm:$0xff] }
  0x38   : > { %1932 = vmatpush1.bf16.msra.mxu1 %v2309_v20  ;;  %v432_v20 = vld [vmem:[%s3394_s2 + $0x428] sm:$0xff]  ;;  %v483_v17 = vld [vmem:[%s3394_s2 + $0x5c0] sm:$0xff] }
  0x39   : > { %1933 = vmatprep.subr.bf16.mxu1 %v2318_v23  ;;  %v2381_v22 = vcombine.low %v428_v18, %v432_v20  ;;  %v2382_v23 = vcombine.high %v428_v18, %v432_v20  ;;  %v487_v18 = vld [vmem:[%s3394_s2 + $0x5e0] sm:$0xff]  ;;  %v488_v20 = vld [vmem:[%s3394_s2 + $0x5e8] sm:$0xff] }
  0x3a   : > { %1852 = vmatpush1.bf16.msra.mxu0 %v2315_v24  ;;  %v435_v24 = vld [vmem:[%s3394_s2 + $0x440] sm:$0xff] }
  0x3b   : > { %1853 = vmatprep.subr.bf16.mxu0 %v2324_v27  ;;  %v436_v27 = vld [vmem:[%s3394_s2 + $0x448] sm:$0xff]  ;;  %v2387_v45 = vcombine.low %v435_v24, %v439_v26 }
  0x3c   : > { %1934 = vmatpush1.bf16.msra.mxu1 %v2317_v28  ;;  %v440_v28 = vld [vmem:[%s3394_s2 + $0x468] sm:$0xff] }
  0x3d   : > { %1935 = vmatprep.subr.bf16.mxu1 %v2326_v31  ;;  %v2389_v46 = vcombine.low %v436_v27, %v440_v28 }
  0x3e   : > { %1854 = vmatpush1.bf16.msra.mxu0 %v2323_v32 }
  0x3f   : > { %1855 = vmatprep.subr.bf16.mxu0 %v2332_v35  ;;  %v2388_v35 = vcombine.high %v435_v24, %v439_v26  ;;  %v495_v26 = vld [vmem:[%s3394_s2 + $0x620] sm:$0xff] }
  0x40   : > { %1936 = vmatpush1.bf16.msra.mxu1 %v2325_v36  ;;  %v2390_v36 = vcombine.high %v436_v27, %v440_v28  ;;  %v492_v27 = vld [vmem:[%s3394_s2 + $0x608] sm:$0xff] }
  0x41   : > { %1937 = vmatprep.subr.bf16.mxu1 %v2334_v39  ;;  %v447_v39 = vld [vmem:[%s3394_s2 + $0x4a0] sm:$0xff]  ;;  %v496_v28 = vld [vmem:[%s3394_s2 + $0x628] sm:$0xff] }
  0x42   : > { %1856 = vmatpush1.bf16.msra.mxu0 %v2331_v40  ;;  %v444_v40 = vld [vmem:[%s3394_s2 + $0x488] sm:$0xff]  ;;  %v2395_v53 = vcombine.low %v443_v37, %v447_v39 }
  0x43   : > { %1857 = vmatprep.subr.bf16.mxu0 %v2340_v43  ;;  %v2397_v54 = vcombine.low %v444_v40, %v448_v41 }
  0x44   : > { %1938 = vmatpush1.bf16.msra.mxu1 %v2333_v44 }
  0x45   : > { %1939 = vmatprep.subr.bf16.mxu1 %v2342_v47  ;;  %v2396_v47 = vcombine.high %v443_v37, %v447_v39  ;;  %v503_v37 = vld [vmem:[%s3394_s2 + $0x660] sm:$0xff]  ;;  %v504_v39 = vld [vmem:[%s3394_s2 + $0x668] sm:$0xff] }
  0x46   : > { %1858 = vmatpush1.bf16.msra.mxu0 %v2339_v48  ;;  %v2398_v48 = vcombine.high %v444_v40, %v448_v41  ;;  %v2445_v41 = vcombine.low %v492_v27, %v496_v28 }
  0x47   : > { %1859 = vmatprep.subr.bf16.mxu0 %v2348_v51  ;;  %v452_v51 = vld [vmem:[%s3394_s2 + $0x4c8] sm:$0xff] }
  0x48   : > { %1940 = vmatpush1.bf16.msra.mxu1 %v2341_v52  ;;  %v456_v52 = vld [vmem:[%s3394_s2 + $0x4e8] sm:$0xff] }
  0x49   : > { %1941 = vmatprep.subr.bf16.mxu1 %v2350_v55  ;;  %v2404_v55 = vcombine.high %v451_v49, %v455_v50  ;;  %v2405_v62 = vcombine.low %v452_v51, %v456_v52 }
  0x4a   : > { %1860 = vmatpush1.bf16.msra.mxu0 %v2347_v56  ;;  %v2406_v56 = vcombine.high %v452_v51, %v456_v52 }
  0x4b   : > { %1861 = vmatprep.subr.bf16.mxu0 %v2356_v59  ;;  %v460_v59 = vld [vmem:[%s3394_s2 + $0x508] sm:$0xff] }
  0x4c   : > { %1942 = vmatpush1.bf16.msra.mxu1 %v2349_v60  ;;  %v464_v60 = vld [vmem:[%s3394_s2 + $0x528] sm:$0xff] }
  0x4d   : > { %1943 = vmatprep.subr.bf16.mxu1 %v2358_v63  ;;  %v2412_v63 = vcombine.high %v459_v57, %v463_v58 }
  0x4e   : > { %1862 = vmatpush1.bf16.msra.mxu0 %v2355_v0  ;;  %v2414_v0 = vcombine.high %v460_v59, %v464_v60 }
  0x4f   : > { %1863 = vmatprep.subr.bf16.mxu0 %v2364_v3  ;;  %v468_v3 = vld [vmem:[%s3394_s2 + $0x548] sm:$0xff] }
  0x50   : > { %1944 = vmatpush1.bf16.msra.mxu1 %v2357_v4  ;;  %v472_v4 = vld [vmem:[%s3394_s2 + $0x568] sm:$0xff] }
  0x51   : > { %1945 = vmatprep.subr.bf16.mxu1 %v2366_v5  ;;  %v2411_v5 = vcombine.low %v459_v57, %v463_v58  ;;  %v2422_v8 = vcombine.high %v468_v3, %v472_v4 }
  0x52   : > { %1864 = vmatpush1.bf16.msra.mxu0 %v2363_v6  ;;  %v2413_v6 = vcombine.low %v460_v59, %v464_v60 }
  0x53   : > { %1865 = vmatprep.subr.bf16.mxu0 %v2372_v11  ;;  %v476_v11 = vld [vmem:[%s3394_s2 + $0x588] sm:$0xff] }
  0x54   : > { %1946 = vmatpush1.bf16.msra.mxu1 %v2365_v7  ;;  %v2420_v7 = vcombine.high %v467_v1, %v471_v2  ;;  %v2430_v16 = vcombine.high %v476_v11, %v480_v12 }
  0x55   : > { %1947 = vmatprep.subr.bf16.mxu1 %v2374_v15  ;;  %v2428_v15 = vcombine.high %v475_v9, %v479_v10 }
  0x56   : > { %1866 = vmatpush1.bf16.msra.mxu0 %v2371_v13  ;;  %v2419_v13 = vcombine.low %v467_v1, %v471_v2 }
  0x57   : > { %1876 = vmatprep.subr.bf16.mxu0 %v2380_v19  ;;  %v484_v19 = vld [vmem:[%s3394_s2 + $0x5c8] sm:$0xff] }
  0x58   : > { %1948 = vmatpush1.bf16.msra.mxu1 %v2373_v14  ;;  %v2421_v14 = vcombine.low %v468_v3, %v472_v4  ;;  %v2438_v24 = vcombine.high %v484_v19, %v488_v20 }
  0x59   : > { %1958 = vmatprep.subr.bf16.mxu1 %v2382_v23  ;;  %v2436_v23 = vcombine.high %v483_v17, %v487_v18 }
  0xec   : > { %v247_v25 = vpop.f32.mrb[0].mxu0 }
  0xed   : > { %v249_v29 = vpop.f32.mrb[1].mxu0  ;;  %v2809_v33 = vpack.c.bf16 %v247_v25, %v247_v25  ;;  %v491_v25 = vld [vmem:[%s3394_s2 + $0x600] sm:$0xff] }
  0xee   : > { %v2805_v30 = vpack.c.bf16 %v249_v29, %v249_v29  ;;  %v251_v31 = vpop.f32.mrb[2].mxu0  ;;  %v2807_v32 = vpop.f32.mrb[0].mxu1  ;;  %v2435_v29 = vcombine.low %v483_v17, %v487_v18  ;;  %v2443_v40 = vcombine.low %v491_v25, %v495_v26 }
  0xef   : > { %v252_v34 = vpop.f32.mrb[3].mxu0  ;;  %v290_v38 = vpop.f32.mrb[1].mxu1  ;;  %v2437_v31 = vcombine.low %v484_v19, %v488_v20 }
  0xf0   : > { %1867 = vmatprep.mubr.bf16.mxu0 %v2805_v30  ;;  %1949 = vmatprep.mubr.bf16.mxu1 %v2805_v30  ;;  %v2825_v42 = vpack.c.bf16 %v290_v38, %v290_v38  ;;  %v292_v43 = vpop.f32.mrb[2].mxu1  ;;  %v2444_v34 = vcombine.high %v491_v25, %v495_v26  ;;  %v500_v38 = vld [vmem:[%s3394_s2 + $0x648] sm:$0xff] }
  0xf1   : > { %1868 = vmatmul.mubr.bf16.vlgmr.msra.gmra.mrb[4].mxu0 %v2809_v33  ;;  %1950 = vmatmul.mubr.bf16.vlgmr.msra.gmra.mrb[4].mxu1 %v2809_v33  ;;  %v293_v44 = vpop.f32.mrb[3].mxu1  ;;  %v2453_v50 = vcombine.low %v500_v38, %v504_v39 }
  0xf2   : > { %1877 = vmatpush1.bf16.msra.mxu0 %v2379_v21  ;;  %1959 = vmatpush1.bf16.msra.mxu1 %v2381_v22  ;;  %v2427_v21 = vcombine.low %v475_v9, %v479_v10  ;;  %v2429_v22 = vcombine.low %v476_v11, %v480_v12  ;;  %v2454_v44 = vcombine.high %v500_v38, %v504_v39 }
  0xf3   : > { %1878 = vmatprep.subr.bf16.mxu0 %v2388_v35  ;;  %1960 = vmatprep.subr.bf16.mxu1 %v2390_v36  ;;  %v2446_v35 = vcombine.high %v492_v27, %v496_v28  ;;  %v499_v36 = vld [vmem:[%s3394_s2 + $0x640] sm:$0xff] }
  0xf4   : > { %1908 = vmatprep.mubr.bf16.mxu0 %v2825_v42  ;;  %1990 = vmatprep.mubr.bf16.mxu1 %v2825_v42  ;;  %v2452_v43 = vcombine.high %v499_v36, %v503_v37  ;;  %v2451_v49 = vcombine.low %v499_v36, %v503_v37 }
  0xf6   : > { %1879 = vmatpush1.bf16.msra.mxu0 %v2387_v45  ;;  %1961 = vmatpush1.bf16.msra.mxu1 %v2389_v46  ;;  %v507_v45 = vld [vmem:[%s3394_s2 + $0x680] sm:$0xff] }
  0xf7   : > { %1880 = vmatprep.subr.bf16.mxu0 %v2396_v47  ;;  %1962 = vmatprep.subr.bf16.mxu1 %v2398_v48  ;;  %v511_v46 = vld [vmem:[%s3394_s2 + $0x6a0] sm:$0xff]  ;;  %v508_v47 = vld [vmem:[%s3394_s2 + $0x688] sm:$0xff] }
  0xf8   : > { %v512_v48 = vld [vmem:[%s3394_s2 + $0x6a8] sm:$0xff]  ;;  %v2460_v51 = vcombine.high %v507_v45, %v511_v46  ;;  %v2459_v57 = vcombine.low %v507_v45, %v511_v46  ;;  %v314_v45 = vld [vmem:[%s3394_s2 + $0x78] sm:$0xff] }
  0xf9   : > { %v2462_v52 = vcombine.high %v508_v47, %v512_v48  ;;  %v2461_v58 = vcombine.low %v508_v47, %v512_v48 }
  0xfa   : > { %1881 = vmatpush1.bf16.msra.mxu0 %v2395_v53  ;;  %1963 = vmatpush1.bf16.msra.mxu1 %v2397_v54  ;;  %v515_v53 = vld [vmem:[%s3394_s2 + $0x6c0] sm:$0xff] }
  0xfb   : > { %1882 = vmatprep.subr.bf16.mxu0 %v2404_v55  ;;  %1964 = vmatprep.subr.bf16.mxu1 %v2406_v56  ;;  %v519_v54 = vld [vmem:[%s3394_s2 + $0x6e0] sm:$0xff]  ;;  %v516_v55 = vld [vmem:[%s3394_s2 + $0x6c8] sm:$0xff] }
  0xfc   : > { %v520_v56 = vld [vmem:[%s3394_s2 + $0x6e8] sm:$0xff]  ;;  %v2468_v59 = vcombine.high %v515_v53, %v519_v54  ;;  %v2467_v1 = vcombine.low %v515_v53, %v519_v54 }
  0xfd   : > { %v2470_v60 = vcombine.high %v516_v55, %v520_v56  ;;  %v2469_v2 = vcombine.low %v516_v55, %v520_v56 }
  0xfe   : > { %1883 = vmatpush1.bf16.msra.mxu0 %v2403_v61  ;;  %1965 = vmatpush1.bf16.msra.mxu1 %v2405_v62  ;;  %v523_v61 = vld [vmem:[%s3394_s2 + $0x700] sm:$0xff] }
  0xff   : > { %1884 = vmatprep.subr.bf16.mxu0 %v2412_v63  ;;  %1966 = vmatprep.subr.bf16.mxu1 %v2414_v0  ;;  %v527_v62 = vld [vmem:[%s3394_s2 + $0x720] sm:$0xff]  ;;  %v524_v63 = vld [vmem:[%s3394_s2 + $0x708] sm:$0xff] }
 0x100   : > { %v528_v0 = vld [vmem:[%s3394_s2 + $0x728] sm:$0xff]  ;;  %v2476_v3 = vcombine.high %v523_v61, %v527_v62  ;;  %v2475_v9 = vcombine.low %v523_v61, %v527_v62 }
 0x101   : > { %v2478_v4 = vcombine.high %v524_v63, %v528_v0  ;;  %v2477_v10 = vcombine.low %v524_v63, %v528_v0  ;;  %v333_v0 = vld [vmem:[%s3394_s2 + $0x110] sm:$0xff] }
 0x102   : > { %1885 = vmatpush1.bf16.msra.mxu0 %v2411_v5  ;;  %1967 = vmatpush1.bf16.msra.mxu1 %v2413_v6  ;;  %v531_v5 = vld [vmem:[%s3394_s2 + $0x740] sm:$0xff] }
 0x103   : > { %1886 = vmatprep.subr.bf16.mxu0 %v2420_v7  ;;  %1968 = vmatprep.subr.bf16.mxu1 %v2422_v8  ;;  %v535_v6 = vld [vmem:[%s3394_s2 + $0x760] sm:$0xff]  ;;  %v532_v7 = vld [vmem:[%s3394_s2 + $0x748] sm:$0xff] }
 0x104   : > { %v536_v8 = vld [vmem:[%s3394_s2 + $0x768] sm:$0xff]  ;;  %v2484_v11 = vcombine.high %v531_v5, %v535_v6  ;;  %v2483_v17 = vcombine.low %v531_v5, %v535_v6 }
 0x105   : > { %v2486_v12 = vcombine.high %v532_v7, %v536_v8  ;;  %v2485_v18 = vcombine.low %v532_v7, %v536_v8  ;;  %v341_v8 = vld [vmem:[%s3394_s2 + $0x150] sm:$0xff] }
 0x106   : > { %1887 = vmatpush1.bf16.msra.mxu0 %v2419_v13  ;;  %1969 = vmatpush1.bf16.msra.mxu1 %v2421_v14  ;;  %v539_v13 = vld [vmem:[%s3394_s2 + $0x780] sm:$0xff] }
 0x107   : > { %1888 = vmatprep.subr.bf16.mxu0 %v2428_v15  ;;  %1970 = vmatprep.subr.bf16.mxu1 %v2430_v16  ;;  %v543_v14 = vld [vmem:[%s3394_s2 + $0x7a0] sm:$0xff]  ;;  %v540_v15 = vld [vmem:[%s3394_s2 + $0x788] sm:$0xff] }
 0x108   : > { %v544_v16 = vld [vmem:[%s3394_s2 + $0x7a8] sm:$0xff]  ;;  %v2492_v19 = vcombine.high %v539_v13, %v543_v14  ;;  %v2491_v25 = vcombine.low %v539_v13, %v543_v14 }
 0x109   : > { %v2494_v20 = vcombine.high %v540_v15, %v544_v16  ;;  %v2493_v26 = vcombine.low %v540_v15, %v544_v16  ;;  %v349_v16 = vld [vmem:[%s3394_s2 + $0x190] sm:$0xff] }
 0x10a   : > { %1889 = vmatpush1.bf16.msra.mxu0 %v2427_v21  ;;  %1971 = vmatpush1.bf16.msra.mxu1 %v2429_v22  ;;  %v547_v21 = vld [vmem:[%s3394_s2 + $0x7c0] sm:$0xff] }
 0x10b   : > { %1890 = vmatprep.subr.bf16.mxu0 %v2436_v23  ;;  %1972 = vmatprep.subr.bf16.mxu1 %v2438_v24  ;;  %v551_v22 = vld [vmem:[%s3394_s2 + $0x7e0] sm:$0xff]  ;;  %v548_v23 = vld [vmem:[%s3394_s2 + $0x7c8] sm:$0xff] }
 0x10c   : > { %v552_v24 = vld [vmem:[%s3394_s2 + $0x7e8] sm:$0xff]  ;;  %v2500_v27 = vcombine.high %v547_v21, %v551_v22  ;;  %v2499_v36 = vcombine.low %v547_v21, %v551_v22 }
 0x10d   : > { %v2502_v28 = vcombine.high %v548_v23, %v552_v24  ;;  %v2501_v37 = vcombine.low %v548_v23, %v552_v24  ;;  %v357_v24 = vld [vmem:[%s3394_s2 + $0x1d0] sm:$0xff] }
 0x10e   : > { %1891 = vmatpush1.bf16.msra.mxu0 %v2435_v29  ;;  %1973 = vmatpush1.bf16.msra.mxu1 %v2437_v31  ;;  %v301_v29 = vld [vmem:[%s3394_s2 + $0x10] sm:$0xff] }
 0x10f   : > { %1892 = vmatprep.subr.bf16.mxu0 %v2444_v34  ;;  %1974 = vmatprep.subr.bf16.mxu1 %v2446_v35  ;;  %v305_v31 = vld [vmem:[%s3394_s2 + $0x30] sm:$0xff]  ;;  %v302_v34 = vld [vmem:[%s3394_s2 + $0x18] sm:$0xff] }
 0x110   : > { %v306_v35 = vld [vmem:[%s3394_s2 + $0x38] sm:$0xff]  ;;  %v2256_v38 = vcombine.high %v301_v29, %v305_v31  ;;  %v2255_v46 = vcombine.low %v301_v29, %v305_v31 }
 0x111   : > { %v2258_v39 = vcombine.high %v302_v34, %v306_v35  ;;  %v2257_v47 = vcombine.low %v302_v34, %v306_v35  ;;  %v365_v35 = vld [vmem:[%s3394_s2 + $0x210] sm:$0xff] }
 0x112   : > { %1893 = vmatpush1.bf16.msra.mxu0 %v2443_v40  ;;  %1975 = vmatpush1.bf16.msra.mxu1 %v2445_v41  ;;  %v309_v40 = vld [vmem:[%s3394_s2 + $0x50] sm:$0xff]  ;;  %v3004_v41 = vpack.c.bf16 %v2807_v32, %v2807_v32 }
 0x113   : > { %1894 = vmatprep.subr.bf16.mxu0 %v2452_v43  ;;  %1976 = vmatprep.subr.bf16.mxu1 %v2454_v44  ;;  %v313_v43 = vld [vmem:[%s3394_s2 + $0x70] sm:$0xff]  ;;  %v310_v44 = vld [vmem:[%s3394_s2 + $0x58] sm:$0xff] }
 0x114   : > { %v2264_v32 = vcombine.high %v309_v40, %v313_v43  ;;  %v2266_v48 = vcombine.high %v310_v44, %v314_v45  ;;  %v2263_v53 = vcombine.low %v309_v40, %v313_v43  ;;  %v2265_v54 = vcombine.low %v310_v44, %v314_v45  ;;  %v373_v45 = vld [vmem:[%s3394_s2 + $0x250] sm:$0xff] }
 0x116   : > { %1895 = vmatpush1.bf16.msra.mxu0 %v2451_v49  ;;  %1977 = vmatpush1.bf16.msra.mxu1 %v2453_v50  ;;  %v317_v49 = vld [vmem:[%s3394_s2 + $0x90] sm:$0xff] }
 0x117   : > { %1896 = vmatprep.subr.bf16.mxu0 %v2460_v51  ;;  %1978 = vmatprep.subr.bf16.mxu1 %v2462_v52  ;;  %v321_v50 = vld [vmem:[%s3394_s2 + $0xb0] sm:$0xff]  ;;  %v318_v51 = vld [vmem:[%s3394_s2 + $0x98] sm:$0xff] }
 0x118   : > { %v322_v52 = vld [vmem:[%s3394_s2 + $0xb8] sm:$0xff]  ;;  %v2272_v55 = vcombine.high %v317_v49, %v321_v50 }
 0x119   : > { %v2274_v56 = vcombine.high %v318_v51, %v322_v52  ;;  %v2273_v61 = vcombine.low %v318_v51, %v322_v52  ;;  %v381_v52 = vld [vmem:[%s3394_s2 + $0x290] sm:$0xff] }
 0x11a   : > { %1897 = vmatpush1.bf16.msra.mxu0 %v2459_v57  ;;  %1979 = vmatpush1.bf16.msra.mxu1 %v2461_v58  ;;  %v325_v57 = vld [vmem:[%s3394_s2 + $0xd0] sm:$0xff] }
 0x11b   : > { %1898 = vmatprep.subr.bf16.mxu0 %v2468_v59  ;;  %1980 = vmatprep.subr.bf16.mxu1 %v2470_v60  ;;  %v329_v58 = vld [vmem:[%s3394_s2 + $0xf0] sm:$0xff]  ;;  %v326_v59 = vld [vmem:[%s3394_s2 + $0xd8] sm:$0xff]  ;;  %v2271_v60 = vcombine.low %v317_v49, %v321_v50 }
 0x11c   : > { %v2280_v62 = vcombine.high %v325_v57, %v329_v58 }
 0x11e   : > { %1899 = vmatpush1.bf16.msra.mxu0 %v2467_v1  ;;  %1981 = vmatpush1.bf16.msra.mxu1 %v2469_v2  ;;  %v337_v1 = vld [vmem:[%s3394_s2 + $0x130] sm:$0xff]  ;;  %v334_v2 = vld [vmem:[%s3394_s2 + $0x118] sm:$0xff] }
 0x11f   : > { %1900 = vmatprep.subr.bf16.mxu0 %v2476_v3  ;;  %1982 = vmatprep.subr.bf16.mxu1 %v2478_v4  ;;  %v338_v3 = vld [vmem:[%s3394_s2 + $0x138] sm:$0xff]  ;;  %v2279_v4 = vcombine.low %v325_v57, %v329_v58  ;;  %v2288_v6 = vcombine.high %v333_v0, %v337_v1 }
 0x120   : > { %v2290_v7 = vcombine.high %v334_v2, %v338_v3  ;;  %v2289_v13 = vcombine.low %v334_v2, %v338_v3  ;;  %v397_v3 = vld [vmem:[%s3394_s2 + $0x310] sm:$0xff] }
 0x122   : > { %1901 = vmatpush1.bf16.msra.mxu0 %v2475_v9  ;;  %1983 = vmatpush1.bf16.msra.mxu1 %v2477_v10  ;;  %v345_v9 = vld [vmem:[%s3394_s2 + $0x170] sm:$0xff]  ;;  %v342_v10 = vld [vmem:[%s3394_s2 + $0x158] sm:$0xff] }
 0x123   : > { %1902 = vmatprep.subr.bf16.mxu0 %v2484_v11  ;;  %1984 = vmatprep.subr.bf16.mxu1 %v2486_v12  ;;  %v346_v11 = vld [vmem:[%s3394_s2 + $0x178] sm:$0xff]  ;;  %v2287_v12 = vcombine.low %v333_v0, %v337_v1  ;;  %v2296_v14 = vcombine.high %v341_v8, %v345_v9 }
 0x124   : > { %v2298_v15 = vcombine.high %v342_v10, %v346_v11  ;;  %v2297_v21 = vcombine.low %v342_v10, %v346_v11  ;;  %v405_v11 = vld [vmem:[%s3394_s2 + $0x350] sm:$0xff] }
 0x126   : > { %1903 = vmatpush1.bf16.msra.mxu0 %v2483_v17  ;;  %1985 = vmatpush1.bf16.msra.mxu1 %v2485_v18  ;;  %v353_v17 = vld [vmem:[%s3394_s2 + $0x1b0] sm:$0xff]  ;;  %v350_v18 = vld [vmem:[%s3394_s2 + $0x198] sm:$0xff] }
 0x127   : > { %1904 = vmatprep.subr.bf16.mxu0 %v2492_v19  ;;  %1986 = vmatprep.subr.bf16.mxu1 %v2494_v20  ;;  %v354_v19 = vld [vmem:[%s3394_s2 + $0x1b8] sm:$0xff]  ;;  %v2295_v20 = vcombine.low %v341_v8, %v345_v9  ;;  %v2304_v22 = vcombine.high %v349_v16, %v353_v17 }
 0x128   : > { %v2306_v23 = vcombine.high %v350_v18, %v354_v19  ;;  %v2305_v29 = vcombine.low %v350_v18, %v354_v19  ;;  %v413_v19 = vld [vmem:[%s3394_s2 + $0x390] sm:$0xff] }
 0x12a   : > { %1905 = vmatpush1.bf16.msra.mxu0 %v2491_v25  ;;  %1987 = vmatpush1.bf16.msra.mxu1 %v2493_v26  ;;  %v361_v25 = vld [vmem:[%s3394_s2 + $0x1f0] sm:$0xff]  ;;  %v358_v26 = vld [vmem:[%s3394_s2 + $0x1d8] sm:$0xff] }
 0x12b   : > { %1906 = vmatprep.subr.bf16.mxu0 %v2500_v27  ;;  %1988 = vmatprep.subr.bf16.mxu1 %v2502_v28  ;;  %v362_v27 = vld [vmem:[%s3394_s2 + $0x1f8] sm:$0xff]  ;;  %v2303_v28 = vcombine.low %v349_v16, %v353_v17  ;;  %v2312_v31 = vcombine.high %v357_v24, %v361_v25 }
 0x12c   : > { %v2314_v34 = vcombine.high %v358_v26, %v362_v27  ;;  %v2313_v40 = vcombine.low %v358_v26, %v362_v27  ;;  %v421_v27 = vld [vmem:[%s3394_s2 + $0x3d0] sm:$0xff] }
 0x12e   : > { %1907 = vmatpush1.bf16.msra.mxu0 %v2499_v36  ;;  %1989 = vmatpush1.bf16.msra.mxu1 %v2501_v37  ;;  %v369_v36 = vld [vmem:[%s3394_s2 + $0x230] sm:$0xff]  ;;  %v366_v37 = vld [vmem:[%s3394_s2 + $0x218] sm:$0xff] }
 0x12f   : > { %1999 = vmatprep.subr.bf16.mxu0 %v2256_v38  ;;  %2081 = vmatprep.subr.bf16.mxu1 %v2258_v39  ;;  %v370_v38 = vld [vmem:[%s3394_s2 + $0x238] sm:$0xff]  ;;  %v2311_v39 = vcombine.low %v357_v24, %v361_v25  ;;  %v2320_v43 = vcombine.high %v365_v35, %v369_v36 }
 0x130   : > { %v2322_v44 = vcombine.high %v366_v37, %v370_v38  ;;  %v2321_v49 = vcombine.low %v366_v37, %v370_v38  ;;  %v429_v38 = vld [vmem:[%s3394_s2 + $0x410] sm:$0xff] }
 0x131   : > { %1909 = vmatmul.mubr.bf16.vlgmr.msra.gmra.mrb[4].mxu0 %v3004_v41  ;;  %1991 = vmatmul.mubr.bf16.vlgmr.msra.gmra.mrb[4].mxu1 %v3004_v41 }
 0x132   : > { %2000 = vmatpush1.bf16.msra.mxu0 %v2255_v46  ;;  %2031 = vmatprep.mubr.bf16.mxu0 %v2805_v30  ;;  %v377_v46 = vld [vmem:[%s3394_s2 + $0x270] sm:$0xff] }
 0x133   : > { %2082 = vmatpush1.bf16.msra.mxu1 %v2257_v47  ;;  %2113 = vmatprep.mubr.bf16.mxu1 %v2805_v30  ;;  %v330_v30 = vld [vmem:[%s3394_s2 + $0xf8] sm:$0xff]  ;;  %v2328_v50 = vcombine.high %v373_v45, %v377_v46 }
 0x134   : > { %2001 = vmatprep.subr.bf16.mxu0 %v2264_v32  ;;  %2083 = vmatprep.subr.bf16.mxu1 %v2266_v48  ;;  %v2282_v63 = vcombine.high %v326_v59, %v330_v30  ;;  %v2281_v5 = vcombine.low %v326_v59, %v330_v30  ;;  %v374_v47 = vld [vmem:[%s3394_s2 + $0x258] sm:$0xff]  ;;  %v2319_v48 = vcombine.low %v365_v35, %v369_v36  ;;  %v389_v30 = vld [vmem:[%s3394_s2 + $0x2d0] sm:$0xff] }
 0x135   : > { %v378_v32 = vld [vmem:[%s3394_s2 + $0x278] sm:$0xff] }
 0x136   : > { %2002 = vmatpush1.bf16.msra.mxu0 %v2263_v53  ;;  %v2330_v51 = vcombine.high %v374_v47, %v378_v32  ;;  %v385_v53 = vld [vmem:[%s3394_s2 + $0x2b0] sm:$0xff]  ;;  %v2329_v57 = vcombine.low %v374_v47, %v378_v32 }
 0x137   : > { %2084 = vmatpush1.bf16.msra.mxu1 %v2265_v54  ;;  %2003 = vmatprep.subr.bf16.mxu0 %v2272_v55  ;;  %v382_v54 = vld [vmem:[%s3394_s2 + $0x298] sm:$0xff]  ;;  %v2336_v58 = vcombine.high %v381_v52, %v385_v53  ;;  %v437_v32 = vld [vmem:[%s3394_s2 + $0x450] sm:$0xff] }
 0x138   : > { %2085 = vmatprep.subr.bf16.mxu1 %v2274_v56  ;;  %v386_v55 = vld [vmem:[%s3394_s2 + $0x2b8] sm:$0xff]  ;;  %v2327_v56 = vcombine.low %v373_v45, %v377_v46 }
 0x139   : > { %v2338_v59 = vcombine.high %v382_v54, %v386_v55  ;;  %v2337_v0 = vcombine.low %v382_v54, %v386_v55  ;;  %v445_v54 = vld [vmem:[%s3394_s2 + $0x490] sm:$0xff] }
 0x13a   : > { %2004 = vmatpush1.bf16.msra.mxu0 %v2271_v60  ;;  %v393_v60 = vld [vmem:[%s3394_s2 + $0x2f0] sm:$0xff] }
 0x13b   : > { %2086 = vmatpush1.bf16.msra.mxu1 %v2273_v61  ;;  %2005 = vmatprep.subr.bf16.mxu0 %v2280_v62  ;;  %v390_v61 = vld [vmem:[%s3394_s2 + $0x2d8] sm:$0xff]  ;;  %v2344_v1 = vcombine.high %v389_v30, %v393_v60  ;;  %v449_v55 = vld [vmem:[%s3394_s2 + $0x4b0] sm:$0xff] }
 0x13c   : > { %2087 = vmatprep.subr.bf16.mxu1 %v2282_v63  ;;  %v394_v62 = vld [vmem:[%s3394_s2 + $0x2f8] sm:$0xff]  ;;  %v2335_v63 = vcombine.low %v381_v52, %v385_v53 }
 0x13d   : > { %v2346_v2 = vcombine.high %v390_v61, %v394_v62  ;;  %v2345_v8 = vcombine.low %v390_v61, %v394_v62  ;;  %v453_v62 = vld [vmem:[%s3394_s2 + $0x4d0] sm:$0xff] }
 0x13e   : > { %2006 = vmatpush1.bf16.msra.mxu0 %v2279_v4  ;;  %v401_v4 = vld [vmem:[%s3394_s2 + $0x330] sm:$0xff] }
 0x13f   : > { %2088 = vmatpush1.bf16.msra.mxu1 %v2281_v5  ;;  %2007 = vmatprep.subr.bf16.mxu0 %v2288_v6  ;;  %v398_v5 = vld [vmem:[%s3394_s2 + $0x318] sm:$0xff]  ;;  %v2352_v9 = vcombine.high %v397_v3, %v401_v4 }
 0x140   : > { %2089 = vmatprep.subr.bf16.mxu1 %v2290_v7  ;;  %v402_v6 = vld [vmem:[%s3394_s2 + $0x338] sm:$0xff]  ;;  %v2343_v7 = vcombine.low %v389_v30, %v393_v60  ;;  %v2400_v60 = vcombine.high %v445_v54, %v449_v55 }
 0x141   : > { %v2354_v10 = vcombine.high %v398_v5, %v402_v6  ;;  %v2353_v16 = vcombine.low %v398_v5, %v402_v6  ;;  %v465_v5 = vld [vmem:[%s3394_s2 + $0x530] sm:$0xff]  ;;  %v462_v6 = vld [vmem:[%s3394_s2 + $0x518] sm:$0xff] }
 0x142   : > { %2008 = vmatpush1.bf16.msra.mxu0 %v2287_v12  ;;  %v409_v12 = vld [vmem:[%s3394_s2 + $0x370] sm:$0xff] }
 0x143   : > { %2090 = vmatpush1.bf16.msra.mxu1 %v2289_v13  ;;  %2009 = vmatprep.subr.bf16.mxu0 %v2296_v14  ;;  %v406_v13 = vld [vmem:[%s3394_s2 + $0x358] sm:$0xff]  ;;  %v2360_v17 = vcombine.high %v405_v11, %v409_v12 }
 0x144   : > { %2091 = vmatprep.subr.bf16.mxu1 %v2298_v15  ;;  %v410_v14 = vld [vmem:[%s3394_s2 + $0x378] sm:$0xff]  ;;  %v2351_v15 = vcombine.low %v397_v3, %v401_v4  ;;  %v461_v4 = vld [vmem:[%s3394_s2 + $0x510] sm:$0xff] }
 0x145   : > { %v2362_v18 = vcombine.high %v406_v13, %v410_v14  ;;  %v2361_v24 = vcombine.low %v406_v13, %v410_v14  ;;  %v473_v13 = vld [vmem:[%s3394_s2 + $0x570] sm:$0xff]  ;;  %v470_v14 = vld [vmem:[%s3394_s2 + $0x558] sm:$0xff] }
 0x146   : > { %2010 = vmatpush1.bf16.msra.mxu0 %v2295_v20  ;;  %v417_v20 = vld [vmem:[%s3394_s2 + $0x3b0] sm:$0xff] }
 0x147   : > { %2092 = vmatpush1.bf16.msra.mxu1 %v2297_v21  ;;  %2011 = vmatprep.subr.bf16.mxu0 %v2304_v22  ;;  %v414_v21 = vld [vmem:[%s3394_s2 + $0x398] sm:$0xff]  ;;  %v2368_v25 = vcombine.high %v413_v19, %v417_v20 }
 0x148   : > { %2093 = vmatprep.subr.bf16.mxu1 %v2306_v23  ;;  %v418_v22 = vld [vmem:[%s3394_s2 + $0x3b8] sm:$0xff]  ;;  %v2359_v23 = vcombine.low %v405_v11, %v409_v12  ;;  %v469_v12 = vld [vmem:[%s3394_s2 + $0x550] sm:$0xff] }
 0x149   : > { %v2370_v26 = vcombine.high %v414_v21, %v418_v22  ;;  %v2369_v35 = vcombine.low %v414_v21, %v418_v22  ;;  %v481_v21 = vld [vmem:[%s3394_s2 + $0x5b0] sm:$0xff]  ;;  %v478_v22 = vld [vmem:[%s3394_s2 + $0x598] sm:$0xff] }
 0x14a   : > { %2012 = vmatpush1.bf16.msra.mxu0 %v2303_v28  ;;  %v425_v28 = vld [vmem:[%s3394_s2 + $0x3f0] sm:$0xff] }
 0x14b   : > { %2094 = vmatpush1.bf16.msra.mxu1 %v2305_v29  ;;  %2013 = vmatprep.subr.bf16.mxu0 %v2312_v31  ;;  %v422_v29 = vld [vmem:[%s3394_s2 + $0x3d8] sm:$0xff]  ;;  %v2376_v36 = vcombine.high %v421_v27, %v425_v28 }
 0x14c   : > { %2095 = vmatprep.subr.bf16.mxu1 %v2314_v34  ;;  %v426_v31 = vld [vmem:[%s3394_s2 + $0x3f8] sm:$0xff]  ;;  %v2367_v34 = vcombine.low %v413_v19, %v417_v20  ;;  %v477_v20 = vld [vmem:[%s3394_s2 + $0x590] sm:$0xff] }
 0x14d   : > { %v2378_v37 = vcombine.high %v422_v29, %v426_v31  ;;  %v2377_v45 = vcombine.low %v422_v29, %v426_v31  ;;  %v489_v29 = vld [vmem:[%s3394_s2 + $0x5f0] sm:$0xff]  ;;  %v486_v31 = vld [vmem:[%s3394_s2 + $0x5d8] sm:$0xff] }
 0x14e   : > { %2014 = vmatpush1.bf16.msra.mxu0 %v2311_v39  ;;  %v433_v39 = vld [vmem:[%s3394_s2 + $0x430] sm:$0xff] }
 0x14f   : > { %2096 = vmatpush1.bf16.msra.mxu1 %v2313_v40  ;;  %2015 = vmatprep.subr.bf16.mxu0 %v2320_v43  ;;  %v430_v40 = vld [vmem:[%s3394_s2 + $0x418] sm:$0xff]  ;;  %v2384_v46 = vcombine.high %v429_v38, %v433_v39 }
 0x150   : > { %2097 = vmatprep.subr.bf16.mxu1 %v2322_v44  ;;  %v434_v43 = vld [vmem:[%s3394_s2 + $0x438] sm:$0xff]  ;;  %v2375_v44 = vcombine.low %v421_v27, %v425_v28  ;;  %v485_v28 = vld [vmem:[%s3394_s2 + $0x5d0] sm:$0xff] }
 0x151   : > { %v2386_v47 = vcombine.high %v430_v40, %v434_v43  ;;  %v2385_v52 = vcombine.low %v430_v40, %v434_v43  ;;  %v497_v40 = vld [vmem:[%s3394_s2 + $0x630] sm:$0xff]  ;;  %v494_v43 = vld [vmem:[%s3394_s2 + $0x618] sm:$0xff] }
 0x152   : > { %2016 = vmatpush1.bf16.msra.mxu0 %v2319_v48  ;;  %v441_v48 = vld [vmem:[%s3394_s2 + $0x470] sm:$0xff] }
 0x153   : > { %2098 = vmatpush1.bf16.msra.mxu1 %v2321_v49  ;;  %2017 = vmatprep.subr.bf16.mxu0 %v2328_v50  ;;  %v2383_v49 = vcombine.low %v429_v38, %v433_v39  ;;  %v438_v50 = vld [vmem:[%s3394_s2 + $0x458] sm:$0xff]  ;;  %v2392_v53 = vcombine.high %v437_v32, %v441_v48  ;;  %v493_v39 = vld [vmem:[%s3394_s2 + $0x610] sm:$0xff] }
 0x154   : > { %2099 = vmatprep.subr.bf16.mxu1 %v2330_v51  ;;  %v442_v51 = vld [vmem:[%s3394_s2 + $0x478] sm:$0xff] }
 0x155   : > { %v2393_v30 = vcombine.low %v438_v50, %v442_v51 }
 0x156   : > { %2018 = vmatpush1.bf16.msra.mxu0 %v2327_v56  ;;  %v2394_v56 = vcombine.high %v438_v50, %v442_v51  ;;  %v502_v50 = vld [vmem:[%s3394_s2 + $0x658] sm:$0xff] }
 0x157   : > { %2100 = vmatpush1.bf16.msra.mxu1 %v2329_v57  ;;  %2019 = vmatprep.subr.bf16.mxu0 %v2336_v58  ;;  %v446_v57 = vld [vmem:[%s3394_s2 + $0x498] sm:$0xff] }
 0x158   : > { %2101 = vmatprep.subr.bf16.mxu1 %v2338_v59  ;;  %v450_v58 = vld [vmem:[%s3394_s2 + $0x4b8] sm:$0xff]  ;;  %v2391_v59 = vcombine.low %v437_v32, %v441_v48  ;;  %v501_v48 = vld [vmem:[%s3394_s2 + $0x650] sm:$0xff] }
 0x159   : > { %v2402_v61 = vcombine.high %v446_v57, %v450_v58  ;;  %v506_v51 = vld [vmem:[%s3394_s2 + $0x678] sm:$0xff] }
 0x15a   : > { %2020 = vmatpush1.bf16.msra.mxu0 %v2335_v63  ;;  %v457_v63 = vld [vmem:[%s3394_s2 + $0x4f0] sm:$0xff] }
 0x15b   : > { %2102 = vmatpush1.bf16.msra.mxu1 %v2337_v0  ;;  %2021 = vmatprep.subr.bf16.mxu0 %v2344_v1  ;;  %v458_v0 = vld [vmem:[%s3394_s2 + $0x4f8] sm:$0xff]  ;;  %v2401_v1 = vcombine.low %v446_v57, %v450_v58  ;;  %v513_v57 = vld [vmem:[%s3394_s2 + $0x6b0] sm:$0xff] }
 0x15c   : > { %2103 = vmatprep.subr.bf16.mxu1 %v2346_v2  ;;  %v2408_v2 = vcombine.high %v453_v62, %v457_v63  ;;  %v510_v58 = vld [vmem:[%s3394_s2 + $0x698] sm:$0xff] }
 0x15e   : > { %2022 = vmatpush1.bf16.msra.mxu0 %v2343_v7  ;;  %v466_v7 = vld [vmem:[%s3394_s2 + $0x538] sm:$0xff] }
 0x15f   : > { %2104 = vmatpush1.bf16.msra.mxu1 %v2345_v8  ;;  %2023 = vmatprep.subr.bf16.mxu0 %v2352_v9  ;;  %v2407_v8 = vcombine.low %v453_v62, %v457_v63  ;;  %v2418_v11 = vcombine.high %v462_v6, %v466_v7  ;;  %v517_v63 = vld [vmem:[%s3394_s2 + $0x6d0] sm:$0xff] }
 0x160   : > { %2105 = vmatprep.subr.bf16.mxu1 %v2354_v10  ;;  %v2416_v10 = vcombine.high %v461_v4, %v465_v5 }
 0x162   : > { %2024 = vmatpush1.bf16.msra.mxu0 %v2351_v15  ;;  %v474_v15 = vld [vmem:[%s3394_s2 + $0x578] sm:$0xff] }
 0x163   : > { %2106 = vmatpush1.bf16.msra.mxu1 %v2353_v16  ;;  %2025 = vmatprep.subr.bf16.mxu0 %v2360_v17  ;;  %v2415_v16 = vcombine.low %v461_v4, %v465_v5  ;;  %v2417_v17 = vcombine.low %v462_v6, %v466_v7  ;;  %v2426_v19 = vcombine.high %v470_v14, %v474_v15  ;;  %v525_v5 = vld [vmem:[%s3394_s2 + $0x710] sm:$0xff]  ;;  %v526_v7 = vld [vmem:[%s3394_s2 + $0x718] sm:$0xff] }
 0x164   : > { %2107 = vmatprep.subr.bf16.mxu1 %v2362_v18  ;;  %v2424_v18 = vcombine.high %v469_v12, %v473_v13  ;;  %v529_v6 = vld [vmem:[%s3394_s2 + $0x730] sm:$0xff] }
 0x166   : > { %2026 = vmatpush1.bf16.msra.mxu0 %v2359_v23  ;;  %v482_v23 = vld [vmem:[%s3394_s2 + $0x5b8] sm:$0xff] }
 0x167   : > { %2108 = vmatpush1.bf16.msra.mxu1 %v2361_v24  ;;  %2027 = vmatprep.subr.bf16.mxu0 %v2368_v25  ;;  %v2423_v24 = vcombine.low %v469_v12, %v473_v13  ;;  %v2425_v25 = vcombine.low %v470_v14, %v474_v15  ;;  %v2434_v27 = vcombine.high %v478_v22, %v482_v23  ;;  %v533_v13 = vld [vmem:[%s3394_s2 + $0x750] sm:$0xff]  ;;  %v534_v15 = vld [vmem:[%s3394_s2 + $0x758] sm:$0xff] }
 0x168   : > { %2109 = vmatprep.subr.bf16.mxu1 %v2370_v26  ;;  %v2432_v26 = vcombine.high %v477_v20, %v481_v21  ;;  %v537_v14 = vld [vmem:[%s3394_s2 + $0x770] sm:$0xff] }
 0x16a   : > { %2028 = vmatpush1.bf16.msra.mxu0 %v2367_v34  ;;  %v490_v34 = vld [vmem:[%s3394_s2 + $0x5f8] sm:$0xff] }
 0x16b   : > { %2110 = vmatpush1.bf16.msra.mxu1 %v2369_v35  ;;  %2029 = vmatprep.subr.bf16.mxu0 %v2376_v36  ;;  %v2431_v35 = vcombine.low %v477_v20, %v481_v21  ;;  %v2433_v36 = vcombine.low %v478_v22, %v482_v23  ;;  %v2442_v38 = vcombine.high %v486_v31, %v490_v34  ;;  %v541_v21 = vld [vmem:[%s3394_s2 + $0x790] sm:$0xff]  ;;  %v542_v23 = vld [vmem:[%s3394_s2 + $0x798] sm:$0xff] }
 0x16c   : > { %2111 = vmatprep.subr.bf16.mxu1 %v2378_v37  ;;  %v2440_v37 = vcombine.high %v485_v28, %v489_v29  ;;  %v545_v22 = vld [vmem:[%s3394_s2 + $0x7b0] sm:$0xff] }
 0x16e   : > { %2030 = vmatpush1.bf16.msra.mxu0 %v2375_v44  ;;  %v498_v44 = vld [vmem:[%s3394_s2 + $0x638] sm:$0xff] }
 0x16f   : > { %2112 = vmatpush1.bf16.msra.mxu1 %v2377_v45  ;;  %2040 = vmatprep.subr.bf16.mxu0 %v2384_v46  ;;  %v2439_v45 = vcombine.low %v485_v28, %v489_v29  ;;  %v2441_v46 = vcombine.low %v486_v31, %v490_v34  ;;  %v2450_v32 = vcombine.high %v494_v43, %v498_v44  ;;  %v549_v29 = vld [vmem:[%s3394_s2 + $0x7d0] sm:$0xff]  ;;  %v550_v34 = vld [vmem:[%s3394_s2 + $0x7d8] sm:$0xff] }
 0x170   : > { %2122 = vmatprep.subr.bf16.mxu1 %v2386_v47  ;;  %v2448_v47 = vcombine.high %v493_v39, %v497_v40  ;;  %v553_v31 = vld [vmem:[%s3394_s2 + $0x7f0] sm:$0xff] }
 0x171   : > { %2032 = vmatmul.mubr.bf16.vlgmr.msra.gmra.mrb[8].mxu0 %v2809_v33 }
 0x172   : > { %2114 = vmatmul.mubr.bf16.vlgmr.msra.gmra.mrb[8].mxu1 %v2809_v33  ;;  %2041 = vmatpush1.bf16.msra.mxu0 %v2383_v49  ;;  %v454_v33 = vld [vmem:[%s3394_s2 + $0x4d8] sm:$0xff]  ;;  %v505_v49 = vld [vmem:[%s3394_s2 + $0x670] sm:$0xff] }
 0x173   : > { %2072 = vmatprep.mubr.bf16.mxu0 %v2825_v42  ;;  %2123 = vmatpush1.bf16.msra.mxu1 %v2385_v52  ;;  %v2410_v3 = vcombine.high %v454_v33, %v458_v0  ;;  %v2409_v9 = vcombine.low %v454_v33, %v458_v0  ;;  %v2447_v52 = vcombine.low %v493_v39, %v497_v40  ;;  %v521_v33 = vld [vmem:[%s3394_s2 + $0x6f0] sm:$0xff]  ;;  %v518_v0 = vld [vmem:[%s3394_s2 + $0x6d8] sm:$0xff] }
 0x174   : > { %2154 = vmatprep.mubr.bf16.mxu1 %v2825_v42  ;;  %2042 = vmatprep.subr.bf16.mxu0 %v2392_v53  ;;  %v2399_v42 = vcombine.low %v445_v54, %v449_v55  ;;  %v2449_v53 = vcombine.low %v494_v43, %v498_v44  ;;  %v2456_v54 = vcombine.high %v501_v48, %v505_v49 }
 0x175   : > { %2124 = vmatprep.subr.bf16.mxu1 %v2394_v56  ;;  %v2458_v55 = vcombine.high %v502_v50, %v506_v51  ;;  %v509_v56 = vld [vmem:[%s3394_s2 + $0x690] sm:$0xff]  ;;  %v2503_v40 = vcombine.low %v549_v29, %v553_v31 }
 0x176   : > { %2043 = vmatpush1.bf16.msra.mxu0 %v2391_v59  ;;  %v514_v59 = vld [vmem:[%s3394_s2 + $0x6b8] sm:$0xff] }
 0x177   : > { %2125 = vmatpush1.bf16.msra.mxu1 %v2393_v30  ;;  %2044 = vmatprep.subr.bf16.mxu0 %v2400_v60  ;;  %v2455_v30 = vcombine.low %v501_v48, %v505_v49  ;;  %v2457_v60 = vcombine.low %v502_v50, %v506_v51  ;;  %v2466_v62 = vcombine.high %v510_v58, %v514_v59 }
 0x178   : > { %2126 = vmatprep.subr.bf16.mxu1 %v2402_v61  ;;  %v2464_v61 = vcombine.high %v509_v56, %v513_v57 }
 0x17a   : > { %2045 = vmatpush1.bf16.msra.mxu0 %v2399_v42  ;;  %v522_v42 = vld [vmem:[%s3394_s2 + $0x6f8] sm:$0xff] }
 0x17b   : > { %2127 = vmatpush1.bf16.msra.mxu1 %v2401_v1  ;;  %2046 = vmatprep.subr.bf16.mxu0 %v2408_v2  ;;  %v2463_v1 = vcombine.low %v509_v56, %v513_v57  ;;  %v2465_v2 = vcombine.low %v510_v58, %v514_v59  ;;  %v2474_v4 = vcombine.high %v518_v0, %v522_v42 }
 0x17c   : > { %2128 = vmatprep.subr.bf16.mxu1 %v2410_v3  ;;  %v2472_v3 = vcombine.high %v517_v63, %v521_v33 }
 0x17e   : > { %2047 = vmatpush1.bf16.msra.mxu0 %v2407_v8  ;;  %v530_v8 = vld [vmem:[%s3394_s2 + $0x738] sm:$0xff] }
 0x17f   : > { %2129 = vmatpush1.bf16.msra.mxu1 %v2409_v9  ;;  %2048 = vmatprep.subr.bf16.mxu0 %v2416_v10  ;;  %v2471_v9 = vcombine.low %v517_v63, %v521_v33  ;;  %v2473_v10 = vcombine.low %v518_v0, %v522_v42  ;;  %v2482_v12 = vcombine.high %v526_v7, %v530_v8 }
 0x180   : > { %2130 = vmatprep.subr.bf16.mxu1 %v2418_v11  ;;  %v2480_v11 = vcombine.high %v525_v5, %v529_v6 }
 0x182   : > { %2049 = vmatpush1.bf16.msra.mxu0 %v2415_v16  ;;  %v538_v16 = vld [vmem:[%s3394_s2 + $0x778] sm:$0xff] }
 0x183   : > { %2131 = vmatpush1.bf16.msra.mxu1 %v2417_v17  ;;  %2050 = vmatprep.subr.bf16.mxu0 %v2424_v18  ;;  %v2479_v17 = vcombine.low %v525_v5, %v529_v6  ;;  %v2481_v18 = vcombine.low %v526_v7, %v530_v8  ;;  %v2490_v20 = vcombine.high %v534_v15, %v538_v16 }
 0x184   : > { %2132 = vmatprep.subr.bf16.mxu1 %v2426_v19  ;;  %v2488_v19 = vcombine.high %v533_v13, %v537_v14 }
 0x186   : > { %2051 = vmatpush1.bf16.msra.mxu0 %v2423_v24  ;;  %v546_v24 = vld [vmem:[%s3394_s2 + $0x7b8] sm:$0xff] }
 0x187   : > { %2133 = vmatpush1.bf16.msra.mxu1 %v2425_v25  ;;  %2052 = vmatprep.subr.bf16.mxu0 %v2432_v26  ;;  %v2487_v25 = vcombine.low %v533_v13, %v537_v14  ;;  %v2489_v26 = vcombine.low %v534_v15, %v538_v16  ;;  %v2498_v28 = vcombine.high %v542_v23, %v546_v24 }
 0x188   : > { %2134 = vmatprep.subr.bf16.mxu1 %v2434_v27  ;;  %v2496_v27 = vcombine.high %v541_v21, %v545_v22 }
 0x18a   : > { %2053 = vmatpush1.bf16.msra.mxu0 %v2431_v35  ;;  %v554_v35 = vld [vmem:[%s3394_s2 + $0x7f8] sm:$0xff] }
 0x18b   : > { %2135 = vmatpush1.bf16.msra.mxu1 %v2433_v36  ;;  %2054 = vmatprep.subr.bf16.mxu0 %v2440_v37  ;;  %v2495_v36 = vcombine.low %v541_v21, %v545_v22  ;;  %v2497_v37 = vcombine.low %v542_v23, %v546_v24  ;;  %v2506_v39 = vcombine.high %v550_v34, %v554_v35 }
 0x18c   : > { %2136 = vmatprep.subr.bf16.mxu1 %v2442_v38  ;;  %v2504_v38 = vcombine.high %v549_v29, %v553_v31  ;;  %v2505_v43 = vcombine.low %v550_v34, %v554_v35 }
 0x18e   : > { %2055 = vmatpush1.bf16.msra.mxu0 %v2439_v45 }
 0x18f   : > { %2137 = vmatpush1.bf16.msra.mxu1 %v2441_v46  ;;  %2056 = vmatprep.subr.bf16.mxu0 %v2448_v47 }
 0x190   : > { %2138 = vmatprep.subr.bf16.mxu1 %v2450_v32 }
 0x192   : > { %2057 = vmatpush1.bf16.msra.mxu0 %v2447_v52 }
 0x193   : > { %2139 = vmatpush1.bf16.msra.mxu1 %v2449_v53  ;;  %2058 = vmatprep.subr.bf16.mxu0 %v2456_v54 }
 0x194   : > { %2140 = vmatprep.subr.bf16.mxu1 %v2458_v55 }
 0x196   : > { %2059 = vmatpush1.bf16.msra.mxu0 %v2455_v30 }
 0x197   : > { %2141 = vmatpush1.bf16.msra.mxu1 %v2457_v60  ;;  %2060 = vmatprep.subr.bf16.mxu0 %v2464_v61 }
 0x198   : > { %2142 = vmatprep.subr.bf16.mxu1 %v2466_v62 }
 0x19a   : > { %2061 = vmatpush1.bf16.msra.mxu0 %v2463_v1 }
 0x19b   : > { %2143 = vmatpush1.bf16.msra.mxu1 %v2465_v2  ;;  %2062 = vmatprep.subr.bf16.mxu0 %v2472_v3 }
 0x19c   : > { %2144 = vmatprep.subr.bf16.mxu1 %v2474_v4 }
 0x19e   : > { %2063 = vmatpush1.bf16.msra.mxu0 %v2471_v9 }
 0x19f   : > { %2145 = vmatpush1.bf16.msra.mxu1 %v2473_v10  ;;  %2064 = vmatprep.subr.bf16.mxu0 %v2480_v11 }
 0x1a0   : > { %2146 = vmatprep.subr.bf16.mxu1 %v2482_v12 }
 0x1a2   : > { %2065 = vmatpush1.bf16.msra.mxu0 %v2479_v17 }
 0x1a3   : > { %2147 = vmatpush1.bf16.msra.mxu1 %v2481_v18  ;;  %2066 = vmatprep.subr.bf16.mxu0 %v2488_v19 }
 0x1a4   : > { %2148 = vmatprep.subr.bf16.mxu1 %v2490_v20 }
 0x1a6   : > { %2067 = vmatpush1.bf16.msra.mxu0 %v2487_v25 }
 0x1a7   : > { %2149 = vmatpush1.bf16.msra.mxu1 %v2489_v26  ;;  %2068 = vmatprep.subr.bf16.mxu0 %v2496_v27 }
 0x1a8   : > { %2150 = vmatprep.subr.bf16.mxu1 %v2498_v28 }
 0x1aa   : > { %2069 = vmatpush1.bf16.msra.mxu0 %v2495_v36 }
 0x1ab   : > { %2151 = vmatpush1.bf16.msra.mxu1 %v2497_v37  ;;  %2070 = vmatprep.subr.bf16.mxu0 %v2504_v38 }
 0x1ac   : > { %2152 = vmatprep.subr.bf16.mxu1 %v2506_v39 }
 0x1ae   : > { %2071 = vmatpush1.bf16.msra.mxu0 %v2503_v40 }
 0x1af   : > { %2153 = vmatpush1.bf16.msra.mxu1 %v2505_v43 }
 0x1b1   : > { %2073 = vmatmul.mubr.bf16.vlgmr.msra.gmra.mrb[8].mxu0 %v3004_v41 }
 0x1b2   : > { %2155 = vmatmul.mubr.bf16.vlgmr.msra.gmra.mrb[8].mxu1 %v3004_v41 }
 0x204   : > { %v1910_v44 = vpop.f32.mrb[4].mxu0  ;;  %v1992_v45 = vpop.f32.mrb[4].mxu1 }
 0x205   : > { %v1912_v46 = vpop.f32.mrb[5].mxu0  ;;  %v1994_v47 = vpop.f32.mrb[5].mxu1 }
 0x206   : > { %v2171_v32 = vcombine.low %v1910_v44, %v1912_v46  ;;  %v2172_v48 = vcombine.low %v1992_v45, %v1994_v47  ;;  %v1914_v49 = vpop.f32.mrb[6].mxu0  ;;  %v1996_v50 = vpop.f32.mrb[6].mxu1 }
 0x207   : > { %v1915_v51 = vpop.f32.mrb[7].mxu0  ;;  %v1997_v52 = vpop.f32.mrb[7].mxu1 }
 0x208   : > { %2179 = vst [vmem:[%s167_s8] sm:$0xff] %v2171_v32  ;;  %2180 = vst [vmem:[%s167_s8 + $0x8] sm:$0xff] %v2172_v48 }
 0x284   : > { %v2074_v53 = vpop.f32.mrb[8].mxu0 }
 0x285   : > { %v2156_v54 = vpop.f32.mrb[8].mxu1  ;;  %v2076_v41 = vpop.f32.mrb[9].mxu0 }
 0x286   : > { %v2173_v55 = vcombine.low %v2074_v53, %v2076_v41  ;;  %v2158_v56 = vpop.f32.mrb[9].mxu1  ;;  %v2078_v57 = vpop.f32.mrb[10].mxu0 }
 0x287   : > { %v2174_v58 = vcombine.low %v2156_v54, %v2158_v56  ;;  %v2160_v59 = vpop.f32.mrb[10].mxu1  ;;  %v2079_v30 = vpop.f32.mrb[11].mxu0 }
 0x288   : > { %2181 = vst [vmem:[%s167_s8 + $0x10] sm:$0xff] %v2173_v55  ;;  %v2161_v60 = vpop.f32.mrb[11].mxu1 }
 0x289   : > { %2182 = vst [vmem:[%s167_s8 + $0x18] sm:$0xff] %v2174_v58 }
 0x28a PF: > { %s13_s12 = sadd.s32 1, %s2542_s12  }
 0x28b   : > { %p10_p4 = scmp.ge.s32.totalorder %s13_s12, 4  }
 0x28d   :  { %12 = sbr.rel (!%p10_p4) target bundleno = 1 (0x1), region = 62 }

// kernel: dis_forward.17
= control target key start
LH: loop header
LB: loop body
LE: loop exit
PB: predicated region body
PF: predicated region fallthrough
CT: control target
= control target key end

     0   :  { %s1117_s12 = smov 0   ;;  %s1119_s13 = smov 0   ;;  %s1243_s0 = inlined_call_operand.vmem [shape: bf16[32,2560], index: 0, kind: input, shape index: {}]   ;;  %s1244_s1 = inlined_call_operand.vmem [shape: bf16[2560,128], index: 1, kind: input, shape index: {}]   ;;  %s1245_s2 = inlined_call_operand.vmem [shape: f32[1,128], index: 2, kind: input, shape index: {}]   ;;  %s1246_s3 = inlined_call_operand.vmem [shape: f32[32,128], index: 3, kind: output, shape index: {}]  }
   0x1   :  { %s1121_s14 = smov 0   ;;  %s1123_s15 = smov 0  }
   0x2   :  { %s1125_s16 = smov 0  }
   0x3 LB: > { %s25_s17 = sadd.s32 1, %s1090_s15  ;;  %p48_p1 = scmp.ne.s32.totalorder %s1082_s13, %s1078_s12  ;;  %s1094_s16 = sphi %s1125_s16, %s13_s16   ;;  %s1090_s15 = sphi %s1123_s15, %s1250_s15   ;;  %s1086_s14 = sphi %s1121_s14, %s1249_s14   ;;  %s1082_s13 = sphi %s1119_s13, %s1248_s13   ;;  %s1078_s12 = sphi %s1117_s12, %s1247_s12  }
   0x4   : > { %p26_p0 = scmp.ge.s32.totalorder %s25_s17, 5  ;;  %p49_p2 = scmp.eq.s32.totalorder %s1094_s16, 0 }
   0x5   : > { %s41_s19 = sadd.s32 1, %s1082_s13  ;;  %p859_p5 = scmp.ge.s32.totalorder %s1094_s16, 5 }
   0x6   : > { %s1252_s17 = smov (%p26_p0, %s25_s17), 0  ;;  %p50_p3 = por %p49_p2, %p48_p1 }
   0x7   : > { %s37_s18 = ssub.s32 %s1090_s15, %s1252_s17  ;;  %162 = sbr.rel (%p859_p5) target bundleno = 22 (0x16), region = 20 }
   0x8   : > { %p39_p4 = scmp.eq.s32.totalorder %s37_s18, 0 }
   0xa   : > { %s1152_s20 = scalar_select %p39_p4, %s1082_s13, %s41_s19  }
   0xe   : > { %165 = sbr.rel (!%p50_p3) target bundleno = 22 (0x16), region = 24  ;;  %s167_s21 = sand.u32 (%p50_p3), 1, %s1082_s13  }
   0xf   : > { %s914_s22 = sshll.u32 (%p50_p3), %s1090_s15, 4  ;;  %s860_s23 = sshll.u32 (%p50_p3), %s167_s21, 6 }
  0x10   : > { %s175_s26 = scalar_lea.vmem (%p50_p3), %s1243_s0, %s914_s22  ;;  %s169_s27 = scalar_lea.vmem (%p50_p3), [#allocation3], %s860_s23 }
  0x11   : > { %v188_v0 = vld [vmem:[%s175_s26] sm:$0xff] (%p50_p3)  ;;  %v190_v1 = vld [vmem:[%s175_s26 + $0x8] sm:$0xff] (%p50_p3)  ;;  %v192_v2 = vld [vmem:[%s175_s26 + $0x50] sm:$0xff] (%p50_p3) }
  0x12   : > { %189 = vst [vmem:[%s169_s27] sm:$0xff] (%p50_p3), %v188_v0  ;;  %191 = vst [vmem:[%s169_s27 + $0x8] sm:$0xff] (%p50_p3), %v190_v1  ;;  %v194_v3 = vld [vmem:[%s175_s26 + $0x58] sm:$0xff] (%p50_p3)  ;;  %v196_v4 = vld [vmem:[%s175_s26 + $0xa0] sm:$0xff] (%p50_p3) }
  0x13   : > { %193 = vst [vmem:[%s169_s27 + $0x10] sm:$0xff] (%p50_p3), %v192_v2  ;;  %v198_v5 = vld [vmem:[%s175_s26 + $0xa8] sm:$0xff] (%p50_p3)  ;;  %195 = vst [vmem:[%s169_s27 + $0x18] sm:$0xff] (%p50_p3), %v194_v3  ;;  %v200_v6 = vld [vmem:[%s175_s26 + $0xf0] sm:$0xff] (%p50_p3) }
  0x14   : > { %197 = vst [vmem:[%s169_s27 + $0x20] sm:$0xff] (%p50_p3), %v196_v4  ;;  %199 = vst [vmem:[%s169_s27 + $0x28] sm:$0xff] (%p50_p3), %v198_v5  ;;  %v202_v7 = vld [vmem:[%s175_s26 + $0xf8] sm:$0xff] (%p50_p3) }
  0x15   : > { %201 = vst [vmem:[%s169_s27 + $0x30] sm:$0xff] %v200_v6  ;;  %203 = vst [vmem:[%s169_s27 + $0x38] sm:$0xff] %v202_v7 }
  0x16 PF: > { %p863_p6 = scmp.ge.s32.totalorder %s1094_s16, 1  ;;  %p220_p7 = scmp.lt.s32.totalorder %s1094_s16, 6 }
  0x18   : > { %p221_p8 = pnand %p863_p6, %p220_p7 }
  0x19   : > { %s227_s28 = sand.u32 (!%p221_p8), 1, %s1078_s12   ;;  %s865_s29 = sshll.u32 (!%p221_p8), %s1086_s14, 6 }
  0x1a   : > { %224 = sbr.rel (%p221_p8) target bundleno = 318 (0x13e), region = 51  ;;  %s864_s30 = sshll.u32 (!%p221_p8), %s227_s28, 6 }
  0x1b   : > { %p267_p9 = scmp.lt.s32.totalorder (!%p221_p8), %s865_s29, 319  ;;  %s1169_s8 = scalar_lea.vmem (!%p221_p8), [#allocation3], %s864_s30 }
  0x1c   : > { %p867_p10 = scmp.ne.s32.totalorder (!%p221_p8), %s1086_s14, 0 }
  0x21   : > { %s1254_s29 = smov (!%p267_p9, %s865_s29), 319  ;;  %291 = sbr.rel (%p867_p10) target bundleno = 40 (0x28), region = 59 }
  0x22   : > { %s866_s4 = sshll.u32 %s1254_s29, 2  ;;  %v1096_v8 = vmov (!%p867_p10), 0.0  }
  0x23   : > { %s1167_s7 = scalar_lea.vmem %s1244_s1, %s866_s4  ;;  %292 = vst [vmem:[#allocation2] sm:$0xff] (!%p867_p10), %v1096_v8  ;;  %293 = vst [vmem:[#allocation2 + $0x8] sm:$0xff] (!%p867_p10), %v1096_v8 }
  0x24   : > { %294 = vst [vmem:[#allocation2 + $0x10] sm:$0xff] (!%p867_p10), %v1096_v8  ;;  %295 = vst [vmem:[#allocation2 + $0x18] sm:$0xff] (!%p867_p10), %v1096_v8 }
  0x28 PF: > { %v1012_v9 = vld [vmem:[%s1167_s7 + $0x40] sm:$0xff]   ;;  %v1016_v13 = vld [vmem:[%s1167_s7 + $0x48] sm:$0xff]   ;;  %v1020_v17 = vld [vmem:[%s1167_s7 + $0x50] sm:$0xff]   ;;  %p908_p11 = scmp.ne.s32.totalorder %s1086_s14, 4 }
  0x29   : > { %v1013_v10 = vld [vmem:[%s1167_s7 + $0xc0] sm:$0xff]   ;;  %915 = vmatprep.subr.bf16.mxu0 %v1012_v9  ;;  %v1017_v14 = vld [vmem:[%s1167_s7 + $0xc8] sm:$0xff]   ;;  %v1021_v18 = vld [vmem:[%s1167_s7 + $0xd0] sm:$0xff]  }
  0x2a   : > { %v1014_v11 = vld [vmem:[%s1167_s7] sm:$0xff]   ;;  %943 = vmatprep.subr.bf16.mxu1 %v1013_v10  ;;  %v1018_v15 = vld [vmem:[%s1167_s7 + $0x8] sm:$0xff]   ;;  %v1022_v19 = vld [vmem:[%s1167_s7 + $0x10] sm:$0xff]  }
  0x2b   : > { %v1015_v12 = vld [vmem:[%s1167_s7 + $0x80] sm:$0xff]   ;;  %916 = vmatpush3.bf16.msra.mxu0 %v1014_v11  ;;  %v1019_v16 = vld [vmem:[%s1167_s7 + $0x88] sm:$0xff]   ;;  %v1023_v20 = vld [vmem:[%s1167_s7 + $0x90] sm:$0xff]  }
  0x2c   : > { %944 = vmatpush3.bf16.msra.mxu1 %v1015_v12  ;;  %917 = vmatprep.subr.bf16.mxu0 %v1016_v13  ;;  %v1024_v21 = vld [vmem:[%s1167_s7 + $0x58] sm:$0xff]   ;;  %v1028_v25 = vld [vmem:[%s1167_s7 + $0x60] sm:$0xff]   ;;  %v1032_v29 = vld [vmem:[%s1167_s7 + $0x68] sm:$0xff]  }
  0x2d   : > { %945 = vmatprep.subr.bf16.mxu1 %v1017_v14  ;;  %v1025_v22 = vld [vmem:[%s1167_s7 + $0xd8] sm:$0xff]   ;;  %v1029_v26 = vld [vmem:[%s1167_s7 + $0xe0] sm:$0xff]   ;;  %v1033_v30 = vld [vmem:[%s1167_s7 + $0xe8] sm:$0xff]  }
  0x2e   : > { %v1026_v23 = vld [vmem:[%s1167_s7 + $0x18] sm:$0xff]   ;;  %v1030_v27 = vld [vmem:[%s1167_s7 + $0x20] sm:$0xff]   ;;  %v1034_v31 = vld [vmem:[%s1167_s7 + $0x28] sm:$0xff]  }
  0x2f   : > { %918 = vmatpush3.bf16.msra.mxu0 %v1018_v15  ;;  %v1027_v24 = vld [vmem:[%s1167_s7 + $0x98] sm:$0xff]   ;;  %v1031_v28 = vld [vmem:[%s1167_s7 + $0xa0] sm:$0xff]   ;;  %v1035_v32 = vld [vmem:[%s1167_s7 + $0xa8] sm:$0xff]  }
  0x30   : > { %946 = vmatpush3.bf16.msra.mxu1 %v1019_v16  ;;  %919 = vmatprep.subr.bf16.mxu0 %v1020_v17  ;;  %v1036_v33 = vld [vmem:[%s1167_s7 + $0x70] sm:$0xff]   ;;  %v1040_v37 = vld [vmem:[%s1167_s7 + $0x78] sm:$0xff]   ;;  %v296_v58 = vld [vmem:[#allocation2] sm:$0xff] }
  0x31   : > { %947 = vmatprep.subr.bf16.mxu1 %v1021_v18  ;;  %v1037_v34 = vld [vmem:[%s1167_s7 + $0xf0] sm:$0xff]   ;;  %v1041_v38 = vld [vmem:[%s1167_s7 + $0xf8] sm:$0xff]   ;;  %v297_v63 = vld [vmem:[#allocation2 + $0x8] sm:$0xff] }
  0x32   : > { %v1038_v35 = vld [vmem:[%s1167_s7 + $0x30] sm:$0xff]   ;;  %v1042_v39 = vld [vmem:[%s1167_s7 + $0x38] sm:$0xff]  }
  0x33   : > { %920 = vmatpush3.bf16.msra.mxu0 %v1022_v19  ;;  %v1039_v36 = vld [vmem:[%s1167_s7 + $0xb0] sm:$0xff]   ;;  %v1043_v40 = vld [vmem:[%s1167_s7 + $0xb8] sm:$0xff]  }
  0x34   : > { %948 = vmatpush3.bf16.msra.mxu1 %v1023_v20  ;;  %921 = vmatprep.subr.bf16.mxu0 %v1024_v21  ;;  %v1044_v41 = vld [vmem:[%s1169_s8] ss:$16 sps:$4 sm:$0xff]   ;;  %v1046_v42 = vld [vmem:[%s1169_s8 + $0x4] ss:$16 sps:$4 sm:$0xff]   ;;  %v1047_v43 = vld [vmem:[%s1169_s8 + $0x8] ss:$16 sps:$4 sm:$0xff]  }
  0x35   : > { %949 = vmatprep.subr.bf16.mxu1 %v1025_v22  ;;  %v1049_v44 = vld [vmem:[%s1169_s8 + $0xc] ss:$16 sps:$4 sm:$0xff]   ;;  %636 = vmatprep.mubr.bf16.mxu0 %v1046_v42  ;;  %v1050_v45 = vld [vmem:[%s1169_s8 + $0x24] ss:$16 sps:$4 sm:$0xff]   ;;  %v1054_v47 = vld [vmem:[%s1169_s8 + $0x20] ss:$16 sps:$4 sm:$0xff]  }
  0x36   : > { %685 = vmatprep.mubr.bf16.mxu1 %v1049_v44  ;;  %v1052_v46 = vld [vmem:[%s1169_s8 + $0x2c] ss:$16 sps:$4 sm:$0xff]   ;;  %v1055_v48 = vld [vmem:[%s1169_s8 + $0x28] ss:$16 sps:$4 sm:$0xff]   ;;  %v298_v12 = vld [vmem:[#allocation2 + $0x10] sm:$0xff] }
  0x37   : > { %922 = vmatpush3.bf16.msra.mxu0 %v1026_v23  ;;  %v299_v17 = vld [vmem:[#allocation2 + $0x18] sm:$0xff]  ;;  %v909_v22 = vld [vmem:[%s1245_s2] ss:$0 sm:$0xff] (!%p908_p11) }
  0x38   : > { %950 = vmatpush3.bf16.msra.mxu1 %v1027_v24  ;;  %923 = vmatprep.subr.bf16.mxu0 %v1028_v25 }
  0x39   : > { %951 = vmatprep.subr.bf16.mxu1 %v1029_v26 }
  0x3b   : > { %924 = vmatpush3.bf16.msra.mxu0 %v1030_v27 }
  0x3c   : > { %952 = vmatpush3.bf16.msra.mxu1 %v1031_v28  ;;  %925 = vmatprep.subr.bf16.mxu0 %v1032_v29 }
  0x3d   : > { %953 = vmatprep.subr.bf16.mxu1 %v1033_v30 }
  0x3f   : > { %926 = vmatpush3.bf16.msra.mxu0 %v1034_v31 }
  0x40   : > { %954 = vmatpush3.bf16.msra.mxu1 %v1035_v32  ;;  %927 = vmatprep.subr.bf16.mxu0 %v1036_v33 }
  0x41   : > { %955 = vmatprep.subr.bf16.mxu1 %v1037_v34 }
  0x43   : > { %928 = vmatpush3.bf16.msra.mxu0 %v1038_v35 }
  0x44   : > { %956 = vmatpush3.bf16.msra.mxu1 %v1039_v36  ;;  %929 = vmatprep.subr.bf16.mxu0 %v1040_v37 }
  0x45   : > { %957 = vmatprep.subr.bf16.mxu1 %v1041_v38 }
  0x47   : > { %930 = vmatpush3.bf16.msra.mxu0 %v1042_v39 }
  0x48   : > { %958 = vmatpush3.bf16.msra.mxu1 %v1043_v40 }
  0x4a   : > { %637 = vmatmul.mubr.bf16.vlgmr.msra.gmra.mrb[0].mxu0 %v1044_v41 }
  0x4b   : > { %686 = vmatmul.mubr.bf16.vlgmr.msra.gmra.mrb[0].mxu1 %v1047_v43  ;;  %644 = vmatprep.mubr.bf16.mxu0 %v1050_v45 }
  0x4c   : > { %693 = vmatprep.mubr.bf16.mxu1 %v1052_v46 }
  0x52   : > { %645 = vmatmul.mubr.bf16.gmra.mrb[4].mxu0 %v1054_v47 }
  0x53   : > { %694 = vmatmul.mubr.bf16.gmra.mrb[4].mxu1 %v1055_v48 }
 0x11d   : > { %v931_v49 = vpop.f32.mrb[0].mxu0 }
 0x11e   : > { %v959_v50 = vpop.f32.mrb[0].mxu1  ;;  %v932_v51 = vpop.f32.mrb[1].mxu0 }
 0x11f   : > { %v933_v52 = vadd.f32 %v932_v51, %v931_v49  ;;  %v960_v53 = vpop.f32.mrb[1].mxu1  ;;  %v934_v54 = vpop.f32.mrb[2].mxu0 }
 0x120   : > { %v961_v55 = vadd.f32 %v960_v53, %v959_v50  ;;  %v962_v56 = vpop.f32.mrb[2].mxu1  ;;  %v935_v57 = vpop.f32.mrb[3].mxu0 }
 0x121   : > { %v936_v59 = vadd.f32 %v935_v57, %v934_v54  ;;  %v963_v60 = vpop.f32.mrb[3].mxu1 }
 0x122   : > { %v688_v61 = vadd.f32 %v961_v55, %v933_v52  ;;  %v964_v62 = vadd.f32 %v963_v60, %v962_v56 }
 0x124   : > { %v702_v0 = vadd.f32 %v688_v61, %v296_v58  ;;  %v691_v1 = vadd.f32 %v964_v62, %v936_v59 }
 0x125   : > { %v937_v2 = vpop.f32.mrb[4].mxu0 }
 0x126   : > { %706 = vst [vmem:[#allocation2] sm:$0xff] %v702_v0  ;;  %v703_v3 = vadd.f32 %v691_v1, %v297_v63  ;;  %v965_v4 = vpop.f32.mrb[4].mxu1  ;;  %v938_v5 = vpop.f32.mrb[5].mxu0 }
 0x127   : > { %v939_v6 = vadd.f32 %v938_v5, %v937_v2  ;;  %v966_v7 = vpop.f32.mrb[5].mxu1  ;;  %v940_v8 = vpop.f32.mrb[6].mxu0 }
 0x128   : > { %707 = vst [vmem:[#allocation2 + $0x8] sm:$0xff] %v703_v3  ;;  %v967_v9 = vadd.f32 %v966_v7, %v965_v4  ;;  %v968_v10 = vpop.f32.mrb[6].mxu1  ;;  %v941_v11 = vpop.f32.mrb[7].mxu0 }
 0x129   : > { %v942_v13 = vadd.f32 %v941_v11, %v940_v8  ;;  %v969_v14 = vpop.f32.mrb[7].mxu1 }
 0x12a   : > { %v696_v15 = vadd.f32 %v967_v9, %v939_v6  ;;  %v970_v16 = vadd.f32 %v969_v14, %v968_v10  ;;  %713 = sbr.rel (%p908_p11) target bundleno = 318 (0x13e), region = 63 }
 0x12c   : > { %v704_v18 = vadd.f32 %v696_v15, %v298_v12  ;;  %v699_v19 = vadd.f32 %v970_v16, %v942_v13 }
 0x12d   : > { %v714_v21 = vld [vmem:[#allocation2] sm:$0xff] (!%p908_p11) }
 0x12e   : > { %708 = vst [vmem:[#allocation2 + $0x10] sm:$0xff] %v704_v18  ;;  %v705_v20 = vadd.f32 %v699_v19, %v299_v17  ;;  %v725_v24 = vadd.f32 (!%p908_p11), %v909_v22, %v714_v21 }
 0x12f   : > { %v715_v23 = vld [vmem:[#allocation2 + $0x8] sm:$0xff] (!%p908_p11) }
 0x130   : > { %709 = vst [vmem:[#allocation2 + $0x18] sm:$0xff] %v705_v20  ;;  %v726_v25 = vadd.f32 (!%p908_p11), %v909_v22, %v715_v23  ;;  %vm729_vm0 = vcmp.ge.f32.partialorder (!%p908_p11), %v725_v24, 0.0  ;;  %v733_v30 = vmul.f32 (!%p908_p11), 0.2, %v725_v24 }
 0x132   : > { %vm730_vm1 = vcmp.ge.f32.partialorder %v726_v25, 0.0  ;;  %v734_v31 = vmul.f32 0.2, %v726_v25  ;;  %v737_v34 = vsel %vm729_vm0, %v725_v24, %v733_v30 }
 0x133   : > { %741 = vst [vmem:[%s1246_s3] sm:$0xff] %v737_v34 }
 0x134   : > { %v738_v35 = vsel %vm730_vm1, %v726_v25, %v734_v31 }
 0x135   : > { %v716_v26 = vld [vmem:[#allocation2 + $0x10] sm:$0xff]  ;;  %742 = vst [vmem:[%s1246_s3 + $0x8] sm:$0xff] %v738_v35 }
 0x136   : > { %v727_v28 = vadd.f32 %v909_v22, %v716_v26 }
 0x137   : > { %v717_v27 = vld [vmem:[#allocation2 + $0x18] sm:$0xff] }
 0x138   : > { %v728_v29 = vadd.f32 %v909_v22, %v717_v27  ;;  %vm731_vm2 = vcmp.ge.f32.partialorder %v727_v28, 0.0  ;;  %v735_v32 = vmul.f32 0.2, %v727_v28 }
 0x13a   : > { %vm732_vm3 = vcmp.ge.f32.partialorder %v728_v29, 0.0  ;;  %v736_v33 = vmul.f32 0.2, %v728_v29  ;;  %v739_v36 = vsel %vm731_vm2, %v727_v28, %v735_v32 }
 0x13b   : > { %743 = vst [vmem:[%s1246_s3 + $0x10] sm:$0xff] %v739_v36 }
 0x13c   : > { %v740_v37 = vsel %vm732_vm3, %v728_v29, %v736_v33 }
 0x13d   : > { %744 = vst [vmem:[%s1246_s3 + $0x18] sm:$0xff] %v740_v37 }
 0x13e PF: > { %s13_s16 = sadd.s32 1, %s1094_s16   ;;  %s1247_s12 = smov %s1082_s13 }
 0x13f   : > { %p10_p12 = scmp.ge.s32.totalorder %s13_s16, 7   ;;  %s1248_s13 = smov %s1152_s20 }
 0x140   : > { %s1249_s14 = smov %s1090_s15  ;;  %s1250_s15 = smov %s1252_s17 }
 0x141   :  { %12 = sbr.rel (!%p10_p12) target bundleno = 3 (0x3), region = 104 }

// kernel: dis_forward.18
= control target key start
LH: loop header
LB: loop body
LE: loop exit
PB: predicated region body
PF: predicated region fallthrough
CT: control target
= control target key end

     0   :  { %s2552_s12 = smov 0   ;;  %s3378_s0 = inlined_call_operand.vmem [shape: bf16[2,4,512], index: 0, kind: input, shape index: {}]   ;;  %s3379_s1 = inlined_call_operand.vmem [shape: bf16[8,4], index: 1, kind: input, shape index: {}]   ;;  %s3380_s2 = inlined_call_operand.vmem [shape: bf16[512,1024], index: 2, kind: input, shape index: {}]   ;;  %s3381_s3 = inlined_call_operand.vmem [shape: f32[2,8,1024], index: 3, kind: output, shape index: {}]  }
   0x1 LB: > { %s2222_s13 = sadd.s32 4294967295, %s2528_s12   ;;  %p2226_p0 = scmp.ge.s32.totalorder %s2528_s12, 1  ;;  %s2528_s12 = sphi %s2552_s12, %s13_s12  }
   0x2   : > { %p137_p1 = scmp.lt.s32.totalorder %s2528_s12, 3 }
   0x4   : > { %p138_p2 = pnand %p2226_p0, %p137_p1 }
   0x5   : > { %p161_p3 = scmp.lt.s32.totalorder (!%p138_p2), %s2222_s13, 1  ;;  %v179_v0 = vlaneseq (!%p138_p2)  ;;  %v2530_v1 = vmov (!%p138_p2), 1983009808   ;;  %v2531_v3 = vmov (!%p138_p2), 0   ;;  %vm196_vm0 = vcmask (!%p138_p2), 1041408   ;;  %v295_v8 = vld [vmem:[%s3380_s2] sm:$0xff] (!%p138_p2) }
   0x6   : > { %141 = sbr.rel (%p138_p2) target bundleno = 649 (0x289), region = 32  ;;  %v177_v2 = vunpack.c.l.s4 (!%p138_p2), %v2530_v1  ;;  %241 = vmatprep.mubr.bf16.mxu0 (!%p138_p2), %v2531_v3  ;;  %282 = vmatprep.mubr.bf16.mxu1 (!%p138_p2), %v2531_v3  ;;  %v299_v9 = vld [vmem:[%s3380_s2 + $0x20] sm:$0xff] (!%p138_p2)  ;;  %v296_v12 = vld [vmem:[%s3380_s2 + $0x8] sm:$0xff] (!%p138_p2)  ;;  %vm192_vm1 = vcmask (!%p138_p2), 31744  }
   0x7   : > { %v180_v4 = vshrl.u32 (!%p138_p2), %v179_v0, 7  ;;  %v300_v13 = vld [vmem:[%s3380_s2 + $0x28] sm:$0xff] (!%p138_p2)  ;;  %v2236_v17 = vcombine.high (!%p138_p2), %v295_v8, %v299_v9  ;;  %v303_v18 = vld [vmem:[%s3380_s2 + $0x40] sm:$0xff] (!%p138_p2)  ;;  %v2235_v24 = vcombine.low (!%p138_p2), %v295_v8, %v299_v9 }
   0x8   : > { %v178_v5 = vunpack.c.0.s8 (!%p138_p2), %v177_v2  ;;  %v307_v19 = vld [vmem:[%s3380_s2 + $0x60] sm:$0xff] (!%p138_p2)  ;;  %v2238_v22 = vcombine.high (!%p138_p2), %v296_v12, %v300_v13  ;;  %v304_v25 = vld [vmem:[%s3380_s2 + $0x48] sm:$0xff] (!%p138_p2)  ;;  %v2237_v28 = vcombine.low (!%p138_p2), %v296_v12, %v300_v13 }
   0x9   : > { %v173_v23 = vld [vmem:[%s3379_s1] sm:$0xf] (!%p138_p2)  ;;  %v308_v26 = vld [vmem:[%s3380_s2 + $0x68] sm:$0xff] (!%p138_p2)  ;;  %v2244_v27 = vcombine.high (!%p138_p2), %v303_v18, %v307_v19  ;;  %v2243_v32 = vcombine.low (!%p138_p2), %v303_v18, %v307_v19 }
   0xa   : > { %v181_v6 = vsub.s32 (!%p138_p2), %v178_v5, %v180_v4  ;;  %v311_v29 = vld [vmem:[%s3380_s2 + $0x80] sm:$0xff] (!%p138_p2)  ;;  %v2246_v31 = vcombine.high (!%p138_p2), %v304_v25, %v308_v26  ;;  %v312_v33 = vld [vmem:[%s3380_s2 + $0x88] sm:$0xff] (!%p138_p2)  ;;  %v2245_v36 = vcombine.low (!%p138_p2), %v304_v25, %v308_v26 }
   0xb   : > { %v315_v30 = vld [vmem:[%s3380_s2 + $0xa0] sm:$0xff] (!%p138_p2)  ;;  %v316_v34 = vld [vmem:[%s3380_s2 + $0xa8] sm:$0xff] (!%p138_p2) }
   0xc   : > { %v2252_v35 = vcombine.high (!%p138_p2), %v311_v29, %v315_v30  ;;  %v319_v37 = vld [vmem:[%s3380_s2 + $0xc0] sm:$0xff] (!%p138_p2)  ;;  %v2254_v39 = vcombine.high (!%p138_p2), %v312_v33, %v316_v34  ;;  %v2251_v40 = vcombine.low (!%p138_p2), %v311_v29, %v315_v30  ;;  %v320_v41 = vld [vmem:[%s3380_s2 + $0xc8] sm:$0xff] (!%p138_p2)  ;;  %v2253_v44 = vcombine.low (!%p138_p2), %v312_v33, %v316_v34 }
   0xd   : > { %s3383_s13 = smov (!%p161_p3, %s2222_s13), 1  ;;  %v323_v38 = vld [vmem:[%s3380_s2 + $0xe0] sm:$0xff]  ;;  %v324_v42 = vld [vmem:[%s3380_s2 + $0xe8] sm:$0xff] }
   0xe   : > { %s2493_s14 = sshll.u32 %s3383_s13, 3  ;;  %v2260_v43 = vcombine.high %v319_v37, %v323_v38  ;;  %v327_v45 = vld [vmem:[%s3380_s2 + $0x100] sm:$0xff]  ;;  %v2262_v47 = vcombine.high %v320_v41, %v324_v42  ;;  %v2259_v48 = vcombine.low %v319_v37, %v323_v38  ;;  %v328_v49 = vld [vmem:[%s3380_s2 + $0x108] sm:$0xff]  ;;  %v2261_v52 = vcombine.low %v320_v41, %v324_v42  ;;  %s2494_s5 = sshll.u32 %s3383_s13, 6 }
   0xf   : > { %s165_s17 = scalar_lea.vmem %s3378_s0, %s2493_s14  ;;  %v331_v46 = vld [vmem:[%s3380_s2 + $0x120] sm:$0xff]  ;;  %v332_v50 = vld [vmem:[%s3380_s2 + $0x128] sm:$0xff]  ;;  %s170_s8 = scalar_lea.vmem %s3381_s3, %s2494_s5 }
  0x10   : > { %v172_v7 = vld [vmem:[%s165_s17] sm:$0xff]  ;;  %v2268_v51 = vcombine.high %v327_v45, %v331_v46  ;;  %v2270_v55 = vcombine.high %v328_v49, %v332_v50  ;;  %v2267_v56 = vcombine.low %v327_v45, %v331_v46  ;;  %v336_v57 = vld [vmem:[%s3380_s2 + $0x148] sm:$0xff]  ;;  %v2269_v60 = vcombine.low %v328_v49, %v332_v50 }
  0x11   : > { %v182_v10 = vrot.slane %v172_v7, %v181_v6  ;;  %v175_v11 = vcombine.high %v172_v7, %v172_v7  ;;  %v335_v53 = vld [vmem:[%s3380_s2 + $0x140] sm:$0xff]  ;;  %v340_v58 = vld [vmem:[%s3380_s2 + $0x168] sm:$0xff] }
  0x12   : > { %v339_v54 = vld [vmem:[%s3380_s2 + $0x160] sm:$0xff]  ;;  %v2278_v63 = vcombine.high %v336_v57, %v340_v58  ;;  %v344_v1 = vld [vmem:[%s3380_s2 + $0x188] sm:$0xff]  ;;  %v2277_v4 = vcombine.low %v336_v57, %v340_v58 }
  0x13   : > { %v190_v14 = vcombine.high %v182_v10, %v182_v10  ;;  %v198_v15 = vsel %vm196_vm0, %v182_v10, 0  ;;  %v189_v16 = vrot.slane %v175_v11, %v181_v6  ;;  %v2276_v59 = vcombine.high %v335_v53, %v339_v54  ;;  %v343_v61 = vld [vmem:[%s3380_s2 + $0x180] sm:$0xff]  ;;  %v348_v2 = vld [vmem:[%s3380_s2 + $0x1a8] sm:$0xff] }
  0x14   : > { %v347_v62 = vld [vmem:[%s3380_s2 + $0x1a0] sm:$0xff]  ;;  %v2275_v0 = vcombine.low %v335_v53, %v339_v54  ;;  %v2286_v7 = vcombine.high %v344_v1, %v348_v2  ;;  %v352_v9 = vld [vmem:[%s3380_s2 + $0x1c8] sm:$0xff]  ;;  %v2285_v12 = vcombine.low %v344_v1, %v348_v2 }
  0x15   : > { %2231 = vmatprep.subr.msk.bf16.mxu0 %vm196_vm0, %v190_v14  ;;  %v191_v20 = vcombine.high %v189_v16, %v189_v16  ;;  %v204_v21 = vsel %vm196_vm0, %v189_v16, 0  ;;  %v2284_v3 = vcombine.high %v343_v61, %v347_v62  ;;  %v351_v5 = vld [vmem:[%s3380_s2 + $0x1c0] sm:$0xff]  ;;  %v2283_v8 = vcombine.low %v343_v61, %v347_v62  ;;  %v356_v10 = vld [vmem:[%s3380_s2 + $0x1e8] sm:$0xff] }
  0x16   : > { %210 = vmatpush1.bf16.msra.mxu0 %v198_v15  ;;  %v355_v6 = vld [vmem:[%s3380_s2 + $0x1e0] sm:$0xff]  ;;  %v2294_v15 = vcombine.high %v352_v9, %v356_v10  ;;  %v364_v18 = vld [vmem:[%s3380_s2 + $0x228] sm:$0xff] }
  0x17   : > { %2233 = vmatprep.subr.msk.bf16.mxu1 %vm196_vm0, %v191_v20  ;;  %1831 = vmatprep.subr.bf16.mxu0 %v2236_v17  ;;  %v2292_v11 = vcombine.high %v351_v5, %v355_v6  ;;  %v359_v13 = vld [vmem:[%s3380_s2 + $0x200] sm:$0xff]  ;;  %v2291_v16 = vcombine.low %v351_v5, %v355_v6  ;;  %v360_v17 = vld [vmem:[%s3380_s2 + $0x208] sm:$0xff]  ;;  %v2293_v20 = vcombine.low %v352_v9, %v356_v10 }
  0x18   : > { %251 = vmatpush1.bf16.msra.mxu1 %v204_v21  ;;  %v363_v14 = vld [vmem:[%s3380_s2 + $0x220] sm:$0xff]  ;;  %v368_v25 = vld [vmem:[%s3380_s2 + $0x248] sm:$0xff] }
  0x19   : > { %2232 = vmatmul.mubr.msk.bf16.vlgmr.msra.gmra.mrb[0].mxu0 %vm192_vm1, %v173_v23  ;;  %1913 = vmatprep.subr.bf16.mxu1 %v2238_v22  ;;  %v2300_v19 = vcombine.high %v359_v13, %v363_v14  ;;  %v367_v21 = vld [vmem:[%s3380_s2 + $0x240] sm:$0xff]  ;;  %v372_v26 = vld [vmem:[%s3380_s2 + $0x268] sm:$0xff] }
  0x1a   : > { %1832 = vmatpush1.bf16.msra.mxu0 %v2235_v24  ;;  %v371_v22 = vld [vmem:[%s3380_s2 + $0x260] sm:$0xff]  ;;  %v2299_v24 = vcombine.low %v359_v13, %v363_v14  ;;  %v376_v33 = vld [vmem:[%s3380_s2 + $0x288] sm:$0xff] }
  0x1b   : > { %2234 = vmatmul.mubr.msk.bf16.vlgmr.msra.gmra.mrb[0].mxu1 %vm192_vm1, %v173_v23  ;;  %1833 = vmatprep.subr.bf16.mxu0 %v2244_v27  ;;  %v2302_v23 = vcombine.high %v360_v17, %v364_v18  ;;  %v2308_v27 = vcombine.high %v367_v21, %v371_v22  ;;  %v375_v29 = vld [vmem:[%s3380_s2 + $0x280] sm:$0xff]  ;;  %v380_v34 = vld [vmem:[%s3380_s2 + $0x2a8] sm:$0xff] }
  0x1c   : > { %1914 = vmatpush1.bf16.msra.mxu1 %v2237_v28  ;;  %v2301_v28 = vcombine.low %v360_v17, %v364_v18  ;;  %v379_v30 = vld [vmem:[%s3380_s2 + $0x2a0] sm:$0xff]  ;;  %v384_v41 = vld [vmem:[%s3380_s2 + $0x2c8] sm:$0xff] }
  0x1d   : > { %1915 = vmatprep.subr.bf16.mxu1 %v2246_v31  ;;  %v2310_v31 = vcombine.high %v368_v25, %v372_v26  ;;  %v383_v37 = vld [vmem:[%s3380_s2 + $0x2c0] sm:$0xff]  ;;  %v388_v42 = vld [vmem:[%s3380_s2 + $0x2e8] sm:$0xff] }
  0x1e   : > { %1834 = vmatpush1.bf16.msra.mxu0 %v2243_v32  ;;  %v2307_v32 = vcombine.low %v367_v21, %v371_v22  ;;  %v387_v38 = vld [vmem:[%s3380_s2 + $0x2e0] sm:$0xff]  ;;  %v392_v49 = vld [vmem:[%s3380_s2 + $0x308] sm:$0xff] }
  0x1f   : > { %1835 = vmatprep.subr.bf16.mxu0 %v2252_v35  ;;  %v2316_v35 = vcombine.high %v375_v29, %v379_v30  ;;  %v391_v45 = vld [vmem:[%s3380_s2 + $0x300] sm:$0xff]  ;;  %v396_v50 = vld [vmem:[%s3380_s2 + $0x328] sm:$0xff] }
  0x20   : > { %1916 = vmatpush1.bf16.msra.mxu1 %v2245_v36  ;;  %v2309_v36 = vcombine.low %v368_v25, %v372_v26  ;;  %v395_v46 = vld [vmem:[%s3380_s2 + $0x320] sm:$0xff]  ;;  %v400_v57 = vld [vmem:[%s3380_s2 + $0x348] sm:$0xff] }
  0x21   : > { %1917 = vmatprep.subr.bf16.mxu1 %v2254_v39  ;;  %v2318_v39 = vcombine.high %v376_v33, %v380_v34  ;;  %v399_v53 = vld [vmem:[%s3380_s2 + $0x340] sm:$0xff]  ;;  %v404_v58 = vld [vmem:[%s3380_s2 + $0x368] sm:$0xff] }
  0x22   : > { %1836 = vmatpush1.bf16.msra.mxu0 %v2251_v40  ;;  %v2315_v40 = vcombine.low %v375_v29, %v379_v30  ;;  %v403_v54 = vld [vmem:[%s3380_s2 + $0x360] sm:$0xff]  ;;  %v408_v1 = vld [vmem:[%s3380_s2 + $0x388] sm:$0xff] }
  0x23   : > { %1837 = vmatprep.subr.bf16.mxu0 %v2260_v43  ;;  %v2324_v43 = vcombine.high %v383_v37, %v387_v38  ;;  %v407_v61 = vld [vmem:[%s3380_s2 + $0x380] sm:$0xff]  ;;  %v412_v2 = vld [vmem:[%s3380_s2 + $0x3a8] sm:$0xff] }
  0x24   : > { %1918 = vmatpush1.bf16.msra.mxu1 %v2253_v44  ;;  %v2317_v44 = vcombine.low %v376_v33, %v380_v34  ;;  %v411_v62 = vld [vmem:[%s3380_s2 + $0x3a0] sm:$0xff]  ;;  %v2350_v5 = vcombine.high %v408_v1, %v412_v2  ;;  %v416_v10 = vld [vmem:[%s3380_s2 + $0x3c8] sm:$0xff] }
  0x25   : > { %1919 = vmatprep.subr.bf16.mxu1 %v2262_v47  ;;  %v2326_v47 = vcombine.high %v384_v41, %v388_v42  ;;  %v2347_v6 = vcombine.low %v407_v61, %v411_v62  ;;  %v419_v9 = vld [vmem:[%s3380_s2 + $0x3e0] sm:$0xff]  ;;  %v424_v18 = vld [vmem:[%s3380_s2 + $0x408] sm:$0xff] }
  0x26   : > { %1838 = vmatpush1.bf16.msra.mxu0 %v2259_v48  ;;  %v2323_v48 = vcombine.low %v383_v37, %v387_v38  ;;  %v427_v17 = vld [vmem:[%s3380_s2 + $0x420] sm:$0xff] }
  0x27   : > { %1839 = vmatprep.subr.bf16.mxu0 %v2268_v51  ;;  %v2332_v51 = vcombine.high %v391_v45, %v395_v46  ;;  %v435_v26 = vld [vmem:[%s3380_s2 + $0x460] sm:$0xff] }
  0x28   : > { %1920 = vmatpush1.bf16.msra.mxu1 %v2261_v52  ;;  %v2325_v52 = vcombine.low %v384_v41, %v388_v42  ;;  %v439_v37 = vld [vmem:[%s3380_s2 + $0x480] sm:$0xff]  ;;  %v444_v41 = vld [vmem:[%s3380_s2 + $0x4a8] sm:$0xff] }
  0x29   : > { %1921 = vmatprep.subr.bf16.mxu1 %v2270_v55  ;;  %v2334_v55 = vcombine.high %v392_v49, %v396_v50 }
  0x2a   : > { %1840 = vmatpush1.bf16.msra.mxu0 %v2267_v56  ;;  %v2331_v56 = vcombine.low %v391_v45, %v395_v46 }
  0x2b   : > { %1841 = vmatprep.subr.bf16.mxu0 %v2276_v59  ;;  %v2340_v59 = vcombine.high %v399_v53, %v403_v54 }
  0x2c   : > { %1922 = vmatpush1.bf16.msra.mxu1 %v2269_v60  ;;  %v2333_v60 = vcombine.low %v392_v49, %v396_v50  ;;  %v447_v49 = vld [vmem:[%s3380_s2 + $0x4c0] sm:$0xff] }
  0x2d   : > { %1923 = vmatprep.subr.bf16.mxu1 %v2278_v63  ;;  %v2342_v63 = vcombine.high %v400_v57, %v404_v58  ;;  %v451_v50 = vld [vmem:[%s3380_s2 + $0x4e0] sm:$0xff] }
  0x2e   : > { %1842 = vmatpush1.bf16.msra.mxu0 %v2275_v0  ;;  %v2339_v0 = vcombine.low %v399_v53, %v403_v54 }
  0x2f   : > { %1843 = vmatprep.subr.bf16.mxu0 %v2284_v3  ;;  %v2348_v3 = vcombine.high %v407_v61, %v411_v62  ;;  %v2387_v61 = vcombine.low %v447_v49, %v451_v50 }
  0x30   : > { %1924 = vmatpush1.bf16.msra.mxu1 %v2277_v4  ;;  %v2341_v4 = vcombine.low %v400_v57, %v404_v58  ;;  %v455_v57 = vld [vmem:[%s3380_s2 + $0x500] sm:$0xff] }
  0x31   : > { %1925 = vmatprep.subr.bf16.mxu1 %v2286_v7  ;;  %v2349_v7 = vcombine.low %v408_v1, %v412_v2  ;;  %v459_v58 = vld [vmem:[%s3380_s2 + $0x520] sm:$0xff] }
  0x32   : > { %1844 = vmatpush1.bf16.msra.mxu0 %v2283_v8  ;;  %v415_v8 = vld [vmem:[%s3380_s2 + $0x3c0] sm:$0xff] }
  0x33   : > { %1845 = vmatprep.subr.bf16.mxu0 %v2292_v11  ;;  %v2356_v11 = vcombine.high %v415_v8, %v419_v9  ;;  %v2355_v13 = vcombine.low %v415_v8, %v419_v9  ;;  %v463_v1 = vld [vmem:[%s3380_s2 + $0x540] sm:$0xff] }
  0x34   : > { %1926 = vmatpush1.bf16.msra.mxu1 %v2285_v12  ;;  %v420_v12 = vld [vmem:[%s3380_s2 + $0x3e8] sm:$0xff]  ;;  %v467_v2 = vld [vmem:[%s3380_s2 + $0x560] sm:$0xff] }
  0x35   : > { %1927 = vmatprep.subr.bf16.mxu1 %v2294_v15  ;;  %v2357_v14 = vcombine.low %v416_v10, %v420_v12  ;;  %v2358_v15 = vcombine.high %v416_v10, %v420_v12  ;;  %v471_v9 = vld [vmem:[%s3380_s2 + $0x580] sm:$0xff]  ;;  %v476_v12 = vld [vmem:[%s3380_s2 + $0x5a8] sm:$0xff] }
  0x36   : > { %1846 = vmatpush1.bf16.msra.mxu0 %v2291_v16  ;;  %v423_v16 = vld [vmem:[%s3380_s2 + $0x400] sm:$0xff] }
  0x37   : > { %1847 = vmatprep.subr.bf16.mxu0 %v2300_v19  ;;  %v2364_v19 = vcombine.high %v423_v16, %v427_v17  ;;  %v2363_v21 = vcombine.low %v423_v16, %v427_v17  ;;  %v475_v10 = vld [vmem:[%s3380_s2 + $0x5a0] sm:$0xff] }
  0x38   : > { %1928 = vmatpush1.bf16.msra.mxu1 %v2293_v20  ;;  %v428_v20 = vld [vmem:[%s3380_s2 + $0x428] sm:$0xff]  ;;  %v479_v17 = vld [vmem:[%s3380_s2 + $0x5c0] sm:$0xff] }
  0x39   : > { %1929 = vmatprep.subr.bf16.mxu1 %v2302_v23  ;;  %v2365_v22 = vcombine.low %v424_v18, %v428_v20  ;;  %v2366_v23 = vcombine.high %v424_v18, %v428_v20  ;;  %v483_v18 = vld [vmem:[%s3380_s2 + $0x5e0] sm:$0xff]  ;;  %v484_v20 = vld [vmem:[%s3380_s2 + $0x5e8] sm:$0xff] }
  0x3a   : > { %1848 = vmatpush1.bf16.msra.mxu0 %v2299_v24  ;;  %v431_v24 = vld [vmem:[%s3380_s2 + $0x440] sm:$0xff] }
  0x3b   : > { %1849 = vmatprep.subr.bf16.mxu0 %v2308_v27  ;;  %v432_v27 = vld [vmem:[%s3380_s2 + $0x448] sm:$0xff]  ;;  %v2371_v45 = vcombine.low %v431_v24, %v435_v26 }
  0x3c   : > { %1930 = vmatpush1.bf16.msra.mxu1 %v2301_v28  ;;  %v436_v28 = vld [vmem:[%s3380_s2 + $0x468] sm:$0xff] }
  0x3d   : > { %1931 = vmatprep.subr.bf16.mxu1 %v2310_v31  ;;  %v2373_v46 = vcombine.low %v432_v27, %v436_v28 }
  0x3e   : > { %1850 = vmatpush1.bf16.msra.mxu0 %v2307_v32 }
  0x3f   : > { %1851 = vmatprep.subr.bf16.mxu0 %v2316_v35  ;;  %v2372_v35 = vcombine.high %v431_v24, %v435_v26  ;;  %v491_v26 = vld [vmem:[%s3380_s2 + $0x620] sm:$0xff] }
  0x40   : > { %1932 = vmatpush1.bf16.msra.mxu1 %v2309_v36  ;;  %v2374_v36 = vcombine.high %v432_v27, %v436_v28  ;;  %v488_v27 = vld [vmem:[%s3380_s2 + $0x608] sm:$0xff] }
  0x41   : > { %1933 = vmatprep.subr.bf16.mxu1 %v2318_v39  ;;  %v443_v39 = vld [vmem:[%s3380_s2 + $0x4a0] sm:$0xff]  ;;  %v492_v28 = vld [vmem:[%s3380_s2 + $0x628] sm:$0xff] }
  0x42   : > { %1852 = vmatpush1.bf16.msra.mxu0 %v2315_v40  ;;  %v440_v40 = vld [vmem:[%s3380_s2 + $0x488] sm:$0xff]  ;;  %v2379_v53 = vcombine.low %v439_v37, %v443_v39 }
  0x43   : > { %1853 = vmatprep.subr.bf16.mxu0 %v2324_v43  ;;  %v2381_v54 = vcombine.low %v440_v40, %v444_v41 }
  0x44   : > { %1934 = vmatpush1.bf16.msra.mxu1 %v2317_v44 }
  0x45   : > { %1935 = vmatprep.subr.bf16.mxu1 %v2326_v47  ;;  %v2380_v47 = vcombine.high %v439_v37, %v443_v39  ;;  %v499_v37 = vld [vmem:[%s3380_s2 + $0x660] sm:$0xff]  ;;  %v500_v39 = vld [vmem:[%s3380_s2 + $0x668] sm:$0xff] }
  0x46   : > { %1854 = vmatpush1.bf16.msra.mxu0 %v2323_v48  ;;  %v2382_v48 = vcombine.high %v440_v40, %v444_v41  ;;  %v2429_v41 = vcombine.low %v488_v27, %v492_v28 }
  0x47   : > { %1855 = vmatprep.subr.bf16.mxu0 %v2332_v51  ;;  %v448_v51 = vld [vmem:[%s3380_s2 + $0x4c8] sm:$0xff] }
  0x48   : > { %1936 = vmatpush1.bf16.msra.mxu1 %v2325_v52  ;;  %v452_v52 = vld [vmem:[%s3380_s2 + $0x4e8] sm:$0xff] }
  0x49   : > { %1937 = vmatprep.subr.bf16.mxu1 %v2334_v55  ;;  %v2388_v55 = vcombine.high %v447_v49, %v451_v50  ;;  %v2389_v62 = vcombine.low %v448_v51, %v452_v52 }
  0x4a   : > { %1856 = vmatpush1.bf16.msra.mxu0 %v2331_v56  ;;  %v2390_v56 = vcombine.high %v448_v51, %v452_v52 }
  0x4b   : > { %1857 = vmatprep.subr.bf16.mxu0 %v2340_v59  ;;  %v456_v59 = vld [vmem:[%s3380_s2 + $0x508] sm:$0xff] }
  0x4c   : > { %1938 = vmatpush1.bf16.msra.mxu1 %v2333_v60  ;;  %v460_v60 = vld [vmem:[%s3380_s2 + $0x528] sm:$0xff] }
  0x4d   : > { %1939 = vmatprep.subr.bf16.mxu1 %v2342_v63  ;;  %v2396_v63 = vcombine.high %v455_v57, %v459_v58 }
  0x4e   : > { %1858 = vmatpush1.bf16.msra.mxu0 %v2339_v0  ;;  %v2398_v0 = vcombine.high %v456_v59, %v460_v60 }
  0x4f   : > { %1859 = vmatprep.subr.bf16.mxu0 %v2348_v3  ;;  %v464_v3 = vld [vmem:[%s3380_s2 + $0x548] sm:$0xff] }
  0x50   : > { %1940 = vmatpush1.bf16.msra.mxu1 %v2341_v4  ;;  %v468_v4 = vld [vmem:[%s3380_s2 + $0x568] sm:$0xff] }
  0x51   : > { %1941 = vmatprep.subr.bf16.mxu1 %v2350_v5  ;;  %v2395_v5 = vcombine.low %v455_v57, %v459_v58  ;;  %v2406_v8 = vcombine.high %v464_v3, %v468_v4 }
  0x52   : > { %1860 = vmatpush1.bf16.msra.mxu0 %v2347_v6  ;;  %v2397_v6 = vcombine.low %v456_v59, %v460_v60 }
  0x53   : > { %1861 = vmatprep.subr.bf16.mxu0 %v2356_v11  ;;  %v472_v11 = vld [vmem:[%s3380_s2 + $0x588] sm:$0xff] }
  0x54   : > { %1942 = vmatpush1.bf16.msra.mxu1 %v2349_v7  ;;  %v2404_v7 = vcombine.high %v463_v1, %v467_v2  ;;  %v2414_v16 = vcombine.high %v472_v11, %v476_v12 }
  0x55   : > { %1943 = vmatprep.subr.bf16.mxu1 %v2358_v15  ;;  %v2412_v15 = vcombine.high %v471_v9, %v475_v10 }
  0x56   : > { %1862 = vmatpush1.bf16.msra.mxu0 %v2355_v13  ;;  %v2403_v13 = vcombine.low %v463_v1, %v467_v2 }
  0x57   : > { %1872 = vmatprep.subr.bf16.mxu0 %v2364_v19  ;;  %v480_v19 = vld [vmem:[%s3380_s2 + $0x5c8] sm:$0xff] }
  0x58   : > { %1944 = vmatpush1.bf16.msra.mxu1 %v2357_v14  ;;  %v2405_v14 = vcombine.low %v464_v3, %v468_v4  ;;  %v2422_v24 = vcombine.high %v480_v19, %v484_v20 }
  0x59   : > { %1954 = vmatprep.subr.bf16.mxu1 %v2366_v23  ;;  %v2420_v23 = vcombine.high %v479_v17, %v483_v18 }
  0xec   : > { %v243_v25 = vpop.f32.mrb[0].mxu0 }
  0xed   : > { %v245_v29 = vpop.f32.mrb[1].mxu0  ;;  %v2795_v33 = vpack.c.bf16 %v243_v25, %v243_v25  ;;  %v487_v25 = vld [vmem:[%s3380_s2 + $0x600] sm:$0xff] }
  0xee   : > { %v2791_v30 = vpack.c.bf16 %v245_v29, %v245_v29  ;;  %v247_v31 = vpop.f32.mrb[2].mxu0  ;;  %v2793_v32 = vpop.f32.mrb[0].mxu1  ;;  %v2419_v29 = vcombine.low %v479_v17, %v483_v18  ;;  %v2427_v40 = vcombine.low %v487_v25, %v491_v26 }
  0xef   : > { %v248_v34 = vpop.f32.mrb[3].mxu0  ;;  %v286_v38 = vpop.f32.mrb[1].mxu1  ;;  %v2421_v31 = vcombine.low %v480_v19, %v484_v20 }
  0xf0   : > { %1863 = vmatprep.mubr.bf16.mxu0 %v2791_v30  ;;  %1945 = vmatprep.mubr.bf16.mxu1 %v2791_v30  ;;  %v2811_v42 = vpack.c.bf16 %v286_v38, %v286_v38  ;;  %v288_v43 = vpop.f32.mrb[2].mxu1  ;;  %v2428_v34 = vcombine.high %v487_v25, %v491_v26  ;;  %v496_v38 = vld [vmem:[%s3380_s2 + $0x648] sm:$0xff] }
  0xf1   : > { %1864 = vmatmul.mubr.bf16.vlgmr.msra.gmra.mrb[4].mxu0 %v2795_v33  ;;  %1946 = vmatmul.mubr.bf16.vlgmr.msra.gmra.mrb[4].mxu1 %v2795_v33  ;;  %v289_v44 = vpop.f32.mrb[3].mxu1  ;;  %v2437_v50 = vcombine.low %v496_v38, %v500_v39 }
  0xf2   : > { %1873 = vmatpush1.bf16.msra.mxu0 %v2363_v21  ;;  %1955 = vmatpush1.bf16.msra.mxu1 %v2365_v22  ;;  %v2411_v21 = vcombine.low %v471_v9, %v475_v10  ;;  %v2413_v22 = vcombine.low %v472_v11, %v476_v12  ;;  %v2438_v44 = vcombine.high %v496_v38, %v500_v39 }
  0xf3   : > { %1874 = vmatprep.subr.bf16.mxu0 %v2372_v35  ;;  %1956 = vmatprep.subr.bf16.mxu1 %v2374_v36  ;;  %v2430_v35 = vcombine.high %v488_v27, %v492_v28  ;;  %v495_v36 = vld [vmem:[%s3380_s2 + $0x640] sm:$0xff] }
  0xf4   : > { %1904 = vmatprep.mubr.bf16.mxu0 %v2811_v42  ;;  %1986 = vmatprep.mubr.bf16.mxu1 %v2811_v42  ;;  %v2436_v43 = vcombine.high %v495_v36, %v499_v37  ;;  %v2435_v49 = vcombine.low %v495_v36, %v499_v37 }
  0xf6   : > { %1875 = vmatpush1.bf16.msra.mxu0 %v2371_v45  ;;  %1957 = vmatpush1.bf16.msra.mxu1 %v2373_v46  ;;  %v503_v45 = vld [vmem:[%s3380_s2 + $0x680] sm:$0xff] }
  0xf7   : > { %1876 = vmatprep.subr.bf16.mxu0 %v2380_v47  ;;  %1958 = vmatprep.subr.bf16.mxu1 %v2382_v48  ;;  %v507_v46 = vld [vmem:[%s3380_s2 + $0x6a0] sm:$0xff]  ;;  %v504_v47 = vld [vmem:[%s3380_s2 + $0x688] sm:$0xff] }
  0xf8   : > { %v508_v48 = vld [vmem:[%s3380_s2 + $0x6a8] sm:$0xff]  ;;  %v2444_v51 = vcombine.high %v503_v45, %v507_v46  ;;  %v2443_v57 = vcombine.low %v503_v45, %v507_v46  ;;  %v310_v45 = vld [vmem:[%s3380_s2 + $0x78] sm:$0xff] }
  0xf9   : > { %v2446_v52 = vcombine.high %v504_v47, %v508_v48  ;;  %v2445_v58 = vcombine.low %v504_v47, %v508_v48 }
  0xfa   : > { %1877 = vmatpush1.bf16.msra.mxu0 %v2379_v53  ;;  %1959 = vmatpush1.bf16.msra.mxu1 %v2381_v54  ;;  %v511_v53 = vld [vmem:[%s3380_s2 + $0x6c0] sm:$0xff] }
  0xfb   : > { %1878 = vmatprep.subr.bf16.mxu0 %v2388_v55  ;;  %1960 = vmatprep.subr.bf16.mxu1 %v2390_v56  ;;  %v515_v54 = vld [vmem:[%s3380_s2 + $0x6e0] sm:$0xff]  ;;  %v512_v55 = vld [vmem:[%s3380_s2 + $0x6c8] sm:$0xff] }
  0xfc   : > { %v516_v56 = vld [vmem:[%s3380_s2 + $0x6e8] sm:$0xff]  ;;  %v2452_v59 = vcombine.high %v511_v53, %v515_v54  ;;  %v2451_v1 = vcombine.low %v511_v53, %v515_v54 }
  0xfd   : > { %v2454_v60 = vcombine.high %v512_v55, %v516_v56  ;;  %v2453_v2 = vcombine.low %v512_v55, %v516_v56 }
  0xfe   : > { %1879 = vmatpush1.bf16.msra.mxu0 %v2387_v61  ;;  %1961 = vmatpush1.bf16.msra.mxu1 %v2389_v62  ;;  %v519_v61 = vld [vmem:[%s3380_s2 + $0x700] sm:$0xff] }
  0xff   : > { %1880 = vmatprep.subr.bf16.mxu0 %v2396_v63  ;;  %1962 = vmatprep.subr.bf16.mxu1 %v2398_v0  ;;  %v523_v62 = vld [vmem:[%s3380_s2 + $0x720] sm:$0xff]  ;;  %v520_v63 = vld [vmem:[%s3380_s2 + $0x708] sm:$0xff] }
 0x100   : > { %v524_v0 = vld [vmem:[%s3380_s2 + $0x728] sm:$0xff]  ;;  %v2460_v3 = vcombine.high %v519_v61, %v523_v62  ;;  %v2459_v9 = vcombine.low %v519_v61, %v523_v62 }
 0x101   : > { %v2462_v4 = vcombine.high %v520_v63, %v524_v0  ;;  %v2461_v10 = vcombine.low %v520_v63, %v524_v0  ;;  %v329_v0 = vld [vmem:[%s3380_s2 + $0x110] sm:$0xff] }
 0x102   : > { %1881 = vmatpush1.bf16.msra.mxu0 %v2395_v5  ;;  %1963 = vmatpush1.bf16.msra.mxu1 %v2397_v6  ;;  %v527_v5 = vld [vmem:[%s3380_s2 + $0x740] sm:$0xff] }
 0x103   : > { %1882 = vmatprep.subr.bf16.mxu0 %v2404_v7  ;;  %1964 = vmatprep.subr.bf16.mxu1 %v2406_v8  ;;  %v531_v6 = vld [vmem:[%s3380_s2 + $0x760] sm:$0xff]  ;;  %v528_v7 = vld [vmem:[%s3380_s2 + $0x748] sm:$0xff] }
 0x104   : > { %v532_v8 = vld [vmem:[%s3380_s2 + $0x768] sm:$0xff]  ;;  %v2468_v11 = vcombine.high %v527_v5, %v531_v6  ;;  %v2467_v17 = vcombine.low %v527_v5, %v531_v6 }
 0x105   : > { %v2470_v12 = vcombine.high %v528_v7, %v532_v8  ;;  %v2469_v18 = vcombine.low %v528_v7, %v532_v8  ;;  %v337_v8 = vld [vmem:[%s3380_s2 + $0x150] sm:$0xff] }
 0x106   : > { %1883 = vmatpush1.bf16.msra.mxu0 %v2403_v13  ;;  %1965 = vmatpush1.bf16.msra.mxu1 %v2405_v14  ;;  %v535_v13 = vld [vmem:[%s3380_s2 + $0x780] sm:$0xff] }
 0x107   : > { %1884 = vmatprep.subr.bf16.mxu0 %v2412_v15  ;;  %1966 = vmatprep.subr.bf16.mxu1 %v2414_v16  ;;  %v539_v14 = vld [vmem:[%s3380_s2 + $0x7a0] sm:$0xff]  ;;  %v536_v15 = vld [vmem:[%s3380_s2 + $0x788] sm:$0xff] }
 0x108   : > { %v540_v16 = vld [vmem:[%s3380_s2 + $0x7a8] sm:$0xff]  ;;  %v2476_v19 = vcombine.high %v535_v13, %v539_v14  ;;  %v2475_v25 = vcombine.low %v535_v13, %v539_v14 }
 0x109   : > { %v2478_v20 = vcombine.high %v536_v15, %v540_v16  ;;  %v2477_v26 = vcombine.low %v536_v15, %v540_v16  ;;  %v345_v16 = vld [vmem:[%s3380_s2 + $0x190] sm:$0xff] }
 0x10a   : > { %1885 = vmatpush1.bf16.msra.mxu0 %v2411_v21  ;;  %1967 = vmatpush1.bf16.msra.mxu1 %v2413_v22  ;;  %v543_v21 = vld [vmem:[%s3380_s2 + $0x7c0] sm:$0xff] }
 0x10b   : > { %1886 = vmatprep.subr.bf16.mxu0 %v2420_v23  ;;  %1968 = vmatprep.subr.bf16.mxu1 %v2422_v24  ;;  %v547_v22 = vld [vmem:[%s3380_s2 + $0x7e0] sm:$0xff]  ;;  %v544_v23 = vld [vmem:[%s3380_s2 + $0x7c8] sm:$0xff] }
 0x10c   : > { %v548_v24 = vld [vmem:[%s3380_s2 + $0x7e8] sm:$0xff]  ;;  %v2484_v27 = vcombine.high %v543_v21, %v547_v22  ;;  %v2483_v36 = vcombine.low %v543_v21, %v547_v22 }
 0x10d   : > { %v2486_v28 = vcombine.high %v544_v23, %v548_v24  ;;  %v2485_v37 = vcombine.low %v544_v23, %v548_v24  ;;  %v353_v24 = vld [vmem:[%s3380_s2 + $0x1d0] sm:$0xff] }
 0x10e   : > { %1887 = vmatpush1.bf16.msra.mxu0 %v2419_v29  ;;  %1969 = vmatpush1.bf16.msra.mxu1 %v2421_v31  ;;  %v297_v29 = vld [vmem:[%s3380_s2 + $0x10] sm:$0xff] }
 0x10f   : > { %1888 = vmatprep.subr.bf16.mxu0 %v2428_v34  ;;  %1970 = vmatprep.subr.bf16.mxu1 %v2430_v35  ;;  %v301_v31 = vld [vmem:[%s3380_s2 + $0x30] sm:$0xff]  ;;  %v298_v34 = vld [vmem:[%s3380_s2 + $0x18] sm:$0xff] }
 0x110   : > { %v302_v35 = vld [vmem:[%s3380_s2 + $0x38] sm:$0xff]  ;;  %v2240_v38 = vcombine.high %v297_v29, %v301_v31  ;;  %v2239_v46 = vcombine.low %v297_v29, %v301_v31 }
 0x111   : > { %v2242_v39 = vcombine.high %v298_v34, %v302_v35  ;;  %v2241_v47 = vcombine.low %v298_v34, %v302_v35  ;;  %v361_v35 = vld [vmem:[%s3380_s2 + $0x210] sm:$0xff] }
 0x112   : > { %1889 = vmatpush1.bf16.msra.mxu0 %v2427_v40  ;;  %1971 = vmatpush1.bf16.msra.mxu1 %v2429_v41  ;;  %v305_v40 = vld [vmem:[%s3380_s2 + $0x50] sm:$0xff]  ;;  %v2990_v41 = vpack.c.bf16 %v2793_v32, %v2793_v32 }
 0x113   : > { %1890 = vmatprep.subr.bf16.mxu0 %v2436_v43  ;;  %1972 = vmatprep.subr.bf16.mxu1 %v2438_v44  ;;  %v309_v43 = vld [vmem:[%s3380_s2 + $0x70] sm:$0xff]  ;;  %v306_v44 = vld [vmem:[%s3380_s2 + $0x58] sm:$0xff] }
 0x114   : > { %v2248_v32 = vcombine.high %v305_v40, %v309_v43  ;;  %v2250_v48 = vcombine.high %v306_v44, %v310_v45  ;;  %v2247_v53 = vcombine.low %v305_v40, %v309_v43  ;;  %v2249_v54 = vcombine.low %v306_v44, %v310_v45  ;;  %v369_v45 = vld [vmem:[%s3380_s2 + $0x250] sm:$0xff] }
 0x116   : > { %1891 = vmatpush1.bf16.msra.mxu0 %v2435_v49  ;;  %1973 = vmatpush1.bf16.msra.mxu1 %v2437_v50  ;;  %v313_v49 = vld [vmem:[%s3380_s2 + $0x90] sm:$0xff] }
 0x117   : > { %1892 = vmatprep.subr.bf16.mxu0 %v2444_v51  ;;  %1974 = vmatprep.subr.bf16.mxu1 %v2446_v52  ;;  %v317_v50 = vld [vmem:[%s3380_s2 + $0xb0] sm:$0xff]  ;;  %v314_v51 = vld [vmem:[%s3380_s2 + $0x98] sm:$0xff] }
 0x118   : > { %v318_v52 = vld [vmem:[%s3380_s2 + $0xb8] sm:$0xff]  ;;  %v2256_v55 = vcombine.high %v313_v49, %v317_v50 }
 0x119   : > { %v2258_v56 = vcombine.high %v314_v51, %v318_v52  ;;  %v2257_v61 = vcombine.low %v314_v51, %v318_v52  ;;  %v377_v52 = vld [vmem:[%s3380_s2 + $0x290] sm:$0xff] }
 0x11a   : > { %1893 = vmatpush1.bf16.msra.mxu0 %v2443_v57  ;;  %1975 = vmatpush1.bf16.msra.mxu1 %v2445_v58  ;;  %v321_v57 = vld [vmem:[%s3380_s2 + $0xd0] sm:$0xff] }
 0x11b   : > { %1894 = vmatprep.subr.bf16.mxu0 %v2452_v59  ;;  %1976 = vmatprep.subr.bf16.mxu1 %v2454_v60  ;;  %v325_v58 = vld [vmem:[%s3380_s2 + $0xf0] sm:$0xff]  ;;  %v322_v59 = vld [vmem:[%s3380_s2 + $0xd8] sm:$0xff]  ;;  %v2255_v60 = vcombine.low %v313_v49, %v317_v50 }
 0x11c   : > { %v2264_v62 = vcombine.high %v321_v57, %v325_v58 }
 0x11e   : > { %1895 = vmatpush1.bf16.msra.mxu0 %v2451_v1  ;;  %1977 = vmatpush1.bf16.msra.mxu1 %v2453_v2  ;;  %v333_v1 = vld [vmem:[%s3380_s2 + $0x130] sm:$0xff]  ;;  %v330_v2 = vld [vmem:[%s3380_s2 + $0x118] sm:$0xff] }
 0x11f   : > { %1896 = vmatprep.subr.bf16.mxu0 %v2460_v3  ;;  %1978 = vmatprep.subr.bf16.mxu1 %v2462_v4  ;;  %v334_v3 = vld [vmem:[%s3380_s2 + $0x138] sm:$0xff]  ;;  %v2263_v4 = vcombine.low %v321_v57, %v325_v58  ;;  %v2272_v6 = vcombine.high %v329_v0, %v333_v1 }
 0x120   : > { %v2274_v7 = vcombine.high %v330_v2, %v334_v3  ;;  %v2273_v13 = vcombine.low %v330_v2, %v334_v3  ;;  %v393_v3 = vld [vmem:[%s3380_s2 + $0x310] sm:$0xff] }
 0x122   : > { %1897 = vmatpush1.bf16.msra.mxu0 %v2459_v9  ;;  %1979 = vmatpush1.bf16.msra.mxu1 %v2461_v10  ;;  %v341_v9 = vld [vmem:[%s3380_s2 + $0x170] sm:$0xff]  ;;  %v338_v10 = vld [vmem:[%s3380_s2 + $0x158] sm:$0xff] }
 0x123   : > { %1898 = vmatprep.subr.bf16.mxu0 %v2468_v11  ;;  %1980 = vmatprep.subr.bf16.mxu1 %v2470_v12  ;;  %v342_v11 = vld [vmem:[%s3380_s2 + $0x178] sm:$0xff]  ;;  %v2271_v12 = vcombine.low %v329_v0, %v333_v1  ;;  %v2280_v14 = vcombine.high %v337_v8, %v341_v9 }
 0x124   : > { %v2282_v15 = vcombine.high %v338_v10, %v342_v11  ;;  %v2281_v21 = vcombine.low %v338_v10, %v342_v11  ;;  %v401_v11 = vld [vmem:[%s3380_s2 + $0x350] sm:$0xff] }
 0x126   : > { %1899 = vmatpush1.bf16.msra.mxu0 %v2467_v17  ;;  %1981 = vmatpush1.bf16.msra.mxu1 %v2469_v18  ;;  %v349_v17 = vld [vmem:[%s3380_s2 + $0x1b0] sm:$0xff]  ;;  %v346_v18 = vld [vmem:[%s3380_s2 + $0x198] sm:$0xff] }
 0x127   : > { %1900 = vmatprep.subr.bf16.mxu0 %v2476_v19  ;;  %1982 = vmatprep.subr.bf16.mxu1 %v2478_v20  ;;  %v350_v19 = vld [vmem:[%s3380_s2 + $0x1b8] sm:$0xff]  ;;  %v2279_v20 = vcombine.low %v337_v8, %v341_v9  ;;  %v2288_v22 = vcombine.high %v345_v16, %v349_v17 }
 0x128   : > { %v2290_v23 = vcombine.high %v346_v18, %v350_v19  ;;  %v2289_v29 = vcombine.low %v346_v18, %v350_v19  ;;  %v409_v19 = vld [vmem:[%s3380_s2 + $0x390] sm:$0xff] }
 0x12a   : > { %1901 = vmatpush1.bf16.msra.mxu0 %v2475_v25  ;;  %1983 = vmatpush1.bf16.msra.mxu1 %v2477_v26  ;;  %v357_v25 = vld [vmem:[%s3380_s2 + $0x1f0] sm:$0xff]  ;;  %v354_v26 = vld [vmem:[%s3380_s2 + $0x1d8] sm:$0xff] }
 0x12b   : > { %1902 = vmatprep.subr.bf16.mxu0 %v2484_v27  ;;  %1984 = vmatprep.subr.bf16.mxu1 %v2486_v28  ;;  %v358_v27 = vld [vmem:[%s3380_s2 + $0x1f8] sm:$0xff]  ;;  %v2287_v28 = vcombine.low %v345_v16, %v349_v17  ;;  %v2296_v31 = vcombine.high %v353_v24, %v357_v25 }
 0x12c   : > { %v2298_v34 = vcombine.high %v354_v26, %v358_v27  ;;  %v2297_v40 = vcombine.low %v354_v26, %v358_v27  ;;  %v417_v27 = vld [vmem:[%s3380_s2 + $0x3d0] sm:$0xff] }
 0x12e   : > { %1903 = vmatpush1.bf16.msra.mxu0 %v2483_v36  ;;  %1985 = vmatpush1.bf16.msra.mxu1 %v2485_v37  ;;  %v365_v36 = vld [vmem:[%s3380_s2 + $0x230] sm:$0xff]  ;;  %v362_v37 = vld [vmem:[%s3380_s2 + $0x218] sm:$0xff] }
 0x12f   : > { %1995 = vmatprep.subr.bf16.mxu0 %v2240_v38  ;;  %2077 = vmatprep.subr.bf16.mxu1 %v2242_v39  ;;  %v366_v38 = vld [vmem:[%s3380_s2 + $0x238] sm:$0xff]  ;;  %v2295_v39 = vcombine.low %v353_v24, %v357_v25  ;;  %v2304_v43 = vcombine.high %v361_v35, %v365_v36 }
 0x130   : > { %v2306_v44 = vcombine.high %v362_v37, %v366_v38  ;;  %v2305_v49 = vcombine.low %v362_v37, %v366_v38  ;;  %v425_v38 = vld [vmem:[%s3380_s2 + $0x410] sm:$0xff] }
 0x131   : > { %1905 = vmatmul.mubr.bf16.vlgmr.msra.gmra.mrb[4].mxu0 %v2990_v41  ;;  %1987 = vmatmul.mubr.bf16.vlgmr.msra.gmra.mrb[4].mxu1 %v2990_v41 }
 0x132   : > { %1996 = vmatpush1.bf16.msra.mxu0 %v2239_v46  ;;  %2027 = vmatprep.mubr.bf16.mxu0 %v2791_v30  ;;  %v373_v46 = vld [vmem:[%s3380_s2 + $0x270] sm:$0xff] }
 0x133   : > { %2078 = vmatpush1.bf16.msra.mxu1 %v2241_v47  ;;  %2109 = vmatprep.mubr.bf16.mxu1 %v2791_v30  ;;  %v326_v30 = vld [vmem:[%s3380_s2 + $0xf8] sm:$0xff]  ;;  %v2312_v50 = vcombine.high %v369_v45, %v373_v46 }
 0x134   : > { %1997 = vmatprep.subr.bf16.mxu0 %v2248_v32  ;;  %2079 = vmatprep.subr.bf16.mxu1 %v2250_v48  ;;  %v2266_v63 = vcombine.high %v322_v59, %v326_v30  ;;  %v2265_v5 = vcombine.low %v322_v59, %v326_v30  ;;  %v370_v47 = vld [vmem:[%s3380_s2 + $0x258] sm:$0xff]  ;;  %v2303_v48 = vcombine.low %v361_v35, %v365_v36  ;;  %v385_v30 = vld [vmem:[%s3380_s2 + $0x2d0] sm:$0xff] }
 0x135   : > { %v374_v32 = vld [vmem:[%s3380_s2 + $0x278] sm:$0xff] }
 0x136   : > { %1998 = vmatpush1.bf16.msra.mxu0 %v2247_v53  ;;  %v2314_v51 = vcombine.high %v370_v47, %v374_v32  ;;  %v381_v53 = vld [vmem:[%s3380_s2 + $0x2b0] sm:$0xff]  ;;  %v2313_v57 = vcombine.low %v370_v47, %v374_v32 }
 0x137   : > { %2080 = vmatpush1.bf16.msra.mxu1 %v2249_v54  ;;  %1999 = vmatprep.subr.bf16.mxu0 %v2256_v55  ;;  %v378_v54 = vld [vmem:[%s3380_s2 + $0x298] sm:$0xff]  ;;  %v2320_v58 = vcombine.high %v377_v52, %v381_v53  ;;  %v433_v32 = vld [vmem:[%s3380_s2 + $0x450] sm:$0xff] }
 0x138   : > { %2081 = vmatprep.subr.bf16.mxu1 %v2258_v56  ;;  %v382_v55 = vld [vmem:[%s3380_s2 + $0x2b8] sm:$0xff]  ;;  %v2311_v56 = vcombine.low %v369_v45, %v373_v46 }
 0x139   : > { %v2322_v59 = vcombine.high %v378_v54, %v382_v55  ;;  %v2321_v0 = vcombine.low %v378_v54, %v382_v55  ;;  %v441_v54 = vld [vmem:[%s3380_s2 + $0x490] sm:$0xff] }
 0x13a   : > { %2000 = vmatpush1.bf16.msra.mxu0 %v2255_v60  ;;  %v389_v60 = vld [vmem:[%s3380_s2 + $0x2f0] sm:$0xff] }
 0x13b   : > { %2082 = vmatpush1.bf16.msra.mxu1 %v2257_v61  ;;  %2001 = vmatprep.subr.bf16.mxu0 %v2264_v62  ;;  %v386_v61 = vld [vmem:[%s3380_s2 + $0x2d8] sm:$0xff]  ;;  %v2328_v1 = vcombine.high %v385_v30, %v389_v60  ;;  %v445_v55 = vld [vmem:[%s3380_s2 + $0x4b0] sm:$0xff] }
 0x13c   : > { %2083 = vmatprep.subr.bf16.mxu1 %v2266_v63  ;;  %v390_v62 = vld [vmem:[%s3380_s2 + $0x2f8] sm:$0xff]  ;;  %v2319_v63 = vcombine.low %v377_v52, %v381_v53 }
 0x13d   : > { %v2330_v2 = vcombine.high %v386_v61, %v390_v62  ;;  %v2329_v8 = vcombine.low %v386_v61, %v390_v62  ;;  %v449_v62 = vld [vmem:[%s3380_s2 + $0x4d0] sm:$0xff] }
 0x13e   : > { %2002 = vmatpush1.bf16.msra.mxu0 %v2263_v4  ;;  %v397_v4 = vld [vmem:[%s3380_s2 + $0x330] sm:$0xff] }
 0x13f   : > { %2084 = vmatpush1.bf16.msra.mxu1 %v2265_v5  ;;  %2003 = vmatprep.subr.bf16.mxu0 %v2272_v6  ;;  %v394_v5 = vld [vmem:[%s3380_s2 + $0x318] sm:$0xff]  ;;  %v2336_v9 = vcombine.high %v393_v3, %v397_v4 }
 0x140   : > { %2085 = vmatprep.subr.bf16.mxu1 %v2274_v7  ;;  %v398_v6 = vld [vmem:[%s3380_s2 + $0x338] sm:$0xff]  ;;  %v2327_v7 = vcombine.low %v385_v30, %v389_v60  ;;  %v2384_v60 = vcombine.high %v441_v54, %v445_v55 }
 0x141   : > { %v2338_v10 = vcombine.high %v394_v5, %v398_v6  ;;  %v2337_v16 = vcombine.low %v394_v5, %v398_v6  ;;  %v461_v5 = vld [vmem:[%s3380_s2 + $0x530] sm:$0xff]  ;;  %v458_v6 = vld [vmem:[%s3380_s2 + $0x518] sm:$0xff] }
 0x142   : > { %2004 = vmatpush1.bf16.msra.mxu0 %v2271_v12  ;;  %v405_v12 = vld [vmem:[%s3380_s2 + $0x370] sm:$0xff] }
 0x143   : > { %2086 = vmatpush1.bf16.msra.mxu1 %v2273_v13  ;;  %2005 = vmatprep.subr.bf16.mxu0 %v2280_v14  ;;  %v402_v13 = vld [vmem:[%s3380_s2 + $0x358] sm:$0xff]  ;;  %v2344_v17 = vcombine.high %v401_v11, %v405_v12 }
 0x144   : > { %2087 = vmatprep.subr.bf16.mxu1 %v2282_v15  ;;  %v406_v14 = vld [vmem:[%s3380_s2 + $0x378] sm:$0xff]  ;;  %v2335_v15 = vcombine.low %v393_v3, %v397_v4  ;;  %v457_v4 = vld [vmem:[%s3380_s2 + $0x510] sm:$0xff] }
 0x145   : > { %v2346_v18 = vcombine.high %v402_v13, %v406_v14  ;;  %v2345_v24 = vcombine.low %v402_v13, %v406_v14  ;;  %v469_v13 = vld [vmem:[%s3380_s2 + $0x570] sm:$0xff]  ;;  %v466_v14 = vld [vmem:[%s3380_s2 + $0x558] sm:$0xff] }
 0x146   : > { %2006 = vmatpush1.bf16.msra.mxu0 %v2279_v20  ;;  %v413_v20 = vld [vmem:[%s3380_s2 + $0x3b0] sm:$0xff] }
 0x147   : > { %2088 = vmatpush1.bf16.msra.mxu1 %v2281_v21  ;;  %2007 = vmatprep.subr.bf16.mxu0 %v2288_v22  ;;  %v410_v21 = vld [vmem:[%s3380_s2 + $0x398] sm:$0xff]  ;;  %v2352_v25 = vcombine.high %v409_v19, %v413_v20 }
 0x148   : > { %2089 = vmatprep.subr.bf16.mxu1 %v2290_v23  ;;  %v414_v22 = vld [vmem:[%s3380_s2 + $0x3b8] sm:$0xff]  ;;  %v2343_v23 = vcombine.low %v401_v11, %v405_v12  ;;  %v465_v12 = vld [vmem:[%s3380_s2 + $0x550] sm:$0xff] }
 0x149   : > { %v2354_v26 = vcombine.high %v410_v21, %v414_v22  ;;  %v2353_v35 = vcombine.low %v410_v21, %v414_v22  ;;  %v477_v21 = vld [vmem:[%s3380_s2 + $0x5b0] sm:$0xff]  ;;  %v474_v22 = vld [vmem:[%s3380_s2 + $0x598] sm:$0xff] }
 0x14a   : > { %2008 = vmatpush1.bf16.msra.mxu0 %v2287_v28  ;;  %v421_v28 = vld [vmem:[%s3380_s2 + $0x3f0] sm:$0xff] }
 0x14b   : > { %2090 = vmatpush1.bf16.msra.mxu1 %v2289_v29  ;;  %2009 = vmatprep.subr.bf16.mxu0 %v2296_v31  ;;  %v418_v29 = vld [vmem:[%s3380_s2 + $0x3d8] sm:$0xff]  ;;  %v2360_v36 = vcombine.high %v417_v27, %v421_v28 }
 0x14c   : > { %2091 = vmatprep.subr.bf16.mxu1 %v2298_v34  ;;  %v422_v31 = vld [vmem:[%s3380_s2 + $0x3f8] sm:$0xff]  ;;  %v2351_v34 = vcombine.low %v409_v19, %v413_v20  ;;  %v473_v20 = vld [vmem:[%s3380_s2 + $0x590] sm:$0xff] }
 0x14d   : > { %v2362_v37 = vcombine.high %v418_v29, %v422_v31  ;;  %v2361_v45 = vcombine.low %v418_v29, %v422_v31  ;;  %v485_v29 = vld [vmem:[%s3380_s2 + $0x5f0] sm:$0xff]  ;;  %v482_v31 = vld [vmem:[%s3380_s2 + $0x5d8] sm:$0xff] }
 0x14e   : > { %2010 = vmatpush1.bf16.msra.mxu0 %v2295_v39  ;;  %v429_v39 = vld [vmem:[%s3380_s2 + $0x430] sm:$0xff] }
 0x14f   : > { %2092 = vmatpush1.bf16.msra.mxu1 %v2297_v40  ;;  %2011 = vmatprep.subr.bf16.mxu0 %v2304_v43  ;;  %v426_v40 = vld [vmem:[%s3380_s2 + $0x418] sm:$0xff]  ;;  %v2368_v46 = vcombine.high %v425_v38, %v429_v39 }
 0x150   : > { %2093 = vmatprep.subr.bf16.mxu1 %v2306_v44  ;;  %v430_v43 = vld [vmem:[%s3380_s2 + $0x438] sm:$0xff]  ;;  %v2359_v44 = vcombine.low %v417_v27, %v421_v28  ;;  %v481_v28 = vld [vmem:[%s3380_s2 + $0x5d0] sm:$0xff] }
 0x151   : > { %v2370_v47 = vcombine.high %v426_v40, %v430_v43  ;;  %v2369_v52 = vcombine.low %v426_v40, %v430_v43  ;;  %v493_v40 = vld [vmem:[%s3380_s2 + $0x630] sm:$0xff]  ;;  %v490_v43 = vld [vmem:[%s3380_s2 + $0x618] sm:$0xff] }
 0x152   : > { %2012 = vmatpush1.bf16.msra.mxu0 %v2303_v48  ;;  %v437_v48 = vld [vmem:[%s3380_s2 + $0x470] sm:$0xff] }
 0x153   : > { %2094 = vmatpush1.bf16.msra.mxu1 %v2305_v49  ;;  %2013 = vmatprep.subr.bf16.mxu0 %v2312_v50  ;;  %v2367_v49 = vcombine.low %v425_v38, %v429_v39  ;;  %v434_v50 = vld [vmem:[%s3380_s2 + $0x458] sm:$0xff]  ;;  %v2376_v53 = vcombine.high %v433_v32, %v437_v48  ;;  %v489_v39 = vld [vmem:[%s3380_s2 + $0x610] sm:$0xff] }
 0x154   : > { %2095 = vmatprep.subr.bf16.mxu1 %v2314_v51  ;;  %v438_v51 = vld [vmem:[%s3380_s2 + $0x478] sm:$0xff] }
 0x155   : > { %v2377_v30 = vcombine.low %v434_v50, %v438_v51 }
 0x156   : > { %2014 = vmatpush1.bf16.msra.mxu0 %v2311_v56  ;;  %v2378_v56 = vcombine.high %v434_v50, %v438_v51  ;;  %v498_v50 = vld [vmem:[%s3380_s2 + $0x658] sm:$0xff] }
 0x157   : > { %2096 = vmatpush1.bf16.msra.mxu1 %v2313_v57  ;;  %2015 = vmatprep.subr.bf16.mxu0 %v2320_v58  ;;  %v442_v57 = vld [vmem:[%s3380_s2 + $0x498] sm:$0xff] }
 0x158   : > { %2097 = vmatprep.subr.bf16.mxu1 %v2322_v59  ;;  %v446_v58 = vld [vmem:[%s3380_s2 + $0x4b8] sm:$0xff]  ;;  %v2375_v59 = vcombine.low %v433_v32, %v437_v48  ;;  %v497_v48 = vld [vmem:[%s3380_s2 + $0x650] sm:$0xff] }
 0x159   : > { %v2386_v61 = vcombine.high %v442_v57, %v446_v58  ;;  %v502_v51 = vld [vmem:[%s3380_s2 + $0x678] sm:$0xff] }
 0x15a   : > { %2016 = vmatpush1.bf16.msra.mxu0 %v2319_v63  ;;  %v453_v63 = vld [vmem:[%s3380_s2 + $0x4f0] sm:$0xff] }
 0x15b   : > { %2098 = vmatpush1.bf16.msra.mxu1 %v2321_v0  ;;  %2017 = vmatprep.subr.bf16.mxu0 %v2328_v1  ;;  %v454_v0 = vld [vmem:[%s3380_s2 + $0x4f8] sm:$0xff]  ;;  %v2385_v1 = vcombine.low %v442_v57, %v446_v58  ;;  %v509_v57 = vld [vmem:[%s3380_s2 + $0x6b0] sm:$0xff] }
 0x15c   : > { %2099 = vmatprep.subr.bf16.mxu1 %v2330_v2  ;;  %v2392_v2 = vcombine.high %v449_v62, %v453_v63  ;;  %v506_v58 = vld [vmem:[%s3380_s2 + $0x698] sm:$0xff] }
 0x15e   : > { %2018 = vmatpush1.bf16.msra.mxu0 %v2327_v7  ;;  %v462_v7 = vld [vmem:[%s3380_s2 + $0x538] sm:$0xff] }
 0x15f   : > { %2100 = vmatpush1.bf16.msra.mxu1 %v2329_v8  ;;  %2019 = vmatprep.subr.bf16.mxu0 %v2336_v9  ;;  %v2391_v8 = vcombine.low %v449_v62, %v453_v63  ;;  %v2402_v11 = vcombine.high %v458_v6, %v462_v7  ;;  %v513_v63 = vld [vmem:[%s3380_s2 + $0x6d0] sm:$0xff] }
 0x160   : > { %2101 = vmatprep.subr.bf16.mxu1 %v2338_v10  ;;  %v2400_v10 = vcombine.high %v457_v4, %v461_v5 }
 0x162   : > { %2020 = vmatpush1.bf16.msra.mxu0 %v2335_v15  ;;  %v470_v15 = vld [vmem:[%s3380_s2 + $0x578] sm:$0xff] }
 0x163   : > { %2102 = vmatpush1.bf16.msra.mxu1 %v2337_v16  ;;  %2021 = vmatprep.subr.bf16.mxu0 %v2344_v17  ;;  %v2399_v16 = vcombine.low %v457_v4, %v461_v5  ;;  %v2401_v17 = vcombine.low %v458_v6, %v462_v7  ;;  %v2410_v19 = vcombine.high %v466_v14, %v470_v15  ;;  %v521_v5 = vld [vmem:[%s3380_s2 + $0x710] sm:$0xff]  ;;  %v522_v7 = vld [vmem:[%s3380_s2 + $0x718] sm:$0xff] }
 0x164   : > { %2103 = vmatprep.subr.bf16.mxu1 %v2346_v18  ;;  %v2408_v18 = vcombine.high %v465_v12, %v469_v13  ;;  %v525_v6 = vld [vmem:[%s3380_s2 + $0x730] sm:$0xff] }
 0x166   : > { %2022 = vmatpush1.bf16.msra.mxu0 %v2343_v23  ;;  %v478_v23 = vld [vmem:[%s3380_s2 + $0x5b8] sm:$0xff] }
 0x167   : > { %2104 = vmatpush1.bf16.msra.mxu1 %v2345_v24  ;;  %2023 = vmatprep.subr.bf16.mxu0 %v2352_v25  ;;  %v2407_v24 = vcombine.low %v465_v12, %v469_v13  ;;  %v2409_v25 = vcombine.low %v466_v14, %v470_v15  ;;  %v2418_v27 = vcombine.high %v474_v22, %v478_v23  ;;  %v529_v13 = vld [vmem:[%s3380_s2 + $0x750] sm:$0xff]  ;;  %v530_v15 = vld [vmem:[%s3380_s2 + $0x758] sm:$0xff] }
 0x168   : > { %2105 = vmatprep.subr.bf16.mxu1 %v2354_v26  ;;  %v2416_v26 = vcombine.high %v473_v20, %v477_v21  ;;  %v533_v14 = vld [vmem:[%s3380_s2 + $0x770] sm:$0xff] }
 0x16a   : > { %2024 = vmatpush1.bf16.msra.mxu0 %v2351_v34  ;;  %v486_v34 = vld [vmem:[%s3380_s2 + $0x5f8] sm:$0xff] }
 0x16b   : > { %2106 = vmatpush1.bf16.msra.mxu1 %v2353_v35  ;;  %2025 = vmatprep.subr.bf16.mxu0 %v2360_v36  ;;  %v2415_v35 = vcombine.low %v473_v20, %v477_v21  ;;  %v2417_v36 = vcombine.low %v474_v22, %v478_v23  ;;  %v2426_v38 = vcombine.high %v482_v31, %v486_v34  ;;  %v537_v21 = vld [vmem:[%s3380_s2 + $0x790] sm:$0xff]  ;;  %v538_v23 = vld [vmem:[%s3380_s2 + $0x798] sm:$0xff] }
 0x16c   : > { %2107 = vmatprep.subr.bf16.mxu1 %v2362_v37  ;;  %v2424_v37 = vcombine.high %v481_v28, %v485_v29  ;;  %v541_v22 = vld [vmem:[%s3380_s2 + $0x7b0] sm:$0xff] }
 0x16e   : > { %2026 = vmatpush1.bf16.msra.mxu0 %v2359_v44  ;;  %v494_v44 = vld [vmem:[%s3380_s2 + $0x638] sm:$0xff] }
 0x16f   : > { %2108 = vmatpush1.bf16.msra.mxu1 %v2361_v45  ;;  %2036 = vmatprep.subr.bf16.mxu0 %v2368_v46  ;;  %v2423_v45 = vcombine.low %v481_v28, %v485_v29  ;;  %v2425_v46 = vcombine.low %v482_v31, %v486_v34  ;;  %v2434_v32 = vcombine.high %v490_v43, %v494_v44  ;;  %v545_v29 = vld [vmem:[%s3380_s2 + $0x7d0] sm:$0xff]  ;;  %v546_v34 = vld [vmem:[%s3380_s2 + $0x7d8] sm:$0xff] }
 0x170   : > { %2118 = vmatprep.subr.bf16.mxu1 %v2370_v47  ;;  %v2432_v47 = vcombine.high %v489_v39, %v493_v40  ;;  %v549_v31 = vld [vmem:[%s3380_s2 + $0x7f0] sm:$0xff] }
 0x171   : > { %2028 = vmatmul.mubr.bf16.vlgmr.msra.gmra.mrb[8].mxu0 %v2795_v33 }
 0x172   : > { %2110 = vmatmul.mubr.bf16.vlgmr.msra.gmra.mrb[8].mxu1 %v2795_v33  ;;  %2037 = vmatpush1.bf16.msra.mxu0 %v2367_v49  ;;  %v450_v33 = vld [vmem:[%s3380_s2 + $0x4d8] sm:$0xff]  ;;  %v501_v49 = vld [vmem:[%s3380_s2 + $0x670] sm:$0xff] }
 0x173   : > { %2068 = vmatprep.mubr.bf16.mxu0 %v2811_v42  ;;  %2119 = vmatpush1.bf16.msra.mxu1 %v2369_v52  ;;  %v2394_v3 = vcombine.high %v450_v33, %v454_v0  ;;  %v2393_v9 = vcombine.low %v450_v33, %v454_v0  ;;  %v2431_v52 = vcombine.low %v489_v39, %v493_v40  ;;  %v517_v33 = vld [vmem:[%s3380_s2 + $0x6f0] sm:$0xff]  ;;  %v514_v0 = vld [vmem:[%s3380_s2 + $0x6d8] sm:$0xff] }
 0x174   : > { %2150 = vmatprep.mubr.bf16.mxu1 %v2811_v42  ;;  %2038 = vmatprep.subr.bf16.mxu0 %v2376_v53  ;;  %v2383_v42 = vcombine.low %v441_v54, %v445_v55  ;;  %v2433_v53 = vcombine.low %v490_v43, %v494_v44  ;;  %v2440_v54 = vcombine.high %v497_v48, %v501_v49 }
 0x175   : > { %2120 = vmatprep.subr.bf16.mxu1 %v2378_v56  ;;  %v2442_v55 = vcombine.high %v498_v50, %v502_v51  ;;  %v505_v56 = vld [vmem:[%s3380_s2 + $0x690] sm:$0xff]  ;;  %v2487_v40 = vcombine.low %v545_v29, %v549_v31 }
 0x176   : > { %2039 = vmatpush1.bf16.msra.mxu0 %v2375_v59  ;;  %v510_v59 = vld [vmem:[%s3380_s2 + $0x6b8] sm:$0xff] }
 0x177   : > { %2121 = vmatpush1.bf16.msra.mxu1 %v2377_v30  ;;  %2040 = vmatprep.subr.bf16.mxu0 %v2384_v60  ;;  %v2439_v30 = vcombine.low %v497_v48, %v501_v49  ;;  %v2441_v60 = vcombine.low %v498_v50, %v502_v51  ;;  %v2450_v62 = vcombine.high %v506_v58, %v510_v59 }
 0x178   : > { %2122 = vmatprep.subr.bf16.mxu1 %v2386_v61  ;;  %v2448_v61 = vcombine.high %v505_v56, %v509_v57 }
 0x17a   : > { %2041 = vmatpush1.bf16.msra.mxu0 %v2383_v42  ;;  %v518_v42 = vld [vmem:[%s3380_s2 + $0x6f8] sm:$0xff] }
 0x17b   : > { %2123 = vmatpush1.bf16.msra.mxu1 %v2385_v1  ;;  %2042 = vmatprep.subr.bf16.mxu0 %v2392_v2  ;;  %v2447_v1 = vcombine.low %v505_v56, %v509_v57  ;;  %v2449_v2 = vcombine.low %v506_v58, %v510_v59  ;;  %v2458_v4 = vcombine.high %v514_v0, %v518_v42 }
 0x17c   : > { %2124 = vmatprep.subr.bf16.mxu1 %v2394_v3  ;;  %v2456_v3 = vcombine.high %v513_v63, %v517_v33 }
 0x17e   : > { %2043 = vmatpush1.bf16.msra.mxu0 %v2391_v8  ;;  %v526_v8 = vld [vmem:[%s3380_s2 + $0x738] sm:$0xff] }
 0x17f   : > { %2125 = vmatpush1.bf16.msra.mxu1 %v2393_v9  ;;  %2044 = vmatprep.subr.bf16.mxu0 %v2400_v10  ;;  %v2455_v9 = vcombine.low %v513_v63, %v517_v33  ;;  %v2457_v10 = vcombine.low %v514_v0, %v518_v42  ;;  %v2466_v12 = vcombine.high %v522_v7, %v526_v8 }
 0x180   : > { %2126 = vmatprep.subr.bf16.mxu1 %v2402_v11  ;;  %v2464_v11 = vcombine.high %v521_v5, %v525_v6 }
 0x182   : > { %2045 = vmatpush1.bf16.msra.mxu0 %v2399_v16  ;;  %v534_v16 = vld [vmem:[%s3380_s2 + $0x778] sm:$0xff] }
 0x183   : > { %2127 = vmatpush1.bf16.msra.mxu1 %v2401_v17  ;;  %2046 = vmatprep.subr.bf16.mxu0 %v2408_v18  ;;  %v2463_v17 = vcombine.low %v521_v5, %v525_v6  ;;  %v2465_v18 = vcombine.low %v522_v7, %v526_v8  ;;  %v2474_v20 = vcombine.high %v530_v15, %v534_v16 }
 0x184   : > { %2128 = vmatprep.subr.bf16.mxu1 %v2410_v19  ;;  %v2472_v19 = vcombine.high %v529_v13, %v533_v14 }
 0x186   : > { %2047 = vmatpush1.bf16.msra.mxu0 %v2407_v24  ;;  %v542_v24 = vld [vmem:[%s3380_s2 + $0x7b8] sm:$0xff] }
 0x187   : > { %2129 = vmatpush1.bf16.msra.mxu1 %v2409_v25  ;;  %2048 = vmatprep.subr.bf16.mxu0 %v2416_v26  ;;  %v2471_v25 = vcombine.low %v529_v13, %v533_v14  ;;  %v2473_v26 = vcombine.low %v530_v15, %v534_v16  ;;  %v2482_v28 = vcombine.high %v538_v23, %v542_v24 }
 0x188   : > { %2130 = vmatprep.subr.bf16.mxu1 %v2418_v27  ;;  %v2480_v27 = vcombine.high %v537_v21, %v541_v22 }
 0x18a   : > { %2049 = vmatpush1.bf16.msra.mxu0 %v2415_v35  ;;  %v550_v35 = vld [vmem:[%s3380_s2 + $0x7f8] sm:$0xff] }
 0x18b   : > { %2131 = vmatpush1.bf16.msra.mxu1 %v2417_v36  ;;  %2050 = vmatprep.subr.bf16.mxu0 %v2424_v37  ;;  %v2479_v36 = vcombine.low %v537_v21, %v541_v22  ;;  %v2481_v37 = vcombine.low %v538_v23, %v542_v24  ;;  %v2490_v39 = vcombine.high %v546_v34, %v550_v35 }
 0x18c   : > { %2132 = vmatprep.subr.bf16.mxu1 %v2426_v38  ;;  %v2488_v38 = vcombine.high %v545_v29, %v549_v31  ;;  %v2489_v43 = vcombine.low %v546_v34, %v550_v35 }
 0x18e   : > { %2051 = vmatpush1.bf16.msra.mxu0 %v2423_v45 }
 0x18f   : > { %2133 = vmatpush1.bf16.msra.mxu1 %v2425_v46  ;;  %2052 = vmatprep.subr.bf16.mxu0 %v2432_v47 }
 0x190   : > { %2134 = vmatprep.subr.bf16.mxu1 %v2434_v32 }
 0x192   : > { %2053 = vmatpush1.bf16.msra.mxu0 %v2431_v52 }
 0x193   : > { %2135 = vmatpush1.bf16.msra.mxu1 %v2433_v53  ;;  %2054 = vmatprep.subr.bf16.mxu0 %v2440_v54 }
 0x194   : > { %2136 = vmatprep.subr.bf16.mxu1 %v2442_v55 }
 0x196   : > { %2055 = vmatpush1.bf16.msra.mxu0 %v2439_v30 }
 0x197   : > { %2137 = vmatpush1.bf16.msra.mxu1 %v2441_v60  ;;  %2056 = vmatprep.subr.bf16.mxu0 %v2448_v61 }
 0x198   : > { %2138 = vmatprep.subr.bf16.mxu1 %v2450_v62 }
 0x19a   : > { %2057 = vmatpush1.bf16.msra.mxu0 %v2447_v1 }
 0x19b   : > { %2139 = vmatpush1.bf16.msra.mxu1 %v2449_v2  ;;  %2058 = vmatprep.subr.bf16.mxu0 %v2456_v3 }
 0x19c   : > { %2140 = vmatprep.subr.bf16.mxu1 %v2458_v4 }
 0x19e   : > { %2059 = vmatpush1.bf16.msra.mxu0 %v2455_v9 }
 0x19f   : > { %2141 = vmatpush1.bf16.msra.mxu1 %v2457_v10  ;;  %2060 = vmatprep.subr.bf16.mxu0 %v2464_v11 }
 0x1a0   : > { %2142 = vmatprep.subr.bf16.mxu1 %v2466_v12 }
 0x1a2   : > { %2061 = vmatpush1.bf16.msra.mxu0 %v2463_v17 }
 0x1a3   : > { %2143 = vmatpush1.bf16.msra.mxu1 %v2465_v18  ;;  %2062 = vmatprep.subr.bf16.mxu0 %v2472_v19 }
 0x1a4   : > { %2144 = vmatprep.subr.bf16.mxu1 %v2474_v20 }
 0x1a6   : > { %2063 = vmatpush1.bf16.msra.mxu0 %v2471_v25 }
 0x1a7   : > { %2145 = vmatpush1.bf16.msra.mxu1 %v2473_v26  ;;  %2064 = vmatprep.subr.bf16.mxu0 %v2480_v27 }
 0x1a8   : > { %2146 = vmatprep.subr.bf16.mxu1 %v2482_v28 }
 0x1aa   : > { %2065 = vmatpush1.bf16.msra.mxu0 %v2479_v36 }
 0x1ab   : > { %2147 = vmatpush1.bf16.msra.mxu1 %v2481_v37  ;;  %2066 = vmatprep.subr.bf16.mxu0 %v2488_v38 }
 0x1ac   : > { %2148 = vmatprep.subr.bf16.mxu1 %v2490_v39 }
 0x1ae   : > { %2067 = vmatpush1.bf16.msra.mxu0 %v2487_v40 }
 0x1af   : > { %2149 = vmatpush1.bf16.msra.mxu1 %v2489_v43 }
 0x1b1   : > { %2069 = vmatmul.mubr.bf16.vlgmr.msra.gmra.mrb[8].mxu0 %v2990_v41 }
 0x1b2   : > { %2151 = vmatmul.mubr.bf16.vlgmr.msra.gmra.mrb[8].mxu1 %v2990_v41 }
 0x204   : > { %v1906_v44 = vpop.f32.mrb[4].mxu0  ;;  %v1988_v45 = vpop.f32.mrb[4].mxu1 }
 0x205   : > { %2159 = vst [vmem:[%s170_s8] sm:$0xff] %v1906_v44  ;;  %2161 = vst [vmem:[%s170_s8 + $0x10] sm:$0xff] %v1988_v45  ;;  %v1908_v46 = vpop.f32.mrb[5].mxu0  ;;  %v1990_v47 = vpop.f32.mrb[5].mxu1 }
 0x206   : > { %2160 = vst [vmem:[%s170_s8 + $0x8] sm:$0xff] %v1908_v46  ;;  %2162 = vst [vmem:[%s170_s8 + $0x18] sm:$0xff] %v1990_v47  ;;  %v1910_v32 = vpop.f32.mrb[6].mxu0  ;;  %v1992_v48 = vpop.f32.mrb[6].mxu1 }
 0x207   : > { %v1911_v49 = vpop.f32.mrb[7].mxu0  ;;  %v1993_v50 = vpop.f32.mrb[7].mxu1 }
 0x284   : > { %v2070_v51 = vpop.f32.mrb[8].mxu0 }
 0x285   : > { %2163 = vst [vmem:[%s170_s8 + $0x20] sm:$0xff] %v2070_v51  ;;  %v2152_v41 = vpop.f32.mrb[8].mxu1  ;;  %v2072_v52 = vpop.f32.mrb[9].mxu0 }
 0x286   : > { %2165 = vst [vmem:[%s170_s8 + $0x30] sm:$0xff] %v2152_v41  ;;  %2164 = vst [vmem:[%s170_s8 + $0x28] sm:$0xff] %v2072_v52  ;;  %v2154_v53 = vpop.f32.mrb[9].mxu1  ;;  %v2074_v54 = vpop.f32.mrb[10].mxu0 }
 0x287   : > { %2166 = vst [vmem:[%s170_s8 + $0x38] sm:$0xff] %v2154_v53  ;;  %v2156_v55 = vpop.f32.mrb[10].mxu1  ;;  %v2075_v56 = vpop.f32.mrb[11].mxu0 }
 0x288   : > { %v2157_v57 = vpop.f32.mrb[11].mxu1 }
 0x289 PF: > { %s13_s12 = sadd.s32 1, %s2528_s12  }
 0x28a   : > { %p10_p4 = scmp.ge.s32.totalorder %s13_s12, 4  }
 0x28c   :  { %12 = sbr.rel (!%p10_p4) target bundleno = 1 (0x1), region = 62 }

// kernel: dis_forward.19
= control target key start
LH: loop header
LB: loop body
LE: loop exit
PB: predicated region body
PF: predicated region fallthrough
CT: control target
= control target key end

     0   :  { %s1657_s12 = smov 0   ;;  %s1659_s13 = smov 0   ;;  %s1929_s0 = inlined_call_operand.vmem [shape: bf16[128,1536], index: 0, kind: input, shape index: {}]   ;;  %s1930_s1 = inlined_call_operand.vmem [shape: bf16[1536,128], index: 1, kind: input, shape index: {}]   ;;  %s1931_s2 = inlined_call_operand.vmem [shape: f32[1,128], index: 2, kind: input, shape index: {}]   ;;  %s1932_s3 = inlined_call_operand.vmem [shape: f32[128,128], index: 3, kind: output, shape index: {}]  }
   0x1   :  { %s1661_s14 = smov 0   ;;  %s1663_s15 = smov 0  }
   0x2   :  { %s1665_s16 = smov 0  }
   0x3 LB: > { %s25_s17 = sadd.s32 1, %s1630_s15  ;;  %p48_p1 = scmp.ne.s32.totalorder %s1622_s13, %s1618_s12  ;;  %s1634_s16 = sphi %s1665_s16, %s13_s16   ;;  %s1630_s15 = sphi %s1663_s15, %s1936_s15   ;;  %s1626_s14 = sphi %s1661_s14, %s1935_s14   ;;  %s1622_s13 = sphi %s1659_s13, %s1934_s13   ;;  %s1618_s12 = sphi %s1657_s12, %s1933_s12  }
   0x4   : > { %p26_p0 = scmp.ge.s32.totalorder %s25_s17, 3  ;;  %p49_p2 = scmp.eq.s32.totalorder %s1634_s16, 0 }
   0x5   : > { %s41_s19 = sadd.s32 1, %s1622_s13  ;;  %p1267_p5 = scmp.ge.s32.totalorder %s1634_s16, 3 }
   0x6   : > { %s1938_s17 = smov (%p26_p0, %s25_s17), 0  ;;  %p50_p3 = por %p49_p2, %p48_p1 }
   0x7   : > { %s37_s18 = ssub.s32 %s1630_s15, %s1938_s17  ;;  %162 = sbr.rel (%p1267_p5) target bundleno = 34 (0x22), region = 20 }
   0x8   : > { %p39_p4 = scmp.eq.s32.totalorder %s37_s18, 0 }
   0xa   : > { %s1692_s20 = scalar_select %p39_p4, %s1622_s13, %s41_s19  }
   0xe   : > { %165 = sbr.rel (!%p50_p3) target bundleno = 34 (0x22), region = 24  ;;  %s167_s21 = sand.u32 (%p50_p3), 1, %s1622_s13  }
   0xf   : > { %s1346_s22 = sshll.u32 (%p50_p3), %s1630_s15, 4  ;;  %s1268_s23 = sshll.u32 (%p50_p3), %s167_s21, 8 }
  0x10   : > { %s1700_s26 = scalar_lea.vmem (%p50_p3), %s1929_s0, %s1346_s22  ;;  %s1705_s27 = scalar_lea.vmem (%p50_p3), [#allocation3], %s1268_s23 }
  0x11   : > { %v188_v0 = vld [vmem:[%s1700_s26] sm:$0xff] (%p50_p3)  ;;  %v190_v1 = vld [vmem:[%s1700_s26 + $0x8] sm:$0xff] (%p50_p3)  ;;  %v192_v2 = vld [vmem:[%s1700_s26 + $0x30] sm:$0xff] (%p50_p3) }
  0x12   : > { %189 = vst [vmem:[%s1705_s27] sm:$0xff] (%p50_p3), %v188_v0  ;;  %191 = vst [vmem:[%s1705_s27 + $0x8] sm:$0xff] (%p50_p3), %v190_v1  ;;  %v194_v3 = vld [vmem:[%s1700_s26 + $0x38] sm:$0xff] (%p50_p3)  ;;  %v196_v4 = vld [vmem:[%s1700_s26 + $0x60] sm:$0xff] (%p50_p3) }
  0x13   : > { %193 = vst [vmem:[%s1705_s27 + $0x10] sm:$0xff] (%p50_p3), %v192_v2  ;;  %v198_v5 = vld [vmem:[%s1700_s26 + $0x68] sm:$0xff] (%p50_p3)  ;;  %195 = vst [vmem:[%s1705_s27 + $0x18] sm:$0xff] (%p50_p3), %v194_v3  ;;  %v200_v6 = vld [vmem:[%s1700_s26 + $0x90] sm:$0xff] (%p50_p3) }
  0x14   : > { %197 = vst [vmem:[%s1705_s27 + $0x20] sm:$0xff] (%p50_p3), %v196_v4  ;;  %199 = vst [vmem:[%s1705_s27 + $0x28] sm:$0xff] (%p50_p3), %v198_v5  ;;  %v202_v7 = vld [vmem:[%s1700_s26 + $0x98] sm:$0xff] (%p50_p3)  ;;  %v204_v8 = vld [vmem:[%s1700_s26 + $0xc0] sm:$0xff] (%p50_p3) }
  0x15   : > { %201 = vst [vmem:[%s1705_s27 + $0x30] sm:$0xff] %v200_v6  ;;  %203 = vst [vmem:[%s1705_s27 + $0x38] sm:$0xff] %v202_v7  ;;  %v206_v9 = vld [vmem:[%s1700_s26 + $0xc8] sm:$0xff]  ;;  %v208_v10 = vld [vmem:[%s1700_s26 + $0xf0] sm:$0xff] }
  0x16   : > { %205 = vst [vmem:[%s1705_s27 + $0x40] sm:$0xff] %v204_v8  ;;  %v210_v11 = vld [vmem:[%s1700_s26 + $0xf8] sm:$0xff]  ;;  %207 = vst [vmem:[%s1705_s27 + $0x48] sm:$0xff] %v206_v9  ;;  %v212_v12 = vld [vmem:[%s1700_s26 + $0x120] sm:$0xff] }
  0x17   : > { %209 = vst [vmem:[%s1705_s27 + $0x50] sm:$0xff] %v208_v10  ;;  %211 = vst [vmem:[%s1705_s27 + $0x58] sm:$0xff] %v210_v11  ;;  %v214_v13 = vld [vmem:[%s1700_s26 + $0x128] sm:$0xff]  ;;  %v216_v14 = vld [vmem:[%s1700_s26 + $0x150] sm:$0xff] }
  0x18   : > { %213 = vst [vmem:[%s1705_s27 + $0x60] sm:$0xff] %v212_v12  ;;  %215 = vst [vmem:[%s1705_s27 + $0x68] sm:$0xff] %v214_v13  ;;  %v218_v15 = vld [vmem:[%s1700_s26 + $0x158] sm:$0xff]  ;;  %v220_v16 = vld [vmem:[%s1700_s26 + $0x180] sm:$0xff] }
  0x19   : > { %217 = vst [vmem:[%s1705_s27 + $0x70] sm:$0xff] %v216_v14  ;;  %v222_v17 = vld [vmem:[%s1700_s26 + $0x188] sm:$0xff]  ;;  %219 = vst [vmem:[%s1705_s27 + $0x78] sm:$0xff] %v218_v15  ;;  %v224_v18 = vld [vmem:[%s1700_s26 + $0x1b0] sm:$0xff] }
  0x1a   : > { %221 = vst [vmem:[%s1705_s27 + $0x80] sm:$0xff] %v220_v16  ;;  %223 = vst [vmem:[%s1705_s27 + $0x88] sm:$0xff] %v222_v17  ;;  %v226_v19 = vld [vmem:[%s1700_s26 + $0x1b8] sm:$0xff]  ;;  %v228_v20 = vld [vmem:[%s1700_s26 + $0x1e0] sm:$0xff] }
  0x1b   : > { %225 = vst [vmem:[%s1705_s27 + $0x90] sm:$0xff] %v224_v18  ;;  %227 = vst [vmem:[%s1705_s27 + $0x98] sm:$0xff] %v226_v19  ;;  %v230_v21 = vld [vmem:[%s1700_s26 + $0x1e8] sm:$0xff]  ;;  %v232_v22 = vld [vmem:[%s1700_s26 + $0x210] sm:$0xff] }
  0x1c   : > { %229 = vst [vmem:[%s1705_s27 + $0xa0] sm:$0xff] %v228_v20  ;;  %v234_v23 = vld [vmem:[%s1700_s26 + $0x218] sm:$0xff]  ;;  %231 = vst [vmem:[%s1705_s27 + $0xa8] sm:$0xff] %v230_v21  ;;  %v236_v24 = vld [vmem:[%s1700_s26 + $0x240] sm:$0xff] }
  0x1d   : > { %233 = vst [vmem:[%s1705_s27 + $0xb0] sm:$0xff] %v232_v22  ;;  %235 = vst [vmem:[%s1705_s27 + $0xb8] sm:$0xff] %v234_v23  ;;  %v238_v25 = vld [vmem:[%s1700_s26 + $0x248] sm:$0xff]  ;;  %v240_v26 = vld [vmem:[%s1700_s26 + $0x270] sm:$0xff] }
  0x1e   : > { %237 = vst [vmem:[%s1705_s27 + $0xc0] sm:$0xff] %v236_v24  ;;  %239 = vst [vmem:[%s1705_s27 + $0xc8] sm:$0xff] %v238_v25  ;;  %v242_v27 = vld [vmem:[%s1700_s26 + $0x278] sm:$0xff]  ;;  %v244_v28 = vld [vmem:[%s1700_s26 + $0x2a0] sm:$0xff] }
  0x1f   : > { %241 = vst [vmem:[%s1705_s27 + $0xd0] sm:$0xff] %v240_v26  ;;  %v246_v29 = vld [vmem:[%s1700_s26 + $0x2a8] sm:$0xff]  ;;  %243 = vst [vmem:[%s1705_s27 + $0xd8] sm:$0xff] %v242_v27  ;;  %v248_v30 = vld [vmem:[%s1700_s26 + $0x2d0] sm:$0xff] }
  0x20   : > { %245 = vst [vmem:[%s1705_s27 + $0xe0] sm:$0xff] %v244_v28  ;;  %247 = vst [vmem:[%s1705_s27 + $0xe8] sm:$0xff] %v246_v29  ;;  %v250_v31 = vld [vmem:[%s1700_s26 + $0x2d8] sm:$0xff] }
  0x21   : > { %249 = vst [vmem:[%s1705_s27 + $0xf0] sm:$0xff] %v248_v30  ;;  %251 = vst [vmem:[%s1705_s27 + $0xf8] sm:$0xff] %v250_v31 }
  0x22 PF: > { %p1271_p6 = scmp.ge.s32.totalorder %s1634_s16, 1  ;;  %p268_p7 = scmp.lt.s32.totalorder %s1634_s16, 4 }
  0x24   : > { %p269_p8 = pnand %p1271_p6, %p268_p7 }
  0x25   : > { %s275_s28 = sand.u32 (!%p269_p8), 1, %s1618_s12   ;;  %s1273_s29 = sshll.u32 (!%p269_p8), %s1626_s14, 6 }
  0x26   : > { %272 = sbr.rel (%p269_p8) target bundleno = 381 (0x17d), region = 51  ;;  %s1272_s30 = sshll.u32 (!%p269_p8), %s275_s28, 8 }
  0x27   : > { %p315_p9 = scmp.lt.s32.totalorder (!%p269_p8), %s1273_s29, 191  ;;  %s1777_s8 = scalar_lea.vmem (!%p269_p8), [#allocation3], %s1272_s30 }
  0x28   : > { %p1275_p10 = scmp.ne.s32.totalorder (!%p269_p8), %s1626_s14, 0 }
  0x2d   : > { %s1940_s29 = smov (!%p315_p9, %s1273_s29), 191  ;;  %339 = sbr.rel (%p1275_p10) target bundleno = 55 (0x37), region = 59 }
  0x2e   : > { %s1274_s4 = sshll.u32 %s1940_s29, 2  ;;  %v1636_v32 = vmov (!%p1275_p10), 0.0  }
  0x2f   : > { %s1775_s7 = scalar_lea.vmem %s1930_s1, %s1274_s4  ;;  %340 = vst [vmem:[#allocation2] sm:$0xff] (!%p1275_p10), %v1636_v32  ;;  %341 = vst [vmem:[#allocation2 + $0x8] sm:$0xff] (!%p1275_p10), %v1636_v32 }
  0x30   : > { %342 = vst [vmem:[#allocation2 + $0x10] sm:$0xff] (!%p1275_p10), %v1636_v32  ;;  %343 = vst [vmem:[#allocation2 + $0x18] sm:$0xff] (!%p1275_p10), %v1636_v32 }
  0x31   : > { %344 = vst [vmem:[#allocation2 + $0x20] sm:$0xff] (!%p1275_p10), %v1636_v32  ;;  %345 = vst [vmem:[#allocation2 + $0x28] sm:$0xff] (!%p1275_p10), %v1636_v32 }
  0x32   : > { %346 = vst [vmem:[#allocation2 + $0x30] sm:$0xff] (!%p1275_p10), %v1636_v32  ;;  %347 = vst [vmem:[#allocation2 + $0x38] sm:$0xff] (!%p1275_p10), %v1636_v32 }
  0x33   : > { %348 = vst [vmem:[#allocation2 + $0x40] sm:$0xff] (!%p1275_p10), %v1636_v32  ;;  %349 = vst [vmem:[#allocation2 + $0x48] sm:$0xff] (!%p1275_p10), %v1636_v32 }
  0x34   : > { %350 = vst [vmem:[#allocation2 + $0x50] sm:$0xff] %v1636_v32  ;;  %351 = vst [vmem:[#allocation2 + $0x58] sm:$0xff] %v1636_v32 }
  0x35   : > { %352 = vst [vmem:[#allocation2 + $0x60] sm:$0xff] %v1636_v32  ;;  %353 = vst [vmem:[#allocation2 + $0x68] sm:$0xff] %v1636_v32 }
  0x36   : > { %354 = vst [vmem:[#allocation2 + $0x70] sm:$0xff] %v1636_v32  ;;  %355 = vst [vmem:[#allocation2 + $0x78] sm:$0xff] %v1636_v32 }
  0x37 PF: > { %v1516_v33 = vld [vmem:[%s1775_s7 + $0x40] sm:$0xff]   ;;  %v1520_v37 = vld [vmem:[%s1775_s7 + $0x48] sm:$0xff]   ;;  %v1524_v41 = vld [vmem:[%s1775_s7 + $0x50] sm:$0xff]   ;;  %p1340_p11 = scmp.ne.s32.totalorder %s1626_s14, 2 }
  0x38   : > { %v1517_v34 = vld [vmem:[%s1775_s7 + $0xc0] sm:$0xff]   ;;  %1347 = vmatprep.subr.bf16.mxu0 %v1516_v33  ;;  %v1521_v38 = vld [vmem:[%s1775_s7 + $0xc8] sm:$0xff]   ;;  %v1525_v42 = vld [vmem:[%s1775_s7 + $0xd0] sm:$0xff]  }
  0x39   : > { %v1518_v35 = vld [vmem:[%s1775_s7] sm:$0xff]   ;;  %1411 = vmatprep.subr.bf16.mxu1 %v1517_v34  ;;  %v1522_v39 = vld [vmem:[%s1775_s7 + $0x8] sm:$0xff]   ;;  %v1526_v43 = vld [vmem:[%s1775_s7 + $0x10] sm:$0xff]  }
  0x3a   : > { %v1519_v36 = vld [vmem:[%s1775_s7 + $0x80] sm:$0xff]   ;;  %1348 = vmatpush3.bf16.msra.mxu0 %v1518_v35  ;;  %v1523_v40 = vld [vmem:[%s1775_s7 + $0x88] sm:$0xff]   ;;  %v1527_v44 = vld [vmem:[%s1775_s7 + $0x90] sm:$0xff]  }
  0x3b   : > { %1412 = vmatpush3.bf16.msra.mxu1 %v1519_v36  ;;  %1349 = vmatprep.subr.bf16.mxu0 %v1520_v37  ;;  %v1528_v45 = vld [vmem:[%s1775_s7 + $0x58] sm:$0xff]   ;;  %v1532_v49 = vld [vmem:[%s1775_s7 + $0x60] sm:$0xff]   ;;  %v1536_v53 = vld [vmem:[%s1775_s7 + $0x68] sm:$0xff]  }
  0x3c   : > { %1413 = vmatprep.subr.bf16.mxu1 %v1521_v38  ;;  %v1529_v46 = vld [vmem:[%s1775_s7 + $0xd8] sm:$0xff]   ;;  %v1533_v50 = vld [vmem:[%s1775_s7 + $0xe0] sm:$0xff]   ;;  %v1537_v54 = vld [vmem:[%s1775_s7 + $0xe8] sm:$0xff]  }
  0x3d   : > { %v1530_v47 = vld [vmem:[%s1775_s7 + $0x18] sm:$0xff]   ;;  %v1534_v51 = vld [vmem:[%s1775_s7 + $0x20] sm:$0xff]   ;;  %v1538_v55 = vld [vmem:[%s1775_s7 + $0x28] sm:$0xff]  }
  0x3e   : > { %1350 = vmatpush3.bf16.msra.mxu0 %v1522_v39  ;;  %v1531_v48 = vld [vmem:[%s1775_s7 + $0x98] sm:$0xff]   ;;  %v1535_v52 = vld [vmem:[%s1775_s7 + $0xa0] sm:$0xff]   ;;  %v1539_v56 = vld [vmem:[%s1775_s7 + $0xa8] sm:$0xff]  }
  0x3f   : > { %1414 = vmatpush3.bf16.msra.mxu1 %v1523_v40  ;;  %1351 = vmatprep.subr.bf16.mxu0 %v1524_v41  ;;  %v1540_v57 = vld [vmem:[%s1775_s7 + $0x70] sm:$0xff]   ;;  %v1544_v61 = vld [vmem:[%s1775_s7 + $0x78] sm:$0xff]  }
  0x40   : > { %1415 = vmatprep.subr.bf16.mxu1 %v1525_v42  ;;  %v1541_v58 = vld [vmem:[%s1775_s7 + $0xf0] sm:$0xff]   ;;  %v1545_v62 = vld [vmem:[%s1775_s7 + $0xf8] sm:$0xff]   ;;  %v356_v42 = vld [vmem:[#allocation2] sm:$0xff] }
  0x41   : > { %v1542_v59 = vld [vmem:[%s1775_s7 + $0x30] sm:$0xff]   ;;  %v1546_v63 = vld [vmem:[%s1775_s7 + $0x38] sm:$0xff]  }
  0x42   : > { %1352 = vmatpush3.bf16.msra.mxu0 %v1526_v43  ;;  %v1543_v60 = vld [vmem:[%s1775_s7 + $0xb0] sm:$0xff]   ;;  %v1547_v0 = vld [vmem:[%s1775_s7 + $0xb8] sm:$0xff]  }
  0x43   : > { %1416 = vmatpush3.bf16.msra.mxu1 %v1527_v44  ;;  %1353 = vmatprep.subr.bf16.mxu0 %v1528_v45  ;;  %v1548_v1 = vld [vmem:[%s1777_s8] ss:$16 sps:$4 sm:$0xff]   ;;  %v1550_v2 = vld [vmem:[%s1777_s8 + $0x4] ss:$16 sps:$4 sm:$0xff]   ;;  %v1551_v3 = vld [vmem:[%s1777_s8 + $0x8] ss:$16 sps:$4 sm:$0xff]  }
  0x44   : > { %1417 = vmatprep.subr.bf16.mxu1 %v1529_v46  ;;  %v1553_v4 = vld [vmem:[%s1777_s8 + $0xc] ss:$16 sps:$4 sm:$0xff]   ;;  %852 = vmatprep.mubr.bf16.mxu0 %v1550_v2  ;;  %v1554_v5 = vld [vmem:[%s1777_s8 + $0x24] ss:$16 sps:$4 sm:$0xff]   ;;  %v1558_v7 = vld [vmem:[%s1777_s8 + $0x20] ss:$16 sps:$4 sm:$0xff]  }
  0x45   : > { %949 = vmatprep.mubr.bf16.mxu1 %v1553_v4  ;;  %v1556_v6 = vld [vmem:[%s1777_s8 + $0x2c] ss:$16 sps:$4 sm:$0xff]   ;;  %v1559_v8 = vld [vmem:[%s1777_s8 + $0x28] ss:$16 sps:$4 sm:$0xff]   ;;  %v1560_v9 = vld [vmem:[%s1777_s8 + $0x44] ss:$16 sps:$4 sm:$0xff]  }
  0x46   : > { %1354 = vmatpush3.bf16.msra.mxu0 %v1530_v47  ;;  %v1562_v10 = vld [vmem:[%s1777_s8 + $0x4c] ss:$16 sps:$4 sm:$0xff]   ;;  %v1564_v11 = vld [vmem:[%s1777_s8 + $0x40] ss:$16 sps:$4 sm:$0xff]   ;;  %v1565_v12 = vld [vmem:[%s1777_s8 + $0x48] ss:$16 sps:$4 sm:$0xff]  }
  0x47   : > { %1418 = vmatpush3.bf16.msra.mxu1 %v1531_v48  ;;  %1355 = vmatprep.subr.bf16.mxu0 %v1532_v49  ;;  %v1566_v13 = vld [vmem:[%s1777_s8 + $0x64] ss:$16 sps:$4 sm:$0xff]   ;;  %v1568_v14 = vld [vmem:[%s1777_s8 + $0x6c] ss:$16 sps:$4 sm:$0xff]   ;;  %v1570_v15 = vld [vmem:[%s1777_s8 + $0x60] ss:$16 sps:$4 sm:$0xff]  }
  0x48   : > { %1419 = vmatprep.subr.bf16.mxu1 %v1533_v50  ;;  %v1571_v16 = vld [vmem:[%s1777_s8 + $0x68] ss:$16 sps:$4 sm:$0xff]   ;;  %v1572_v17 = vld [vmem:[%s1777_s8 + $0x84] ss:$16 sps:$4 sm:$0xff]   ;;  %v1574_v18 = vld [vmem:[%s1777_s8 + $0x8c] ss:$16 sps:$4 sm:$0xff]  }
  0x49   : > { %v1576_v19 = vld [vmem:[%s1777_s8 + $0x80] ss:$16 sps:$4 sm:$0xff]   ;;  %v1577_v20 = vld [vmem:[%s1777_s8 + $0x88] ss:$16 sps:$4 sm:$0xff]   ;;  %v1578_v21 = vld [vmem:[%s1777_s8 + $0xa4] ss:$16 sps:$4 sm:$0xff]  }
  0x4a   : > { %1356 = vmatpush3.bf16.msra.mxu0 %v1534_v51  ;;  %v1580_v22 = vld [vmem:[%s1777_s8 + $0xac] ss:$16 sps:$4 sm:$0xff]   ;;  %v1582_v23 = vld [vmem:[%s1777_s8 + $0xa0] ss:$16 sps:$4 sm:$0xff]   ;;  %v1583_v24 = vld [vmem:[%s1777_s8 + $0xa8] ss:$16 sps:$4 sm:$0xff]  }
  0x4b   : > { %1420 = vmatpush3.bf16.msra.mxu1 %v1535_v52  ;;  %1357 = vmatprep.subr.bf16.mxu0 %v1536_v53  ;;  %v1584_v25 = vld [vmem:[%s1777_s8 + $0xc4] ss:$16 sps:$4 sm:$0xff]   ;;  %v1586_v26 = vld [vmem:[%s1777_s8 + $0xcc] ss:$16 sps:$4 sm:$0xff]   ;;  %v1588_v27 = vld [vmem:[%s1777_s8 + $0xc0] ss:$16 sps:$4 sm:$0xff]  }
  0x4c   : > { %1421 = vmatprep.subr.bf16.mxu1 %v1537_v54  ;;  %v1589_v28 = vld [vmem:[%s1777_s8 + $0xc8] ss:$16 sps:$4 sm:$0xff]   ;;  %v1590_v29 = vld [vmem:[%s1777_s8 + $0xe4] ss:$16 sps:$4 sm:$0xff]   ;;  %v1592_v30 = vld [vmem:[%s1777_s8 + $0xec] ss:$16 sps:$4 sm:$0xff]  }
  0x4d   : > { %v1594_v31 = vld [vmem:[%s1777_s8 + $0xe0] ss:$16 sps:$4 sm:$0xff]   ;;  %v1595_v32 = vld [vmem:[%s1777_s8 + $0xe8] ss:$16 sps:$4 sm:$0xff]  }
  0x4e   : > { %1358 = vmatpush3.bf16.msra.mxu0 %v1538_v55  ;;  %v357_v47 = vld [vmem:[#allocation2 + $0x8] sm:$0xff] }
  0x4f   : > { %1422 = vmatpush3.bf16.msra.mxu1 %v1539_v56  ;;  %1359 = vmatprep.subr.bf16.mxu0 %v1540_v57 }
  0x50   : > { %1423 = vmatprep.subr.bf16.mxu1 %v1541_v58 }
  0x52   : > { %1360 = vmatpush3.bf16.msra.mxu0 %v1542_v59 }
  0x53   : > { %1424 = vmatpush3.bf16.msra.mxu1 %v1543_v60  ;;  %1361 = vmatprep.subr.bf16.mxu0 %v1544_v61  ;;  %v358_v60 = vld [vmem:[#allocation2 + $0x10] sm:$0xff] }
  0x54   : > { %1425 = vmatprep.subr.bf16.mxu1 %v1545_v62 }
  0x56   : > { %1362 = vmatpush3.bf16.msra.mxu0 %v1546_v63 }
  0x57   : > { %1426 = vmatpush3.bf16.msra.mxu1 %v1547_v0 }
  0x59   : > { %853 = vmatmul.mubr.bf16.vlgmr.msra.gmra.mrb[0].mxu0 %v1548_v1  ;;  %v359_v1 = vld [vmem:[#allocation2 + $0x18] sm:$0xff] }
  0x5a   : > { %950 = vmatmul.mubr.bf16.vlgmr.msra.gmra.mrb[0].mxu1 %v1551_v3  ;;  %860 = vmatprep.mubr.bf16.mxu0 %v1554_v5 }
  0x5b   : > { %957 = vmatprep.mubr.bf16.mxu1 %v1556_v6 }
  0x61   : > { %861 = vmatmul.mubr.bf16.gmra.mrb[4].mxu0 %v1558_v7 }
  0x62   : > { %958 = vmatmul.mubr.bf16.gmra.mrb[4].mxu1 %v1559_v8  ;;  %868 = vmatprep.mubr.bf16.mxu0 %v1560_v9 }
  0x63   : > { %965 = vmatprep.mubr.bf16.mxu1 %v1562_v10 }
  0x69   : > { %869 = vmatmul.mubr.bf16.gmra.mrb[8].mxu0 %v1564_v11 }
  0x6a   : > { %966 = vmatmul.mubr.bf16.gmra.mrb[8].mxu1 %v1565_v12  ;;  %876 = vmatprep.mubr.bf16.mxu0 %v1566_v13 }
  0x6b   : > { %973 = vmatprep.mubr.bf16.mxu1 %v1568_v14  ;;  %v360_v14 = vld [vmem:[#allocation2 + $0x20] sm:$0xff] }
  0x71   : > { %877 = vmatmul.mubr.bf16.gmra.mrb[12].mxu0 %v1570_v15 }
  0x72   : > { %974 = vmatmul.mubr.bf16.gmra.mrb[12].mxu1 %v1571_v16  ;;  %884 = vmatprep.mubr.bf16.mxu0 %v1572_v17 }
  0x73   : > { %981 = vmatprep.mubr.bf16.mxu1 %v1574_v18 }
  0x79   : > { %885 = vmatmul.mubr.bf16.gmra.mrb[16].mxu0 %v1576_v19  ;;  %v361_v19 = vld [vmem:[#allocation2 + $0x28] sm:$0xff] }
  0x7a   : > { %982 = vmatmul.mubr.bf16.gmra.mrb[16].mxu1 %v1577_v20  ;;  %892 = vmatprep.mubr.bf16.mxu0 %v1578_v21 }
  0x7b   : > { %989 = vmatprep.mubr.bf16.mxu1 %v1580_v22 }
  0x81   : > { %893 = vmatmul.mubr.bf16.gmra.mrb[20].mxu0 %v1582_v23 }
  0x82   : > { %990 = vmatmul.mubr.bf16.gmra.mrb[20].mxu1 %v1583_v24  ;;  %900 = vmatprep.mubr.bf16.mxu0 %v1584_v25 }
  0x83   : > { %997 = vmatprep.mubr.bf16.mxu1 %v1586_v26 }
  0x89   : > { %901 = vmatmul.mubr.bf16.gmra.mrb[24].mxu0 %v1588_v27 }
  0x8a   : > { %998 = vmatmul.mubr.bf16.gmra.mrb[24].mxu1 %v1589_v28  ;;  %908 = vmatprep.mubr.bf16.mxu0 %v1590_v29 }
  0x8b   : > { %1005 = vmatprep.mubr.bf16.mxu1 %v1592_v30 }
  0x91   : > { %909 = vmatmul.mubr.bf16.gmra.mrb[28].mxu0 %v1594_v31 }
  0x92   : > { %1006 = vmatmul.mubr.bf16.gmra.mrb[28].mxu1 %v1595_v32  ;;  %v362_v32 = vld [vmem:[#allocation2 + $0x30] sm:$0xff] }
 0x12c   : > { %v1363_v33 = vpop.f32.mrb[0].mxu0 }
 0x12d   : > { %v1427_v34 = vpop.f32.mrb[0].mxu1  ;;  %v1364_v35 = vpop.f32.mrb[1].mxu0 }
 0x12e   : > { %v1365_v36 = vadd.f32 %v1364_v35, %v1363_v33  ;;  %v1428_v37 = vpop.f32.mrb[1].mxu1  ;;  %v1366_v38 = vpop.f32.mrb[2].mxu0 }
 0x12f   : > { %v1429_v39 = vadd.f32 %v1428_v37, %v1427_v34  ;;  %v1430_v40 = vpop.f32.mrb[2].mxu1  ;;  %v1367_v41 = vpop.f32.mrb[3].mxu0  ;;  %v363_v37 = vld [vmem:[#allocation2 + $0x38] sm:$0xff] }
 0x130   : > { %v1368_v43 = vadd.f32 %v1367_v41, %v1366_v38  ;;  %v1431_v44 = vpop.f32.mrb[3].mxu1 }
 0x131   : > { %v952_v45 = vadd.f32 %v1429_v39, %v1365_v36  ;;  %v1432_v46 = vadd.f32 %v1431_v44, %v1430_v40 }
 0x133   : > { %v1014_v48 = vadd.f32 %v952_v45, %v356_v42  ;;  %v955_v49 = vadd.f32 %v1432_v46, %v1368_v43 }
 0x134   : > { %v1369_v50 = vpop.f32.mrb[4].mxu0 }
 0x135   : > { %1030 = vst [vmem:[#allocation2] sm:$0xff] %v1014_v48  ;;  %v1015_v51 = vadd.f32 %v955_v49, %v357_v47  ;;  %v1433_v52 = vpop.f32.mrb[4].mxu1  ;;  %v1370_v53 = vpop.f32.mrb[5].mxu0 }
 0x136   : > { %v1371_v54 = vadd.f32 %v1370_v53, %v1369_v50  ;;  %v1434_v55 = vpop.f32.mrb[5].mxu1  ;;  %v1372_v56 = vpop.f32.mrb[6].mxu0  ;;  %v364_v50 = vld [vmem:[#allocation2 + $0x40] sm:$0xff] }
 0x137   : > { %1031 = vst [vmem:[#allocation2 + $0x8] sm:$0xff] %v1015_v51  ;;  %v1435_v57 = vadd.f32 %v1434_v55, %v1433_v52  ;;  %v1436_v58 = vpop.f32.mrb[6].mxu1  ;;  %v1373_v59 = vpop.f32.mrb[7].mxu0  ;;  %v365_v55 = vld [vmem:[#allocation2 + $0x48] sm:$0xff] }
 0x138   : > { %v1374_v61 = vadd.f32 %v1373_v59, %v1372_v56  ;;  %v1437_v62 = vpop.f32.mrb[7].mxu1 }
 0x139   : > { %v960_v63 = vadd.f32 %v1435_v57, %v1371_v54  ;;  %v1438_v0 = vadd.f32 %v1437_v62, %v1436_v58 }
 0x13b   : > { %v1016_v2 = vadd.f32 %v960_v63, %v358_v60  ;;  %v963_v3 = vadd.f32 %v1438_v0, %v1374_v61 }
 0x13c   : > { %v1375_v4 = vpop.f32.mrb[8].mxu0 }
 0x13d   : > { %1032 = vst [vmem:[#allocation2 + $0x10] sm:$0xff] %v1016_v2  ;;  %v1017_v5 = vadd.f32 %v963_v3, %v359_v1  ;;  %v1439_v6 = vpop.f32.mrb[8].mxu1  ;;  %v1376_v7 = vpop.f32.mrb[9].mxu0 }
 0x13e   : > { %v1377_v8 = vadd.f32 %v1376_v7, %v1375_v4  ;;  %v1440_v9 = vpop.f32.mrb[9].mxu1  ;;  %v1378_v10 = vpop.f32.mrb[10].mxu0  ;;  %v366_v4 = vld [vmem:[#allocation2 + $0x50] sm:$0xff] }
 0x13f   : > { %1033 = vst [vmem:[#allocation2 + $0x18] sm:$0xff] %v1017_v5  ;;  %v1441_v11 = vadd.f32 %v1440_v9, %v1439_v6  ;;  %v1442_v12 = vpop.f32.mrb[10].mxu1  ;;  %v1379_v13 = vpop.f32.mrb[11].mxu0  ;;  %v367_v9 = vld [vmem:[#allocation2 + $0x58] sm:$0xff] }
 0x140   : > { %v1380_v15 = vadd.f32 %v1379_v13, %v1378_v10  ;;  %v1443_v16 = vpop.f32.mrb[11].mxu1 }
 0x141   : > { %v968_v17 = vadd.f32 %v1441_v11, %v1377_v8  ;;  %v1444_v18 = vadd.f32 %v1443_v16, %v1442_v12 }
 0x143   : > { %v1018_v20 = vadd.f32 %v968_v17, %v360_v14  ;;  %v971_v21 = vadd.f32 %v1444_v18, %v1380_v15 }
 0x144   : > { %v1381_v22 = vpop.f32.mrb[12].mxu0 }
 0x145   : > { %1034 = vst [vmem:[#allocation2 + $0x20] sm:$0xff] %v1018_v20  ;;  %v1019_v23 = vadd.f32 %v971_v21, %v361_v19  ;;  %v1445_v24 = vpop.f32.mrb[12].mxu1  ;;  %v1382_v25 = vpop.f32.mrb[13].mxu0 }
 0x146   : > { %v1383_v26 = vadd.f32 %v1382_v25, %v1381_v22  ;;  %v1446_v27 = vpop.f32.mrb[13].mxu1  ;;  %v1384_v28 = vpop.f32.mrb[14].mxu0  ;;  %v368_v22 = vld [vmem:[#allocation2 + $0x60] sm:$0xff] }
 0x147   : > { %1035 = vst [vmem:[#allocation2 + $0x28] sm:$0xff] %v1019_v23  ;;  %v1447_v29 = vadd.f32 %v1446_v27, %v1445_v24  ;;  %v1448_v30 = vpop.f32.mrb[14].mxu1  ;;  %v1385_v31 = vpop.f32.mrb[15].mxu0  ;;  %v369_v27 = vld [vmem:[#allocation2 + $0x68] sm:$0xff] }
 0x148   : > { %v1386_v33 = vadd.f32 %v1385_v31, %v1384_v28  ;;  %v1449_v34 = vpop.f32.mrb[15].mxu1 }
 0x149   : > { %v976_v35 = vadd.f32 %v1447_v29, %v1383_v26  ;;  %v1450_v36 = vadd.f32 %v1449_v34, %v1448_v30 }
 0x14b   : > { %v1020_v38 = vadd.f32 %v976_v35, %v362_v32  ;;  %v979_v39 = vadd.f32 %v1450_v36, %v1386_v33 }
 0x14c   : > { %v1387_v40 = vpop.f32.mrb[16].mxu0 }
 0x14d   : > { %1036 = vst [vmem:[#allocation2 + $0x30] sm:$0xff] %v1020_v38  ;;  %v1021_v41 = vadd.f32 %v979_v39, %v363_v37  ;;  %v1451_v42 = vpop.f32.mrb[16].mxu1  ;;  %v1388_v43 = vpop.f32.mrb[17].mxu0 }
 0x14e   : > { %v1389_v44 = vadd.f32 %v1388_v43, %v1387_v40  ;;  %v1452_v45 = vpop.f32.mrb[17].mxu1  ;;  %v1390_v46 = vpop.f32.mrb[18].mxu0  ;;  %v370_v40 = vld [vmem:[#allocation2 + $0x70] sm:$0xff] }
 0x14f   : > { %1037 = vst [vmem:[#allocation2 + $0x38] sm:$0xff] %v1021_v41  ;;  %v1453_v47 = vadd.f32 %v1452_v45, %v1451_v42  ;;  %v1454_v48 = vpop.f32.mrb[18].mxu1  ;;  %v1391_v49 = vpop.f32.mrb[19].mxu0  ;;  %v371_v45 = vld [vmem:[#allocation2 + $0x78] sm:$0xff] }
 0x150   : > { %v1392_v51 = vadd.f32 %v1391_v49, %v1390_v46  ;;  %v1455_v52 = vpop.f32.mrb[19].mxu1  ;;  %v1050_v49 = vld [vmem:[#allocation2] sm:$0xff] (!%p1340_p11) }
 0x151   : > { %v984_v53 = vadd.f32 %v1453_v47, %v1389_v44  ;;  %v1456_v54 = vadd.f32 %v1455_v52, %v1454_v48 }
 0x153   : > { %v1022_v56 = vadd.f32 %v984_v53, %v364_v50  ;;  %v987_v57 = vadd.f32 %v1456_v54, %v1392_v51  ;;  %v1848_v50 = vld [vmem:[%s1931_s2] ss:$0 sm:$0xff] (!%p1340_p11)  ;;  %v1051_v51 = vld [vmem:[#allocation2 + $0x8] sm:$0xff] (!%p1340_p11)  ;;  %v1052_v54 = vld [vmem:[#allocation2 + $0x10] sm:$0xff] (!%p1340_p11) }
 0x154   : > { %v1393_v58 = vpop.f32.mrb[20].mxu0  ;;  %v1073_v52 = vadd.f32 (!%p1340_p11), %v1848_v50, %v1050_v49  ;;  %v1074_v53 = vadd.f32 (!%p1340_p11), %v1848_v50, %v1051_v51 }
 0x155   : > { %1038 = vst [vmem:[#allocation2 + $0x40] sm:$0xff] %v1022_v56  ;;  %v1023_v59 = vadd.f32 %v987_v57, %v365_v55  ;;  %v1457_v60 = vpop.f32.mrb[20].mxu1  ;;  %v1394_v61 = vpop.f32.mrb[21].mxu0  ;;  %v1053_v55 = vld [vmem:[#allocation2 + $0x18] sm:$0xff] (!%p1340_p11)  ;;  %v1054_v56 = vld [vmem:[#allocation2 + $0x20] sm:$0xff] (!%p1340_p11)  ;;  %v1075_v57 = vadd.f32 (!%p1340_p11), %v1848_v50, %v1052_v54 }
 0x156   : > { %v1395_v62 = vadd.f32 %v1394_v61, %v1393_v58  ;;  %v1458_v63 = vpop.f32.mrb[21].mxu1  ;;  %v1396_v0 = vpop.f32.mrb[22].mxu0  ;;  %v1076_v58 = vadd.f32 (!%p1340_p11), %v1848_v50, %v1053_v55  ;;  %v1056_v61 = vld [vmem:[#allocation2 + $0x30] sm:$0xff] (!%p1340_p11)  ;;  %vm1089_vm0 = vcmp.ge.f32.partialorder (!%p1340_p11), %v1073_v52, 0.0  ;;  %vm1090_vm1 = vcmp.ge.f32.partialorder (!%p1340_p11), %v1074_v53, 0.0 }
 0x157   : > { %1039 = vst [vmem:[#allocation2 + $0x48] sm:$0xff] %v1023_v59  ;;  %v1459_v1 = vadd.f32 %v1458_v63, %v1457_v60  ;;  %v1460_v2 = vpop.f32.mrb[22].mxu1  ;;  %v1397_v3 = vpop.f32.mrb[23].mxu0  ;;  %v1077_v59 = vadd.f32 (!%p1340_p11), %v1848_v50, %v1054_v56  ;;  %v1055_v60 = vld [vmem:[#allocation2 + $0x28] sm:$0xff] (!%p1340_p11)  ;;  %v1105_v63 = vmul.f32 (!%p1340_p11), 0.2, %v1073_v52 }
 0x158   : > { %v1398_v5 = vadd.f32 %v1397_v3, %v1396_v0  ;;  %v1461_v6 = vpop.f32.mrb[23].mxu1  ;;  %v1106_v0 = vmul.f32 (!%p1340_p11), 0.2, %v1074_v53  ;;  %vm1091_vm2 = vcmp.ge.f32.partialorder (!%p1340_p11), %v1075_v57, 0.0  ;;  %vm1092_vm3 = vcmp.ge.f32.partialorder (!%p1340_p11), %v1076_v58, 0.0 }
 0x159   : > { %v992_v7 = vadd.f32 %v1459_v1, %v1395_v62  ;;  %v1462_v8 = vadd.f32 %v1461_v6, %v1460_v2  ;;  %v1057_v62 = vld [vmem:[#allocation2 + $0x38] sm:$0xff] (!%p1340_p11)  ;;  %v1107_v1 = vmul.f32 (!%p1340_p11), 0.2, %v1075_v57  ;;  %v1108_v2 = vmul.f32 (!%p1340_p11), 0.2, %v1076_v58 }
 0x15a   : > { %v1121_v3 = vsel (!%p1340_p11), %vm1089_vm0, %v1073_v52, %v1105_v63  ;;  %vm1093_vm4 = vcmp.ge.f32.partialorder (!%p1340_p11), %v1077_v59, 0.0 }
 0x15b   : > { %v1024_v10 = vadd.f32 %v992_v7, %v366_v4  ;;  %v995_v11 = vadd.f32 %v1462_v8, %v1398_v5  ;;  %v1122_v4 = vsel (!%p1340_p11), %vm1090_vm1, %v1074_v53, %v1106_v0  ;;  %v1109_v5 = vmul.f32 (!%p1340_p11), 0.2, %v1077_v59  ;;  %1137 = vst [vmem:[%s1932_s3] sm:$0xff] (!%p1340_p11), %v1121_v3 }
 0x15c   : > { %v1399_v12 = vpop.f32.mrb[24].mxu0  ;;  %v1058_v6 = vld [vmem:[#allocation2 + $0x40] sm:$0xff] (!%p1340_p11)  ;;  %1138 = vst [vmem:[%s1932_s3 + $0x8] sm:$0xff] (!%p1340_p11), %v1122_v4  ;;  %v1123_v8 = vsel (!%p1340_p11), %vm1091_vm2, %v1075_v57, %v1107_v1 }
 0x15d   : > { %1040 = vst [vmem:[#allocation2 + $0x50] sm:$0xff] %v1024_v10  ;;  %v1025_v13 = vadd.f32 %v995_v11, %v367_v9  ;;  %v1463_v14 = vpop.f32.mrb[24].mxu1  ;;  %v1400_v15 = vpop.f32.mrb[25].mxu0  ;;  %v1124_v9 = vsel (!%p1340_p11), %vm1092_vm3, %v1076_v58, %v1108_v2  ;;  %v1078_v10 = vadd.f32 (!%p1340_p11), %v1848_v50, %v1055_v60  ;;  %v1079_v11 = vadd.f32 (!%p1340_p11), %v1848_v50, %v1056_v61 }
 0x15e   : > { %v1401_v16 = vadd.f32 %v1400_v15, %v1399_v12  ;;  %v1464_v17 = vpop.f32.mrb[25].mxu1  ;;  %v1402_v18 = vpop.f32.mrb[26].mxu0  ;;  %v1059_v7 = vld [vmem:[#allocation2 + $0x48] sm:$0xff] (!%p1340_p11)  ;;  %1139 = vst [vmem:[%s1932_s3 + $0x10] sm:$0xff] (!%p1340_p11), %v1123_v8  ;;  %1140 = vst [vmem:[%s1932_s3 + $0x18] sm:$0xff] (!%p1340_p11), %v1124_v9  ;;  %v1080_v15 = vadd.f32 (!%p1340_p11), %v1848_v50, %v1057_v62 }
 0x15f   : > { %1041 = vst [vmem:[#allocation2 + $0x58] sm:$0xff] %v1025_v13  ;;  %v1465_v19 = vadd.f32 %v1464_v17, %v1463_v14  ;;  %v1466_v20 = vpop.f32.mrb[26].mxu1  ;;  %v1403_v21 = vpop.f32.mrb[27].mxu0  ;;  %v1125_v14 = vsel (!%p1340_p11), %vm1093_vm4, %v1077_v59, %v1109_v5  ;;  %v1082_v17 = vadd.f32 (!%p1340_p11), %v1848_v50, %v1059_v7  ;;  %vm1094_vm5 = vcmp.ge.f32.partialorder (!%p1340_p11), %v1078_v10, 0.0 }
 0x160   : > { %v1404_v23 = vadd.f32 %v1403_v21, %v1402_v18  ;;  %v1467_v24 = vpop.f32.mrb[27].mxu1  ;;  %1141 = vst [vmem:[%s1932_s3 + $0x20] sm:$0xff] (!%p1340_p11), %v1125_v14  ;;  %v1110_v21 = vmul.f32 (!%p1340_p11), 0.2, %v1078_v10  ;;  %vm1095_vm6 = vcmp.ge.f32.partialorder (!%p1340_p11), %v1079_v11, 0.0  ;;  %vm1096_vm7 = vcmp.ge.f32.partialorder (!%p1340_p11), %v1080_v15, 0.0 }
 0x161   : > { %v1000_v25 = vadd.f32 %v1465_v19, %v1401_v16  ;;  %v1468_v26 = vadd.f32 %v1467_v24, %v1466_v20  ;;  %v1081_v16 = vadd.f32 (!%p1340_p11), %v1848_v50, %v1058_v6  ;;  %vm1098_vm9 = vcmp.ge.f32.partialorder (!%p1340_p11), %v1082_v17, 0.0 }
 0x163   : > { %v1026_v28 = vadd.f32 %v1000_v25, %v368_v22  ;;  %v1003_v29 = vadd.f32 %v1468_v26, %v1404_v23  ;;  %v1111_v22 = vmul.f32 (!%p1340_p11), 0.2, %v1079_v11  ;;  %v1112_v23 = vmul.f32 (!%p1340_p11), 0.2, %v1080_v15 }
 0x164   : > { %v1405_v30 = vpop.f32.mrb[28].mxu0  ;;  %v1060_v12 = vld [vmem:[#allocation2 + $0x50] sm:$0xff] (!%p1340_p11)  ;;  %vm1097_vm8 = vcmp.ge.f32.partialorder (!%p1340_p11), %v1081_v16, 0.0  ;;  %v1113_v24 = vmul.f32 (!%p1340_p11), 0.2, %v1081_v16  ;;  %v1126_v25 = vsel (!%p1340_p11), %vm1094_vm5, %v1078_v10, %v1110_v21 }
 0x165   : > { %1042 = vst [vmem:[#allocation2 + $0x60] sm:$0xff] %v1026_v28  ;;  %v1027_v31 = vadd.f32 %v1003_v29, %v369_v27  ;;  %v1469_v32 = vpop.f32.mrb[28].mxu1  ;;  %v1406_v33 = vpop.f32.mrb[29].mxu0  ;;  %v1127_v26 = vsel (!%p1340_p11), %vm1095_vm6, %v1079_v11, %v1111_v22  ;;  %v1114_v27 = vmul.f32 (!%p1340_p11), 0.2, %v1082_v17  ;;  %1142 = vst [vmem:[%s1932_s3 + $0x28] sm:$0xff] (!%p1340_p11), %v1126_v25  ;;  %v1128_v28 = vsel (!%p1340_p11), %vm1096_vm7, %v1080_v15, %v1112_v23 }
 0x166   : > { %v1407_v34 = vadd.f32 %v1406_v33, %v1405_v30  ;;  %v1470_v35 = vpop.f32.mrb[29].mxu1  ;;  %v1408_v36 = vpop.f32.mrb[30].mxu0  ;;  %v1061_v13 = vld [vmem:[#allocation2 + $0x58] sm:$0xff] (!%p1340_p11)  ;;  %1143 = vst [vmem:[%s1932_s3 + $0x30] sm:$0xff] (!%p1340_p11), %v1127_v26  ;;  %v1129_v29 = vsel (!%p1340_p11), %vm1097_vm8, %v1081_v16, %v1113_v24  ;;  %v1083_v30 = vadd.f32 (!%p1340_p11), %v1848_v50, %v1060_v12  ;;  %1144 = vst [vmem:[%s1932_s3 + $0x38] sm:$0xff] (!%p1340_p11), %v1128_v28 }
 0x167   : > { %1043 = vst [vmem:[#allocation2 + $0x68] sm:$0xff] %v1027_v31  ;;  %v1471_v37 = vadd.f32 %v1470_v35, %v1469_v32  ;;  %v1472_v38 = vpop.f32.mrb[30].mxu1  ;;  %v1409_v39 = vpop.f32.mrb[31].mxu0  ;;  %v1084_v31 = vadd.f32 (!%p1340_p11), %v1848_v50, %v1061_v13  ;;  %1145 = vst [vmem:[%s1932_s3 + $0x40] sm:$0xff] (!%p1340_p11), %v1129_v29  ;;  %v1130_v32 = vsel (!%p1340_p11), %vm1098_vm9, %v1082_v17, %v1114_v27 }
 0x168   : > { %v1410_v41 = vadd.f32 %v1409_v39, %v1408_v36  ;;  %v1473_v42 = vpop.f32.mrb[31].mxu1  ;;  %1146 = vst [vmem:[%s1932_s3 + $0x48] sm:$0xff] (!%p1340_p11), %v1130_v32  ;;  %vm1099_vm10 = vcmp.ge.f32.partialorder (!%p1340_p11), %v1083_v30, 0.0 }
 0x169   : > { %v1008_v43 = vadd.f32 %v1471_v37, %v1407_v34  ;;  %v1474_v44 = vadd.f32 %v1473_v42, %v1472_v38  ;;  %1049 = sbr.rel (%p1340_p11) target bundleno = 381 (0x17d), region = 63  ;;  %v1115_v37 = vmul.f32 (!%p1340_p11), 0.2, %v1083_v30  ;;  %vm1100_vm11 = vcmp.ge.f32.partialorder (!%p1340_p11), %v1084_v31, 0.0 }
 0x16a   : > { %v1116_v38 = vmul.f32 (!%p1340_p11), 0.2, %v1084_v31 }
 0x16b   : > { %v1028_v46 = vadd.f32 %v1008_v43, %v370_v40  ;;  %v1011_v47 = vadd.f32 %v1474_v44, %v1410_v41  ;;  %v1131_v41 = vsel (!%p1340_p11), %vm1099_vm10, %v1083_v30, %v1115_v37 }
 0x16c   : > { %v1062_v18 = vld [vmem:[#allocation2 + $0x60] sm:$0xff] (!%p1340_p11)  ;;  %v1132_v42 = vsel (!%p1340_p11), %vm1100_vm11, %v1084_v31, %v1116_v38  ;;  %1147 = vst [vmem:[%s1932_s3 + $0x50] sm:$0xff] (!%p1340_p11), %v1131_v41 }
 0x16d   : > { %1044 = vst [vmem:[#allocation2 + $0x70] sm:$0xff] %v1028_v46  ;;  %v1029_v48 = vadd.f32 %v1011_v47, %v371_v45  ;;  %v1085_v33 = vadd.f32 (!%p1340_p11), %v1848_v50, %v1062_v18  ;;  %1148 = vst [vmem:[%s1932_s3 + $0x58] sm:$0xff] (!%p1340_p11), %v1132_v42 }
 0x16e   : > { %v1063_v19 = vld [vmem:[#allocation2 + $0x68] sm:$0xff] (!%p1340_p11) }
 0x16f   : > { %1045 = vst [vmem:[#allocation2 + $0x78] sm:$0xff] %v1029_v48  ;;  %v1086_v34 = vadd.f32 (!%p1340_p11), %v1848_v50, %v1063_v19  ;;  %vm1101_vm12 = vcmp.ge.f32.partialorder (!%p1340_p11), %v1085_v33, 0.0  ;;  %v1117_v39 = vmul.f32 (!%p1340_p11), 0.2, %v1085_v33 }
 0x171   : > { %vm1102_vm13 = vcmp.ge.f32.partialorder %v1086_v34, 0.0  ;;  %v1118_v40 = vmul.f32 0.2, %v1086_v34  ;;  %v1133_v44 = vsel %vm1101_vm12, %v1085_v33, %v1117_v39 }
 0x172   : > { %1149 = vst [vmem:[%s1932_s3 + $0x60] sm:$0xff] %v1133_v44 }
 0x173   : > { %v1134_v45 = vsel %vm1102_vm13, %v1086_v34, %v1118_v40 }
 0x174   : > { %v1064_v20 = vld [vmem:[#allocation2 + $0x70] sm:$0xff]  ;;  %1150 = vst [vmem:[%s1932_s3 + $0x68] sm:$0xff] %v1134_v45 }
 0x175   : > { %v1087_v35 = vadd.f32 %v1848_v50, %v1064_v20 }
 0x176   : > { %v1065_v36 = vld [vmem:[#allocation2 + $0x78] sm:$0xff] }
 0x177   : > { %vm1103_vm14 = vcmp.ge.f32.partialorder %v1087_v35, 0.0  ;;  %v1119_v43 = vmul.f32 0.2, %v1087_v35  ;;  %v1088_v46 = vadd.f32 %v1848_v50, %v1065_v36 }
 0x179   : > { %v1135_v47 = vsel %vm1103_vm14, %v1087_v35, %v1119_v43  ;;  %vm1104_vm15 = vcmp.ge.f32.partialorder %v1088_v46, 0.0  ;;  %v1120_v48 = vmul.f32 0.2, %v1088_v46 }
 0x17a   : > { %1151 = vst [vmem:[%s1932_s3 + $0x70] sm:$0xff] %v1135_v47 }
 0x17b   : > { %v1136_v49 = vsel %vm1104_vm15, %v1088_v46, %v1120_v48 }
 0x17c   : > { %1152 = vst [vmem:[%s1932_s3 + $0x78] sm:$0xff] %v1136_v49 }
 0x17d PF: > { %s13_s16 = sadd.s32 1, %s1634_s16   ;;  %s1933_s12 = smov %s1622_s13 }
 0x17e   : > { %p10_p12 = scmp.ge.s32.totalorder %s13_s16, 5   ;;  %s1934_s13 = smov %s1692_s20 }
 0x17f   : > { %s1935_s14 = smov %s1630_s15  ;;  %s1936_s15 = smov %s1938_s17 }
 0x180   :  { %12 = sbr.rel (!%p10_p12) target bundleno = 3 (0x3), region = 104 }

// kernel: dis_forward.20
= control target key start
LH: loop header
LB: loop body
LE: loop exit
PB: predicated region body
PF: predicated region fallthrough
CT: control target
= control target key end

     0   :  { %s2586_s12 = smov 0   ;;  %s3424_s0 = inlined_call_operand.vmem [shape: bf16[2,8,512], index: 0, kind: input, shape index: {}]   ;;  %s3425_s1 = inlined_call_operand.vmem [shape: bf16[16,8], index: 1, kind: input, shape index: {}]   ;;  %s3426_s2 = inlined_call_operand.vmem [shape: bf16[512,1024], index: 2, kind: input, shape index: {}]   ;;  %s3427_s3 = inlined_call_operand.vmem [shape: f32[2,16,1024], index: 3, kind: output, shape index: {}]  }
   0x1 LB: > { %s2249_s13 = sadd.s32 4294967295, %s2563_s12   ;;  %p2253_p0 = scmp.ge.s32.totalorder %s2563_s12, 1  ;;  %s2563_s12 = sphi %s2586_s12, %s13_s12  }
   0x2   : > { %p137_p1 = scmp.lt.s32.totalorder %s2563_s12, 3 }
   0x4   : > { %p138_p2 = pnand %p2253_p0, %p137_p1 }
   0x5   : > { %p161_p3 = scmp.lt.s32.totalorder (!%p138_p2), %s2249_s13, 1  ;;  %v2565_v0 = vmov (!%p138_p2), 0   ;;  %v298_v1 = vld [vmem:[%s3426_s2] sm:$0xff] (!%p138_p2)  ;;  %v299_v3 = vld [vmem:[%s3426_s2 + $0x8] sm:$0xff] (!%p138_p2)  ;;  %vm195_vm0 = vcmask (!%p138_p2), 1043456   ;;  %vm191_vm1 = vcmask (!%p138_p2), 64512  }
   0x6   : > { %141 = sbr.rel (%p138_p2) target bundleno = 650 (0x28a), region = 32  ;;  %240 = vmatprep.mubr.bf16.mxu0 (!%p138_p2), %v2565_v0  ;;  %283 = vmatprep.mubr.bf16.mxu1 (!%p138_p2), %v2565_v0  ;;  %v302_v2 = vld [vmem:[%s3426_s2 + $0x20] sm:$0xff] (!%p138_p2)  ;;  %v303_v4 = vld [vmem:[%s3426_s2 + $0x28] sm:$0xff] (!%p138_p2) }
   0x7   : > { %v2268_v7 = vcombine.high (!%p138_p2), %v298_v1, %v302_v2  ;;  %v2270_v8 = vcombine.high (!%p138_p2), %v299_v3, %v303_v4  ;;  %v306_v13 = vld [vmem:[%s3426_s2 + $0x40] sm:$0xff] (!%p138_p2)  ;;  %v307_v15 = vld [vmem:[%s3426_s2 + $0x48] sm:$0xff] (!%p138_p2)  ;;  %v2267_v20 = vcombine.low (!%p138_p2), %v298_v1, %v302_v2  ;;  %v2269_v21 = vcombine.low (!%p138_p2), %v299_v3, %v303_v4 }
   0x8   : > { %v310_v14 = vld [vmem:[%s3426_s2 + $0x60] sm:$0xff] (!%p138_p2)  ;;  %v311_v16 = vld [vmem:[%s3426_s2 + $0x68] sm:$0xff] (!%p138_p2) }
   0x9   : > { %v2554_v18 = vld [vmem:[%s3425_s1] sm:$0xff] (!%p138_p2)   ;;  %v2276_v22 = vcombine.high (!%p138_p2), %v306_v13, %v310_v14  ;;  %v2278_v23 = vcombine.high (!%p138_p2), %v307_v15, %v311_v16  ;;  %v315_v26 = vld [vmem:[%s3426_s2 + $0x88] sm:$0xff] (!%p138_p2)  ;;  %v2275_v28 = vcombine.low (!%p138_p2), %v306_v13, %v310_v14  ;;  %v2277_v29 = vcombine.low (!%p138_p2), %v307_v15, %v311_v16 }
   0xa   : > { %v314_v24 = vld [vmem:[%s3426_s2 + $0x80] sm:$0xff] (!%p138_p2)  ;;  %v319_v27 = vld [vmem:[%s3426_s2 + $0xa8] sm:$0xff] (!%p138_p2) }
   0xb   : > { %v318_v25 = vld [vmem:[%s3426_s2 + $0xa0] sm:$0xff] (!%p138_p2)  ;;  %v2286_v31 = vcombine.high (!%p138_p2), %v315_v26, %v319_v27  ;;  %v323_v34 = vld [vmem:[%s3426_s2 + $0xc8] sm:$0xff] (!%p138_p2)  ;;  %v2285_v37 = vcombine.low (!%p138_p2), %v315_v26, %v319_v27 }
   0xc   : > { %v2284_v30 = vcombine.high (!%p138_p2), %v314_v24, %v318_v25  ;;  %v322_v32 = vld [vmem:[%s3426_s2 + $0xc0] sm:$0xff] (!%p138_p2)  ;;  %v327_v35 = vld [vmem:[%s3426_s2 + $0xe8] sm:$0xff] (!%p138_p2)  ;;  %v2283_v36 = vcombine.low (!%p138_p2), %v314_v24, %v318_v25 }
   0xd   : > { %s3429_s13 = smov (!%p161_p3, %s2249_s13), 1  ;;  %v326_v33 = vld [vmem:[%s3426_s2 + $0xe0] sm:$0xff]  ;;  %v2294_v39 = vcombine.high %v323_v34, %v327_v35  ;;  %v331_v42 = vld [vmem:[%s3426_s2 + $0x108] sm:$0xff]  ;;  %v2293_v45 = vcombine.low %v323_v34, %v327_v35 }
   0xe   : > { %s2525_s22 = sshll.u32 %s3429_s13, 4  ;;  %v2292_v38 = vcombine.high %v322_v32, %v326_v33  ;;  %v330_v40 = vld [vmem:[%s3426_s2 + $0x100] sm:$0xff]  ;;  %v335_v43 = vld [vmem:[%s3426_s2 + $0x128] sm:$0xff]  ;;  %v2291_v44 = vcombine.low %v322_v32, %v326_v33  ;;  %s2526_s5 = sshll.u32 %s3429_s13, 7 }
   0xf   : > { %s165_s25 = scalar_lea.vmem %s3424_s0, %s2525_s22  ;;  %v334_v41 = vld [vmem:[%s3426_s2 + $0x120] sm:$0xff]  ;;  %v2302_v47 = vcombine.high %v331_v42, %v335_v43  ;;  %v339_v50 = vld [vmem:[%s3426_s2 + $0x148] sm:$0xff]  ;;  %v2301_v53 = vcombine.low %v331_v42, %v335_v43  ;;  %s3403_s8 = scalar_lea.vmem %s3427_s3, %s2526_s5 }
  0x10   : > { %v172_v5 = vld [vmem:[%s165_s25] sm:$0xff]  ;;  %v173_v6 = vld [vmem:[%s165_s25 + $0x8] sm:$0xff]  ;;  %v2300_v46 = vcombine.high %v330_v40, %v334_v41  ;;  %v2299_v52 = vcombine.low %v330_v40, %v334_v41 }
  0x11   : > { %v2260_v9 = vcombine.high %v172_v5, %v172_v5  ;;  %v2259_v10 = vcombine.low %v172_v5, %v172_v5  ;;  %v2262_v11 = vcombine.high %v173_v6, %v173_v6  ;;  %v2261_v12 = vcombine.low %v173_v6, %v173_v6  ;;  %v338_v48 = vld [vmem:[%s3426_s2 + $0x140] sm:$0xff]  ;;  %v343_v51 = vld [vmem:[%s3426_s2 + $0x168] sm:$0xff] }
  0x12   : > { %v342_v49 = vld [vmem:[%s3426_s2 + $0x160] sm:$0xff]  ;;  %v2310_v55 = vcombine.high %v339_v50, %v343_v51  ;;  %v347_v58 = vld [vmem:[%s3426_s2 + $0x188] sm:$0xff]  ;;  %v2309_v61 = vcombine.low %v339_v50, %v343_v51 }
  0x13   : > { %2263 = vmatprep.subr.msk.bf16.mxu0 %vm195_vm0, %v2260_v9  ;;  %v197_v17 = vsel %vm195_vm0, %v2259_v10, 0  ;;  %2265 = vmatprep.subr.msk.bf16.mxu1 %vm195_vm0, %v2262_v11  ;;  %v203_v19 = vsel %vm195_vm0, %v2261_v12, 0  ;;  %v2308_v54 = vcombine.high %v338_v48, %v342_v49  ;;  %v346_v56 = vld [vmem:[%s3426_s2 + $0x180] sm:$0xff]  ;;  %v351_v59 = vld [vmem:[%s3426_s2 + $0x1a8] sm:$0xff]  ;;  %v2307_v60 = vcombine.low %v338_v48, %v342_v49 }
  0x14   : > { %209 = vmatpush1.bf16.msra.mxu0 %v197_v17  ;;  %252 = vmatpush1.bf16.msra.mxu1 %v203_v19  ;;  %v350_v57 = vld [vmem:[%s3426_s2 + $0x1a0] sm:$0xff]  ;;  %v2318_v63 = vcombine.high %v347_v58, %v351_v59  ;;  %v355_v2 = vld [vmem:[%s3426_s2 + $0x1c8] sm:$0xff]  ;;  %v2317_v5 = vcombine.low %v347_v58, %v351_v59 }
  0x15   : > { %1834 = vmatprep.subr.bf16.mxu0 %v2268_v7  ;;  %1920 = vmatprep.subr.bf16.mxu1 %v2270_v8  ;;  %v2316_v62 = vcombine.high %v346_v56, %v350_v57  ;;  %v354_v0 = vld [vmem:[%s3426_s2 + $0x1c0] sm:$0xff]  ;;  %v359_v3 = vld [vmem:[%s3426_s2 + $0x1e8] sm:$0xff]  ;;  %v2315_v4 = vcombine.low %v346_v56, %v350_v57 }
  0x16   : > { %v358_v1 = vld [vmem:[%s3426_s2 + $0x1e0] sm:$0xff]  ;;  %v2326_v7 = vcombine.high %v355_v2, %v359_v3  ;;  %v363_v10 = vld [vmem:[%s3426_s2 + $0x208] sm:$0xff]  ;;  %v2325_v13 = vcombine.low %v355_v2, %v359_v3 }
  0x17   : > { %2264 = vmatmul.mubr.msk.bf16.vlgmr.msra.gmra.mrb[0].mxu0 %vm191_vm1, %v2554_v18  ;;  %2266 = vmatmul.mubr.msk.bf16.vlgmr.msra.gmra.mrb[0].mxu1 %vm191_vm1, %v2554_v18  ;;  %v2324_v6 = vcombine.high %v354_v0, %v358_v1  ;;  %v362_v8 = vld [vmem:[%s3426_s2 + $0x200] sm:$0xff]  ;;  %v367_v11 = vld [vmem:[%s3426_s2 + $0x228] sm:$0xff]  ;;  %v2323_v12 = vcombine.low %v354_v0, %v358_v1 }
  0x18   : > { %1835 = vmatpush1.bf16.msra.mxu0 %v2267_v20  ;;  %1921 = vmatpush1.bf16.msra.mxu1 %v2269_v21  ;;  %v366_v9 = vld [vmem:[%s3426_s2 + $0x220] sm:$0xff]  ;;  %v2334_v15 = vcombine.high %v363_v10, %v367_v11  ;;  %v371_v18 = vld [vmem:[%s3426_s2 + $0x248] sm:$0xff]  ;;  %v2333_v21 = vcombine.low %v363_v10, %v367_v11 }
  0x19   : > { %1836 = vmatprep.subr.bf16.mxu0 %v2276_v22  ;;  %1922 = vmatprep.subr.bf16.mxu1 %v2278_v23  ;;  %v2332_v14 = vcombine.high %v362_v8, %v366_v9  ;;  %v370_v16 = vld [vmem:[%s3426_s2 + $0x240] sm:$0xff]  ;;  %v375_v19 = vld [vmem:[%s3426_s2 + $0x268] sm:$0xff]  ;;  %v2331_v20 = vcombine.low %v362_v8, %v366_v9 }
  0x1a   : > { %v374_v17 = vld [vmem:[%s3426_s2 + $0x260] sm:$0xff]  ;;  %v2342_v23 = vcombine.high %v371_v18, %v375_v19  ;;  %v379_v26 = vld [vmem:[%s3426_s2 + $0x288] sm:$0xff] }
  0x1b   : > { %v2340_v22 = vcombine.high %v370_v16, %v374_v17  ;;  %v378_v24 = vld [vmem:[%s3426_s2 + $0x280] sm:$0xff]  ;;  %v383_v27 = vld [vmem:[%s3426_s2 + $0x2a8] sm:$0xff] }
  0x1c   : > { %1837 = vmatpush1.bf16.msra.mxu0 %v2275_v28  ;;  %1923 = vmatpush1.bf16.msra.mxu1 %v2277_v29  ;;  %v382_v25 = vld [vmem:[%s3426_s2 + $0x2a0] sm:$0xff]  ;;  %v2339_v28 = vcombine.low %v370_v16, %v374_v17  ;;  %v2341_v29 = vcombine.low %v371_v18, %v375_v19  ;;  %v387_v34 = vld [vmem:[%s3426_s2 + $0x2c8] sm:$0xff] }
  0x1d   : > { %1838 = vmatprep.subr.bf16.mxu0 %v2284_v30  ;;  %1924 = vmatprep.subr.bf16.mxu1 %v2286_v31  ;;  %v2348_v30 = vcombine.high %v378_v24, %v382_v25  ;;  %v2350_v31 = vcombine.high %v379_v26, %v383_v27  ;;  %v386_v32 = vld [vmem:[%s3426_s2 + $0x2c0] sm:$0xff]  ;;  %v391_v35 = vld [vmem:[%s3426_s2 + $0x2e8] sm:$0xff] }
  0x1e   : > { %v390_v33 = vld [vmem:[%s3426_s2 + $0x2e0] sm:$0xff]  ;;  %v395_v42 = vld [vmem:[%s3426_s2 + $0x308] sm:$0xff] }
  0x1f   : > { %v394_v40 = vld [vmem:[%s3426_s2 + $0x300] sm:$0xff]  ;;  %v399_v43 = vld [vmem:[%s3426_s2 + $0x328] sm:$0xff] }
  0x20   : > { %1839 = vmatpush1.bf16.msra.mxu0 %v2283_v36  ;;  %1925 = vmatpush1.bf16.msra.mxu1 %v2285_v37  ;;  %v2347_v36 = vcombine.low %v378_v24, %v382_v25  ;;  %v2349_v37 = vcombine.low %v379_v26, %v383_v27  ;;  %v398_v41 = vld [vmem:[%s3426_s2 + $0x320] sm:$0xff]  ;;  %v403_v50 = vld [vmem:[%s3426_s2 + $0x348] sm:$0xff] }
  0x21   : > { %1840 = vmatprep.subr.bf16.mxu0 %v2292_v38  ;;  %1926 = vmatprep.subr.bf16.mxu1 %v2294_v39  ;;  %v2356_v38 = vcombine.high %v386_v32, %v390_v33  ;;  %v2358_v39 = vcombine.high %v387_v34, %v391_v35  ;;  %v402_v48 = vld [vmem:[%s3426_s2 + $0x340] sm:$0xff]  ;;  %v407_v51 = vld [vmem:[%s3426_s2 + $0x368] sm:$0xff] }
  0x22   : > { %v406_v49 = vld [vmem:[%s3426_s2 + $0x360] sm:$0xff]  ;;  %v411_v58 = vld [vmem:[%s3426_s2 + $0x388] sm:$0xff] }
  0x23   : > { %v410_v56 = vld [vmem:[%s3426_s2 + $0x380] sm:$0xff]  ;;  %v415_v59 = vld [vmem:[%s3426_s2 + $0x3a8] sm:$0xff] }
  0x24   : > { %1841 = vmatpush1.bf16.msra.mxu0 %v2291_v44  ;;  %1927 = vmatpush1.bf16.msra.mxu1 %v2293_v45  ;;  %v2355_v44 = vcombine.low %v386_v32, %v390_v33  ;;  %v2357_v45 = vcombine.low %v387_v34, %v391_v35  ;;  %v414_v57 = vld [vmem:[%s3426_s2 + $0x3a0] sm:$0xff]  ;;  %v2381_v1 = vcombine.low %v411_v58, %v415_v59  ;;  %v435_v25 = vld [vmem:[%s3426_s2 + $0x448] sm:$0xff] }
  0x25   : > { %1842 = vmatprep.subr.bf16.mxu0 %v2300_v46  ;;  %1928 = vmatprep.subr.bf16.mxu1 %v2302_v47  ;;  %v2364_v46 = vcombine.high %v394_v40, %v398_v41  ;;  %v2366_v47 = vcombine.high %v395_v42, %v399_v43  ;;  %v2379_v0 = vcombine.low %v410_v56, %v414_v57  ;;  %v418_v2 = vld [vmem:[%s3426_s2 + $0x3c0] sm:$0xff]  ;;  %v439_v26 = vld [vmem:[%s3426_s2 + $0x468] sm:$0xff] }
  0x26   : > { %v422_v3 = vld [vmem:[%s3426_s2 + $0x3e0] sm:$0xff]  ;;  %v2406_v35 = vcombine.high %v435_v25, %v439_v26 }
  0x27   : > { %v426_v10 = vld [vmem:[%s3426_s2 + $0x400] sm:$0xff] }
  0x28   : > { %1843 = vmatpush1.bf16.msra.mxu0 %v2299_v52  ;;  %1929 = vmatpush1.bf16.msra.mxu1 %v2301_v53  ;;  %v2363_v52 = vcombine.low %v394_v40, %v398_v41  ;;  %v2365_v53 = vcombine.low %v395_v42, %v399_v43  ;;  %v430_v11 = vld [vmem:[%s3426_s2 + $0x420] sm:$0xff]  ;;  %v2405_v41 = vcombine.low %v435_v25, %v439_v26 }
  0x29   : > { %1844 = vmatprep.subr.bf16.mxu0 %v2308_v54  ;;  %1930 = vmatprep.subr.bf16.mxu1 %v2310_v55  ;;  %v2372_v54 = vcombine.high %v402_v48, %v406_v49  ;;  %v2374_v55 = vcombine.high %v403_v50, %v407_v51  ;;  %v438_v24 = vld [vmem:[%s3426_s2 + $0x460] sm:$0xff] }
  0x2c   : > { %1845 = vmatpush1.bf16.msra.mxu0 %v2307_v60  ;;  %1931 = vmatpush1.bf16.msra.mxu1 %v2309_v61  ;;  %v2371_v60 = vcombine.low %v402_v48, %v406_v49  ;;  %v2373_v61 = vcombine.low %v403_v50, %v407_v51 }
  0x2d   : > { %1846 = vmatprep.subr.bf16.mxu0 %v2316_v62  ;;  %1932 = vmatprep.subr.bf16.mxu1 %v2318_v63  ;;  %v2380_v62 = vcombine.high %v410_v56, %v414_v57  ;;  %v2382_v63 = vcombine.high %v411_v58, %v415_v59 }
  0x30   : > { %1847 = vmatpush1.bf16.msra.mxu0 %v2315_v4  ;;  %1933 = vmatpush1.bf16.msra.mxu1 %v2317_v5  ;;  %v419_v4 = vld [vmem:[%s3426_s2 + $0x3c8] sm:$0xff]  ;;  %v2388_v5 = vcombine.high %v418_v2, %v422_v3 }
  0x31   : > { %1848 = vmatprep.subr.bf16.mxu0 %v2324_v6  ;;  %1934 = vmatprep.subr.bf16.mxu1 %v2326_v7  ;;  %v423_v6 = vld [vmem:[%s3426_s2 + $0x3e8] sm:$0xff]  ;;  %v2387_v7 = vcombine.low %v418_v2, %v422_v3 }
  0x32   : > { %v2389_v8 = vcombine.low %v419_v4, %v423_v6  ;;  %v2390_v9 = vcombine.high %v419_v4, %v423_v6  ;;  %v474_v4 = vld [vmem:[%s3426_s2 + $0x580] sm:$0xff]  ;;  %v475_v6 = vld [vmem:[%s3426_s2 + $0x588] sm:$0xff] }
  0x34   : > { %1849 = vmatpush1.bf16.msra.mxu0 %v2323_v12  ;;  %1935 = vmatpush1.bf16.msra.mxu1 %v2325_v13  ;;  %v427_v12 = vld [vmem:[%s3426_s2 + $0x408] sm:$0xff]  ;;  %v2396_v13 = vcombine.high %v426_v10, %v430_v11 }
  0x35   : > { %1850 = vmatprep.subr.bf16.mxu0 %v2332_v14  ;;  %1936 = vmatprep.subr.bf16.mxu1 %v2334_v15  ;;  %v431_v14 = vld [vmem:[%s3426_s2 + $0x428] sm:$0xff]  ;;  %v2395_v15 = vcombine.low %v426_v10, %v430_v11 }
  0x36   : > { %v2397_v16 = vcombine.low %v427_v12, %v431_v14  ;;  %v2398_v17 = vcombine.high %v427_v12, %v431_v14  ;;  %v482_v12 = vld [vmem:[%s3426_s2 + $0x5c0] sm:$0xff]  ;;  %v483_v14 = vld [vmem:[%s3426_s2 + $0x5c8] sm:$0xff] }
  0x38   : > { %1851 = vmatpush1.bf16.msra.mxu0 %v2331_v20  ;;  %1937 = vmatpush1.bf16.msra.mxu1 %v2333_v21  ;;  %v434_v21 = vld [vmem:[%s3426_s2 + $0x440] sm:$0xff] }
  0x39   : > { %1852 = vmatprep.subr.bf16.mxu0 %v2340_v22  ;;  %1938 = vmatprep.subr.bf16.mxu1 %v2342_v23  ;;  %v2404_v34 = vcombine.high %v434_v21, %v438_v24  ;;  %v2403_v40 = vcombine.low %v434_v21, %v438_v24  ;;  %v494_v21 = vld [vmem:[%s3426_s2 + $0x620] sm:$0xff] }
  0x3c   : > { %1853 = vmatpush1.bf16.msra.mxu0 %v2339_v28  ;;  %1939 = vmatpush1.bf16.msra.mxu1 %v2341_v29 }
  0x3d   : > { %1854 = vmatprep.subr.bf16.mxu0 %v2348_v30  ;;  %1940 = vmatprep.subr.bf16.mxu1 %v2350_v31 }
  0x40   : > { %1855 = vmatpush1.bf16.msra.mxu0 %v2347_v36  ;;  %1941 = vmatpush1.bf16.msra.mxu1 %v2349_v37  ;;  %v442_v36 = vld [vmem:[%s3426_s2 + $0x480] sm:$0xff] }
  0x41   : > { %1856 = vmatprep.subr.bf16.mxu0 %v2356_v38  ;;  %1942 = vmatprep.subr.bf16.mxu1 %v2358_v39  ;;  %v446_v37 = vld [vmem:[%s3426_s2 + $0x4a0] sm:$0xff]  ;;  %v443_v38 = vld [vmem:[%s3426_s2 + $0x488] sm:$0xff] }
  0x42   : > { %v447_v39 = vld [vmem:[%s3426_s2 + $0x4a8] sm:$0xff]  ;;  %v2412_v42 = vcombine.high %v442_v36, %v446_v37  ;;  %v2411_v48 = vcombine.low %v442_v36, %v446_v37 }
  0x43   : > { %v2414_v43 = vcombine.high %v443_v38, %v447_v39  ;;  %v2413_v49 = vcombine.low %v443_v38, %v447_v39 }
  0x44   : > { %1857 = vmatpush1.bf16.msra.mxu0 %v2355_v44  ;;  %1943 = vmatpush1.bf16.msra.mxu1 %v2357_v45  ;;  %v450_v44 = vld [vmem:[%s3426_s2 + $0x4c0] sm:$0xff] }
  0x45   : > { %1858 = vmatprep.subr.bf16.mxu0 %v2364_v46  ;;  %1944 = vmatprep.subr.bf16.mxu1 %v2366_v47  ;;  %v454_v45 = vld [vmem:[%s3426_s2 + $0x4e0] sm:$0xff]  ;;  %v451_v46 = vld [vmem:[%s3426_s2 + $0x4c8] sm:$0xff] }
  0x46   : > { %v455_v47 = vld [vmem:[%s3426_s2 + $0x4e8] sm:$0xff]  ;;  %v2420_v50 = vcombine.high %v450_v44, %v454_v45  ;;  %v2419_v56 = vcombine.low %v450_v44, %v454_v45 }
  0x47   : > { %v2422_v51 = vcombine.high %v451_v46, %v455_v47  ;;  %v2421_v57 = vcombine.low %v451_v46, %v455_v47 }
  0x48   : > { %1859 = vmatpush1.bf16.msra.mxu0 %v2363_v52  ;;  %1945 = vmatpush1.bf16.msra.mxu1 %v2365_v53  ;;  %v458_v52 = vld [vmem:[%s3426_s2 + $0x500] sm:$0xff] }
  0x49   : > { %1860 = vmatprep.subr.bf16.mxu0 %v2372_v54  ;;  %1946 = vmatprep.subr.bf16.mxu1 %v2374_v55  ;;  %v462_v53 = vld [vmem:[%s3426_s2 + $0x520] sm:$0xff]  ;;  %v459_v54 = vld [vmem:[%s3426_s2 + $0x508] sm:$0xff] }
  0x4a   : > { %v463_v55 = vld [vmem:[%s3426_s2 + $0x528] sm:$0xff]  ;;  %v2428_v58 = vcombine.high %v458_v52, %v462_v53 }
  0x4b   : > { %v2430_v59 = vcombine.high %v459_v54, %v463_v55 }
  0x4c   : > { %1861 = vmatpush1.bf16.msra.mxu0 %v2371_v60  ;;  %1947 = vmatpush1.bf16.msra.mxu1 %v2373_v61  ;;  %v466_v60 = vld [vmem:[%s3426_s2 + $0x540] sm:$0xff] }
  0x4d   : > { %1862 = vmatprep.subr.bf16.mxu0 %v2380_v62  ;;  %1948 = vmatprep.subr.bf16.mxu1 %v2382_v63  ;;  %v470_v61 = vld [vmem:[%s3426_s2 + $0x560] sm:$0xff]  ;;  %v467_v62 = vld [vmem:[%s3426_s2 + $0x548] sm:$0xff] }
  0x4e   : > { %v471_v63 = vld [vmem:[%s3426_s2 + $0x568] sm:$0xff]  ;;  %v2436_v2 = vcombine.high %v466_v60, %v470_v61 }
  0x4f   : > { %v2438_v3 = vcombine.high %v467_v62, %v471_v63 }
  0x50   : > { %1863 = vmatpush1.bf16.msra.mxu0 %v2379_v0  ;;  %1949 = vmatpush1.bf16.msra.mxu1 %v2381_v1  ;;  %v2427_v0 = vcombine.low %v458_v52, %v462_v53  ;;  %v2429_v1 = vcombine.low %v459_v54, %v463_v55 }
  0x51   : > { %1864 = vmatprep.subr.bf16.mxu0 %v2388_v5  ;;  %1950 = vmatprep.subr.bf16.mxu1 %v2390_v9  ;;  %v478_v5 = vld [vmem:[%s3426_s2 + $0x5a0] sm:$0xff]  ;;  %v2437_v9 = vcombine.low %v467_v62, %v471_v63 }
  0x52   : > { %v2444_v10 = vcombine.high %v474_v4, %v478_v5 }
  0x54   : > { %1865 = vmatpush1.bf16.msra.mxu0 %v2387_v7  ;;  %1951 = vmatpush1.bf16.msra.mxu1 %v2389_v8  ;;  %v479_v7 = vld [vmem:[%s3426_s2 + $0x5a8] sm:$0xff]  ;;  %v2435_v8 = vcombine.low %v466_v60, %v470_v61 }
  0x55   : > { %1877 = vmatprep.subr.bf16.mxu0 %v2396_v13  ;;  %1963 = vmatprep.subr.bf16.mxu1 %v2398_v17  ;;  %v2446_v11 = vcombine.high %v475_v6, %v479_v7  ;;  %v486_v13 = vld [vmem:[%s3426_s2 + $0x5e0] sm:$0xff]  ;;  %v2445_v17 = vcombine.low %v475_v6, %v479_v7 }
  0x56   : > { %v2451_v24 = vcombine.low %v482_v12, %v486_v13 }
  0xea   : > { %v242_v18 = vpop.f32.mrb[0].mxu0  ;;  %v285_v19 = vpop.f32.mrb[0].mxu1 }
  0xeb   : > { %v244_v20 = vpop.f32.mrb[1].mxu0  ;;  %v287_v22 = vpop.f32.mrb[1].mxu1 }
  0xec   : > { %v246_v23 = vpop.f32.mrb[2].mxu0  ;;  %v289_v27 = vpop.f32.mrb[2].mxu1 }
  0xed   : > { %v2823_v28 = vpack.c.bf16 %v246_v23, %v242_v18  ;;  %v248_v29 = vpop.f32.mrb[3].mxu0  ;;  %v2825_v30 = vpack.c.bf16 %v289_v27, %v285_v19  ;;  %v291_v31 = vpop.f32.mrb[3].mxu1  ;;  %v2452_v18 = vcombine.high %v482_v12, %v486_v13  ;;  %v495_v23 = vld [vmem:[%s3426_s2 + $0x628] sm:$0xff] }
  0xee   : > { %v2827_v32 = vpack.c.bf16 %v248_v29, %v244_v20  ;;  %v2829_v33 = vpack.c.bf16 %v291_v31, %v287_v22  ;;  %v490_v20 = vld [vmem:[%s3426_s2 + $0x600] sm:$0xff]  ;;  %v491_v22 = vld [vmem:[%s3426_s2 + $0x608] sm:$0xff] }
  0xef   : > { %v2460_v26 = vcombine.high %v490_v20, %v494_v21  ;;  %v2462_v27 = vcombine.high %v491_v22, %v495_v23  ;;  %v498_v29 = vld [vmem:[%s3426_s2 + $0x640] sm:$0xff]  ;;  %v2459_v36 = vcombine.low %v490_v20, %v494_v21  ;;  %v2461_v37 = vcombine.low %v491_v22, %v495_v23 }
  0xf0   : > { %1866 = vmatprep.mubr.bf16.mxu0 %v2827_v32  ;;  %1952 = vmatprep.mubr.bf16.mxu1 %v2827_v32  ;;  %v502_v31 = vld [vmem:[%s3426_s2 + $0x660] sm:$0xff] }
  0xf1   : > { %1867 = vmatmul.mubr.bf16.vlgmr.msra.gmra.mrb[4].mxu0 %v2823_v28  ;;  %1953 = vmatmul.mubr.bf16.vlgmr.msra.gmra.mrb[4].mxu1 %v2823_v28  ;;  %v2468_v38 = vcombine.high %v498_v29, %v502_v31  ;;  %v2467_v44 = vcombine.low %v498_v29, %v502_v31 }
  0xf2   : > { %1878 = vmatpush1.bf16.msra.mxu0 %v2395_v15  ;;  %1964 = vmatpush1.bf16.msra.mxu1 %v2397_v16  ;;  %v487_v15 = vld [vmem:[%s3426_s2 + $0x5e8] sm:$0xff]  ;;  %v2443_v16 = vcombine.low %v474_v4, %v478_v5 }
  0xf3   : > { %1879 = vmatprep.subr.bf16.mxu0 %v2404_v34  ;;  %1965 = vmatprep.subr.bf16.mxu1 %v2406_v35  ;;  %v2454_v19 = vcombine.high %v483_v14, %v487_v15  ;;  %v2453_v25 = vcombine.low %v483_v14, %v487_v15  ;;  %v499_v34 = vld [vmem:[%s3426_s2 + $0x648] sm:$0xff] }
  0xf4   : > { %1909 = vmatprep.mubr.bf16.mxu0 %v2829_v33  ;;  %1995 = vmatprep.mubr.bf16.mxu1 %v2829_v33  ;;  %v503_v35 = vld [vmem:[%s3426_s2 + $0x668] sm:$0xff] }
  0xf5   : > { %v2470_v39 = vcombine.high %v499_v34, %v503_v35  ;;  %v2469_v45 = vcombine.low %v499_v34, %v503_v35 }
  0xf6   : > { %1880 = vmatpush1.bf16.msra.mxu0 %v2403_v40  ;;  %1966 = vmatpush1.bf16.msra.mxu1 %v2405_v41  ;;  %v506_v40 = vld [vmem:[%s3426_s2 + $0x680] sm:$0xff] }
  0xf7   : > { %1881 = vmatprep.subr.bf16.mxu0 %v2412_v42  ;;  %1967 = vmatprep.subr.bf16.mxu1 %v2414_v43  ;;  %v510_v41 = vld [vmem:[%s3426_s2 + $0x6a0] sm:$0xff]  ;;  %v507_v42 = vld [vmem:[%s3426_s2 + $0x688] sm:$0xff] }
  0xf8   : > { %v511_v43 = vld [vmem:[%s3426_s2 + $0x6a8] sm:$0xff]  ;;  %v2476_v46 = vcombine.high %v506_v40, %v510_v41  ;;  %v2475_v52 = vcombine.low %v506_v40, %v510_v41 }
  0xf9   : > { %v2478_v47 = vcombine.high %v507_v42, %v511_v43  ;;  %v2477_v53 = vcombine.low %v507_v42, %v511_v43 }
  0xfa   : > { %1882 = vmatpush1.bf16.msra.mxu0 %v2411_v48  ;;  %1968 = vmatpush1.bf16.msra.mxu1 %v2413_v49  ;;  %v514_v48 = vld [vmem:[%s3426_s2 + $0x6c0] sm:$0xff] }
  0xfb   : > { %1883 = vmatprep.subr.bf16.mxu0 %v2420_v50  ;;  %1969 = vmatprep.subr.bf16.mxu1 %v2422_v51  ;;  %v518_v49 = vld [vmem:[%s3426_s2 + $0x6e0] sm:$0xff]  ;;  %v515_v50 = vld [vmem:[%s3426_s2 + $0x6c8] sm:$0xff] }
  0xfc   : > { %v519_v51 = vld [vmem:[%s3426_s2 + $0x6e8] sm:$0xff]  ;;  %v2484_v54 = vcombine.high %v514_v48, %v518_v49  ;;  %v2483_v60 = vcombine.low %v514_v48, %v518_v49 }
  0xfd   : > { %v2486_v55 = vcombine.high %v515_v50, %v519_v51  ;;  %v2485_v61 = vcombine.low %v515_v50, %v519_v51 }
  0xfe   : > { %1884 = vmatpush1.bf16.msra.mxu0 %v2419_v56  ;;  %1970 = vmatpush1.bf16.msra.mxu1 %v2421_v57  ;;  %v522_v56 = vld [vmem:[%s3426_s2 + $0x700] sm:$0xff] }
  0xff   : > { %1885 = vmatprep.subr.bf16.mxu0 %v2428_v58  ;;  %1971 = vmatprep.subr.bf16.mxu1 %v2430_v59  ;;  %v526_v57 = vld [vmem:[%s3426_s2 + $0x720] sm:$0xff]  ;;  %v523_v58 = vld [vmem:[%s3426_s2 + $0x708] sm:$0xff] }
 0x100   : > { %v527_v59 = vld [vmem:[%s3426_s2 + $0x728] sm:$0xff]  ;;  %v2492_v62 = vcombine.high %v522_v56, %v526_v57  ;;  %v2491_v4 = vcombine.low %v522_v56, %v526_v57 }
 0x101   : > { %v2494_v63 = vcombine.high %v523_v58, %v527_v59  ;;  %v2493_v5 = vcombine.low %v523_v58, %v527_v59  ;;  %v332_v59 = vld [vmem:[%s3426_s2 + $0x110] sm:$0xff] }
 0x102   : > { %1886 = vmatpush1.bf16.msra.mxu0 %v2427_v0  ;;  %1972 = vmatpush1.bf16.msra.mxu1 %v2429_v1  ;;  %v530_v0 = vld [vmem:[%s3426_s2 + $0x740] sm:$0xff] }
 0x103   : > { %1887 = vmatprep.subr.bf16.mxu0 %v2436_v2  ;;  %1973 = vmatprep.subr.bf16.mxu1 %v2438_v3  ;;  %v534_v1 = vld [vmem:[%s3426_s2 + $0x760] sm:$0xff]  ;;  %v531_v2 = vld [vmem:[%s3426_s2 + $0x748] sm:$0xff] }
 0x104   : > { %v535_v3 = vld [vmem:[%s3426_s2 + $0x768] sm:$0xff]  ;;  %v2500_v6 = vcombine.high %v530_v0, %v534_v1  ;;  %v2499_v12 = vcombine.low %v530_v0, %v534_v1 }
 0x105   : > { %v2502_v7 = vcombine.high %v531_v2, %v535_v3  ;;  %v2501_v13 = vcombine.low %v531_v2, %v535_v3  ;;  %v340_v3 = vld [vmem:[%s3426_s2 + $0x150] sm:$0xff] }
 0x106   : > { %1888 = vmatpush1.bf16.msra.mxu0 %v2435_v8  ;;  %1974 = vmatpush1.bf16.msra.mxu1 %v2437_v9  ;;  %v538_v8 = vld [vmem:[%s3426_s2 + $0x780] sm:$0xff] }
 0x107   : > { %1889 = vmatprep.subr.bf16.mxu0 %v2444_v10  ;;  %1975 = vmatprep.subr.bf16.mxu1 %v2446_v11  ;;  %v542_v9 = vld [vmem:[%s3426_s2 + $0x7a0] sm:$0xff]  ;;  %v539_v10 = vld [vmem:[%s3426_s2 + $0x788] sm:$0xff] }
 0x108   : > { %v543_v11 = vld [vmem:[%s3426_s2 + $0x7a8] sm:$0xff]  ;;  %v2508_v14 = vcombine.high %v538_v8, %v542_v9  ;;  %v2507_v20 = vcombine.low %v538_v8, %v542_v9 }
 0x109   : > { %v2510_v15 = vcombine.high %v539_v10, %v543_v11  ;;  %v2509_v21 = vcombine.low %v539_v10, %v543_v11  ;;  %v348_v11 = vld [vmem:[%s3426_s2 + $0x190] sm:$0xff] }
 0x10a   : > { %1890 = vmatpush1.bf16.msra.mxu0 %v2443_v16  ;;  %1976 = vmatpush1.bf16.msra.mxu1 %v2445_v17  ;;  %v546_v16 = vld [vmem:[%s3426_s2 + $0x7c0] sm:$0xff] }
 0x10b   : > { %1891 = vmatprep.subr.bf16.mxu0 %v2452_v18  ;;  %1977 = vmatprep.subr.bf16.mxu1 %v2454_v19  ;;  %v550_v17 = vld [vmem:[%s3426_s2 + $0x7e0] sm:$0xff]  ;;  %v547_v18 = vld [vmem:[%s3426_s2 + $0x7c8] sm:$0xff] }
 0x10c   : > { %v551_v19 = vld [vmem:[%s3426_s2 + $0x7e8] sm:$0xff]  ;;  %v2516_v22 = vcombine.high %v546_v16, %v550_v17  ;;  %v2515_v29 = vcombine.low %v546_v16, %v550_v17 }
 0x10d   : > { %v2518_v23 = vcombine.high %v547_v18, %v551_v19  ;;  %v2517_v31 = vcombine.low %v547_v18, %v551_v19  ;;  %v356_v19 = vld [vmem:[%s3426_s2 + $0x1d0] sm:$0xff] }
 0x10e   : > { %1892 = vmatpush1.bf16.msra.mxu0 %v2451_v24  ;;  %1978 = vmatpush1.bf16.msra.mxu1 %v2453_v25  ;;  %v300_v24 = vld [vmem:[%s3426_s2 + $0x10] sm:$0xff] }
 0x10f   : > { %1893 = vmatprep.subr.bf16.mxu0 %v2460_v26  ;;  %1979 = vmatprep.subr.bf16.mxu1 %v2462_v27  ;;  %v304_v25 = vld [vmem:[%s3426_s2 + $0x30] sm:$0xff]  ;;  %v301_v26 = vld [vmem:[%s3426_s2 + $0x18] sm:$0xff] }
 0x110   : > { %v305_v27 = vld [vmem:[%s3426_s2 + $0x38] sm:$0xff]  ;;  %v2272_v34 = vcombine.high %v300_v24, %v304_v25  ;;  %v2271_v40 = vcombine.low %v300_v24, %v304_v25 }
 0x111   : > { %v2274_v35 = vcombine.high %v301_v26, %v305_v27  ;;  %v2273_v41 = vcombine.low %v301_v26, %v305_v27  ;;  %v364_v27 = vld [vmem:[%s3426_s2 + $0x210] sm:$0xff] }
 0x112   : > { %1894 = vmatpush1.bf16.msra.mxu0 %v2459_v36  ;;  %1980 = vmatpush1.bf16.msra.mxu1 %v2461_v37  ;;  %v308_v36 = vld [vmem:[%s3426_s2 + $0x50] sm:$0xff] }
 0x113   : > { %1895 = vmatprep.subr.bf16.mxu0 %v2468_v38  ;;  %1981 = vmatprep.subr.bf16.mxu1 %v2470_v39  ;;  %v312_v37 = vld [vmem:[%s3426_s2 + $0x70] sm:$0xff]  ;;  %v309_v38 = vld [vmem:[%s3426_s2 + $0x58] sm:$0xff] }
 0x114   : > { %v313_v39 = vld [vmem:[%s3426_s2 + $0x78] sm:$0xff]  ;;  %v2280_v42 = vcombine.high %v308_v36, %v312_v37  ;;  %v2279_v48 = vcombine.low %v308_v36, %v312_v37 }
 0x115   : > { %v2282_v43 = vcombine.high %v309_v38, %v313_v39  ;;  %v2281_v49 = vcombine.low %v309_v38, %v313_v39  ;;  %v372_v39 = vld [vmem:[%s3426_s2 + $0x250] sm:$0xff] }
 0x116   : > { %1896 = vmatpush1.bf16.msra.mxu0 %v2467_v44  ;;  %1982 = vmatpush1.bf16.msra.mxu1 %v2469_v45  ;;  %v316_v44 = vld [vmem:[%s3426_s2 + $0x90] sm:$0xff] }
 0x117   : > { %1897 = vmatprep.subr.bf16.mxu0 %v2476_v46  ;;  %1983 = vmatprep.subr.bf16.mxu1 %v2478_v47  ;;  %v320_v45 = vld [vmem:[%s3426_s2 + $0xb0] sm:$0xff]  ;;  %v317_v46 = vld [vmem:[%s3426_s2 + $0x98] sm:$0xff] }
 0x118   : > { %v321_v47 = vld [vmem:[%s3426_s2 + $0xb8] sm:$0xff]  ;;  %v2288_v50 = vcombine.high %v316_v44, %v320_v45 }
 0x119   : > { %v2290_v51 = vcombine.high %v317_v46, %v321_v47  ;;  %v2289_v56 = vcombine.low %v317_v46, %v321_v47  ;;  %v380_v47 = vld [vmem:[%s3426_s2 + $0x290] sm:$0xff] }
 0x11a   : > { %1898 = vmatpush1.bf16.msra.mxu0 %v2475_v52  ;;  %1984 = vmatpush1.bf16.msra.mxu1 %v2477_v53  ;;  %v324_v52 = vld [vmem:[%s3426_s2 + $0xd0] sm:$0xff] }
 0x11b   : > { %1899 = vmatprep.subr.bf16.mxu0 %v2484_v54  ;;  %1985 = vmatprep.subr.bf16.mxu1 %v2486_v55  ;;  %v328_v53 = vld [vmem:[%s3426_s2 + $0xf0] sm:$0xff]  ;;  %v325_v54 = vld [vmem:[%s3426_s2 + $0xd8] sm:$0xff]  ;;  %v2287_v55 = vcombine.low %v316_v44, %v320_v45 }
 0x11c   : > { %v2296_v57 = vcombine.high %v324_v52, %v328_v53 }
 0x11e   : > { %1900 = vmatpush1.bf16.msra.mxu0 %v2483_v60  ;;  %1986 = vmatpush1.bf16.msra.mxu1 %v2485_v61  ;;  %v336_v60 = vld [vmem:[%s3426_s2 + $0x130] sm:$0xff]  ;;  %v333_v61 = vld [vmem:[%s3426_s2 + $0x118] sm:$0xff] }
 0x11f   : > { %1901 = vmatprep.subr.bf16.mxu0 %v2492_v62  ;;  %1987 = vmatprep.subr.bf16.mxu1 %v2494_v63  ;;  %v337_v62 = vld [vmem:[%s3426_s2 + $0x138] sm:$0xff]  ;;  %v2295_v63 = vcombine.low %v324_v52, %v328_v53  ;;  %v2304_v1 = vcombine.high %v332_v59, %v336_v60 }
 0x120   : > { %v2306_v2 = vcombine.high %v333_v61, %v337_v62  ;;  %v2305_v8 = vcombine.low %v333_v61, %v337_v62  ;;  %v396_v62 = vld [vmem:[%s3426_s2 + $0x310] sm:$0xff] }
 0x122   : > { %1902 = vmatpush1.bf16.msra.mxu0 %v2491_v4  ;;  %1988 = vmatpush1.bf16.msra.mxu1 %v2493_v5  ;;  %v344_v4 = vld [vmem:[%s3426_s2 + $0x170] sm:$0xff]  ;;  %v341_v5 = vld [vmem:[%s3426_s2 + $0x158] sm:$0xff] }
 0x123   : > { %1903 = vmatprep.subr.bf16.mxu0 %v2500_v6  ;;  %1989 = vmatprep.subr.bf16.mxu1 %v2502_v7  ;;  %v345_v6 = vld [vmem:[%s3426_s2 + $0x178] sm:$0xff]  ;;  %v2303_v7 = vcombine.low %v332_v59, %v336_v60  ;;  %v2312_v9 = vcombine.high %v340_v3, %v344_v4 }
 0x124   : > { %v2314_v10 = vcombine.high %v341_v5, %v345_v6  ;;  %v2313_v16 = vcombine.low %v341_v5, %v345_v6  ;;  %v404_v6 = vld [vmem:[%s3426_s2 + $0x350] sm:$0xff] }
 0x126   : > { %1904 = vmatpush1.bf16.msra.mxu0 %v2499_v12  ;;  %1990 = vmatpush1.bf16.msra.mxu1 %v2501_v13  ;;  %v352_v12 = vld [vmem:[%s3426_s2 + $0x1b0] sm:$0xff]  ;;  %v349_v13 = vld [vmem:[%s3426_s2 + $0x198] sm:$0xff] }
 0x127   : > { %1905 = vmatprep.subr.bf16.mxu0 %v2508_v14  ;;  %1991 = vmatprep.subr.bf16.mxu1 %v2510_v15  ;;  %v353_v14 = vld [vmem:[%s3426_s2 + $0x1b8] sm:$0xff]  ;;  %v2311_v15 = vcombine.low %v340_v3, %v344_v4  ;;  %v2320_v17 = vcombine.high %v348_v11, %v352_v12 }
 0x128   : > { %v2322_v18 = vcombine.high %v349_v13, %v353_v14  ;;  %v2321_v24 = vcombine.low %v349_v13, %v353_v14  ;;  %v412_v14 = vld [vmem:[%s3426_s2 + $0x390] sm:$0xff] }
 0x12a   : > { %1906 = vmatpush1.bf16.msra.mxu0 %v2507_v20  ;;  %1992 = vmatpush1.bf16.msra.mxu1 %v2509_v21  ;;  %v360_v20 = vld [vmem:[%s3426_s2 + $0x1f0] sm:$0xff]  ;;  %v357_v21 = vld [vmem:[%s3426_s2 + $0x1d8] sm:$0xff] }
 0x12b   : > { %1907 = vmatprep.subr.bf16.mxu0 %v2516_v22  ;;  %1993 = vmatprep.subr.bf16.mxu1 %v2518_v23  ;;  %v361_v22 = vld [vmem:[%s3426_s2 + $0x1f8] sm:$0xff]  ;;  %v2319_v23 = vcombine.low %v348_v11, %v352_v12  ;;  %v2328_v25 = vcombine.high %v356_v19, %v360_v20 }
 0x12c   : > { %v2330_v26 = vcombine.high %v357_v21, %v361_v22  ;;  %v2329_v36 = vcombine.low %v357_v21, %v361_v22  ;;  %v420_v22 = vld [vmem:[%s3426_s2 + $0x3d0] sm:$0xff] }
 0x12e   : > { %1908 = vmatpush1.bf16.msra.mxu0 %v2515_v29  ;;  %1994 = vmatpush1.bf16.msra.mxu1 %v2517_v31  ;;  %v368_v29 = vld [vmem:[%s3426_s2 + $0x230] sm:$0xff]  ;;  %v365_v31 = vld [vmem:[%s3426_s2 + $0x218] sm:$0xff] }
 0x12f   : > { %2006 = vmatprep.subr.bf16.mxu0 %v2272_v34  ;;  %2092 = vmatprep.subr.bf16.mxu1 %v2274_v35  ;;  %v369_v34 = vld [vmem:[%s3426_s2 + $0x238] sm:$0xff]  ;;  %v2327_v35 = vcombine.low %v356_v19, %v360_v20  ;;  %v2336_v37 = vcombine.high %v364_v27, %v368_v29 }
 0x130   : > { %v2338_v38 = vcombine.high %v365_v31, %v369_v34  ;;  %v2337_v44 = vcombine.low %v365_v31, %v369_v34  ;;  %v428_v34 = vld [vmem:[%s3426_s2 + $0x410] sm:$0xff] }
 0x131   : > { %1910 = vmatmul.mubr.bf16.vlgmr.msra.gmra.mrb[4].mxu0 %v2825_v30  ;;  %1996 = vmatmul.mubr.bf16.vlgmr.msra.gmra.mrb[4].mxu1 %v2825_v30 }
 0x132   : > { %2007 = vmatpush1.bf16.msra.mxu0 %v2271_v40  ;;  %2038 = vmatprep.mubr.bf16.mxu0 %v2827_v32  ;;  %v376_v40 = vld [vmem:[%s3426_s2 + $0x270] sm:$0xff] }
 0x133   : > { %2093 = vmatpush1.bf16.msra.mxu1 %v2273_v41  ;;  %2124 = vmatprep.mubr.bf16.mxu1 %v2827_v32  ;;  %v329_v32 = vld [vmem:[%s3426_s2 + $0xf8] sm:$0xff]  ;;  %v2344_v45 = vcombine.high %v372_v39, %v376_v40 }
 0x134   : > { %2008 = vmatprep.subr.bf16.mxu0 %v2280_v42  ;;  %2094 = vmatprep.subr.bf16.mxu1 %v2282_v43  ;;  %v2298_v58 = vcombine.high %v325_v54, %v329_v32  ;;  %v2297_v0 = vcombine.low %v325_v54, %v329_v32  ;;  %v373_v41 = vld [vmem:[%s3426_s2 + $0x258] sm:$0xff]  ;;  %v2335_v43 = vcombine.low %v364_v27, %v368_v29  ;;  %v388_v32 = vld [vmem:[%s3426_s2 + $0x2d0] sm:$0xff] }
 0x135   : > { %v377_v42 = vld [vmem:[%s3426_s2 + $0x278] sm:$0xff] }
 0x136   : > { %2009 = vmatpush1.bf16.msra.mxu0 %v2279_v48  ;;  %v2346_v46 = vcombine.high %v373_v41, %v377_v42  ;;  %v384_v48 = vld [vmem:[%s3426_s2 + $0x2b0] sm:$0xff]  ;;  %v2345_v52 = vcombine.low %v373_v41, %v377_v42 }
 0x137   : > { %2095 = vmatpush1.bf16.msra.mxu1 %v2281_v49  ;;  %2010 = vmatprep.subr.bf16.mxu0 %v2288_v50  ;;  %v381_v49 = vld [vmem:[%s3426_s2 + $0x298] sm:$0xff]  ;;  %v2352_v53 = vcombine.high %v380_v47, %v384_v48  ;;  %v436_v42 = vld [vmem:[%s3426_s2 + $0x450] sm:$0xff] }
 0x138   : > { %2096 = vmatprep.subr.bf16.mxu1 %v2290_v51  ;;  %v385_v50 = vld [vmem:[%s3426_s2 + $0x2b8] sm:$0xff]  ;;  %v2343_v51 = vcombine.low %v372_v39, %v376_v40 }
 0x139   : > { %v2354_v54 = vcombine.high %v381_v49, %v385_v50  ;;  %v2353_v59 = vcombine.low %v381_v49, %v385_v50  ;;  %v444_v49 = vld [vmem:[%s3426_s2 + $0x490] sm:$0xff] }
 0x13a   : > { %2011 = vmatpush1.bf16.msra.mxu0 %v2287_v55  ;;  %v392_v55 = vld [vmem:[%s3426_s2 + $0x2f0] sm:$0xff] }
 0x13b   : > { %2097 = vmatpush1.bf16.msra.mxu1 %v2289_v56  ;;  %2012 = vmatprep.subr.bf16.mxu0 %v2296_v57  ;;  %v389_v56 = vld [vmem:[%s3426_s2 + $0x2d8] sm:$0xff]  ;;  %v2360_v60 = vcombine.high %v388_v32, %v392_v55  ;;  %v448_v50 = vld [vmem:[%s3426_s2 + $0x4b0] sm:$0xff] }
 0x13c   : > { %2098 = vmatprep.subr.bf16.mxu1 %v2298_v58  ;;  %v393_v57 = vld [vmem:[%s3426_s2 + $0x2f8] sm:$0xff]  ;;  %v2351_v58 = vcombine.low %v380_v47, %v384_v48 }
 0x13d   : > { %v2362_v61 = vcombine.high %v389_v56, %v393_v57  ;;  %v2361_v3 = vcombine.low %v389_v56, %v393_v57  ;;  %v452_v57 = vld [vmem:[%s3426_s2 + $0x4d0] sm:$0xff] }
 0x13e   : > { %2013 = vmatpush1.bf16.msra.mxu0 %v2295_v63  ;;  %v400_v63 = vld [vmem:[%s3426_s2 + $0x330] sm:$0xff] }
 0x13f   : > { %2099 = vmatpush1.bf16.msra.mxu1 %v2297_v0  ;;  %2014 = vmatprep.subr.bf16.mxu0 %v2304_v1  ;;  %v397_v0 = vld [vmem:[%s3426_s2 + $0x318] sm:$0xff]  ;;  %v2368_v4 = vcombine.high %v396_v62, %v400_v63 }
 0x140   : > { %2100 = vmatprep.subr.bf16.mxu1 %v2306_v2  ;;  %v401_v1 = vld [vmem:[%s3426_s2 + $0x338] sm:$0xff]  ;;  %v2359_v2 = vcombine.low %v388_v32, %v392_v55  ;;  %v2416_v55 = vcombine.high %v444_v49, %v448_v50 }
 0x141   : > { %v2370_v5 = vcombine.high %v397_v0, %v401_v1  ;;  %v2369_v11 = vcombine.low %v397_v0, %v401_v1  ;;  %v464_v0 = vld [vmem:[%s3426_s2 + $0x530] sm:$0xff]  ;;  %v461_v1 = vld [vmem:[%s3426_s2 + $0x518] sm:$0xff] }
 0x142   : > { %2015 = vmatpush1.bf16.msra.mxu0 %v2303_v7  ;;  %v408_v7 = vld [vmem:[%s3426_s2 + $0x370] sm:$0xff] }
 0x143   : > { %2101 = vmatpush1.bf16.msra.mxu1 %v2305_v8  ;;  %2016 = vmatprep.subr.bf16.mxu0 %v2312_v9  ;;  %v405_v8 = vld [vmem:[%s3426_s2 + $0x358] sm:$0xff]  ;;  %v2376_v12 = vcombine.high %v404_v6, %v408_v7 }
 0x144   : > { %2102 = vmatprep.subr.bf16.mxu1 %v2314_v10  ;;  %v409_v9 = vld [vmem:[%s3426_s2 + $0x378] sm:$0xff]  ;;  %v2367_v10 = vcombine.low %v396_v62, %v400_v63  ;;  %v460_v63 = vld [vmem:[%s3426_s2 + $0x510] sm:$0xff] }
 0x145   : > { %v2378_v13 = vcombine.high %v405_v8, %v409_v9  ;;  %v2377_v19 = vcombine.low %v405_v8, %v409_v9  ;;  %v472_v8 = vld [vmem:[%s3426_s2 + $0x570] sm:$0xff]  ;;  %v469_v9 = vld [vmem:[%s3426_s2 + $0x558] sm:$0xff] }
 0x146   : > { %2017 = vmatpush1.bf16.msra.mxu0 %v2311_v15  ;;  %v416_v15 = vld [vmem:[%s3426_s2 + $0x3b0] sm:$0xff] }
 0x147   : > { %2103 = vmatpush1.bf16.msra.mxu1 %v2313_v16  ;;  %2018 = vmatprep.subr.bf16.mxu0 %v2320_v17  ;;  %v413_v16 = vld [vmem:[%s3426_s2 + $0x398] sm:$0xff]  ;;  %v2384_v20 = vcombine.high %v412_v14, %v416_v15 }
 0x148   : > { %2104 = vmatprep.subr.bf16.mxu1 %v2322_v18  ;;  %v417_v17 = vld [vmem:[%s3426_s2 + $0x3b8] sm:$0xff]  ;;  %v2375_v18 = vcombine.low %v404_v6, %v408_v7  ;;  %v468_v7 = vld [vmem:[%s3426_s2 + $0x550] sm:$0xff] }
 0x149   : > { %v2386_v21 = vcombine.high %v413_v16, %v417_v17  ;;  %v2385_v27 = vcombine.low %v413_v16, %v417_v17  ;;  %v480_v16 = vld [vmem:[%s3426_s2 + $0x5b0] sm:$0xff]  ;;  %v477_v17 = vld [vmem:[%s3426_s2 + $0x598] sm:$0xff] }
 0x14a   : > { %2019 = vmatpush1.bf16.msra.mxu0 %v2319_v23  ;;  %v424_v23 = vld [vmem:[%s3426_s2 + $0x3f0] sm:$0xff] }
 0x14b   : > { %2105 = vmatpush1.bf16.msra.mxu1 %v2321_v24  ;;  %2020 = vmatprep.subr.bf16.mxu0 %v2328_v25  ;;  %v421_v24 = vld [vmem:[%s3426_s2 + $0x3d8] sm:$0xff]  ;;  %v2392_v29 = vcombine.high %v420_v22, %v424_v23 }
 0x14c   : > { %2106 = vmatprep.subr.bf16.mxu1 %v2330_v26  ;;  %v425_v25 = vld [vmem:[%s3426_s2 + $0x3f8] sm:$0xff]  ;;  %v2383_v26 = vcombine.low %v412_v14, %v416_v15  ;;  %v476_v15 = vld [vmem:[%s3426_s2 + $0x590] sm:$0xff] }
 0x14d   : > { %v2394_v31 = vcombine.high %v421_v24, %v425_v25  ;;  %v2393_v39 = vcombine.low %v421_v24, %v425_v25  ;;  %v488_v24 = vld [vmem:[%s3426_s2 + $0x5f0] sm:$0xff]  ;;  %v485_v25 = vld [vmem:[%s3426_s2 + $0x5d8] sm:$0xff] }
 0x14e   : > { %2021 = vmatpush1.bf16.msra.mxu0 %v2327_v35  ;;  %v432_v35 = vld [vmem:[%s3426_s2 + $0x430] sm:$0xff] }
 0x14f   : > { %2107 = vmatpush1.bf16.msra.mxu1 %v2329_v36  ;;  %2022 = vmatprep.subr.bf16.mxu0 %v2336_v37  ;;  %v429_v36 = vld [vmem:[%s3426_s2 + $0x418] sm:$0xff]  ;;  %v2400_v40 = vcombine.high %v428_v34, %v432_v35 }
 0x150   : > { %2108 = vmatprep.subr.bf16.mxu1 %v2338_v38  ;;  %v433_v37 = vld [vmem:[%s3426_s2 + $0x438] sm:$0xff]  ;;  %v2391_v38 = vcombine.low %v420_v22, %v424_v23  ;;  %v484_v23 = vld [vmem:[%s3426_s2 + $0x5d0] sm:$0xff] }
 0x151   : > { %v2402_v41 = vcombine.high %v429_v36, %v433_v37  ;;  %v2401_v47 = vcombine.low %v429_v36, %v433_v37  ;;  %v496_v36 = vld [vmem:[%s3426_s2 + $0x630] sm:$0xff]  ;;  %v493_v37 = vld [vmem:[%s3426_s2 + $0x618] sm:$0xff] }
 0x152   : > { %2023 = vmatpush1.bf16.msra.mxu0 %v2335_v43  ;;  %v440_v43 = vld [vmem:[%s3426_s2 + $0x470] sm:$0xff] }
 0x153   : > { %2109 = vmatpush1.bf16.msra.mxu1 %v2337_v44  ;;  %2024 = vmatprep.subr.bf16.mxu0 %v2344_v45  ;;  %v2399_v44 = vcombine.low %v428_v34, %v432_v35  ;;  %v437_v45 = vld [vmem:[%s3426_s2 + $0x458] sm:$0xff]  ;;  %v2408_v48 = vcombine.high %v436_v42, %v440_v43  ;;  %v492_v35 = vld [vmem:[%s3426_s2 + $0x610] sm:$0xff] }
 0x154   : > { %2110 = vmatprep.subr.bf16.mxu1 %v2346_v46  ;;  %v441_v46 = vld [vmem:[%s3426_s2 + $0x478] sm:$0xff] }
 0x155   : > { %v2409_v32 = vcombine.low %v437_v45, %v441_v46 }
 0x156   : > { %2025 = vmatpush1.bf16.msra.mxu0 %v2343_v51  ;;  %v2410_v51 = vcombine.high %v437_v45, %v441_v46  ;;  %v501_v45 = vld [vmem:[%s3426_s2 + $0x658] sm:$0xff] }
 0x157   : > { %2111 = vmatpush1.bf16.msra.mxu1 %v2345_v52  ;;  %2026 = vmatprep.subr.bf16.mxu0 %v2352_v53  ;;  %v445_v52 = vld [vmem:[%s3426_s2 + $0x498] sm:$0xff] }
 0x158   : > { %2112 = vmatprep.subr.bf16.mxu1 %v2354_v54  ;;  %v449_v53 = vld [vmem:[%s3426_s2 + $0x4b8] sm:$0xff]  ;;  %v2407_v54 = vcombine.low %v436_v42, %v440_v43  ;;  %v500_v43 = vld [vmem:[%s3426_s2 + $0x650] sm:$0xff] }
 0x159   : > { %v2418_v56 = vcombine.high %v445_v52, %v449_v53  ;;  %v505_v46 = vld [vmem:[%s3426_s2 + $0x678] sm:$0xff] }
 0x15a   : > { %2027 = vmatpush1.bf16.msra.mxu0 %v2351_v58  ;;  %v456_v58 = vld [vmem:[%s3426_s2 + $0x4f0] sm:$0xff] }
 0x15b   : > { %2113 = vmatpush1.bf16.msra.mxu1 %v2353_v59  ;;  %2028 = vmatprep.subr.bf16.mxu0 %v2360_v60  ;;  %v457_v59 = vld [vmem:[%s3426_s2 + $0x4f8] sm:$0xff]  ;;  %v2417_v60 = vcombine.low %v445_v52, %v449_v53  ;;  %v512_v52 = vld [vmem:[%s3426_s2 + $0x6b0] sm:$0xff] }
 0x15c   : > { %2114 = vmatprep.subr.bf16.mxu1 %v2362_v61  ;;  %v2424_v61 = vcombine.high %v452_v57, %v456_v58  ;;  %v509_v53 = vld [vmem:[%s3426_s2 + $0x698] sm:$0xff] }
 0x15e   : > { %2029 = vmatpush1.bf16.msra.mxu0 %v2359_v2  ;;  %v465_v2 = vld [vmem:[%s3426_s2 + $0x538] sm:$0xff] }
 0x15f   : > { %2115 = vmatpush1.bf16.msra.mxu1 %v2361_v3  ;;  %2030 = vmatprep.subr.bf16.mxu0 %v2368_v4  ;;  %v2423_v3 = vcombine.low %v452_v57, %v456_v58  ;;  %v2434_v6 = vcombine.high %v461_v1, %v465_v2  ;;  %v516_v58 = vld [vmem:[%s3426_s2 + $0x6d0] sm:$0xff] }
 0x160   : > { %2116 = vmatprep.subr.bf16.mxu1 %v2370_v5  ;;  %v2432_v5 = vcombine.high %v460_v63, %v464_v0 }
 0x162   : > { %2031 = vmatpush1.bf16.msra.mxu0 %v2367_v10  ;;  %v473_v10 = vld [vmem:[%s3426_s2 + $0x578] sm:$0xff] }
 0x163   : > { %2117 = vmatpush1.bf16.msra.mxu1 %v2369_v11  ;;  %2032 = vmatprep.subr.bf16.mxu0 %v2376_v12  ;;  %v2431_v11 = vcombine.low %v460_v63, %v464_v0  ;;  %v2433_v12 = vcombine.low %v461_v1, %v465_v2  ;;  %v2442_v14 = vcombine.high %v469_v9, %v473_v10  ;;  %v524_v0 = vld [vmem:[%s3426_s2 + $0x710] sm:$0xff]  ;;  %v525_v2 = vld [vmem:[%s3426_s2 + $0x718] sm:$0xff] }
 0x164   : > { %2118 = vmatprep.subr.bf16.mxu1 %v2378_v13  ;;  %v2440_v13 = vcombine.high %v468_v7, %v472_v8  ;;  %v528_v1 = vld [vmem:[%s3426_s2 + $0x730] sm:$0xff] }
 0x166   : > { %2033 = vmatpush1.bf16.msra.mxu0 %v2375_v18  ;;  %v481_v18 = vld [vmem:[%s3426_s2 + $0x5b8] sm:$0xff] }
 0x167   : > { %2119 = vmatpush1.bf16.msra.mxu1 %v2377_v19  ;;  %2034 = vmatprep.subr.bf16.mxu0 %v2384_v20  ;;  %v2439_v19 = vcombine.low %v468_v7, %v472_v8  ;;  %v2441_v20 = vcombine.low %v469_v9, %v473_v10  ;;  %v2450_v22 = vcombine.high %v477_v17, %v481_v18  ;;  %v532_v8 = vld [vmem:[%s3426_s2 + $0x750] sm:$0xff]  ;;  %v533_v10 = vld [vmem:[%s3426_s2 + $0x758] sm:$0xff] }
 0x168   : > { %2120 = vmatprep.subr.bf16.mxu1 %v2386_v21  ;;  %v2448_v21 = vcombine.high %v476_v15, %v480_v16  ;;  %v536_v9 = vld [vmem:[%s3426_s2 + $0x770] sm:$0xff] }
 0x16a   : > { %2035 = vmatpush1.bf16.msra.mxu0 %v2383_v26  ;;  %v489_v26 = vld [vmem:[%s3426_s2 + $0x5f8] sm:$0xff] }
 0x16b   : > { %2121 = vmatpush1.bf16.msra.mxu1 %v2385_v27  ;;  %2036 = vmatprep.subr.bf16.mxu0 %v2392_v29  ;;  %v2447_v27 = vcombine.low %v476_v15, %v480_v16  ;;  %v2449_v29 = vcombine.low %v477_v17, %v481_v18  ;;  %v2458_v34 = vcombine.high %v485_v25, %v489_v26  ;;  %v540_v16 = vld [vmem:[%s3426_s2 + $0x790] sm:$0xff]  ;;  %v541_v18 = vld [vmem:[%s3426_s2 + $0x798] sm:$0xff] }
 0x16c   : > { %2122 = vmatprep.subr.bf16.mxu1 %v2394_v31  ;;  %v2456_v31 = vcombine.high %v484_v23, %v488_v24  ;;  %v544_v17 = vld [vmem:[%s3426_s2 + $0x7b0] sm:$0xff] }
 0x16e   : > { %2037 = vmatpush1.bf16.msra.mxu0 %v2391_v38  ;;  %v497_v38 = vld [vmem:[%s3426_s2 + $0x638] sm:$0xff] }
 0x16f   : > { %2123 = vmatpush1.bf16.msra.mxu1 %v2393_v39  ;;  %2049 = vmatprep.subr.bf16.mxu0 %v2400_v40  ;;  %v2455_v39 = vcombine.low %v484_v23, %v488_v24  ;;  %v2457_v40 = vcombine.low %v485_v25, %v489_v26  ;;  %v2466_v42 = vcombine.high %v493_v37, %v497_v38  ;;  %v548_v24 = vld [vmem:[%s3426_s2 + $0x7d0] sm:$0xff]  ;;  %v549_v26 = vld [vmem:[%s3426_s2 + $0x7d8] sm:$0xff] }
 0x170   : > { %2135 = vmatprep.subr.bf16.mxu1 %v2402_v41  ;;  %v2464_v41 = vcombine.high %v492_v35, %v496_v36  ;;  %v552_v25 = vld [vmem:[%s3426_s2 + $0x7f0] sm:$0xff] }
 0x171   : > { %2039 = vmatmul.mubr.bf16.vlgmr.msra.gmra.mrb[8].mxu0 %v2823_v28 }
 0x172   : > { %2125 = vmatmul.mubr.bf16.vlgmr.msra.gmra.mrb[8].mxu1 %v2823_v28  ;;  %2050 = vmatpush1.bf16.msra.mxu0 %v2399_v44  ;;  %v453_v28 = vld [vmem:[%s3426_s2 + $0x4d8] sm:$0xff]  ;;  %v504_v44 = vld [vmem:[%s3426_s2 + $0x670] sm:$0xff] }
 0x173   : > { %2081 = vmatprep.mubr.bf16.mxu0 %v2829_v33  ;;  %2136 = vmatpush1.bf16.msra.mxu1 %v2401_v47  ;;  %v2426_v62 = vcombine.high %v453_v28, %v457_v59  ;;  %v2425_v4 = vcombine.low %v453_v28, %v457_v59  ;;  %v2463_v47 = vcombine.low %v492_v35, %v496_v36  ;;  %v520_v28 = vld [vmem:[%s3426_s2 + $0x6f0] sm:$0xff]  ;;  %v517_v59 = vld [vmem:[%s3426_s2 + $0x6d8] sm:$0xff] }
 0x174   : > { %2167 = vmatprep.mubr.bf16.mxu1 %v2829_v33  ;;  %2051 = vmatprep.subr.bf16.mxu0 %v2408_v48  ;;  %v2415_v33 = vcombine.low %v444_v49, %v448_v50  ;;  %v2465_v48 = vcombine.low %v493_v37, %v497_v38  ;;  %v2472_v49 = vcombine.high %v500_v43, %v504_v44 }
 0x175   : > { %2137 = vmatprep.subr.bf16.mxu1 %v2410_v51  ;;  %v2474_v50 = vcombine.high %v501_v45, %v505_v46  ;;  %v508_v51 = vld [vmem:[%s3426_s2 + $0x690] sm:$0xff]  ;;  %v2519_v36 = vcombine.low %v548_v24, %v552_v25 }
 0x176   : > { %2052 = vmatpush1.bf16.msra.mxu0 %v2407_v54  ;;  %v513_v54 = vld [vmem:[%s3426_s2 + $0x6b8] sm:$0xff] }
 0x177   : > { %2138 = vmatpush1.bf16.msra.mxu1 %v2409_v32  ;;  %2053 = vmatprep.subr.bf16.mxu0 %v2416_v55  ;;  %v2471_v32 = vcombine.low %v500_v43, %v504_v44  ;;  %v2473_v55 = vcombine.low %v501_v45, %v505_v46  ;;  %v2482_v57 = vcombine.high %v509_v53, %v513_v54 }
 0x178   : > { %2139 = vmatprep.subr.bf16.mxu1 %v2418_v56  ;;  %v2480_v56 = vcombine.high %v508_v51, %v512_v52 }
 0x17a   : > { %2054 = vmatpush1.bf16.msra.mxu0 %v2415_v33  ;;  %v521_v33 = vld [vmem:[%s3426_s2 + $0x6f8] sm:$0xff] }
 0x17b   : > { %2140 = vmatpush1.bf16.msra.mxu1 %v2417_v60  ;;  %2055 = vmatprep.subr.bf16.mxu0 %v2424_v61  ;;  %v2479_v60 = vcombine.low %v508_v51, %v512_v52  ;;  %v2481_v61 = vcombine.low %v509_v53, %v513_v54  ;;  %v2490_v63 = vcombine.high %v517_v59, %v521_v33 }
 0x17c   : > { %2141 = vmatprep.subr.bf16.mxu1 %v2426_v62  ;;  %v2488_v62 = vcombine.high %v516_v58, %v520_v28 }
 0x17e   : > { %2056 = vmatpush1.bf16.msra.mxu0 %v2423_v3  ;;  %v529_v3 = vld [vmem:[%s3426_s2 + $0x738] sm:$0xff] }
 0x17f   : > { %2142 = vmatpush1.bf16.msra.mxu1 %v2425_v4  ;;  %2057 = vmatprep.subr.bf16.mxu0 %v2432_v5  ;;  %v2487_v4 = vcombine.low %v516_v58, %v520_v28  ;;  %v2489_v5 = vcombine.low %v517_v59, %v521_v33  ;;  %v2498_v7 = vcombine.high %v525_v2, %v529_v3 }
 0x180   : > { %2143 = vmatprep.subr.bf16.mxu1 %v2434_v6  ;;  %v2496_v6 = vcombine.high %v524_v0, %v528_v1 }
 0x182   : > { %2058 = vmatpush1.bf16.msra.mxu0 %v2431_v11  ;;  %v537_v11 = vld [vmem:[%s3426_s2 + $0x778] sm:$0xff] }
 0x183   : > { %2144 = vmatpush1.bf16.msra.mxu1 %v2433_v12  ;;  %2059 = vmatprep.subr.bf16.mxu0 %v2440_v13  ;;  %v2495_v12 = vcombine.low %v524_v0, %v528_v1  ;;  %v2497_v13 = vcombine.low %v525_v2, %v529_v3  ;;  %v2506_v15 = vcombine.high %v533_v10, %v537_v11 }
 0x184   : > { %2145 = vmatprep.subr.bf16.mxu1 %v2442_v14  ;;  %v2504_v14 = vcombine.high %v532_v8, %v536_v9 }
 0x186   : > { %2060 = vmatpush1.bf16.msra.mxu0 %v2439_v19  ;;  %v545_v19 = vld [vmem:[%s3426_s2 + $0x7b8] sm:$0xff] }
 0x187   : > { %2146 = vmatpush1.bf16.msra.mxu1 %v2441_v20  ;;  %2061 = vmatprep.subr.bf16.mxu0 %v2448_v21  ;;  %v2503_v20 = vcombine.low %v532_v8, %v536_v9  ;;  %v2505_v21 = vcombine.low %v533_v10, %v537_v11  ;;  %v2514_v23 = vcombine.high %v541_v18, %v545_v19 }
 0x188   : > { %2147 = vmatprep.subr.bf16.mxu1 %v2450_v22  ;;  %v2512_v22 = vcombine.high %v540_v16, %v544_v17 }
 0x18a   : > { %2062 = vmatpush1.bf16.msra.mxu0 %v2447_v27  ;;  %v553_v27 = vld [vmem:[%s3426_s2 + $0x7f8] sm:$0xff] }
 0x18b   : > { %2148 = vmatpush1.bf16.msra.mxu1 %v2449_v29  ;;  %2063 = vmatprep.subr.bf16.mxu0 %v2456_v31  ;;  %v2511_v29 = vcombine.low %v540_v16, %v544_v17  ;;  %v2513_v31 = vcombine.low %v541_v18, %v545_v19  ;;  %v2522_v35 = vcombine.high %v549_v26, %v553_v27 }
 0x18c   : > { %2149 = vmatprep.subr.bf16.mxu1 %v2458_v34  ;;  %v2520_v34 = vcombine.high %v548_v24, %v552_v25  ;;  %v2521_v37 = vcombine.low %v549_v26, %v553_v27 }
 0x18e   : > { %2064 = vmatpush1.bf16.msra.mxu0 %v2455_v39 }
 0x18f   : > { %2150 = vmatpush1.bf16.msra.mxu1 %v2457_v40  ;;  %2065 = vmatprep.subr.bf16.mxu0 %v2464_v41 }
 0x190   : > { %2151 = vmatprep.subr.bf16.mxu1 %v2466_v42 }
 0x192   : > { %2066 = vmatpush1.bf16.msra.mxu0 %v2463_v47 }
 0x193   : > { %2152 = vmatpush1.bf16.msra.mxu1 %v2465_v48  ;;  %2067 = vmatprep.subr.bf16.mxu0 %v2472_v49 }
 0x194   : > { %2153 = vmatprep.subr.bf16.mxu1 %v2474_v50 }
 0x196   : > { %2068 = vmatpush1.bf16.msra.mxu0 %v2471_v32 }
 0x197   : > { %2154 = vmatpush1.bf16.msra.mxu1 %v2473_v55  ;;  %2069 = vmatprep.subr.bf16.mxu0 %v2480_v56 }
 0x198   : > { %2155 = vmatprep.subr.bf16.mxu1 %v2482_v57 }
 0x19a   : > { %2070 = vmatpush1.bf16.msra.mxu0 %v2479_v60 }
 0x19b   : > { %2156 = vmatpush1.bf16.msra.mxu1 %v2481_v61  ;;  %2071 = vmatprep.subr.bf16.mxu0 %v2488_v62 }
 0x19c   : > { %2157 = vmatprep.subr.bf16.mxu1 %v2490_v63 }
 0x19e   : > { %2072 = vmatpush1.bf16.msra.mxu0 %v2487_v4 }
 0x19f   : > { %2158 = vmatpush1.bf16.msra.mxu1 %v2489_v5  ;;  %2073 = vmatprep.subr.bf16.mxu0 %v2496_v6 }
 0x1a0   : > { %2159 = vmatprep.subr.bf16.mxu1 %v2498_v7 }
 0x1a2   : > { %2074 = vmatpush1.bf16.msra.mxu0 %v2495_v12 }
 0x1a3   : > { %2160 = vmatpush1.bf16.msra.mxu1 %v2497_v13  ;;  %2075 = vmatprep.subr.bf16.mxu0 %v2504_v14 }
 0x1a4   : > { %2161 = vmatprep.subr.bf16.mxu1 %v2506_v15 }
 0x1a6   : > { %2076 = vmatpush1.bf16.msra.mxu0 %v2503_v20 }
 0x1a7   : > { %2162 = vmatpush1.bf16.msra.mxu1 %v2505_v21  ;;  %2077 = vmatprep.subr.bf16.mxu0 %v2512_v22 }
 0x1a8   : > { %2163 = vmatprep.subr.bf16.mxu1 %v2514_v23 }
 0x1aa   : > { %2078 = vmatpush1.bf16.msra.mxu0 %v2511_v29 }
 0x1ab   : > { %2164 = vmatpush1.bf16.msra.mxu1 %v2513_v31  ;;  %2079 = vmatprep.subr.bf16.mxu0 %v2520_v34 }
 0x1ac   : > { %2165 = vmatprep.subr.bf16.mxu1 %v2522_v35 }
 0x1ae   : > { %2080 = vmatpush1.bf16.msra.mxu0 %v2519_v36 }
 0x1af   : > { %2166 = vmatpush1.bf16.msra.mxu1 %v2521_v37 }
 0x1b1   : > { %2082 = vmatmul.mubr.bf16.vlgmr.msra.gmra.mrb[8].mxu0 %v2825_v30 }
 0x1b2   : > { %2168 = vmatmul.mubr.bf16.vlgmr.msra.gmra.mrb[8].mxu1 %v2825_v30 }
 0x204   : > { %v1911_v38 = vpop.f32.mrb[4].mxu0  ;;  %v1997_v39 = vpop.f32.mrb[4].mxu1 }
 0x205   : > { %2178 = vst [vmem:[%s3403_s8] sm:$0xff] %v1911_v38  ;;  %2180 = vst [vmem:[%s3403_s8 + $0x10] sm:$0xff] %v1997_v39  ;;  %v1913_v30 = vpop.f32.mrb[5].mxu0  ;;  %v1999_v40 = vpop.f32.mrb[5].mxu1 }
 0x206   : > { %2179 = vst [vmem:[%s3403_s8 + $0x8] sm:$0xff] %v1913_v30  ;;  %2181 = vst [vmem:[%s3403_s8 + $0x18] sm:$0xff] %v1999_v40  ;;  %v1915_v41 = vpop.f32.mrb[6].mxu0  ;;  %v2001_v42 = vpop.f32.mrb[6].mxu1 }
 0x207   : > { %2186 = vst [vmem:[%s3403_s8 + $0x40] sm:$0xff] %v1915_v41  ;;  %2188 = vst [vmem:[%s3403_s8 + $0x50] sm:$0xff] %v2001_v42  ;;  %v1917_v43 = vpop.f32.mrb[7].mxu0  ;;  %v2003_v44 = vpop.f32.mrb[7].mxu1 }
 0x208   : > { %2187 = vst [vmem:[%s3403_s8 + $0x48] sm:$0xff] %v1917_v43  ;;  %2189 = vst [vmem:[%s3403_s8 + $0x58] sm:$0xff] %v2003_v44 }
 0x284   : > { %v2083_v45 = vpop.f32.mrb[8].mxu0 }
 0x285   : > { %2182 = vst [vmem:[%s3403_s8 + $0x20] sm:$0xff] %v2083_v45  ;;  %v2169_v46 = vpop.f32.mrb[8].mxu1  ;;  %v2085_v47 = vpop.f32.mrb[9].mxu0 }
 0x286   : > { %2184 = vst [vmem:[%s3403_s8 + $0x30] sm:$0xff] %v2169_v46  ;;  %2183 = vst [vmem:[%s3403_s8 + $0x28] sm:$0xff] %v2085_v47  ;;  %v2171_v48 = vpop.f32.mrb[9].mxu1  ;;  %v2087_v49 = vpop.f32.mrb[10].mxu0 }
 0x287   : > { %2185 = vst [vmem:[%s3403_s8 + $0x38] sm:$0xff] %v2171_v48  ;;  %2190 = vst [vmem:[%s3403_s8 + $0x60] sm:$0xff] %v2087_v49  ;;  %v2173_v50 = vpop.f32.mrb[10].mxu1  ;;  %v2089_v51 = vpop.f32.mrb[11].mxu0 }
 0x288   : > { %2192 = vst [vmem:[%s3403_s8 + $0x70] sm:$0xff] %v2173_v50  ;;  %2191 = vst [vmem:[%s3403_s8 + $0x68] sm:$0xff] %v2089_v51  ;;  %v2175_v52 = vpop.f32.mrb[11].mxu1 }
 0x289   : > { %2193 = vst [vmem:[%s3403_s8 + $0x78] sm:$0xff] %v2175_v52 }
 0x28a PF: > { %s13_s12 = sadd.s32 1, %s2563_s12  }
 0x28b   : > { %p10_p4 = scmp.ge.s32.totalorder %s13_s12, 4  }
 0x28d   :  { %12 = sbr.rel (!%p10_p4) target bundleno = 1 (0x1), region = 62 }

// kernel: dis_forward.21
= control target key start
LH: loop header
LB: loop body
LE: loop exit
PB: predicated region body
PF: predicated region fallthrough
CT: control target
= control target key end

     0   :  { %s1698_s12 = smov 0   ;;  %s1700_s13 = smov 0   ;;  %s1967_s0 = inlined_call_operand.vmem [shape: bf16[512,1024], index: 0, kind: input, shape index: {}]   ;;  %s1968_s1 = inlined_call_operand.vmem [shape: bf16[1024,128], index: 1, kind: input, shape index: {}]   ;;  %s1969_s2 = inlined_call_operand.vmem [shape: f32[1,128], index: 2, kind: input, shape index: {}]   ;;  %s1970_s3 = inlined_call_operand.vmem [shape: f32[512,128], index: 3, kind: output, shape index: {}]  }
   0x1   :  { %s1702_s14 = smov 0   ;;  %s1704_s15 = smov 0  }
   0x2   :  { %s1706_s16 = smov 0   ;;  %s1708_s17 = smov 0  }
   0x3   :  { %s1710_s18 = smov 0  }
   0x4 LB: > { %s25_s19 = sadd.s32 1, %s1667_s16  ;;  %s32_s20 = sadd.s32 1, %s1671_s17  ;;  %s1675_s18 = sphi %s1710_s18, %s13_s18   ;;  %s1671_s17 = sphi %s1708_s17, %s1976_s17   ;;  %s1667_s16 = sphi %s1706_s16, %s1975_s16   ;;  %s1663_s15 = sphi %s1704_s15, %s1974_s15   ;;  %s1659_s14 = sphi %s1702_s14, %s1973_s14   ;;  %s1655_s13 = sphi %s1700_s13, %s1972_s13   ;;  %s1651_s12 = sphi %s1698_s12, %s1971_s12  }
   0x5   : > { %p26_p0 = scmp.ge.s32.totalorder %s25_s19, 2  ;;  %p48_p1 = scmp.ne.s32.totalorder %s1655_s13, %s1651_s12 }
   0x6   : > { %p49_p2 = scmp.eq.s32.totalorder %s1675_s18, 0  ;;  %s41_s24 = sadd.s32 1, %s1655_s13 }
   0x7   : > { %s1978_s19 = smov (%p26_p0, %s25_s19), 0  ;;  %s1980_s20 = smov (!%p26_p0, %s32_s20), %s1671_s17 }
   0x8   : > { %p50_p3 = por %p49_p2, %p48_p1  ;;  %p34_p4 = scmp.ge.s32.totalorder %s1980_s20, 4 }
   0x9   : > { %s37_s21 = ssub.s32 %s1667_s16, %s1978_s19  ;;  %p1274_p6 = scmp.ge.s32.totalorder %s1675_s18, 8 }
   0xa   : > { %s1982_s20 = smov (%p34_p4, %s1980_s20), 0 }
   0xb   : > { %s36_s22 = ssub.s32 %s1671_s17, %s1982_s20  ;;  %162 = sbr.rel (%p1274_p6) target bundleno = 41 (0x29), region = 20 }
   0xc   : > { %s38_s23 = sor.u32 %s37_s21, %s36_s22 }
   0xd   : > { %p39_p5 = scmp.eq.s32.totalorder %s38_s23, 0 }
   0xf   : > { %s1749_s25 = scalar_select %p39_p5, %s1655_s13, %s41_s24  }
  0x12   : > { %165 = sbr.rel (!%p50_p3) target bundleno = 41 (0x29), region = 24  ;;  %s167_s26 = sand.u32 (%p50_p3), 1, %s1655_s13  }
  0x13   : > { %s1277_s27 = sshll.u32 (%p50_p3), %s1667_s16, 2  ;;  %s1275_s28 = sshll.u32 (%p50_p3), %s167_s26, 8 }
  0x14   : > { %s1355_s29 = sshll.u32 (%p50_p3), %s1671_s17, 7  ;;  %s1763_s8 = scalar_lea.vmem (%p50_p3), [#allocation3], %s1275_s28 }
  0x15   : > { %s173_s30 = sadd.s32 (%p50_p3), %s1355_s29, %s1277_s27 }
  0x16   : > { %s1279_s4 = sshll.u32 (%p50_p3), %s173_s30, 2 }
  0x17   : > { %s1758_s7 = scalar_lea.vmem (%p50_p3), %s1967_s0, %s1279_s4 }
  0x18   : > { %v188_v0 = vld [vmem:[%s1758_s7] sm:$0xff] (%p50_p3)  ;;  %v190_v1 = vld [vmem:[%s1758_s7 + $0x8] sm:$0xff] (%p50_p3) }
  0x19   : > { %v192_v2 = vld [vmem:[%s1758_s7 + $0x20] sm:$0xff]  ;;  %189 = vst [vmem:[%s1763_s8] sm:$0xff] %v188_v0  ;;  %191 = vst [vmem:[%s1763_s8 + $0x8] sm:$0xff] %v190_v1  ;;  %v194_v3 = vld [vmem:[%s1758_s7 + $0x28] sm:$0xff] }
  0x1a   : > { %193 = vst [vmem:[%s1763_s8 + $0x10] sm:$0xff] %v192_v2  ;;  %v196_v4 = vld [vmem:[%s1758_s7 + $0x40] sm:$0xff]  ;;  %v198_v5 = vld [vmem:[%s1758_s7 + $0x48] sm:$0xff]  ;;  %195 = vst [vmem:[%s1763_s8 + $0x18] sm:$0xff] %v194_v3 }
  0x1b   : > { %197 = vst [vmem:[%s1763_s8 + $0x20] sm:$0xff] %v196_v4  ;;  %199 = vst [vmem:[%s1763_s8 + $0x28] sm:$0xff] %v198_v5  ;;  %v200_v6 = vld [vmem:[%s1758_s7 + $0x60] sm:$0xff]  ;;  %v202_v7 = vld [vmem:[%s1758_s7 + $0x68] sm:$0xff] }
  0x1c   : > { %v204_v8 = vld [vmem:[%s1758_s7 + $0x80] sm:$0xff]  ;;  %201 = vst [vmem:[%s1763_s8 + $0x30] sm:$0xff] %v200_v6  ;;  %203 = vst [vmem:[%s1763_s8 + $0x38] sm:$0xff] %v202_v7  ;;  %v206_v9 = vld [vmem:[%s1758_s7 + $0x88] sm:$0xff] }
  0x1d   : > { %205 = vst [vmem:[%s1763_s8 + $0x40] sm:$0xff] %v204_v8  ;;  %v208_v10 = vld [vmem:[%s1758_s7 + $0xa0] sm:$0xff]  ;;  %v210_v11 = vld [vmem:[%s1758_s7 + $0xa8] sm:$0xff]  ;;  %207 = vst [vmem:[%s1763_s8 + $0x48] sm:$0xff] %v206_v9 }
  0x1e   : > { %209 = vst [vmem:[%s1763_s8 + $0x50] sm:$0xff] %v208_v10  ;;  %211 = vst [vmem:[%s1763_s8 + $0x58] sm:$0xff] %v210_v11  ;;  %v212_v12 = vld [vmem:[%s1758_s7 + $0xc0] sm:$0xff]  ;;  %v214_v13 = vld [vmem:[%s1758_s7 + $0xc8] sm:$0xff] }
  0x1f   : > { %v216_v14 = vld [vmem:[%s1758_s7 + $0xe0] sm:$0xff]  ;;  %213 = vst [vmem:[%s1763_s8 + $0x60] sm:$0xff] %v212_v12  ;;  %215 = vst [vmem:[%s1763_s8 + $0x68] sm:$0xff] %v214_v13  ;;  %v218_v15 = vld [vmem:[%s1758_s7 + $0xe8] sm:$0xff] }
  0x20   : > { %217 = vst [vmem:[%s1763_s8 + $0x70] sm:$0xff] %v216_v14  ;;  %v220_v16 = vld [vmem:[%s1758_s7 + $0x100] sm:$0xff]  ;;  %v222_v17 = vld [vmem:[%s1758_s7 + $0x108] sm:$0xff]  ;;  %219 = vst [vmem:[%s1763_s8 + $0x78] sm:$0xff] %v218_v15 }
  0x21   : > { %221 = vst [vmem:[%s1763_s8 + $0x80] sm:$0xff] %v220_v16  ;;  %223 = vst [vmem:[%s1763_s8 + $0x88] sm:$0xff] %v222_v17  ;;  %v224_v18 = vld [vmem:[%s1758_s7 + $0x120] sm:$0xff]  ;;  %v226_v19 = vld [vmem:[%s1758_s7 + $0x128] sm:$0xff] }
  0x22   : > { %v228_v20 = vld [vmem:[%s1758_s7 + $0x140] sm:$0xff]  ;;  %225 = vst [vmem:[%s1763_s8 + $0x90] sm:$0xff] %v224_v18  ;;  %227 = vst [vmem:[%s1763_s8 + $0x98] sm:$0xff] %v226_v19  ;;  %v230_v21 = vld [vmem:[%s1758_s7 + $0x148] sm:$0xff] }
  0x23   : > { %229 = vst [vmem:[%s1763_s8 + $0xa0] sm:$0xff] %v228_v20  ;;  %v232_v22 = vld [vmem:[%s1758_s7 + $0x160] sm:$0xff]  ;;  %v234_v23 = vld [vmem:[%s1758_s7 + $0x168] sm:$0xff]  ;;  %231 = vst [vmem:[%s1763_s8 + $0xa8] sm:$0xff] %v230_v21 }
  0x24   : > { %233 = vst [vmem:[%s1763_s8 + $0xb0] sm:$0xff] %v232_v22  ;;  %235 = vst [vmem:[%s1763_s8 + $0xb8] sm:$0xff] %v234_v23  ;;  %v236_v24 = vld [vmem:[%s1758_s7 + $0x180] sm:$0xff]  ;;  %v238_v25 = vld [vmem:[%s1758_s7 + $0x188] sm:$0xff] }
  0x25   : > { %v240_v26 = vld [vmem:[%s1758_s7 + $0x1a0] sm:$0xff]  ;;  %237 = vst [vmem:[%s1763_s8 + $0xc0] sm:$0xff] %v236_v24  ;;  %239 = vst [vmem:[%s1763_s8 + $0xc8] sm:$0xff] %v238_v25  ;;  %v242_v27 = vld [vmem:[%s1758_s7 + $0x1a8] sm:$0xff] }
  0x26   : > { %241 = vst [vmem:[%s1763_s8 + $0xd0] sm:$0xff] %v240_v26  ;;  %v244_v28 = vld [vmem:[%s1758_s7 + $0x1c0] sm:$0xff]  ;;  %v246_v29 = vld [vmem:[%s1758_s7 + $0x1c8] sm:$0xff]  ;;  %243 = vst [vmem:[%s1763_s8 + $0xd8] sm:$0xff] %v242_v27 }
  0x27   : > { %245 = vst [vmem:[%s1763_s8 + $0xe0] sm:$0xff] %v244_v28  ;;  %247 = vst [vmem:[%s1763_s8 + $0xe8] sm:$0xff] %v246_v29  ;;  %v248_v30 = vld [vmem:[%s1758_s7 + $0x1e0] sm:$0xff]  ;;  %v250_v31 = vld [vmem:[%s1758_s7 + $0x1e8] sm:$0xff] }
  0x28   : > { %249 = vst [vmem:[%s1763_s8 + $0xf0] sm:$0xff] %v248_v30  ;;  %251 = vst [vmem:[%s1763_s8 + $0xf8] sm:$0xff] %v250_v31 }
  0x29 PF: > { %p1280_p7 = scmp.ge.s32.totalorder %s1675_s18, 1  ;;  %p268_p8 = scmp.lt.s32.totalorder %s1675_s18, 9 }
  0x2b   : > { %p269_p9 = pnand %p1280_p7, %p268_p8 }
  0x2c   : > { %s275_s9 = sand.u32 (!%p269_p9), 1, %s1651_s12   ;;  %s1282_s10 = sshll.u32 (!%p269_p9), %s1659_s14, 6 }
  0x2d   : > { %272 = sbr.rel (%p269_p9) target bundleno = 388 (0x184), region = 51  ;;  %s1281_s11 = sshll.u32 (!%p269_p9), %s275_s9, 8 }
  0x2e   : > { %p315_p10 = scmp.lt.s32.totalorder (!%p269_p9), %s1282_s10, 127  ;;  %s1284_s21 = sshll.u32 (!%p269_p9), %s1663_s15, 4 }
  0x2f   : > { %p327_p11 = scmp.lt.s32.totalorder (!%p269_p9), %s1284_s21, 63  ;;  %s1841_s12 = scalar_lea.vmem (!%p269_p9), [#allocation3], %s1281_s11 }
  0x30   : > { %p1286_p12 = scmp.ne.s32.totalorder (!%p269_p9), %s1659_s14, 0 }
  0x34   : > { %s1984_s10 = smov (!%p315_p10, %s1282_s10), 127  ;;  %s1986_s21 = smov (!%p327_p11, %s1284_s21), 63 }
  0x35   : > { %s1283_s22 = sshll.u32 %s1984_s10, 2  ;;  %s1285_s27 = sshll.u32 %s1986_s21, 3  ;;  %v1677_v32 = vmov (!%p1286_p12), 0.0  }
  0x36   : > { %s1834_s26 = scalar_lea.vmem %s1968_s1, %s1283_s22  ;;  %s1839_s30 = scalar_lea.vmem %s1970_s3, %s1285_s27  ;;  %340 = vst [vmem:[#allocation2] sm:$0xff] (!%p1286_p12), %v1677_v32  ;;  %341 = vst [vmem:[#allocation2 + $0x8] sm:$0xff] (!%p1286_p12), %v1677_v32 }
  0x37   : > { %339 = sbr.rel (%p1286_p12) target bundleno = 62 (0x3e), region = 59  ;;  %342 = vst [vmem:[#allocation2 + $0x10] sm:$0xff] (!%p1286_p12), %v1677_v32  ;;  %343 = vst [vmem:[#allocation2 + $0x18] sm:$0xff] (!%p1286_p12), %v1677_v32 }
  0x38   : > { %344 = vst [vmem:[#allocation2 + $0x20] sm:$0xff] (!%p1286_p12), %v1677_v32  ;;  %345 = vst [vmem:[#allocation2 + $0x28] sm:$0xff] (!%p1286_p12), %v1677_v32 }
  0x39   : > { %346 = vst [vmem:[#allocation2 + $0x30] sm:$0xff] (!%p1286_p12), %v1677_v32  ;;  %347 = vst [vmem:[#allocation2 + $0x38] sm:$0xff] (!%p1286_p12), %v1677_v32 }
  0x3a   : > { %348 = vst [vmem:[#allocation2 + $0x40] sm:$0xff] (!%p1286_p12), %v1677_v32  ;;  %349 = vst [vmem:[#allocation2 + $0x48] sm:$0xff] (!%p1286_p12), %v1677_v32 }
  0x3b   : > { %350 = vst [vmem:[#allocation2 + $0x50] sm:$0xff] (!%p1286_p12), %v1677_v32  ;;  %351 = vst [vmem:[#allocation2 + $0x58] sm:$0xff] (!%p1286_p12), %v1677_v32 }
  0x3c   : > { %352 = vst [vmem:[#allocation2 + $0x60] sm:$0xff] (!%p1286_p12), %v1677_v32  ;;  %353 = vst [vmem:[#allocation2 + $0x68] sm:$0xff] (!%p1286_p12), %v1677_v32 }
  0x3d   : > { %354 = vst [vmem:[#allocation2 + $0x70] sm:$0xff] (!%p1286_p12), %v1677_v32  ;;  %355 = vst [vmem:[#allocation2 + $0x78] sm:$0xff] (!%p1286_p12), %v1677_v32 }
  0x3e PF: > { %v1541_v33 = vld [vmem:[%s1834_s26 + $0x40] sm:$0xff]   ;;  %v1545_v37 = vld [vmem:[%s1834_s26 + $0x48] sm:$0xff]   ;;  %v1549_v41 = vld [vmem:[%s1834_s26 + $0x50] sm:$0xff]   ;;  %p1351_p13 = scmp.ne.s32.totalorder %s1659_s14, 1 }
  0x3f   : > { %v1542_v34 = vld [vmem:[%s1834_s26 + $0xc0] sm:$0xff]   ;;  %1356 = vmatprep.subr.bf16.mxu0 %v1541_v33  ;;  %v1546_v38 = vld [vmem:[%s1834_s26 + $0xc8] sm:$0xff]   ;;  %v1550_v42 = vld [vmem:[%s1834_s26 + $0xd0] sm:$0xff]  }
  0x40   : > { %v1543_v35 = vld [vmem:[%s1834_s26] sm:$0xff]   ;;  %1420 = vmatprep.subr.bf16.mxu1 %v1542_v34  ;;  %v1547_v39 = vld [vmem:[%s1834_s26 + $0x8] sm:$0xff]   ;;  %v1551_v43 = vld [vmem:[%s1834_s26 + $0x10] sm:$0xff]  }
  0x41   : > { %v1544_v36 = vld [vmem:[%s1834_s26 + $0x80] sm:$0xff]   ;;  %1357 = vmatpush3.bf16.msra.mxu0 %v1543_v35  ;;  %v1548_v40 = vld [vmem:[%s1834_s26 + $0x88] sm:$0xff]   ;;  %v1552_v44 = vld [vmem:[%s1834_s26 + $0x90] sm:$0xff]  }
  0x42   : > { %1421 = vmatpush3.bf16.msra.mxu1 %v1544_v36  ;;  %1358 = vmatprep.subr.bf16.mxu0 %v1545_v37  ;;  %v1553_v45 = vld [vmem:[%s1834_s26 + $0x58] sm:$0xff]   ;;  %v1557_v49 = vld [vmem:[%s1834_s26 + $0x60] sm:$0xff]   ;;  %v1561_v53 = vld [vmem:[%s1834_s26 + $0x68] sm:$0xff]  }
  0x43   : > { %1422 = vmatprep.subr.bf16.mxu1 %v1546_v38  ;;  %v1554_v46 = vld [vmem:[%s1834_s26 + $0xd8] sm:$0xff]   ;;  %v1558_v50 = vld [vmem:[%s1834_s26 + $0xe0] sm:$0xff]   ;;  %v1562_v54 = vld [vmem:[%s1834_s26 + $0xe8] sm:$0xff]  }
  0x44   : > { %v1555_v47 = vld [vmem:[%s1834_s26 + $0x18] sm:$0xff]   ;;  %v1559_v51 = vld [vmem:[%s1834_s26 + $0x20] sm:$0xff]   ;;  %v1563_v55 = vld [vmem:[%s1834_s26 + $0x28] sm:$0xff]  }
  0x45   : > { %1359 = vmatpush3.bf16.msra.mxu0 %v1547_v39  ;;  %v1556_v48 = vld [vmem:[%s1834_s26 + $0x98] sm:$0xff]   ;;  %v1560_v52 = vld [vmem:[%s1834_s26 + $0xa0] sm:$0xff]   ;;  %v1564_v56 = vld [vmem:[%s1834_s26 + $0xa8] sm:$0xff]  }
  0x46   : > { %1423 = vmatpush3.bf16.msra.mxu1 %v1548_v40  ;;  %1360 = vmatprep.subr.bf16.mxu0 %v1549_v41  ;;  %v1565_v57 = vld [vmem:[%s1834_s26 + $0x70] sm:$0xff]   ;;  %v1569_v61 = vld [vmem:[%s1834_s26 + $0x78] sm:$0xff]  }
  0x47   : > { %1424 = vmatprep.subr.bf16.mxu1 %v1550_v42  ;;  %v1566_v58 = vld [vmem:[%s1834_s26 + $0xf0] sm:$0xff]   ;;  %v1570_v62 = vld [vmem:[%s1834_s26 + $0xf8] sm:$0xff]   ;;  %v356_v42 = vld [vmem:[#allocation2] sm:$0xff] }
  0x48   : > { %v1567_v59 = vld [vmem:[%s1834_s26 + $0x30] sm:$0xff]   ;;  %v1571_v63 = vld [vmem:[%s1834_s26 + $0x38] sm:$0xff]  }
  0x49   : > { %1361 = vmatpush3.bf16.msra.mxu0 %v1551_v43  ;;  %v1568_v60 = vld [vmem:[%s1834_s26 + $0xb0] sm:$0xff]   ;;  %v1572_v0 = vld [vmem:[%s1834_s26 + $0xb8] sm:$0xff]  }
  0x4a   : > { %1425 = vmatpush3.bf16.msra.mxu1 %v1552_v44  ;;  %1362 = vmatprep.subr.bf16.mxu0 %v1553_v45  ;;  %v1573_v1 = vld [vmem:[%s1841_s12] ss:$16 sps:$4 sm:$0xff]   ;;  %v1575_v2 = vld [vmem:[%s1841_s12 + $0x4] ss:$16 sps:$4 sm:$0xff]   ;;  %v1576_v3 = vld [vmem:[%s1841_s12 + $0x8] ss:$16 sps:$4 sm:$0xff]  }
  0x4b   : > { %1426 = vmatprep.subr.bf16.mxu1 %v1554_v46  ;;  %v1578_v4 = vld [vmem:[%s1841_s12 + $0xc] ss:$16 sps:$4 sm:$0xff]   ;;  %852 = vmatprep.mubr.bf16.mxu0 %v1575_v2  ;;  %v1579_v5 = vld [vmem:[%s1841_s12 + $0x24] ss:$16 sps:$4 sm:$0xff]   ;;  %v1583_v7 = vld [vmem:[%s1841_s12 + $0x20] ss:$16 sps:$4 sm:$0xff]  }
  0x4c   : > { %949 = vmatprep.mubr.bf16.mxu1 %v1578_v4  ;;  %v1581_v6 = vld [vmem:[%s1841_s12 + $0x2c] ss:$16 sps:$4 sm:$0xff]   ;;  %v1584_v8 = vld [vmem:[%s1841_s12 + $0x28] ss:$16 sps:$4 sm:$0xff]   ;;  %v1585_v9 = vld [vmem:[%s1841_s12 + $0x44] ss:$16 sps:$4 sm:$0xff]  }
  0x4d   : > { %1363 = vmatpush3.bf16.msra.mxu0 %v1555_v47  ;;  %v1587_v10 = vld [vmem:[%s1841_s12 + $0x4c] ss:$16 sps:$4 sm:$0xff]   ;;  %v1589_v11 = vld [vmem:[%s1841_s12 + $0x40] ss:$16 sps:$4 sm:$0xff]   ;;  %v1590_v12 = vld [vmem:[%s1841_s12 + $0x48] ss:$16 sps:$4 sm:$0xff]  }
  0x4e   : > { %1427 = vmatpush3.bf16.msra.mxu1 %v1556_v48  ;;  %1364 = vmatprep.subr.bf16.mxu0 %v1557_v49  ;;  %v1591_v13 = vld [vmem:[%s1841_s12 + $0x64] ss:$16 sps:$4 sm:$0xff]   ;;  %v1593_v14 = vld [vmem:[%s1841_s12 + $0x6c] ss:$16 sps:$4 sm:$0xff]   ;;  %v1595_v15 = vld [vmem:[%s1841_s12 + $0x60] ss:$16 sps:$4 sm:$0xff]  }
  0x4f   : > { %1428 = vmatprep.subr.bf16.mxu1 %v1558_v50  ;;  %v1596_v16 = vld [vmem:[%s1841_s12 + $0x68] ss:$16 sps:$4 sm:$0xff]   ;;  %v1597_v17 = vld [vmem:[%s1841_s12 + $0x84] ss:$16 sps:$4 sm:$0xff]   ;;  %v1599_v18 = vld [vmem:[%s1841_s12 + $0x8c] ss:$16 sps:$4 sm:$0xff]  }
  0x50   : > { %v1601_v19 = vld [vmem:[%s1841_s12 + $0x80] ss:$16 sps:$4 sm:$0xff]   ;;  %v1602_v20 = vld [vmem:[%s1841_s12 + $0x88] ss:$16 sps:$4 sm:$0xff]   ;;  %v1603_v21 = vld [vmem:[%s1841_s12 + $0xa4] ss:$16 sps:$4 sm:$0xff]  }
  0x51   : > { %1365 = vmatpush3.bf16.msra.mxu0 %v1559_v51  ;;  %v1605_v22 = vld [vmem:[%s1841_s12 + $0xac] ss:$16 sps:$4 sm:$0xff]   ;;  %v1607_v23 = vld [vmem:[%s1841_s12 + $0xa0] ss:$16 sps:$4 sm:$0xff]   ;;  %v1608_v24 = vld [vmem:[%s1841_s12 + $0xa8] ss:$16 sps:$4 sm:$0xff]  }
  0x52   : > { %1429 = vmatpush3.bf16.msra.mxu1 %v1560_v52  ;;  %1366 = vmatprep.subr.bf16.mxu0 %v1561_v53  ;;  %v1609_v25 = vld [vmem:[%s1841_s12 + $0xc4] ss:$16 sps:$4 sm:$0xff]   ;;  %v1611_v26 = vld [vmem:[%s1841_s12 + $0xcc] ss:$16 sps:$4 sm:$0xff]   ;;  %v1613_v27 = vld [vmem:[%s1841_s12 + $0xc0] ss:$16 sps:$4 sm:$0xff]  }
  0x53   : > { %1430 = vmatprep.subr.bf16.mxu1 %v1562_v54  ;;  %v1614_v28 = vld [vmem:[%s1841_s12 + $0xc8] ss:$16 sps:$4 sm:$0xff]   ;;  %v1615_v29 = vld [vmem:[%s1841_s12 + $0xe4] ss:$16 sps:$4 sm:$0xff]   ;;  %v1617_v30 = vld [vmem:[%s1841_s12 + $0xec] ss:$16 sps:$4 sm:$0xff]  }
  0x54   : > { %v1619_v31 = vld [vmem:[%s1841_s12 + $0xe0] ss:$16 sps:$4 sm:$0xff]   ;;  %v1620_v32 = vld [vmem:[%s1841_s12 + $0xe8] ss:$16 sps:$4 sm:$0xff]  }
  0x55   : > { %1367 = vmatpush3.bf16.msra.mxu0 %v1563_v55  ;;  %v357_v47 = vld [vmem:[#allocation2 + $0x8] sm:$0xff] }
  0x56   : > { %1431 = vmatpush3.bf16.msra.mxu1 %v1564_v56  ;;  %1368 = vmatprep.subr.bf16.mxu0 %v1565_v57 }
  0x57   : > { %1432 = vmatprep.subr.bf16.mxu1 %v1566_v58 }
  0x59   : > { %1369 = vmatpush3.bf16.msra.mxu0 %v1567_v59 }
  0x5a   : > { %1433 = vmatpush3.bf16.msra.mxu1 %v1568_v60  ;;  %1370 = vmatprep.subr.bf16.mxu0 %v1569_v61  ;;  %v358_v60 = vld [vmem:[#allocation2 + $0x10] sm:$0xff] }
  0x5b   : > { %1434 = vmatprep.subr.bf16.mxu1 %v1570_v62 }
  0x5d   : > { %1371 = vmatpush3.bf16.msra.mxu0 %v1571_v63 }
  0x5e   : > { %1435 = vmatpush3.bf16.msra.mxu1 %v1572_v0 }
  0x60   : > { %853 = vmatmul.mubr.bf16.vlgmr.msra.gmra.mrb[0].mxu0 %v1573_v1  ;;  %v359_v1 = vld [vmem:[#allocation2 + $0x18] sm:$0xff] }
  0x61   : > { %950 = vmatmul.mubr.bf16.vlgmr.msra.gmra.mrb[0].mxu1 %v1576_v3  ;;  %860 = vmatprep.mubr.bf16.mxu0 %v1579_v5 }
  0x62   : > { %957 = vmatprep.mubr.bf16.mxu1 %v1581_v6 }
  0x68   : > { %861 = vmatmul.mubr.bf16.gmra.mrb[4].mxu0 %v1583_v7 }
  0x69   : > { %958 = vmatmul.mubr.bf16.gmra.mrb[4].mxu1 %v1584_v8  ;;  %868 = vmatprep.mubr.bf16.mxu0 %v1585_v9 }
  0x6a   : > { %965 = vmatprep.mubr.bf16.mxu1 %v1587_v10 }
  0x70   : > { %869 = vmatmul.mubr.bf16.gmra.mrb[8].mxu0 %v1589_v11 }
  0x71   : > { %966 = vmatmul.mubr.bf16.gmra.mrb[8].mxu1 %v1590_v12  ;;  %876 = vmatprep.mubr.bf16.mxu0 %v1591_v13 }
  0x72   : > { %973 = vmatprep.mubr.bf16.mxu1 %v1593_v14  ;;  %v360_v14 = vld [vmem:[#allocation2 + $0x20] sm:$0xff] }
  0x78   : > { %877 = vmatmul.mubr.bf16.gmra.mrb[12].mxu0 %v1595_v15 }
  0x79   : > { %974 = vmatmul.mubr.bf16.gmra.mrb[12].mxu1 %v1596_v16  ;;  %884 = vmatprep.mubr.bf16.mxu0 %v1597_v17 }
  0x7a   : > { %981 = vmatprep.mubr.bf16.mxu1 %v1599_v18 }
  0x80   : > { %885 = vmatmul.mubr.bf16.gmra.mrb[16].mxu0 %v1601_v19  ;;  %v361_v19 = vld [vmem:[#allocation2 + $0x28] sm:$0xff] }
  0x81   : > { %982 = vmatmul.mubr.bf16.gmra.mrb[16].mxu1 %v1602_v20  ;;  %892 = vmatprep.mubr.bf16.mxu0 %v1603_v21 }
  0x82   : > { %989 = vmatprep.mubr.bf16.mxu1 %v1605_v22 }
  0x88   : > { %893 = vmatmul.mubr.bf16.gmra.mrb[20].mxu0 %v1607_v23 }
  0x89   : > { %990 = vmatmul.mubr.bf16.gmra.mrb[20].mxu1 %v1608_v24  ;;  %900 = vmatprep.mubr.bf16.mxu0 %v1609_v25 }
  0x8a   : > { %997 = vmatprep.mubr.bf16.mxu1 %v1611_v26 }
  0x90   : > { %901 = vmatmul.mubr.bf16.gmra.mrb[24].mxu0 %v1613_v27 }
  0x91   : > { %998 = vmatmul.mubr.bf16.gmra.mrb[24].mxu1 %v1614_v28  ;;  %908 = vmatprep.mubr.bf16.mxu0 %v1615_v29 }
  0x92   : > { %1005 = vmatprep.mubr.bf16.mxu1 %v1617_v30 }
  0x98   : > { %909 = vmatmul.mubr.bf16.gmra.mrb[28].mxu0 %v1619_v31 }
  0x99   : > { %1006 = vmatmul.mubr.bf16.gmra.mrb[28].mxu1 %v1620_v32  ;;  %v362_v32 = vld [vmem:[#allocation2 + $0x30] sm:$0xff] }
 0x133   : > { %v1372_v33 = vpop.f32.mrb[0].mxu0 }
 0x134   : > { %v1436_v34 = vpop.f32.mrb[0].mxu1  ;;  %v1373_v35 = vpop.f32.mrb[1].mxu0 }
 0x135   : > { %v1374_v36 = vadd.f32 %v1373_v35, %v1372_v33  ;;  %v1437_v37 = vpop.f32.mrb[1].mxu1  ;;  %v1375_v38 = vpop.f32.mrb[2].mxu0 }
 0x136   : > { %v1438_v39 = vadd.f32 %v1437_v37, %v1436_v34  ;;  %v1439_v40 = vpop.f32.mrb[2].mxu1  ;;  %v1376_v41 = vpop.f32.mrb[3].mxu0  ;;  %v363_v37 = vld [vmem:[#allocation2 + $0x38] sm:$0xff] }
 0x137   : > { %v1377_v43 = vadd.f32 %v1376_v41, %v1375_v38  ;;  %v1440_v44 = vpop.f32.mrb[3].mxu1 }
 0x138   : > { %v952_v45 = vadd.f32 %v1438_v39, %v1374_v36  ;;  %v1441_v46 = vadd.f32 %v1440_v44, %v1439_v40 }
 0x13a   : > { %v1014_v48 = vadd.f32 %v952_v45, %v356_v42  ;;  %v955_v49 = vadd.f32 %v1441_v46, %v1377_v43 }
 0x13b   : > { %v1378_v50 = vpop.f32.mrb[4].mxu0 }
 0x13c   : > { %1030 = vst [vmem:[#allocation2] sm:$0xff] %v1014_v48  ;;  %v1015_v51 = vadd.f32 %v955_v49, %v357_v47  ;;  %v1442_v52 = vpop.f32.mrb[4].mxu1  ;;  %v1379_v53 = vpop.f32.mrb[5].mxu0 }
 0x13d   : > { %v1380_v54 = vadd.f32 %v1379_v53, %v1378_v50  ;;  %v1443_v55 = vpop.f32.mrb[5].mxu1  ;;  %v1381_v56 = vpop.f32.mrb[6].mxu0  ;;  %v364_v50 = vld [vmem:[#allocation2 + $0x40] sm:$0xff] }
 0x13e   : > { %1031 = vst [vmem:[#allocation2 + $0x8] sm:$0xff] %v1015_v51  ;;  %v1444_v57 = vadd.f32 %v1443_v55, %v1442_v52  ;;  %v1445_v58 = vpop.f32.mrb[6].mxu1  ;;  %v1382_v59 = vpop.f32.mrb[7].mxu0  ;;  %v365_v55 = vld [vmem:[#allocation2 + $0x48] sm:$0xff] }
 0x13f   : > { %v1383_v61 = vadd.f32 %v1382_v59, %v1381_v56  ;;  %v1446_v62 = vpop.f32.mrb[7].mxu1 }
 0x140   : > { %v960_v63 = vadd.f32 %v1444_v57, %v1380_v54  ;;  %v1447_v0 = vadd.f32 %v1446_v62, %v1445_v58 }
 0x142   : > { %v1016_v2 = vadd.f32 %v960_v63, %v358_v60  ;;  %v963_v3 = vadd.f32 %v1447_v0, %v1383_v61 }
 0x143   : > { %v1384_v4 = vpop.f32.mrb[8].mxu0 }
 0x144   : > { %1032 = vst [vmem:[#allocation2 + $0x10] sm:$0xff] %v1016_v2  ;;  %v1017_v5 = vadd.f32 %v963_v3, %v359_v1  ;;  %v1448_v6 = vpop.f32.mrb[8].mxu1  ;;  %v1385_v7 = vpop.f32.mrb[9].mxu0 }
 0x145   : > { %v1386_v8 = vadd.f32 %v1385_v7, %v1384_v4  ;;  %v1449_v9 = vpop.f32.mrb[9].mxu1  ;;  %v1387_v10 = vpop.f32.mrb[10].mxu0  ;;  %v366_v4 = vld [vmem:[#allocation2 + $0x50] sm:$0xff] }
 0x146   : > { %1033 = vst [vmem:[#allocation2 + $0x18] sm:$0xff] %v1017_v5  ;;  %v1450_v11 = vadd.f32 %v1449_v9, %v1448_v6  ;;  %v1451_v12 = vpop.f32.mrb[10].mxu1  ;;  %v1388_v13 = vpop.f32.mrb[11].mxu0  ;;  %v367_v9 = vld [vmem:[#allocation2 + $0x58] sm:$0xff] }
 0x147   : > { %v1389_v15 = vadd.f32 %v1388_v13, %v1387_v10  ;;  %v1452_v16 = vpop.f32.mrb[11].mxu1 }
 0x148   : > { %v968_v17 = vadd.f32 %v1450_v11, %v1386_v8  ;;  %v1453_v18 = vadd.f32 %v1452_v16, %v1451_v12 }
 0x14a   : > { %v1018_v20 = vadd.f32 %v968_v17, %v360_v14  ;;  %v971_v21 = vadd.f32 %v1453_v18, %v1389_v15 }
 0x14b   : > { %v1390_v22 = vpop.f32.mrb[12].mxu0 }
 0x14c   : > { %1034 = vst [vmem:[#allocation2 + $0x20] sm:$0xff] %v1018_v20  ;;  %v1019_v23 = vadd.f32 %v971_v21, %v361_v19  ;;  %v1454_v24 = vpop.f32.mrb[12].mxu1  ;;  %v1391_v25 = vpop.f32.mrb[13].mxu0 }
 0x14d   : > { %v1392_v26 = vadd.f32 %v1391_v25, %v1390_v22  ;;  %v1455_v27 = vpop.f32.mrb[13].mxu1  ;;  %v1393_v28 = vpop.f32.mrb[14].mxu0  ;;  %v368_v22 = vld [vmem:[#allocation2 + $0x60] sm:$0xff] }
 0x14e   : > { %1035 = vst [vmem:[#allocation2 + $0x28] sm:$0xff] %v1019_v23  ;;  %v1456_v29 = vadd.f32 %v1455_v27, %v1454_v24  ;;  %v1457_v30 = vpop.f32.mrb[14].mxu1  ;;  %v1394_v31 = vpop.f32.mrb[15].mxu0  ;;  %v369_v27 = vld [vmem:[#allocation2 + $0x68] sm:$0xff] }
 0x14f   : > { %v1395_v33 = vadd.f32 %v1394_v31, %v1393_v28  ;;  %v1458_v34 = vpop.f32.mrb[15].mxu1 }
 0x150   : > { %v976_v35 = vadd.f32 %v1456_v29, %v1392_v26  ;;  %v1459_v36 = vadd.f32 %v1458_v34, %v1457_v30 }
 0x152   : > { %v1020_v38 = vadd.f32 %v976_v35, %v362_v32  ;;  %v979_v39 = vadd.f32 %v1459_v36, %v1395_v33 }
 0x153   : > { %v1396_v40 = vpop.f32.mrb[16].mxu0 }
 0x154   : > { %1036 = vst [vmem:[#allocation2 + $0x30] sm:$0xff] %v1020_v38  ;;  %v1021_v41 = vadd.f32 %v979_v39, %v363_v37  ;;  %v1460_v42 = vpop.f32.mrb[16].mxu1  ;;  %v1397_v43 = vpop.f32.mrb[17].mxu0 }
 0x155   : > { %v1398_v44 = vadd.f32 %v1397_v43, %v1396_v40  ;;  %v1461_v45 = vpop.f32.mrb[17].mxu1  ;;  %v1399_v46 = vpop.f32.mrb[18].mxu0  ;;  %v370_v40 = vld [vmem:[#allocation2 + $0x70] sm:$0xff] }
 0x156   : > { %1037 = vst [vmem:[#allocation2 + $0x38] sm:$0xff] %v1021_v41  ;;  %v1462_v47 = vadd.f32 %v1461_v45, %v1460_v42  ;;  %v1463_v48 = vpop.f32.mrb[18].mxu1  ;;  %v1400_v49 = vpop.f32.mrb[19].mxu0  ;;  %v371_v45 = vld [vmem:[#allocation2 + $0x78] sm:$0xff] }
 0x157   : > { %v1401_v51 = vadd.f32 %v1400_v49, %v1399_v46  ;;  %v1464_v52 = vpop.f32.mrb[19].mxu1  ;;  %v1050_v49 = vld [vmem:[#allocation2] sm:$0xff] (!%p1351_p13) }
 0x158   : > { %v984_v53 = vadd.f32 %v1462_v47, %v1398_v44  ;;  %v1465_v54 = vadd.f32 %v1464_v52, %v1463_v48 }
 0x15a   : > { %v1022_v56 = vadd.f32 %v984_v53, %v364_v50  ;;  %v987_v57 = vadd.f32 %v1465_v54, %v1401_v51  ;;  %v1912_v50 = vld [vmem:[%s1969_s2] ss:$0 sm:$0xff] (!%p1351_p13)  ;;  %v1051_v51 = vld [vmem:[#allocation2 + $0x8] sm:$0xff] (!%p1351_p13)  ;;  %v1052_v54 = vld [vmem:[#allocation2 + $0x10] sm:$0xff] (!%p1351_p13) }
 0x15b   : > { %v1402_v58 = vpop.f32.mrb[20].mxu0  ;;  %v1073_v52 = vadd.f32 (!%p1351_p13), %v1912_v50, %v1050_v49  ;;  %v1074_v53 = vadd.f32 (!%p1351_p13), %v1912_v50, %v1051_v51 }
 0x15c   : > { %1038 = vst [vmem:[#allocation2 + $0x40] sm:$0xff] %v1022_v56  ;;  %v1023_v59 = vadd.f32 %v987_v57, %v365_v55  ;;  %v1466_v60 = vpop.f32.mrb[20].mxu1  ;;  %v1403_v61 = vpop.f32.mrb[21].mxu0  ;;  %v1053_v55 = vld [vmem:[#allocation2 + $0x18] sm:$0xff] (!%p1351_p13)  ;;  %v1054_v56 = vld [vmem:[#allocation2 + $0x20] sm:$0xff] (!%p1351_p13)  ;;  %v1075_v57 = vadd.f32 (!%p1351_p13), %v1912_v50, %v1052_v54 }
 0x15d   : > { %v1404_v62 = vadd.f32 %v1403_v61, %v1402_v58  ;;  %v1467_v63 = vpop.f32.mrb[21].mxu1  ;;  %v1405_v0 = vpop.f32.mrb[22].mxu0  ;;  %v1076_v58 = vadd.f32 (!%p1351_p13), %v1912_v50, %v1053_v55  ;;  %v1056_v61 = vld [vmem:[#allocation2 + $0x30] sm:$0xff] (!%p1351_p13)  ;;  %vm1089_vm0 = vcmp.ge.f32.partialorder (!%p1351_p13), %v1073_v52, 0.0  ;;  %vm1090_vm1 = vcmp.ge.f32.partialorder (!%p1351_p13), %v1074_v53, 0.0 }
 0x15e   : > { %1039 = vst [vmem:[#allocation2 + $0x48] sm:$0xff] %v1023_v59  ;;  %v1468_v1 = vadd.f32 %v1467_v63, %v1466_v60  ;;  %v1469_v2 = vpop.f32.mrb[22].mxu1  ;;  %v1406_v3 = vpop.f32.mrb[23].mxu0  ;;  %v1077_v59 = vadd.f32 (!%p1351_p13), %v1912_v50, %v1054_v56  ;;  %v1055_v60 = vld [vmem:[#allocation2 + $0x28] sm:$0xff] (!%p1351_p13)  ;;  %v1105_v63 = vmul.f32 (!%p1351_p13), 0.2, %v1073_v52 }
 0x15f   : > { %v1407_v5 = vadd.f32 %v1406_v3, %v1405_v0  ;;  %v1470_v6 = vpop.f32.mrb[23].mxu1  ;;  %v1106_v0 = vmul.f32 (!%p1351_p13), 0.2, %v1074_v53  ;;  %vm1091_vm2 = vcmp.ge.f32.partialorder (!%p1351_p13), %v1075_v57, 0.0  ;;  %vm1092_vm3 = vcmp.ge.f32.partialorder (!%p1351_p13), %v1076_v58, 0.0 }
 0x160   : > { %v992_v7 = vadd.f32 %v1468_v1, %v1404_v62  ;;  %v1471_v8 = vadd.f32 %v1470_v6, %v1469_v2  ;;  %v1057_v62 = vld [vmem:[#allocation2 + $0x38] sm:$0xff] (!%p1351_p13)  ;;  %v1107_v1 = vmul.f32 (!%p1351_p13), 0.2, %v1075_v57  ;;  %v1108_v2 = vmul.f32 (!%p1351_p13), 0.2, %v1076_v58 }
 0x161   : > { %v1121_v3 = vsel (!%p1351_p13), %vm1089_vm0, %v1073_v52, %v1105_v63  ;;  %vm1093_vm4 = vcmp.ge.f32.partialorder (!%p1351_p13), %v1077_v59, 0.0 }
 0x162   : > { %v1024_v10 = vadd.f32 %v992_v7, %v366_v4  ;;  %v995_v11 = vadd.f32 %v1471_v8, %v1407_v5  ;;  %v1122_v4 = vsel (!%p1351_p13), %vm1090_vm1, %v1074_v53, %v1106_v0  ;;  %v1109_v5 = vmul.f32 (!%p1351_p13), 0.2, %v1077_v59  ;;  %1137 = vst [vmem:[%s1839_s30] sm:$0xff] (!%p1351_p13), %v1121_v3 }
 0x163   : > { %v1408_v12 = vpop.f32.mrb[24].mxu0  ;;  %v1058_v6 = vld [vmem:[#allocation2 + $0x40] sm:$0xff] (!%p1351_p13)  ;;  %1138 = vst [vmem:[%s1839_s30 + $0x8] sm:$0xff] (!%p1351_p13), %v1122_v4  ;;  %v1123_v8 = vsel (!%p1351_p13), %vm1091_vm2, %v1075_v57, %v1107_v1 }
 0x164   : > { %1040 = vst [vmem:[#allocation2 + $0x50] sm:$0xff] %v1024_v10  ;;  %v1025_v13 = vadd.f32 %v995_v11, %v367_v9  ;;  %v1472_v14 = vpop.f32.mrb[24].mxu1  ;;  %v1409_v15 = vpop.f32.mrb[25].mxu0  ;;  %v1124_v9 = vsel (!%p1351_p13), %vm1092_vm3, %v1076_v58, %v1108_v2  ;;  %v1078_v10 = vadd.f32 (!%p1351_p13), %v1912_v50, %v1055_v60  ;;  %v1079_v11 = vadd.f32 (!%p1351_p13), %v1912_v50, %v1056_v61 }
 0x165   : > { %v1410_v16 = vadd.f32 %v1409_v15, %v1408_v12  ;;  %v1473_v17 = vpop.f32.mrb[25].mxu1  ;;  %v1411_v18 = vpop.f32.mrb[26].mxu0  ;;  %v1059_v7 = vld [vmem:[#allocation2 + $0x48] sm:$0xff] (!%p1351_p13)  ;;  %1139 = vst [vmem:[%s1839_s30 + $0x10] sm:$0xff] (!%p1351_p13), %v1123_v8  ;;  %1140 = vst [vmem:[%s1839_s30 + $0x18] sm:$0xff] (!%p1351_p13), %v1124_v9  ;;  %v1080_v15 = vadd.f32 (!%p1351_p13), %v1912_v50, %v1057_v62 }
 0x166   : > { %1041 = vst [vmem:[#allocation2 + $0x58] sm:$0xff] %v1025_v13  ;;  %v1474_v19 = vadd.f32 %v1473_v17, %v1472_v14  ;;  %v1475_v20 = vpop.f32.mrb[26].mxu1  ;;  %v1412_v21 = vpop.f32.mrb[27].mxu0  ;;  %v1125_v14 = vsel (!%p1351_p13), %vm1093_vm4, %v1077_v59, %v1109_v5  ;;  %v1082_v17 = vadd.f32 (!%p1351_p13), %v1912_v50, %v1059_v7  ;;  %vm1094_vm5 = vcmp.ge.f32.partialorder (!%p1351_p13), %v1078_v10, 0.0 }
 0x167   : > { %v1413_v23 = vadd.f32 %v1412_v21, %v1411_v18  ;;  %v1476_v24 = vpop.f32.mrb[27].mxu1  ;;  %1141 = vst [vmem:[%s1839_s30 + $0x20] sm:$0xff] (!%p1351_p13), %v1125_v14  ;;  %v1110_v21 = vmul.f32 (!%p1351_p13), 0.2, %v1078_v10  ;;  %vm1095_vm6 = vcmp.ge.f32.partialorder (!%p1351_p13), %v1079_v11, 0.0  ;;  %vm1096_vm7 = vcmp.ge.f32.partialorder (!%p1351_p13), %v1080_v15, 0.0 }
 0x168   : > { %v1000_v25 = vadd.f32 %v1474_v19, %v1410_v16  ;;  %v1477_v26 = vadd.f32 %v1476_v24, %v1475_v20  ;;  %v1081_v16 = vadd.f32 (!%p1351_p13), %v1912_v50, %v1058_v6  ;;  %vm1098_vm9 = vcmp.ge.f32.partialorder (!%p1351_p13), %v1082_v17, 0.0 }
 0x16a   : > { %v1026_v28 = vadd.f32 %v1000_v25, %v368_v22  ;;  %v1003_v29 = vadd.f32 %v1477_v26, %v1413_v23  ;;  %v1111_v22 = vmul.f32 (!%p1351_p13), 0.2, %v1079_v11  ;;  %v1112_v23 = vmul.f32 (!%p1351_p13), 0.2, %v1080_v15 }
 0x16b   : > { %v1414_v30 = vpop.f32.mrb[28].mxu0  ;;  %v1060_v12 = vld [vmem:[#allocation2 + $0x50] sm:$0xff] (!%p1351_p13)  ;;  %vm1097_vm8 = vcmp.ge.f32.partialorder (!%p1351_p13), %v1081_v16, 0.0  ;;  %v1113_v24 = vmul.f32 (!%p1351_p13), 0.2, %v1081_v16  ;;  %v1126_v25 = vsel (!%p1351_p13), %vm1094_vm5, %v1078_v10, %v1110_v21 }
 0x16c   : > { %1042 = vst [vmem:[#allocation2 + $0x60] sm:$0xff] %v1026_v28  ;;  %v1027_v31 = vadd.f32 %v1003_v29, %v369_v27  ;;  %v1478_v32 = vpop.f32.mrb[28].mxu1  ;;  %v1415_v33 = vpop.f32.mrb[29].mxu0  ;;  %v1127_v26 = vsel (!%p1351_p13), %vm1095_vm6, %v1079_v11, %v1111_v22  ;;  %v1114_v27 = vmul.f32 (!%p1351_p13), 0.2, %v1082_v17  ;;  %1142 = vst [vmem:[%s1839_s30 + $0x28] sm:$0xff] (!%p1351_p13), %v1126_v25  ;;  %v1128_v28 = vsel (!%p1351_p13), %vm1096_vm7, %v1080_v15, %v1112_v23 }
 0x16d   : > { %v1416_v34 = vadd.f32 %v1415_v33, %v1414_v30  ;;  %v1479_v35 = vpop.f32.mrb[29].mxu1  ;;  %v1417_v36 = vpop.f32.mrb[30].mxu0  ;;  %v1061_v13 = vld [vmem:[#allocation2 + $0x58] sm:$0xff] (!%p1351_p13)  ;;  %1143 = vst [vmem:[%s1839_s30 + $0x30] sm:$0xff] (!%p1351_p13), %v1127_v26  ;;  %v1129_v29 = vsel (!%p1351_p13), %vm1097_vm8, %v1081_v16, %v1113_v24  ;;  %v1083_v30 = vadd.f32 (!%p1351_p13), %v1912_v50, %v1060_v12  ;;  %1144 = vst [vmem:[%s1839_s30 + $0x38] sm:$0xff] (!%p1351_p13), %v1128_v28 }
 0x16e   : > { %1043 = vst [vmem:[#allocation2 + $0x68] sm:$0xff] %v1027_v31  ;;  %v1480_v37 = vadd.f32 %v1479_v35, %v1478_v32  ;;  %v1481_v38 = vpop.f32.mrb[30].mxu1  ;;  %v1418_v39 = vpop.f32.mrb[31].mxu0  ;;  %v1084_v31 = vadd.f32 (!%p1351_p13), %v1912_v50, %v1061_v13  ;;  %1145 = vst [vmem:[%s1839_s30 + $0x40] sm:$0xff] (!%p1351_p13), %v1129_v29  ;;  %v1130_v32 = vsel (!%p1351_p13), %vm1098_vm9, %v1082_v17, %v1114_v27 }
 0x16f   : > { %v1419_v41 = vadd.f32 %v1418_v39, %v1417_v36  ;;  %v1482_v42 = vpop.f32.mrb[31].mxu1  ;;  %1146 = vst [vmem:[%s1839_s30 + $0x48] sm:$0xff] (!%p1351_p13), %v1130_v32  ;;  %vm1099_vm10 = vcmp.ge.f32.partialorder (!%p1351_p13), %v1083_v30, 0.0 }
 0x170   : > { %v1008_v43 = vadd.f32 %v1480_v37, %v1416_v34  ;;  %v1483_v44 = vadd.f32 %v1482_v42, %v1481_v38  ;;  %1049 = sbr.rel (%p1351_p13) target bundleno = 388 (0x184), region = 63  ;;  %v1115_v37 = vmul.f32 (!%p1351_p13), 0.2, %v1083_v30  ;;  %vm1100_vm11 = vcmp.ge.f32.partialorder (!%p1351_p13), %v1084_v31, 0.0 }
 0x171   : > { %v1116_v38 = vmul.f32 (!%p1351_p13), 0.2, %v1084_v31 }
 0x172   : > { %v1028_v46 = vadd.f32 %v1008_v43, %v370_v40  ;;  %v1011_v47 = vadd.f32 %v1483_v44, %v1419_v41  ;;  %v1131_v41 = vsel (!%p1351_p13), %vm1099_vm10, %v1083_v30, %v1115_v37 }
 0x173   : > { %v1062_v18 = vld [vmem:[#allocation2 + $0x60] sm:$0xff] (!%p1351_p13)  ;;  %v1132_v42 = vsel (!%p1351_p13), %vm1100_vm11, %v1084_v31, %v1116_v38  ;;  %1147 = vst [vmem:[%s1839_s30 + $0x50] sm:$0xff] (!%p1351_p13), %v1131_v41 }
 0x174   : > { %1044 = vst [vmem:[#allocation2 + $0x70] sm:$0xff] %v1028_v46  ;;  %v1029_v48 = vadd.f32 %v1011_v47, %v371_v45  ;;  %v1085_v33 = vadd.f32 (!%p1351_p13), %v1912_v50, %v1062_v18  ;;  %1148 = vst [vmem:[%s1839_s30 + $0x58] sm:$0xff] (!%p1351_p13), %v1132_v42 }
 0x175   : > { %v1063_v19 = vld [vmem:[#allocation2 + $0x68] sm:$0xff] (!%p1351_p13) }
 0x176   : > { %1045 = vst [vmem:[#allocation2 + $0x78] sm:$0xff] %v1029_v48  ;;  %v1086_v34 = vadd.f32 (!%p1351_p13), %v1912_v50, %v1063_v19  ;;  %vm1101_vm12 = vcmp.ge.f32.partialorder (!%p1351_p13), %v1085_v33, 0.0  ;;  %v1117_v39 = vmul.f32 (!%p1351_p13), 0.2, %v1085_v33 }
 0x178   : > { %vm1102_vm13 = vcmp.ge.f32.partialorder %v1086_v34, 0.0  ;;  %v1118_v40 = vmul.f32 0.2, %v1086_v34  ;;  %v1133_v44 = vsel %vm1101_vm12, %v1085_v33, %v1117_v39 }
 0x179   : > { %1149 = vst [vmem:[%s1839_s30 + $0x60] sm:$0xff] %v1133_v44 }
 0x17a   : > { %v1134_v45 = vsel %vm1102_vm13, %v1086_v34, %v1118_v40 }
 0x17b   : > { %v1064_v20 = vld [vmem:[#allocation2 + $0x70] sm:$0xff]  ;;  %1150 = vst [vmem:[%s1839_s30 + $0x68] sm:$0xff] %v1134_v45 }
 0x17c   : > { %v1087_v35 = vadd.f32 %v1912_v50, %v1064_v20 }
 0x17d   : > { %v1065_v36 = vld [vmem:[#allocation2 + $0x78] sm:$0xff] }
 0x17e   : > { %vm1103_vm14 = vcmp.ge.f32.partialorder %v1087_v35, 0.0  ;;  %v1119_v43 = vmul.f32 0.2, %v1087_v35  ;;  %v1088_v46 = vadd.f32 %v1912_v50, %v1065_v36 }
 0x180   : > { %v1135_v47 = vsel %vm1103_vm14, %v1087_v35, %v1119_v43  ;;  %vm1104_vm15 = vcmp.ge.f32.partialorder %v1088_v46, 0.0  ;;  %v1120_v48 = vmul.f32 0.2, %v1088_v46 }
 0x181   : > { %1151 = vst [vmem:[%s1839_s30 + $0x70] sm:$0xff] %v1135_v47 }
 0x182   : > { %v1136_v49 = vsel %vm1104_vm15, %v1088_v46, %v1120_v48 }
 0x183   : > { %1152 = vst [vmem:[%s1839_s30 + $0x78] sm:$0xff] %v1136_v49 }
 0x184 PF: > { %s13_s18 = sadd.s32 1, %s1675_s18   ;;  %s1971_s12 = smov %s1655_s13 }
 0x185   : > { %p10_p0 = scmp.ge.s32.totalorder %s13_s18, 10   ;;  %s1972_s13 = smov %s1749_s25 }
 0x186   : > { %s1973_s14 = smov %s1667_s16  ;;  %s1974_s15 = smov %s1671_s17 }
 0x187   : > { %s1975_s16 = smov %s1978_s19  ;;  %s1976_s17 = smov %s1982_s20 }
 0x188   :  { %12 = sbr.rel (!%p10_p0) target bundleno = 4 (0x4), region = 104 }

// kernel: dis_forward.22
= control target key start
LH: loop header
LB: loop body
LE: loop exit
PB: predicated region body
PF: predicated region fallthrough
CT: control target
= control target key end

     0   :  { %s1341_s1 = inlined_call_operand.vmem [shape: bf16[512,128], index: 1, kind: input, shape index: {}]   ;;  %s1342_s0 = inlined_call_operand.vmem [shape: bf16[128,512], index: 0, kind: input, shape index: {}]   ;;  %s1343_s2 = inlined_call_operand.vmem [shape: f32[1,128], index: 2, kind: input, shape index: {}]   ;;  %s1344_s3 = inlined_call_operand.vmem [shape: f32[128,128], index: 3, kind: output, shape index: {}]  }
   0x1   :  { %v980_v0 = vld [vmem:[%s1341_s1 + $0x40] sm:$0xff]   ;;  %v984_v4 = vld [vmem:[%s1341_s1 + $0x48] sm:$0xff]   ;;  %v988_v8 = vld [vmem:[%s1341_s1 + $0x50] sm:$0xff]  }
   0x2   :  { %v981_v1 = vld [vmem:[%s1341_s1 + $0xc0] sm:$0xff]   ;;  %852 = vmatprep.subr.bf16.mxu0 %v980_v0  ;;  %v985_v5 = vld [vmem:[%s1341_s1 + $0xc8] sm:$0xff]   ;;  %v989_v9 = vld [vmem:[%s1341_s1 + $0xd0] sm:$0xff]  }
   0x3   :  { %v982_v2 = vld [vmem:[%s1341_s1] sm:$0xff]   ;;  %916 = vmatprep.subr.bf16.mxu1 %v981_v1  ;;  %v986_v6 = vld [vmem:[%s1341_s1 + $0x8] sm:$0xff]   ;;  %v990_v10 = vld [vmem:[%s1341_s1 + $0x10] sm:$0xff]  }
   0x4   :  { %v983_v3 = vld [vmem:[%s1341_s1 + $0x80] sm:$0xff]   ;;  %853 = vmatpush3.bf16.msra.mxu0 %v982_v2  ;;  %v987_v7 = vld [vmem:[%s1341_s1 + $0x88] sm:$0xff]   ;;  %v991_v11 = vld [vmem:[%s1341_s1 + $0x90] sm:$0xff]  }
   0x5   :  { %917 = vmatpush3.bf16.msra.mxu1 %v983_v3  ;;  %854 = vmatprep.subr.bf16.mxu0 %v984_v4  ;;  %v992_v12 = vld [vmem:[%s1341_s1 + $0x58] sm:$0xff]   ;;  %v996_v16 = vld [vmem:[%s1341_s1 + $0x60] sm:$0xff]   ;;  %v1000_v20 = vld [vmem:[%s1341_s1 + $0x68] sm:$0xff]  }
   0x6   :  { %918 = vmatprep.subr.bf16.mxu1 %v985_v5  ;;  %v993_v13 = vld [vmem:[%s1341_s1 + $0xd8] sm:$0xff]   ;;  %v997_v17 = vld [vmem:[%s1341_s1 + $0xe0] sm:$0xff]   ;;  %v1001_v21 = vld [vmem:[%s1341_s1 + $0xe8] sm:$0xff]  }
   0x7   :  { %v994_v14 = vld [vmem:[%s1341_s1 + $0x18] sm:$0xff]   ;;  %v998_v18 = vld [vmem:[%s1341_s1 + $0x20] sm:$0xff]   ;;  %v1002_v22 = vld [vmem:[%s1341_s1 + $0x28] sm:$0xff]  }
   0x8   :  { %855 = vmatpush3.bf16.msra.mxu0 %v986_v6  ;;  %v995_v15 = vld [vmem:[%s1341_s1 + $0x98] sm:$0xff]   ;;  %v999_v19 = vld [vmem:[%s1341_s1 + $0xa0] sm:$0xff]   ;;  %v1003_v23 = vld [vmem:[%s1341_s1 + $0xa8] sm:$0xff]  }
   0x9   :  { %919 = vmatpush3.bf16.msra.mxu1 %v987_v7  ;;  %856 = vmatprep.subr.bf16.mxu0 %v988_v8  ;;  %v1004_v24 = vld [vmem:[%s1341_s1 + $0x70] sm:$0xff]   ;;  %v1008_v28 = vld [vmem:[%s1341_s1 + $0x78] sm:$0xff]  }
   0xa   :  { %920 = vmatprep.subr.bf16.mxu1 %v989_v9  ;;  %v1005_v25 = vld [vmem:[%s1341_s1 + $0xf0] sm:$0xff]   ;;  %v1009_v29 = vld [vmem:[%s1341_s1 + $0xf8] sm:$0xff]   ;;  %v1275_v9 = vld [vmem:[%s1343_s2] ss:$0 sm:$0xff] }
   0xb   :  { %v1006_v26 = vld [vmem:[%s1341_s1 + $0x30] sm:$0xff]   ;;  %v1010_v30 = vld [vmem:[%s1341_s1 + $0x38] sm:$0xff]  }
   0xc   :  { %857 = vmatpush3.bf16.msra.mxu0 %v990_v10  ;;  %v1007_v27 = vld [vmem:[%s1341_s1 + $0xb0] sm:$0xff]   ;;  %v1011_v31 = vld [vmem:[%s1341_s1 + $0xb8] sm:$0xff]  }
   0xd   :  { %921 = vmatpush3.bf16.msra.mxu1 %v991_v11  ;;  %858 = vmatprep.subr.bf16.mxu0 %v992_v12  ;;  %v1012_v32 = vld [vmem:[%s1342_s0] ss:$16 sps:$4 sm:$0xff]   ;;  %v1014_v33 = vld [vmem:[%s1342_s0 + $0x4] ss:$16 sps:$4 sm:$0xff]   ;;  %v1015_v34 = vld [vmem:[%s1342_s0 + $0x8] ss:$16 sps:$4 sm:$0xff]  }
   0xe   :  { %922 = vmatprep.subr.bf16.mxu1 %v993_v13  ;;  %v1017_v35 = vld [vmem:[%s1342_s0 + $0xc] ss:$16 sps:$4 sm:$0xff]   ;;  %531 = vmatprep.mubr.bf16.mxu0 %v1014_v33  ;;  %v1018_v36 = vld [vmem:[%s1342_s0 + $0x24] ss:$16 sps:$4 sm:$0xff]   ;;  %v1022_v38 = vld [vmem:[%s1342_s0 + $0x20] ss:$16 sps:$4 sm:$0xff]  }
   0xf   :  { %628 = vmatprep.mubr.bf16.mxu1 %v1017_v35  ;;  %v1020_v37 = vld [vmem:[%s1342_s0 + $0x2c] ss:$16 sps:$4 sm:$0xff]   ;;  %v1023_v39 = vld [vmem:[%s1342_s0 + $0x28] ss:$16 sps:$4 sm:$0xff]   ;;  %v1024_v40 = vld [vmem:[%s1342_s0 + $0x44] ss:$16 sps:$4 sm:$0xff]  }
  0x10   :  { %859 = vmatpush3.bf16.msra.mxu0 %v994_v14  ;;  %v1026_v41 = vld [vmem:[%s1342_s0 + $0x4c] ss:$16 sps:$4 sm:$0xff]   ;;  %v1028_v42 = vld [vmem:[%s1342_s0 + $0x40] ss:$16 sps:$4 sm:$0xff]   ;;  %v1029_v43 = vld [vmem:[%s1342_s0 + $0x48] ss:$16 sps:$4 sm:$0xff]  }
  0x11   :  { %923 = vmatpush3.bf16.msra.mxu1 %v995_v15  ;;  %860 = vmatprep.subr.bf16.mxu0 %v996_v16  ;;  %v1030_v44 = vld [vmem:[%s1342_s0 + $0x64] ss:$16 sps:$4 sm:$0xff]   ;;  %v1032_v45 = vld [vmem:[%s1342_s0 + $0x6c] ss:$16 sps:$4 sm:$0xff]   ;;  %v1034_v46 = vld [vmem:[%s1342_s0 + $0x60] ss:$16 sps:$4 sm:$0xff]  }
  0x12   :  { %924 = vmatprep.subr.bf16.mxu1 %v997_v17  ;;  %v1035_v47 = vld [vmem:[%s1342_s0 + $0x68] ss:$16 sps:$4 sm:$0xff]   ;;  %v1036_v48 = vld [vmem:[%s1342_s0 + $0x84] ss:$16 sps:$4 sm:$0xff]   ;;  %v1038_v49 = vld [vmem:[%s1342_s0 + $0x8c] ss:$16 sps:$4 sm:$0xff]  }
  0x13   :  { %v1040_v50 = vld [vmem:[%s1342_s0 + $0x80] ss:$16 sps:$4 sm:$0xff]   ;;  %v1041_v51 = vld [vmem:[%s1342_s0 + $0x88] ss:$16 sps:$4 sm:$0xff]   ;;  %v1042_v52 = vld [vmem:[%s1342_s0 + $0xa4] ss:$16 sps:$4 sm:$0xff]  }
  0x14   :  { %861 = vmatpush3.bf16.msra.mxu0 %v998_v18  ;;  %v1044_v53 = vld [vmem:[%s1342_s0 + $0xac] ss:$16 sps:$4 sm:$0xff]   ;;  %v1046_v54 = vld [vmem:[%s1342_s0 + $0xa0] ss:$16 sps:$4 sm:$0xff]   ;;  %v1047_v55 = vld [vmem:[%s1342_s0 + $0xa8] ss:$16 sps:$4 sm:$0xff]  }
  0x15   :  { %925 = vmatpush3.bf16.msra.mxu1 %v999_v19  ;;  %862 = vmatprep.subr.bf16.mxu0 %v1000_v20  ;;  %v1048_v56 = vld [vmem:[%s1342_s0 + $0xc4] ss:$16 sps:$4 sm:$0xff]   ;;  %v1050_v57 = vld [vmem:[%s1342_s0 + $0xcc] ss:$16 sps:$4 sm:$0xff]   ;;  %v1052_v58 = vld [vmem:[%s1342_s0 + $0xc0] ss:$16 sps:$4 sm:$0xff]  }
  0x16   :  { %926 = vmatprep.subr.bf16.mxu1 %v1001_v21  ;;  %v1053_v59 = vld [vmem:[%s1342_s0 + $0xc8] ss:$16 sps:$4 sm:$0xff]   ;;  %v1054_v60 = vld [vmem:[%s1342_s0 + $0xe4] ss:$16 sps:$4 sm:$0xff]   ;;  %v1056_v61 = vld [vmem:[%s1342_s0 + $0xec] ss:$16 sps:$4 sm:$0xff]  }
  0x17   :  { %v1058_v62 = vld [vmem:[%s1342_s0 + $0xe0] ss:$16 sps:$4 sm:$0xff]   ;;  %v1059_v63 = vld [vmem:[%s1342_s0 + $0xe8] ss:$16 sps:$4 sm:$0xff]  }
  0x18   :  { %863 = vmatpush3.bf16.msra.mxu0 %v1002_v22 }
  0x19   :  { %927 = vmatpush3.bf16.msra.mxu1 %v1003_v23  ;;  %864 = vmatprep.subr.bf16.mxu0 %v1004_v24 }
  0x1a   :  { %928 = vmatprep.subr.bf16.mxu1 %v1005_v25 }
  0x1c   :  { %865 = vmatpush3.bf16.msra.mxu0 %v1006_v26 }
  0x1d   :  { %929 = vmatpush3.bf16.msra.mxu1 %v1007_v27  ;;  %866 = vmatprep.subr.bf16.mxu0 %v1008_v28 }
  0x1e   :  { %930 = vmatprep.subr.bf16.mxu1 %v1009_v29 }
  0x20   :  { %867 = vmatpush3.bf16.msra.mxu0 %v1010_v30 }
  0x21   :  { %931 = vmatpush3.bf16.msra.mxu1 %v1011_v31 }
  0x23   :  { %532 = vmatmul.mubr.bf16.vlgmr.msra.gmra.mrb[0].mxu0 %v1012_v32 }
  0x24   :  { %629 = vmatmul.mubr.bf16.vlgmr.msra.gmra.mrb[0].mxu1 %v1015_v34  ;;  %539 = vmatprep.mubr.bf16.mxu0 %v1018_v36 }
  0x25   :  { %636 = vmatprep.mubr.bf16.mxu1 %v1020_v37 }
  0x2b   :  { %540 = vmatmul.mubr.bf16.gmra.mrb[4].mxu0 %v1022_v38 }
  0x2c   :  { %637 = vmatmul.mubr.bf16.gmra.mrb[4].mxu1 %v1023_v39  ;;  %547 = vmatprep.mubr.bf16.mxu0 %v1024_v40 }
  0x2d   :  { %644 = vmatprep.mubr.bf16.mxu1 %v1026_v41 }
  0x33   :  { %548 = vmatmul.mubr.bf16.gmra.mrb[8].mxu0 %v1028_v42 }
  0x34   :  { %645 = vmatmul.mubr.bf16.gmra.mrb[8].mxu1 %v1029_v43  ;;  %555 = vmatprep.mubr.bf16.mxu0 %v1030_v44 }
  0x35   :  { %652 = vmatprep.mubr.bf16.mxu1 %v1032_v45 }
  0x3b   :  { %556 = vmatmul.mubr.bf16.gmra.mrb[12].mxu0 %v1034_v46 }
  0x3c   :  { %653 = vmatmul.mubr.bf16.gmra.mrb[12].mxu1 %v1035_v47  ;;  %563 = vmatprep.mubr.bf16.mxu0 %v1036_v48 }
  0x3d   :  { %660 = vmatprep.mubr.bf16.mxu1 %v1038_v49 }
  0x43   :  { %564 = vmatmul.mubr.bf16.gmra.mrb[16].mxu0 %v1040_v50 }
  0x44   :  { %661 = vmatmul.mubr.bf16.gmra.mrb[16].mxu1 %v1041_v51  ;;  %571 = vmatprep.mubr.bf16.mxu0 %v1042_v52 }
  0x45   :  { %668 = vmatprep.mubr.bf16.mxu1 %v1044_v53 }
  0x4b   :  { %572 = vmatmul.mubr.bf16.gmra.mrb[20].mxu0 %v1046_v54 }
  0x4c   :  { %669 = vmatmul.mubr.bf16.gmra.mrb[20].mxu1 %v1047_v55  ;;  %579 = vmatprep.mubr.bf16.mxu0 %v1048_v56 }
  0x4d   :  { %676 = vmatprep.mubr.bf16.mxu1 %v1050_v57 }
  0x53   :  { %580 = vmatmul.mubr.bf16.gmra.mrb[24].mxu0 %v1052_v58 }
  0x54   :  { %677 = vmatmul.mubr.bf16.gmra.mrb[24].mxu1 %v1053_v59  ;;  %587 = vmatprep.mubr.bf16.mxu0 %v1054_v60 }
  0x55   :  { %684 = vmatprep.mubr.bf16.mxu1 %v1056_v61 }
  0x5b   :  { %588 = vmatmul.mubr.bf16.gmra.mrb[28].mxu0 %v1058_v62 }
  0x5c   :  { %685 = vmatmul.mubr.bf16.gmra.mrb[28].mxu1 %v1059_v63 }
  0xf6   :  { %v868_v0 = vpop.f32.mrb[0].mxu0 }
  0xf7   :  { %v932_v1 = vpop.f32.mrb[0].mxu1  ;;  %v869_v2 = vpop.f32.mrb[1].mxu0 }
  0xf8   :  { %v870_v3 = vadd.f32 %v869_v2, %v868_v0  ;;  %v933_v4 = vpop.f32.mrb[1].mxu1  ;;  %v871_v5 = vpop.f32.mrb[2].mxu0 }
  0xf9   :  { %v934_v6 = vadd.f32 %v933_v4, %v932_v1  ;;  %v935_v7 = vpop.f32.mrb[2].mxu1  ;;  %v872_v8 = vpop.f32.mrb[3].mxu0 }
  0xfa   :  { %v873_v10 = vadd.f32 %v872_v8, %v871_v5  ;;  %v936_v11 = vpop.f32.mrb[3].mxu1 }
  0xfb   :  { %v631_v12 = vadd.f32 %v934_v6, %v870_v3  ;;  %v937_v13 = vadd.f32 %v936_v11, %v935_v7 }
  0xfd   :  { %v751_v14 = vadd.f32 %v1275_v9, %v631_v12  ;;  %v634_v15 = vadd.f32 %v937_v13, %v873_v10 }
  0xfe   :  { %v874_v16 = vpop.f32.mrb[4].mxu0 }
  0xff   :  { %767 = vst [vmem:[%s1344_s3] sm:$0xff] %v751_v14  ;;  %v752_v17 = vadd.f32 %v1275_v9, %v634_v15  ;;  %v938_v18 = vpop.f32.mrb[4].mxu1  ;;  %v875_v19 = vpop.f32.mrb[5].mxu0 }
 0x100   :  { %v876_v20 = vadd.f32 %v875_v19, %v874_v16  ;;  %v939_v21 = vpop.f32.mrb[5].mxu1  ;;  %v877_v22 = vpop.f32.mrb[6].mxu0 }
 0x101   :  { %768 = vst [vmem:[%s1344_s3 + $0x8] sm:$0xff] %v752_v17  ;;  %v940_v23 = vadd.f32 %v939_v21, %v938_v18  ;;  %v941_v24 = vpop.f32.mrb[6].mxu1  ;;  %v878_v25 = vpop.f32.mrb[7].mxu0 }
 0x102   :  { %v879_v26 = vadd.f32 %v878_v25, %v877_v22  ;;  %v942_v27 = vpop.f32.mrb[7].mxu1 }
 0x103   :  { %v639_v28 = vadd.f32 %v940_v23, %v876_v20  ;;  %v943_v29 = vadd.f32 %v942_v27, %v941_v24 }
 0x105   :  { %v753_v30 = vadd.f32 %v1275_v9, %v639_v28  ;;  %v642_v31 = vadd.f32 %v943_v29, %v879_v26 }
 0x106   :  { %v880_v32 = vpop.f32.mrb[8].mxu0 }
 0x107   :  { %769 = vst [vmem:[%s1344_s3 + $0x10] sm:$0xff] %v753_v30  ;;  %v754_v33 = vadd.f32 %v1275_v9, %v642_v31  ;;  %v944_v34 = vpop.f32.mrb[8].mxu1  ;;  %v881_v35 = vpop.f32.mrb[9].mxu0 }
 0x108   :  { %v882_v36 = vadd.f32 %v881_v35, %v880_v32  ;;  %v945_v37 = vpop.f32.mrb[9].mxu1  ;;  %v883_v38 = vpop.f32.mrb[10].mxu0 }
 0x109   :  { %770 = vst [vmem:[%s1344_s3 + $0x18] sm:$0xff] %v754_v33  ;;  %v946_v39 = vadd.f32 %v945_v37, %v944_v34  ;;  %v947_v40 = vpop.f32.mrb[10].mxu1  ;;  %v884_v41 = vpop.f32.mrb[11].mxu0 }
 0x10a   :  { %v885_v42 = vadd.f32 %v884_v41, %v883_v38  ;;  %v948_v43 = vpop.f32.mrb[11].mxu1 }
 0x10b   :  { %v647_v44 = vadd.f32 %v946_v39, %v882_v36  ;;  %v949_v45 = vadd.f32 %v948_v43, %v947_v40 }
 0x10d   :  { %v755_v46 = vadd.f32 %v1275_v9, %v647_v44  ;;  %v650_v47 = vadd.f32 %v949_v45, %v885_v42 }
 0x10e   :  { %v886_v48 = vpop.f32.mrb[12].mxu0 }
 0x10f   :  { %771 = vst [vmem:[%s1344_s3 + $0x20] sm:$0xff] %v755_v46  ;;  %v756_v49 = vadd.f32 %v1275_v9, %v650_v47  ;;  %v950_v50 = vpop.f32.mrb[12].mxu1  ;;  %v887_v51 = vpop.f32.mrb[13].mxu0 }
 0x110   :  { %v888_v52 = vadd.f32 %v887_v51, %v886_v48  ;;  %v951_v53 = vpop.f32.mrb[13].mxu1  ;;  %v889_v54 = vpop.f32.mrb[14].mxu0 }
 0x111   :  { %772 = vst [vmem:[%s1344_s3 + $0x28] sm:$0xff] %v756_v49  ;;  %v952_v55 = vadd.f32 %v951_v53, %v950_v50  ;;  %v953_v56 = vpop.f32.mrb[14].mxu1  ;;  %v890_v57 = vpop.f32.mrb[15].mxu0 }
 0x112   :  { %v891_v58 = vadd.f32 %v890_v57, %v889_v54  ;;  %v954_v59 = vpop.f32.mrb[15].mxu1 }
 0x113   :  { %v655_v60 = vadd.f32 %v952_v55, %v888_v52  ;;  %v955_v61 = vadd.f32 %v954_v59, %v953_v56 }
 0x115   :  { %v757_v62 = vadd.f32 %v1275_v9, %v655_v60  ;;  %v658_v63 = vadd.f32 %v955_v61, %v891_v58 }
 0x116   :  { %v892_v0 = vpop.f32.mrb[16].mxu0 }
 0x117   :  { %773 = vst [vmem:[%s1344_s3 + $0x30] sm:$0xff] %v757_v62  ;;  %v758_v1 = vadd.f32 %v1275_v9, %v658_v63  ;;  %v956_v2 = vpop.f32.mrb[16].mxu1  ;;  %v893_v3 = vpop.f32.mrb[17].mxu0 }
 0x118   :  { %v894_v4 = vadd.f32 %v893_v3, %v892_v0  ;;  %v957_v5 = vpop.f32.mrb[17].mxu1  ;;  %v895_v6 = vpop.f32.mrb[18].mxu0 }
 0x119   :  { %774 = vst [vmem:[%s1344_s3 + $0x38] sm:$0xff] %v758_v1  ;;  %v958_v7 = vadd.f32 %v957_v5, %v956_v2  ;;  %v959_v8 = vpop.f32.mrb[18].mxu1  ;;  %v896_v10 = vpop.f32.mrb[19].mxu0 }
 0x11a   :  { %v897_v11 = vadd.f32 %v896_v10, %v895_v6  ;;  %v960_v12 = vpop.f32.mrb[19].mxu1 }
 0x11b   :  { %v663_v13 = vadd.f32 %v958_v7, %v894_v4  ;;  %v961_v14 = vadd.f32 %v960_v12, %v959_v8 }
 0x11d   :  { %v759_v15 = vadd.f32 %v1275_v9, %v663_v13  ;;  %v666_v16 = vadd.f32 %v961_v14, %v897_v11 }
 0x11e   :  { %v898_v17 = vpop.f32.mrb[20].mxu0 }
 0x11f   :  { %775 = vst [vmem:[%s1344_s3 + $0x40] sm:$0xff] %v759_v15  ;;  %v760_v18 = vadd.f32 %v1275_v9, %v666_v16  ;;  %v962_v19 = vpop.f32.mrb[20].mxu1  ;;  %v899_v20 = vpop.f32.mrb[21].mxu0 }
 0x120   :  { %v900_v21 = vadd.f32 %v899_v20, %v898_v17  ;;  %v963_v22 = vpop.f32.mrb[21].mxu1  ;;  %v901_v23 = vpop.f32.mrb[22].mxu0 }
 0x121   :  { %776 = vst [vmem:[%s1344_s3 + $0x48] sm:$0xff] %v760_v18  ;;  %v964_v24 = vadd.f32 %v963_v22, %v962_v19  ;;  %v965_v25 = vpop.f32.mrb[22].mxu1  ;;  %v902_v26 = vpop.f32.mrb[23].mxu0 }
 0x122   :  { %v903_v27 = vadd.f32 %v902_v26, %v901_v23  ;;  %v966_v28 = vpop.f32.mrb[23].mxu1 }
 0x123   :  { %v671_v29 = vadd.f32 %v964_v24, %v900_v21  ;;  %v967_v30 = vadd.f32 %v966_v28, %v965_v25 }
 0x125   :  { %v761_v31 = vadd.f32 %v1275_v9, %v671_v29  ;;  %v674_v32 = vadd.f32 %v967_v30, %v903_v27 }
 0x126   :  { %v904_v33 = vpop.f32.mrb[24].mxu0 }
 0x127   :  { %777 = vst [vmem:[%s1344_s3 + $0x50] sm:$0xff] %v761_v31  ;;  %v762_v34 = vadd.f32 %v1275_v9, %v674_v32  ;;  %v968_v35 = vpop.f32.mrb[24].mxu1  ;;  %v905_v36 = vpop.f32.mrb[25].mxu0 }
 0x128   :  { %v906_v37 = vadd.f32 %v905_v36, %v904_v33  ;;  %v969_v38 = vpop.f32.mrb[25].mxu1  ;;  %v907_v39 = vpop.f32.mrb[26].mxu0 }
 0x129   :  { %778 = vst [vmem:[%s1344_s3 + $0x58] sm:$0xff] %v762_v34  ;;  %v970_v40 = vadd.f32 %v969_v38, %v968_v35  ;;  %v971_v41 = vpop.f32.mrb[26].mxu1  ;;  %v908_v42 = vpop.f32.mrb[27].mxu0 }
 0x12a   :  { %v909_v43 = vadd.f32 %v908_v42, %v907_v39  ;;  %v972_v44 = vpop.f32.mrb[27].mxu1 }
 0x12b   :  { %v679_v45 = vadd.f32 %v970_v40, %v906_v37  ;;  %v973_v46 = vadd.f32 %v972_v44, %v971_v41 }
 0x12d   :  { %v763_v47 = vadd.f32 %v1275_v9, %v679_v45  ;;  %v682_v48 = vadd.f32 %v973_v46, %v909_v43 }
 0x12e   :  { %v910_v49 = vpop.f32.mrb[28].mxu0 }
 0x12f   :  { %779 = vst [vmem:[%s1344_s3 + $0x60] sm:$0xff] %v763_v47  ;;  %v764_v50 = vadd.f32 %v1275_v9, %v682_v48  ;;  %v974_v51 = vpop.f32.mrb[28].mxu1  ;;  %v911_v52 = vpop.f32.mrb[29].mxu0 }
 0x130   :  { %v912_v53 = vadd.f32 %v911_v52, %v910_v49  ;;  %v975_v54 = vpop.f32.mrb[29].mxu1  ;;  %v913_v55 = vpop.f32.mrb[30].mxu0 }
 0x131   :  { %780 = vst [vmem:[%s1344_s3 + $0x68] sm:$0xff] %v764_v50  ;;  %v976_v56 = vadd.f32 %v975_v54, %v974_v51  ;;  %v977_v57 = vpop.f32.mrb[30].mxu1  ;;  %v914_v58 = vpop.f32.mrb[31].mxu0 }
 0x132   :  { %v915_v59 = vadd.f32 %v914_v58, %v913_v55  ;;  %v978_v60 = vpop.f32.mrb[31].mxu1 }
 0x133   :  { %v687_v61 = vadd.f32 %v976_v56, %v912_v53  ;;  %v979_v62 = vadd.f32 %v978_v60, %v977_v57 }
 0x135   :  { %v765_v63 = vadd.f32 %v1275_v9, %v687_v61  ;;  %v690_v0 = vadd.f32 %v979_v62, %v915_v59 }
 0x137   :  { %781 = vst [vmem:[%s1344_s3 + $0x70] sm:$0xff] %v765_v63  ;;  %v766_v1 = vadd.f32 %v1275_v9, %v690_v0 }
 0x139   :  { %782 = vst [vmem:[%s1344_s3 + $0x78] sm:$0xff] %v766_v1 }

// kernel: dis_forward.23
= control target key start
LH: loop header
LB: loop body
LE: loop exit
PB: predicated region body
PF: predicated region fallthrough
CT: control target
= control target key end

     0   :  { %8 = vsyncpa [#allocation3], 0  ;;  %s716_s0 = inlined_call_operand.vmem [shape: bf16[2,8,8], index: 0, kind: input, shape index: {}]   ;;  %s717_s1 = inlined_call_operand.vmem [shape: bf16[32,8], index: 1, kind: input, shape index: {}]   ;;  %s718_s2 = inlined_call_operand.vmem [shape: bf16[8,32], index: 2, kind: input, shape index: {}]   ;;  %s719_s3 = inlined_call_operand.hbm [shape: f32[2,32,32], index: 3, kind: output, shape index: {}]  }
   0x1   :  { %10 = vsyncpa [#allocation3 + $0x1], 0  ;;  %s596_s12 = smov 0   ;;  %s598_s13 = smov 0  }
   0x2   :  { %s600_s14 = smov 0   ;;  %s602_s15 = smov 0  }
   0x3 LB: > { %s617_s16 = sadd.s32 4294967295, %s571_s15   ;;  %s412_s17 = sadd.s32 4294967294, %s571_s15   ;;  %s571_s15 = sphi %s602_s15, %s725_s15   ;;  %s567_s14 = sphi %s600_s14, %s724_s14   ;;  %s563_s13 = sphi %s598_s13, %s723_s13   ;;  %s559_s12 = sphi %s596_s12, %s722_s12  }
   0x4   : > { %s621_s18 = sadd.s32 1, %s571_s15   ;;  %s91_s19 = sadd.s32 1, %s567_s14 }
   0x5   : > { %s88_s20 = ssub.s32 %s571_s15, %s621_s18  ;;  %p101_p0 = scmp.ne.s32.totalorder %s567_s14, %s563_s13 }
   0x6   : > { %p89_p1 = scmp.eq.s32.totalorder %s88_s20, 0  ;;  %p102_p2 = scmp.eq.s32.totalorder %s617_s16, 1 }
   0x7   : > { %p107_p3 = scmp.ne.s32.totalorder %s563_s13, %s559_s12  ;;  %p108_p4 = scmp.eq.s32.totalorder %s412_s17, 1 }
   0x8   : > { %s632_s21 = scalar_select %p89_p1, %s567_s14, %s91_s19  }
   0x9   : > { %p634_p5 = por %p102_p2, %p101_p0  ;;  %p638_p6 = por %p108_p4, %p107_p3 }
   0xa   : > { %p415_p7 = scmp.ge.s32.totalorder %s571_s15, 1  ;;  %p139_p8 = scmp.lt.s32.totalorder %s571_s15, 3 }
   0xc   : > { %p140_p9 = pnand %p415_p7, %p139_p8 }
   0xd   : > { %p162_p10 = scmp.lt.s32.totalorder (!%p140_p9), %s617_s16, 1  ;;  %v491_v0 = vld [vmem:[%s717_s1] sm:$0xff] (!%p140_p9)   ;;  %vm182_vm0 = vcmask (!%p140_p9), 64512   ;;  %vm189_vm1 = vcmask (!%p140_p9), 1043456   ;;  %v492_v3 = vld [vmem:[%s717_s1 + $0x8] sm:$0xff] (!%p140_p9)   ;;  %s159_s8 = sand.u32 (!%p140_p9), 1, %s563_s13  }
   0xe   : > { %143 = sbr.rel (%p140_p9) target bundleno = 510 (0x1fe), region = 32  ;;  %438 = vmatprep.mubr.msk.bf16.mxu0 (!%p140_p9), %vm182_vm0, %v491_v0  ;;  %v244_v4 = vld [vmem:[%s718_s2] sm:$0xf] (!%p140_p9)  ;;  %s416_s9 = sshll.u32 (!%p140_p9), %s159_s8, 5  ;;  %vm331_vm2 = vcmask (!%p140_p9), 261120  }
   0xf   : > { %449 = vmatprep.subr.msk.bf16.mxu1 (!%p140_p9), %vm189_vm1, %v244_v4  ;;  %v252_v5 = vsel (!%p140_p9), %vm189_vm1, %v244_v4, 0  ;;  %s429_s10 = sshll.u32 (!%p140_p9), %s617_s16, 9  ;;  %s161_s11 = scalar_lea.vmem (!%p140_p9), [#allocation2], %s416_s9 }
  0x10   : > { %443 = vmatpush3.bf16.msra.mxu1 (!%p140_p9), %v252_v5  ;;  %s350_s17 = sshll.u32 (!%p140_p9), %s161_s11, 4  ;;  %s668_s24 = scalar_lea.hbm (!%p140_p9), %s719_s3, %s429_s10  ;;  %s670_s17 = int_to_ptr.vmem [resolvable:$true] %s350_s17 }
  0x11   : > { %s509_s25 = scalar_lea.vmem (!%p140_p9), %s670_s17, 512 }
  0x12   : > { %p510_p11 = scmp.ne.s32.totalorder (!%p140_p9), %s670_s17, %s509_s25 }
  0x14   : > { %p511_p12 = pnand (!%p140_p9), %p510_p11, %p634_p5 }
  0x15   : > { %s163_s26 = scalar_select %p162_p10, %s617_s16, 1 }
  0x16   : > { %s675_s16 = scalar_lea.sflag [#allocation3], %s159_s8  ;;  %p512_p13 = pneg %p511_p12 }
  0x17   : > { %s417_s27 = sshll.u32 %s163_s26, 2  ;;  %s573_s26 = smov [#allocation2]  }
  0x18   : > { %s165_s30 = scalar_lea.vmem %s716_s0, %s417_s27  ;;  %s513_s27 = sshll.u32 %s573_s26, 4  ;;  %s514_s27 = int_to_ptr.vmem [resolvable:$false] %s513_s27 }
  0x19   : > { %v167_v1 = vld [vmem:[%s165_s30] sm:$0xf]  ;;  %s515_s28 = scalar_lea.vmem %s514_s27, 1024  ;;  %p516_p0 = scmp.lt.s32.totalorder %s670_s17, %s514_s27 }
  0x1a   : > { %448 = vmatprep.subr.msk.bf16.mxu0 %vm189_vm1, %v167_v1  ;;  %v191_v2 = vsel %vm189_vm1, %v167_v1, 0  ;;  %p517_p1 = scmp.lt.s32.totalorder %s515_s28, %s509_s25 }
  0x1b   : > { %437 = vmatpush3.bf16.msra.mxu0 %v191_v2 }
  0x1c   : > { %p518_p2 = por %p517_p1, %p516_p0 }
  0x1e   : > { %439 = vmatmul.mubr.msk.bf16.vlgmr.msra.gmra.mrb[0].mxu0 %vm182_vm0, %v492_v3  ;;  %p519_p3 = pnand %p518_p2, %p512_p13 }
  0xf1   : > { %v440_v6 = vpop.f32.mrb[0].mxu0 }
  0xf2   : > { %v227_v7 = vpop.f32.mrb[1].mxu0 }
  0xf3   : > { %v441_v8 = vpop.f32.mrb[2].mxu0 }
  0xf4   : > { %v243_v9 = vpack.c.bf16 %v441_v8, %v440_v6  ;;  %v230_v10 = vpop.f32.mrb[3].mxu0 }
  0xf5   : > { %v242_v11 = vpack.c.bf16 %v230_v10, %v227_v7 }
  0xf7   : > { %444 = vmatprep.mubr.msk.bf16.mxu1 %vm182_vm0, %v242_v11 }
  0xf8   : > { %445 = vmatmul.mubr.msk.bf16.vlgmr.msra.gmra.mrb[0].mxu1 %vm182_vm0, %v243_v9 }
 0x1cb   : > { %v446_v12 = vpop.f32.mrb[0].mxu1 }
 0x1cc   : > { %v305_v13 = vsub.f32 0.0, %v446_v12  ;;  %v288_v14 = vpop.f32.mrb[1].mxu1 }
 0x1cd   : > { %v303_v15 = vsub.f32 0.0, %v288_v14  ;;  %v447_v16 = vpop.f32.mrb[2].mxu1 }
 0x1ce   : > { %v311_v17 = vmul.f32 1.442695, %v305_v13  ;;  %v306_v18 = vsub.f32 0.0, %v447_v16  ;;  %v291_v19 = vpop.f32.mrb[3].mxu1 }
 0x1cf   : > { %v307_v20 = vmul.f32 1.442695, %v303_v15  ;;  %v304_v21 = vsub.f32 0.0, %v291_v19 }
 0x1d0   : > { %493 = vpow2.f32 %v311_v17  ;;  %v313_v22 = vmul.f32 1.442695, %v306_v18 }
 0x1d1   : > { %495 = vpow2.f32 %v307_v20  ;;  %v309_v23 = vmul.f32 1.442695, %v304_v21 }
 0x1d2   : > { %497 = vpow2.f32 %v313_v22 }
 0x1d3   : > { %499 = vpow2.f32 %v309_v23 }
 0x1da   : > { %v494_v24 = vpop.eup %493 }
 0x1db   : > { %v496_v25 = vpop.eup %495  ;;  %v317_v26 = vadd.f32 1.0, %v494_v24 }
 0x1dc   : > { %v498_v27 = vpop.eup %497  ;;  %v315_v28 = vadd.f32 1.0, %v496_v25 }
 0x1dd   : > { %v500_v29 = vpop.eup %499  ;;  %501 = vrcp.f32 %v317_v26  ;;  %v318_v30 = vadd.f32 1.0, %v498_v27 }
 0x1de   : > { %503 = vrcp.f32 %v315_v28  ;;  %v316_v31 = vadd.f32 1.0, %v500_v29 }
 0x1df   : > { %505 = vrcp.f32 %v318_v30 }
 0x1e0   : > { %507 = vrcp.f32 %v316_v31 }
 0x1e7   : > { %v502_v32 = vpop.eup %501 }
 0x1e8   : > { %v504_v33 = vpop.eup %503  ;;  %v325_v34 = vmax.f32 %v502_v32, 0.0 }
 0x1e9   : > { %v506_v35 = vpop.eup %505  ;;  %v323_v36 = vmax.f32 %v504_v33, 0.0 }
 0x1ea   : > { %v508_v37 = vpop.eup %507  ;;  %v329_v38 = vmin.f32 %v325_v34, 1.0  ;;  %v326_v39 = vmax.f32 %v506_v35, 0.0 }
 0x1eb   : > { %v327_v40 = vmin.f32 %v323_v36, 1.0  ;;  %v324_v41 = vmax.f32 %v508_v37, 0.0 }
 0x1ec   : > { %334 = vst.msk [vmem:[%s161_s11 + $0x10] sm:$0xff] %vm331_vm2, %v329_v38  ;;  %v330_v42 = vmin.f32 %v326_v39, 1.0 }
 0x1ed   : > { %332 = vst.msk [vmem:[%s161_s11] sm:$0xff] %vm331_vm2, %v327_v40  ;;  %v328_v43 = vmin.f32 %v324_v41, 1.0 }
 0x1ee   : > { %335 = vst.msk [vmem:[%s161_s11 + $0x18] sm:$0xff] %vm331_vm2, %v330_v42 }
 0x1ef   : > { %333 = vst.msk [vmem:[%s161_s11 + $0x8] sm:$0xff] %vm331_vm2, %v328_v43 }
 0x1f0   : > { %522 = shalt.err (!%p519_p3)
}
 0x1f1   : > { %s523_s29 = scalar_lea.hbm %s668_s24, 512  ;;  %s527_s5 = scalar_lea.hbm %s719_s3, 1024 }
 0x1f2   : > { %p524_p4 = scmp.ne.s32.totalorder %s668_s24, %s523_s29  ;;  %p528_p9 = scmp.lt.u32.totalorder %s668_s24, %s719_s3 }
 0x1f3   : > { %p529_p10 = scmp.lt.u32.totalorder %s527_s5, %s523_s29  ;;  %p531_p12 = scmp.lt.u32.totalorder %s523_s29, %s668_s24 }
 0x1f4   : > { %p525_p7 = pnand %p524_p4, %p634_p5 }
 0x1f5   : > { %p530_p11 = por %p529_p10, %p528_p9 }
 0x1f6   : > { %p526_p8 = pneg %p525_p7 }
 0x1f7   : > { %p532_p13 = por %p531_p12, %p530_p11 }
 0x1f9   : > { %p533_p0 = pnand %p532_p13, %p526_p8 }
 0x1fb   : > { %536 = shalt.err (!%p533_p0)
}
 0x1fc   : > { %s574_s8 = smov 128   ;;  %s575_s9 = smov 8  }
 0x1fd   : > { %450 = dma.vmem_to_hbm [thread:$0]  (%p634_p5), %s670_s17, 512, %s668_s24, %s675_s16, %s574_s8, %s574_s8, %s575_s9  }
 0x1fe PF: > { %p456_p1 = scmp.ge.s32.totalorder %s571_s15, 2  ;;  %s365_s10 = sand.u32 1, %s559_s12  }
 0x1ff   : > { %s366_s11 = scalar_lea.sflag [#allocation3], %s365_s10 }
 0x200   : > { %p453_p2 = pnand %p456_p1, %p638_p6 }
 0x202   : > { %554 = dma.done.wait (!%p453_p2), %s366_s11, 512  }
 0x203   : > { %556 = vsyncadd (!%p453_p2), %s366_s11, 4294966784  ;;  %p13_p3 = scmp.ge.s32.totalorder %s621_s18, 4   ;;  %s722_s12 = smov %s563_s13 }
 0x204   : > { %s723_s13 = smov %s567_s14  ;;  %s724_s14 = smov %s632_s21 }
 0x205   : > { %s725_s15 = smov %s621_s18  ;;  %15 = sbr.rel (!%p13_p3) target bundleno = 3 (0x3), region = 67 }
 0x20c   :  { %371 = vsyncpa [#allocation3], 1 }
 0x20d   :  { %373 = vsyncpa [#allocation3 + $0x1], 1 }

</bundles_post_ra>
